<compile_context>
chip_gen: v7x
topology: tpu7x:2x2x1
jax: 0.10.0
libtpu: 0.0.40
codegen_flags: <defaults>
</compile_context>

<pallas_src>
import functools

import jax
import jax.numpy as jnp
from jax import lax
from jax.experimental import pallas as pl
from jax.experimental.pallas import tpu as pltpu


def _round_up(x, m):
    return ((x + m - 1) // m) * m


def _nbytes(x):
    return x.size * x.dtype.itemsize


# ---------------------------------------------------------------------------
# Fused Pallas kernel: conv-as-GEMM + fc + head (bias + relu fused).
# ---------------------------------------------------------------------------

def _dqn_fused_kernel(pw_ref, w1_ref, b1_ref, w2_ref, b2_ref, w3_ref, b3_ref,
                      o_ref):
    # pw_ref : (BM, C*9*P)    im2col patches, row order (ci, kh, kw, pos)
    # w1_ref : (C*9*P, 16*P)  block-diagonal unfolded conv weight (NCHW-flatten cols)
    # w2_ref : (16*P, 512)    fc weight, pre-transposed
    # w3_ref : (512, Apad)    output weight, pre-transposed, zero-padded to 128 lanes
    feat = jnp.dot(pw_ref[...], w1_ref[...], preferred_element_type=jnp.float32)
    feat = jnp.maximum(feat + b1_ref[...], 0.0)                  # conv + relu
    h = jnp.dot(feat.astype(w2_ref.dtype), w2_ref[...],
                preferred_element_type=jnp.float32)
    h = jnp.maximum(h + b2_ref[...], 0.0)                        # fc + relu
    o = jnp.dot(h.astype(w3_ref.dtype), w3_ref[...],
                preferred_element_type=jnp.float32)
    o_ref[...] = (o + b3_ref[...]).astype(o_ref.dtype)           # output head


# ---------------------------------------------------------------------------
# Parameters: PyTorch layout at init, kernel-ready layout after prepare().
# ---------------------------------------------------------------------------

def init_params(turns, num_actions, key):
    """PyTorch-layout parameters (OIHW conv weight, (out, in) linear weights)."""
    in_ch = turns * 4
    k1, k2, k3, k4, k5, k6 = jax.random.split(key, 6)
    conv_w = jax.random.normal(k1, (16, in_ch, 3, 3), jnp.float32) * 0.05
    conv_b = jax.random.normal(k2, (16,), jnp.float32) * 0.05
    fc_w = jax.random.normal(k3, (512, 1024), jnp.float32) * 0.02
    fc_b = jax.random.normal(k4, (512,), jnp.float32) * 0.02
    out_w = jax.random.normal(k5, (num_actions, 512), jnp.float32) * 0.02
    out_b = jax.random.normal(k6, (num_actions,), jnp.float32) * 0.02
    return dict(conv_w=conv_w, conv_b=conv_b, fc_w=fc_w, fc_b=fc_b,
                out_w=out_w, out_b=out_b)


def prepare_params(params, dtype=jnp.float32):
    """One-time conversion of PyTorch-layout params into kernel-ready weights.

    Pass dtype=jnp.bfloat16 on v6e/v7x for large-batch use (halves VMEM/HBM
    traffic; the kernel still accumulates in f32 and biases stay f32).
    """
    conv_w, conv_b = params["conv_w"], params["conv_b"]   # (16,C,3,3), (16,)
    fc_w, fc_b = params["fc_w"], params["fc_b"]           # (512,1024), (512,)
    out_w, out_b = params["out_w"], params["out_b"]       # (A,512), (A,)

    cout, cin, kh, kw = conv_w.shape
    k = cin * kh * kw
    p = fc_w.shape[1] // cout          # 64 spatial positions (8x8 conv output)

    # Unfold the conv into a block-diagonal first-layer weight:
    #   w1[(ci*9 + dh*3 + dw)*P + pos, c*P + pos] = conv_w[c, ci, dh, dw]
    # Column index c*P + pos is exactly PyTorch's NCHW .view(B, -1) order, so
    # fc_w.T can be used as-is (no per-call activation transpose/permutation).
    wk = conv_w.reshape(cout, k).T                                   # (K, 16)
    eye_p = jnp.eye(p, dtype=jnp.float32)
    w1 = (wk[:, None, :, None] * eye_p[None, :, None, :]).reshape(k * p, cout * p)
    b1 = jnp.repeat(conv_b, p).reshape(1, cout * p)                  # (1, 1024)

    w2 = fc_w.T                                                      # (1024, 512)
    b2 = fc_b.reshape(1, -1)                                         # (1, 512)

    a = out_w.shape[0]
    a_pad = _round_up(max(a, 1), 128)            # lane-dense head output
    w3 = jnp.zeros((w2.shape[1], a_pad), jnp.float32).at[:, :a].set(out_w.T)
    b3 = jnp.zeros((1, a_pad), jnp.float32).at[:, :a].set(out_b[None, :])

    return dict(w1=w1.astype(dtype), b1=b1,
                w2=w2.astype(dtype), b2=b2,
                w3=w3.astype(dtype), b3=b3)


# ---------------------------------------------------------------------------
# Forward pass
# ---------------------------------------------------------------------------

@functools.partial(jax.jit, static_argnames=("num_actions",))
def dqn_forward(obs, prepped, *, num_actions):
    """obs: (B, turns*4, 10, 10) float32 (NCHW, like PyTorch)."""
    if obs.ndim < 4:
        obs = obs[None]
    w1, b1 = prepped["w1"], prepped["b1"]
    w2, b2 = prepped["w2"], prepped["b2"]
    w3, b3 = prepped["w3"], prepped["b3"]

    batch, c, height, width = obs.shape
    oh, ow = height - 2, width - 2
    kp, h1 = w1.shape
    h2 = w2.shape[1]
    a_pad = w3.shape[1]
    if kp != c * 9 * oh * ow or h1 != w2.shape[0]:
        raise ValueError("obs shape inconsistent with prepared parameters")

    # im2col with (ci, kh, kw, pos) row order: a stack of static slices; the
    # flatten to (B, C*9*P) is a free contiguous reshape (no transpose).
    # TODO(synk): at large batch, build the patches inside the kernel from a
    # (BM, C, 10, 10) VMEM tile to avoid the ~5.8x HBM inflation of im2col.
    cols = [obs[:, :, dh:dh + oh, dw:dw + ow]
            for dh in range(3) for dw in range(3)]
    pw = jnp.stack(cols, axis=2).reshape(batch, kp).astype(w1.dtype)

    # Batch tiling: rows padded to a multiple of 8 sublanes; 128-row blocks
    # once the batch is large enough (saturates the MXU M dimension on v5e).
    bm = min(128, _round_up(batch, 8))
    bp = _round_up(batch, bm)
    if bp != batch:
        pw = jnp.pad(pw, ((0, bp - batch), (0, 0)))

    # VMEM budget: double-buffered blocks + resident weights + f32 temporaries,
    # capped below v7x's 64 MiB physical VMEM (32 MiB scoped default).
    block_bytes = (bm * kp * pw.dtype.itemsize
                   + _nbytes(w1) + _nbytes(b1) + _nbytes(w2) + _nbytes(b2)
                   + _nbytes(w3) + _nbytes(b3) + bm * a_pad * 4)
    temp_bytes = bm * (h1 + h2) * 4
    vmem_limit = int(min(60 * 2 ** 20,
                         max(32 * 2 ** 20,
                             2 * block_bytes + temp_bytes + (2 << 20))))

    out_padded = pl.pallas_call(
        _dqn_fused_kernel,
        out_shape=jax.ShapeDtypeStruct((bp, a_pad), jnp.float32),
        grid=(bp // bm,),
        in_specs=[
            pl.BlockSpec((bm, kp), lambda i: (i, 0)),    # patches: per-batch tile
            pl.BlockSpec((kp, h1), lambda i: (0, 0)),    # weights: VMEM-resident
            pl.BlockSpec((1, h1), lambda i: (0, 0)),
            pl.BlockSpec((h1, h2), lambda i: (0, 0)),
            pl.BlockSpec((1, h2), lambda i: (0, 0)),
            pl.BlockSpec((h2, a_pad), lambda i: (0, 0)),
            pl.BlockSpec((1, a_pad), lambda i: (0, 0)),
        ],
        out_specs=pl.BlockSpec((bm, a_pad), lambda i: (i, 0)),
        compiler_params=pltpu.CompilerParams(
            dimension_semantics=("parallel",),
            vmem_limit_bytes=vmem_limit),
    )(pw, w1, b1, w2, b2, w3, b3)

    return out_padded[:batch, :num_actions]


# ---------------------------------------------------------------------------
# Pure-JAX reference (sanity check)
# ---------------------------------------------------------------------------

def dqn_forward_ref(obs, params):
    if obs.ndim < 4:
        obs = obs[None]
    y = lax.conv_general_dilated(
        obs, params["conv_w"], window_strides=(1, 1), padding="VALID",
        dimension_numbers=("NCHW", "OIHW", "NCHW"))
    y = jnp.maximum(y + params["conv_b"][None, :, None, None], 0.0)
    y = y.reshape(y.shape[0], -1)
    y = jnp.maximum(y @ params["fc_w"].T + params["fc_b"], 0.0)
    return y @ params["out_w"].T + params["out_b"]


if __name__ == "__main__":
    turns = 1
    num_actions = 6
    batch = 2
    height = width = 10   # 10x10 input -> 8x8 conv output -> 16*64 = 1024 features

    key = jax.random.PRNGKey(0)
    k_obs, k_par = jax.random.split(key)
    obs = jax.random.normal(k_obs, (batch, turns * 4, height, width), jnp.float32)
    params = init_params(turns, num_actions, k_par)

    # One-time weight prep (use dtype=jnp.bfloat16 on v6e/v7x at large batch).
    prepped = prepare_params(params, dtype=jnp.float32)

    out = dqn_forward(obs, prepped, num_actions=num_actions)
    out = jax.block_until_ready(out)

    ref = dqn_forward_ref(obs, params)
    assert out.shape == (batch, num_actions)
    assert jnp.allclose(out, ref, atol=5e-4, rtol=5e-4), "mismatch vs reference"

    print("KERNEL_OK")
</pallas_src>

<mosaic_0001>
module attributes {stable_mosaic.version = 11 : i64} {
  func.func @_dqn_fused_kernel(%arg0: i32, %arg1: memref<8x2304xf32, #tpu.memory_space<vmem>>, %arg2: memref<2304x1024xf32, #tpu.memory_space<vmem>>, %arg3: memref<1x1024xf32, #tpu.memory_space<vmem>>, %arg4: memref<1024x512xf32, #tpu.memory_space<vmem>>, %arg5: memref<1x512xf32, #tpu.memory_space<vmem>>, %arg6: memref<512x128xf32, #tpu.memory_space<vmem>>, %arg7: memref<1x128xf32, #tpu.memory_space<vmem>>, %arg8: memref<8x128xf32, #tpu.memory_space<vmem>>) attributes {dimension_semantics = [#tpu.dimension_semantics<parallel>], iteration_bounds = array<i64: 1>, scalar_prefetch = 0 : i64, scratch_operands = 0 : i64, tpu.core_type = #tpu.core_type<tc>, window_params = [{transform_indices = @transform_0, window_bounds = array<i64: 8, 2304>}, {pipeline_mode = #tpu.pipeline_mode<synchronous>, transform_indices = @transform_1, window_bounds = array<i64: 2304, 1024>}, {pipeline_mode = #tpu.pipeline_mode<synchronous>, transform_indices = @transform_2, window_bounds = array<i64: 1, 1024>}, {pipeline_mode = #tpu.pipeline_mode<synchronous>, transform_indices = @transform_3, window_bounds = array<i64: 1024, 512>}, {pipeline_mode = #tpu.pipeline_mode<synchronous>, transform_indices = @transform_4, window_bounds = array<i64: 1, 512>}, {pipeline_mode = #tpu.pipeline_mode<synchronous>, transform_indices = @transform_5, window_bounds = array<i64: 512, 128>}, {pipeline_mode = #tpu.pipeline_mode<synchronous>, transform_indices = @transform_6, window_bounds = array<i64: 1, 128>}, {transform_indices = @transform_7, window_bounds = array<i64: 8, 128>}]} {
    %c0 = arith.constant 0 : index
    %c0_0 = arith.constant 0 : index
    %0 = vector.load %arg1[%c0, %c0_0] : memref<8x2304xf32, #tpu.memory_space<vmem>>, vector<8x2304xf32>
    %c0_1 = arith.constant 0 : index
    %c0_2 = arith.constant 0 : index
    %1 = vector.load %arg2[%c0_1, %c0_2] : memref<2304x1024xf32, #tpu.memory_space<vmem>>, vector<2304x1024xf32>
    %cst = arith.constant dense<0.000000e+00> : vector<8x1024xf32>
    %2 = tpu.matmul %0, %1, %cst {dimension_numbers = #tpu.dot_dimension_numbers<[1], [0], [0], [1], [0, 0, 1, 1], [], []>} : vector<8x2304xf32>, vector<2304x1024xf32>, vector<8x1024xf32> -> vector<8x1024xf32>
    %c0_3 = arith.constant 0 : index
    %c0_4 = arith.constant 0 : index
    %3 = vector.load %arg3[%c0_3, %c0_4] : memref<1x1024xf32, #tpu.memory_space<vmem>>, vector<1x1024xf32>
    %4 = vector.broadcast %3 : vector<1x1024xf32> to vector<8x1024xf32>
    %5 = arith.addf %2, %4 : vector<8x1024xf32>
    %cst_5 = arith.constant 0.000000e+00 : f32
    %6 = vector.broadcast %cst_5 : f32 to vector<8x1024xf32>
    %7 = arith.maximumf %5, %6 : vector<8x1024xf32>
    %c0_6 = arith.constant 0 : index
    %c0_7 = arith.constant 0 : index
    %8 = vector.load %arg4[%c0_6, %c0_7] : memref<1024x512xf32, #tpu.memory_space<vmem>>, vector<1024x512xf32>
    %cst_8 = arith.constant dense<0.000000e+00> : vector<8x512xf32>
    %9 = tpu.matmul %7, %8, %cst_8 {dimension_numbers = #tpu.dot_dimension_numbers<[1], [0], [0], [1], [0, 0, 1, 1], [], []>} : vector<8x1024xf32>, vector<1024x512xf32>, vector<8x512xf32> -> vector<8x512xf32>
    %c0_9 = arith.constant 0 : index
    %c0_10 = arith.constant 0 : index
    %10 = vector.load %arg5[%c0_9, %c0_10] : memref<1x512xf32, #tpu.memory_space<vmem>>, vector<1x512xf32>
    %11 = vector.broadcast %10 : vector<1x512xf32> to vector<8x512xf32>
    %12 = arith.addf %9, %11 : vector<8x512xf32>
    %cst_11 = arith.constant 0.000000e+00 : f32
    %13 = vector.broadcast %cst_11 : f32 to vector<8x512xf32>
    %14 = arith.maximumf %12, %13 : vector<8x512xf32>
    %c0_12 = arith.constant 0 : index
    %c0_13 = arith.constant 0 : index
    %15 = vector.load %arg6[%c0_12, %c0_13] : memref<512x128xf32, #tpu.memory_space<vmem>>, vector<512x128xf32>
    %cst_14 = arith.constant dense<0.000000e+00> : vector<8x128xf32>
    %16 = tpu.matmul %14, %15, %cst_14 {dimension_numbers = #tpu.dot_dimension_numbers<[1], [0], [0], [1], [0, 0, 1, 1], [], []>} : vector<8x512xf32>, vector<512x128xf32>, vector<8x128xf32> -> vector<8x128xf32>
    %c0_15 = arith.constant 0 : index
    %c0_16 = arith.constant 0 : index
    %17 = vector.load %arg7[%c0_15, %c0_16] : memref<1x128xf32, #tpu.memory_space<vmem>>, vector<1x128xf32>
    %18 = vector.broadcast %17 : vector<1x128xf32> to vector<8x128xf32>
    %19 = arith.addf %16, %18 : vector<8x128xf32>
    %c0_17 = arith.constant 0 : index
    %c0_18 = arith.constant 0 : index
    %20 = vector.load %arg8[%c0_17, %c0_18] : memref<8x128xf32, #tpu.memory_space<vmem>>, vector<8x128xf32>
    tpu.vector_store %arg8[%c0_17, %c0_18], %19 {strides = array<i32>} : memref<8x128xf32, #tpu.memory_space<vmem>>, vector<8x128xf32>,
    return
  }
  func.func @transform_0(%arg0: i32) -> (i32, i32) {
    %c0_i32 = arith.constant 0 : i32
    %c0_i32_0 = arith.constant 0 : i32
    return %arg0, %c0_i32 : i32, i32
  }
  func.func @transform_1(%arg0: i32) -> (i32, i32) {
    %c0_i32 = arith.constant 0 : i32
    %c0_i32_0 = arith.constant 0 : i32
    %c0_i32_1 = arith.constant 0 : i32
    return %c0_i32, %c0_i32_0 : i32, i32
  }
  func.func @transform_2(%arg0: i32) -> (i32, i32) {
    %c0_i32 = arith.constant 0 : i32
    %c0_i32_0 = arith.constant 0 : i32
    %c0_i32_1 = arith.constant 0 : i32
    return %c0_i32, %c0_i32_0 : i32, i32
  }
  func.func @transform_3(%arg0: i32) -> (i32, i32) {
    %c0_i32 = arith.constant 0 : i32
    %c0_i32_0 = arith.constant 0 : i32
    %c0_i32_1 = arith.constant 0 : i32
    return %c0_i32, %c0_i32_0 : i32, i32
  }
  func.func @transform_4(%arg0: i32) -> (i32, i32) {
    %c0_i32 = arith.constant 0 : i32
    %c0_i32_0 = arith.constant 0 : i32
    %c0_i32_1 = arith.constant 0 : i32
    return %c0_i32, %c0_i32_0 : i32, i32
  }
  func.func @transform_5(%arg0: i32) -> (i32, i32) {
    %c0_i32 = arith.constant 0 : i32
    %c0_i32_0 = arith.constant 0 : i32
    %c0_i32_1 = arith.constant 0 : i32
    return %c0_i32, %c0_i32_0 : i32, i32
  }
  func.func @transform_6(%arg0: i32) -> (i32, i32) {
    %c0_i32 = arith.constant 0 : i32
    %c0_i32_0 = arith.constant 0 : i32
    %c0_i32_1 = arith.constant 0 : i32
    return %c0_i32, %c0_i32_0 : i32, i32
  }
  func.func @transform_7(%arg0: i32) -> (i32, i32) {
    %c0_i32 = arith.constant 0 : i32
    %c0_i32_0 = arith.constant 0 : i32
    return %arg0, %c0_i32 : i32, i32
  }
}

</mosaic_0001>

<bundles_post_ra>
// kernel: dqn_forward.1
= control target key start
LH: loop header
LB: loop body
LE: loop exit
PB: predicated region body
PF: predicated region fallthrough
CT: control target
= control target key end

     0   :  { %12 = vsyncpa [#allocation3], 0  ;;  %s9854_s0 = inlined_call_operand.vmem [shape: f32[8,2304], index: 0, kind: input, shape index: {}]   ;;  %s9855_s1 = inlined_call_operand.hbm [shape: f32[2304,1024], index: 1, kind: input, shape index: {}]   ;;  %s9856_s2 = inlined_call_operand.hbm [shape: f32[1,1024], index: 2, kind: input, shape index: {}]   ;;  %s9857_s3 = inlined_call_operand.hbm [shape: f32[1024,512], index: 3, kind: input, shape index: {}]   ;;  %s9858_s4 = inlined_call_operand.hbm [shape: f32[1,512], index: 4, kind: input, shape index: {}]   ;;  %s9859_s5 = inlined_call_operand.hbm [shape: f32[512,128], index: 5, kind: input, shape index: {}]   ;;  %s9860_s6 = inlined_call_operand.hbm [shape: f32[1,128], index: 6, kind: input, shape index: {}]   ;;  %s9861_s7 = inlined_call_operand.vmem [shape: f32[8,128], index: 7, kind: output, shape index: {}]  }
   0x1   :  { %13 = vsyncpa [#allocation5], 0 }
   0x2   :  { %14 = vsyncpa [#allocation8], 0 }
   0x3   :  { %15 = vsyncpa [#allocation11], 0  ;;  %s9567_s24 = smov [#allocation4]   ;;  %s9568_s26 = smov [#allocation7]  }
   0x4   :  { %s36_s25 = sshll.u32 %s9567_s24, 4  ;;  %s58_s27 = sshll.u32 %s9568_s26, 4  ;;  %s37_s25 = int_to_ptr.vmem [resolvable:$true] %s36_s25  ;;  %s59_s27 = int_to_ptr.vmem [resolvable:$true] %s58_s27 }
   0x5   :  { %s9427_s30 = scalar_lea.hbm %s9856_s2, 128 }
   0x6   :  { %p9428_p0 = scmp.ne.s32.totalorder %s9856_s2, %s9427_s30  ;;  %p9431_p1 = scmp.lt.u32.totalorder %s9427_s30, %s9856_s2 }
   0x8   :  { %p9433_p2 = pnand %p9431_p1, %p9428_p0 }
   0xa   :  { %9436 = shalt.err (!%p9433_p2)
}
   0xb   :  { %s9437_s12 = scalar_lea.vmem %s37_s25, 128  ;;  %p9442_p4 = scmp.lt.s32.totalorder %s37_s25, %s37_s25 }
   0xc   :  { %p9438_p3 = scmp.ne.s32.totalorder %s37_s25, %s9437_s12  ;;  %p9443_p5 = scmp.lt.s32.totalorder %s9437_s12, %s9437_s12 }
   0xe   :  { %p9444_p6 = por %p9443_p5, %p9442_p4 }
  0x10   :  { %p9445_p7 = pnand %p9444_p6, %p9438_p3 }
  0x12   :  { %9448 = shalt.err (!%p9445_p7)
}
  0x13   :  { %39 = dma.hbm_to_vmem [thread:$0]  %s9856_s2, 128, %s37_s25, [#allocation5]  }
  0x14   :  { %s9449_s17 = scalar_lea.hbm %s9858_s4, 64 }
  0x15   :  { %p9450_p8 = scmp.ne.s32.totalorder %s9858_s4, %s9449_s17  ;;  %p9453_p9 = scmp.lt.u32.totalorder %s9449_s17, %s9858_s4 }
  0x17   :  { %p9455_p10 = pnand %p9453_p9, %p9450_p8 }
  0x19   :  { %9458 = shalt.err (!%p9455_p10)
}
  0x1a   :  { %s9459_s22 = scalar_lea.vmem %s59_s27, 64  ;;  %p9464_p12 = scmp.lt.s32.totalorder %s59_s27, %s59_s27 }
  0x1b   :  { %p9460_p11 = scmp.ne.s32.totalorder %s59_s27, %s9459_s22  ;;  %p9465_p13 = scmp.lt.s32.totalorder %s9459_s22, %s9459_s22 }
  0x1d   :  { %p9466_p0 = por %p9465_p13, %p9464_p12 }
  0x1f   :  { %p9467_p1 = pnand %p9466_p0, %p9460_p11 }
  0x21   :  { %9470 = shalt.err (!%p9467_p1)
}
  0x22   :  { %61 = dma.hbm_to_vmem [thread:$0]  %s9858_s4, 64, %s59_s27, [#allocation8]  }
  0x23   :  { %s9569_s24 = smov [#allocation2]   ;;  %s9471_s29 = scalar_lea.hbm %s9855_s1, 294912 }
  0x24   :  { %s23_s25 = sshll.u32 %s9569_s24, 4  ;;  %p9472_p2 = scmp.ne.s32.totalorder %s9855_s1, %s9471_s29  ;;  %s24_s25 = int_to_ptr.vmem [resolvable:$true] %s23_s25 }
  0x25   :  { %p9475_p3 = scmp.lt.u32.totalorder %s9471_s29, %s9855_s1 }
  0x27   :  { %p9477_p4 = pnand %p9475_p3, %p9472_p2 }
  0x29   :  { %9480 = shalt.err (!%p9477_p4)
}
  0x2a   :  { %s9481_s11 = scalar_lea.vmem %s24_s25, 294912  ;;  %p9486_p6 = scmp.lt.s32.totalorder %s24_s25, %s24_s25 }
  0x2b   :  { %p9482_p5 = scmp.ne.s32.totalorder %s24_s25, %s9481_s11  ;;  %p9487_p7 = scmp.lt.s32.totalorder %s9481_s11, %s9481_s11 }
  0x2d   :  { %p9488_p8 = por %p9487_p7, %p9486_p6 }
  0x2f   :  { %p9489_p9 = pnand %p9488_p8, %p9482_p5 }
  0x31   :  { %9492 = shalt.err (!%p9489_p9)
}
  0x32   :  { %s9570_s4 = smov 1024   ;;  %s9571_s27 = smov 64  }
  0x33   :  { %29 = dma.hbm_to_vmem [thread:$0]  %s9855_s1, 294912, %s24_s25, [#allocation3], %s9570_s4, %s9570_s4, %s9571_s27  }
  0x34   :  { %s9572_s14 = smov [#allocation6]   ;;  %s9493_s18 = scalar_lea.hbm %s9857_s3, 65536 }
  0x35   :  { %s45_s15 = sshll.u32 %s9572_s14, 4  ;;  %p9494_p10 = scmp.ne.s32.totalorder %s9857_s3, %s9493_s18  ;;  %s46_s15 = int_to_ptr.vmem [resolvable:$true] %s45_s15 }
  0x36   :  { %p9497_p11 = scmp.lt.u32.totalorder %s9493_s18, %s9857_s3 }
  0x38   :  { %p9499_p12 = pnand %p9497_p11, %p9494_p10 }
  0x3a   :  { %9502 = shalt.err (!%p9499_p12)
}
  0x3b   :  { %s9503_s2 = scalar_lea.vmem %s46_s15, 65536  ;;  %p9508_p0 = scmp.lt.s32.totalorder %s46_s15, %s46_s15 }
  0x3c   :  { %p9504_p13 = scmp.ne.s32.totalorder %s46_s15, %s9503_s2  ;;  %p9509_p1 = scmp.lt.s32.totalorder %s9503_s2, %s9503_s2 }
  0x3e   :  { %p9510_p2 = por %p9509_p1, %p9508_p0 }
  0x40   :  { %p9511_p3 = pnand %p9510_p2, %p9504_p13 }
  0x42   :  { %9514 = shalt.err (!%p9511_p3)
}
  0x43   :  { %s9573_s1 = smov 512   ;;  %s9574_s23 = smov 32  }
  0x44   :  { %51 = dma.hbm_to_vmem [thread:$0]  %s9857_s3, 65536, %s46_s15, [#allocation5], %s9573_s1, %s9573_s1, %s9574_s23  }
  0x45   :  { %s9575_s26 = smov [#allocation9]   ;;  %s9515_s8 = scalar_lea.hbm %s9859_s5, 8192 }
  0x46   :  { %s67_s28 = sshll.u32 %s9575_s26, 4  ;;  %p9516_p4 = scmp.ne.s32.totalorder %s9859_s5, %s9515_s8  ;;  %s68_s28 = int_to_ptr.vmem [resolvable:$true] %s67_s28 }
  0x47   :  { %p9519_p5 = scmp.lt.u32.totalorder %s9515_s8, %s9859_s5 }
  0x49   :  { %p9521_p6 = pnand %p9519_p5, %p9516_p4 }
  0x4b   :  { %9524 = shalt.err (!%p9521_p6)
}
  0x4c   :  { %s9525_s27 = scalar_lea.vmem %s68_s28, 8192  ;;  %p9530_p8 = scmp.lt.s32.totalorder %s68_s28, %s68_s28 }
  0x4d   :  { %p9526_p7 = scmp.ne.s32.totalorder %s68_s28, %s9525_s27  ;;  %p9531_p9 = scmp.lt.s32.totalorder %s9525_s27, %s9525_s27 }
  0x4f   :  { %p9532_p10 = por %p9531_p9, %p9530_p8 }
  0x51   :  { %p9533_p11 = pnand %p9532_p10, %p9526_p7 }
  0x53   :  { %9536 = shalt.err (!%p9533_p11)
}
  0x54   :  { %s9576_s3 = smov 128   ;;  %s9577_s12 = smov 8  }
  0x55   :  { %73 = dma.hbm_to_vmem [thread:$0]  %s9859_s5, 8192, %s68_s28, [#allocation8], %s9576_s3, %s9576_s3, %s9577_s12  }
  0x56   :  { %s9578_s15 = smov [#allocation10]   ;;  %s9537_s19 = scalar_lea.hbm %s9860_s6, 16 }
  0x57   :  { %s80_s16 = sshll.u32 %s9578_s15, 4  ;;  %p9538_p12 = scmp.ne.s32.totalorder %s9860_s6, %s9537_s19  ;;  %s81_s16 = int_to_ptr.vmem [resolvable:$true] %s80_s16 }
  0x58   :  { %p9541_p13 = scmp.lt.u32.totalorder %s9537_s19, %s9860_s6 }
  0x5a   :  { %p9543_p0 = pnand %p9541_p13, %p9538_p12 }
  0x5c   :  { %9546 = shalt.err (!%p9543_p0)
}
  0x5d   :  { %s9547_s1 = scalar_lea.vmem %s81_s16, 16  ;;  %s9551_s5 = scalar_lea.vmem %s81_s16, 32 }
  0x5e   :  { %p9548_p1 = scmp.ne.s32.totalorder %s81_s16, %s9547_s1  ;;  %p9552_p2 = scmp.lt.s32.totalorder %s81_s16, %s81_s16 }
  0x5f   :  { %p9553_p3 = scmp.lt.s32.totalorder %s9551_s5, %s9547_s1 }
  0x61   :  { %p9554_p4 = por %p9553_p3, %p9552_p2 }
  0x63   :  { %p9555_p5 = pnand %p9554_p4, %p9548_p1 }
  0x65   :  { %9558 = shalt.err (!%p9555_p5)
}
  0x66   :  { %83 = dma.hbm_to_vmem [thread:$0]  %s9860_s6, 16, %s81_s16, [#allocation11]  }
  0x67   :  { %9559 = dma.done.wait [#allocation3], 294912  }
  0x68   :  { %9560 = vsyncadd [#allocation3], 4294672384 }
  0x69   :  { %9561 = dma.done.wait [#allocation5], 65664  }
  0x6a   :  { %9562 = vsyncadd [#allocation5], 4294901632 }
  0x6b   :  { %9563 = dma.done.wait [#allocation8], 8256  }
  0x6c   :  { %9564 = vsyncadd [#allocation8], 4294959040 }
  0x6d   :  { %9565 = dma.done.wait [#allocation11], 16  }
  0x6e   :  { %9566 = vsyncadd [#allocation11], 4294967280  ;;  %v121_v0 = vld [vmem:[#allocation2 + $0x8] sm:$0xff]  ;;  %v123_v2 = vld [vmem:[#allocation2 + $0x18] sm:$0xff] }
  0x6f   :  { %v129_v1 = vld [vmem:[#allocation2 + $0x48] sm:$0xff]  ;;  %v131_v4 = vld [vmem:[#allocation2 + $0x58] sm:$0xff]  ;;  %v120_v5 = vld [vmem:[#allocation2] sm:$0xff] }
  0x70   :  { %v6427_v3 = vpack.c.bf16 %v129_v1, %v121_v0  ;;  %v128_v6 = vld [vmem:[#allocation2 + $0x40] sm:$0xff]  ;;  %v7003_v7 = vpack.c.bf16 %v131_v4, %v123_v2  ;;  %v122_v9 = vld [vmem:[#allocation2 + $0x10] sm:$0xff]  ;;  %v137_v11 = vld [vmem:[#allocation2 + $0x88] sm:$0xff] }
  0x71   :  { %v6429_v8 = vpack.c.bf16 %v128_v6, %v120_v5  ;;  %v130_v10 = vld [vmem:[#allocation2 + $0x50] sm:$0xff]  ;;  %v145_v13 = vld [vmem:[#allocation2 + $0xc8] sm:$0xff]  ;;  %v139_v14 = vld [vmem:[#allocation2 + $0x98] sm:$0xff] }
  0x72   :  { %6428 = vmatprep.subr.bf16.mxu0 %v6427_v3  ;;  %v7005_v12 = vpack.c.bf16 %v130_v10, %v122_v9  ;;  %v147_v15 = vld [vmem:[#allocation2 + $0xd8] sm:$0xff]  ;;  %7004 = vmatprep.subr.bf16.mxu1 %v7003_v7  ;;  %v6431_v16 = vpack.c.bf16 %v145_v13, %v137_v11  ;;  %v136_v18 = vld [vmem:[#allocation2 + $0x80] sm:$0xff]  ;;  %v138_v20 = vld [vmem:[#allocation2 + $0x90] sm:$0xff] }
  0x73   :  { %6430 = vmatpush1.bf16.msra.mxu0 %v6429_v8  ;;  %v7007_v17 = vpack.c.bf16 %v147_v15, %v139_v14  ;;  %v144_v19 = vld [vmem:[#allocation2 + $0xc0] sm:$0xff]  ;;  %v146_v22 = vld [vmem:[#allocation2 + $0xd0] sm:$0xff]  ;;  %v153_v23 = vld [vmem:[#allocation2 + $0x108] sm:$0xff] }
  0x74   :  { %7006 = vmatpush1.bf16.msra.mxu1 %v7005_v12  ;;  %v6433_v21 = vpack.c.bf16 %v144_v19, %v136_v18  ;;  %v161_v24 = vld [vmem:[#allocation2 + $0x148] sm:$0xff]  ;;  %6432 = vmatprep.subr.bf16.mxu0 %v6431_v16  ;;  %v7009_v25 = vpack.c.bf16 %v146_v22, %v138_v20  ;;  %v155_v27 = vld [vmem:[#allocation2 + $0x118] sm:$0xff]  ;;  %v152_v29 = vld [vmem:[#allocation2 + $0x100] sm:$0xff] }
  0x75   :  { %7008 = vmatprep.subr.bf16.mxu1 %v7007_v17  ;;  %v6435_v26 = vpack.c.bf16 %v161_v24, %v153_v23  ;;  %v163_v28 = vld [vmem:[#allocation2 + $0x158] sm:$0xff]  ;;  %v160_v31 = vld [vmem:[#allocation2 + $0x140] sm:$0xff]  ;;  %v154_v32 = vld [vmem:[#allocation2 + $0x110] sm:$0xff] }
  0x76   :  { %v7011_v30 = vpack.c.bf16 %v163_v28, %v155_v27  ;;  %v162_v33 = vld [vmem:[#allocation2 + $0x150] sm:$0xff]  ;;  %v6437_v34 = vpack.c.bf16 %v160_v31, %v152_v29  ;;  %v169_v35 = vld [vmem:[#allocation2 + $0x188] sm:$0xff]  ;;  %v171_v37 = vld [vmem:[#allocation2 + $0x198] sm:$0xff] }
  0x77   :  { %6434 = vmatpush1.bf16.msra.mxu0 %v6433_v21  ;;  %v177_v36 = vld [vmem:[#allocation2 + $0x1c8] sm:$0xff]  ;;  %v7013_v38 = vpack.c.bf16 %v162_v33, %v154_v32  ;;  %v179_v40 = vld [vmem:[#allocation2 + $0x1d8] sm:$0xff]  ;;  %v168_v41 = vld [vmem:[#allocation2 + $0x180] sm:$0xff] }
  0x78   :  { %7010 = vmatpush1.bf16.msra.mxu1 %v7009_v25  ;;  %6436 = vmatprep.subr.bf16.mxu0 %v6435_v26  ;;  %v6439_v39 = vpack.c.bf16 %v177_v36, %v169_v35  ;;  %v176_v42 = vld [vmem:[#allocation2 + $0x1c0] sm:$0xff]  ;;  %v7015_v43 = vpack.c.bf16 %v179_v40, %v171_v37  ;;  %v170_v44 = vld [vmem:[#allocation2 + $0x190] sm:$0xff]  ;;  %v185_v46 = vld [vmem:[#allocation2 + $0x208] sm:$0xff] }
  0x79   :  { %7012 = vmatprep.subr.bf16.mxu1 %v7011_v30  ;;  %v178_v45 = vld [vmem:[#allocation2 + $0x1d0] sm:$0xff]  ;;  %v193_v47 = vld [vmem:[#allocation2 + $0x248] sm:$0xff]  ;;  %v187_v48 = vld [vmem:[#allocation2 + $0x218] sm:$0xff]  ;;  %v6441_v50 = vpack.c.bf16 %v176_v42, %v168_v41 }
  0x7a   :  { %v195_v49 = vld [vmem:[#allocation2 + $0x258] sm:$0xff]  ;;  %v7017_v51 = vpack.c.bf16 %v178_v45, %v170_v44  ;;  %v6443_v52 = vpack.c.bf16 %v193_v47, %v185_v46  ;;  %v184_v53 = vld [vmem:[#allocation2 + $0x200] sm:$0xff]  ;;  %v186_v55 = vld [vmem:[#allocation2 + $0x210] sm:$0xff] }
  0x7b   :  { %6438 = vmatpush1.bf16.msra.mxu0 %v6437_v34  ;;  %v192_v54 = vld [vmem:[#allocation2 + $0x240] sm:$0xff]  ;;  %v7019_v56 = vpack.c.bf16 %v195_v49, %v187_v48  ;;  %v194_v57 = vld [vmem:[#allocation2 + $0x250] sm:$0xff]  ;;  %v201_v58 = vld [vmem:[#allocation2 + $0x288] sm:$0xff] }
  0x7c   :  { %7014 = vmatpush1.bf16.msra.mxu1 %v7013_v38  ;;  %6440 = vmatprep.subr.bf16.mxu0 %v6439_v39  ;;  %v209_v59 = vld [vmem:[#allocation2 + $0x2c8] sm:$0xff]  ;;  %v203_v60 = vld [vmem:[#allocation2 + $0x298] sm:$0xff]  ;;  %v6445_v62 = vpack.c.bf16 %v192_v54, %v184_v53  ;;  %v7021_v63 = vpack.c.bf16 %v194_v57, %v186_v55  ;;  %v200_v1 = vld [vmem:[#allocation2 + $0x280] sm:$0xff] }
  0x7d   :  { %7016 = vmatprep.subr.bf16.mxu1 %v7015_v43  ;;  %v211_v61 = vld [vmem:[#allocation2 + $0x2d8] sm:$0xff]  ;;  %v6447_v0 = vpack.c.bf16 %v209_v59, %v201_v58  ;;  %v208_v2 = vld [vmem:[#allocation2 + $0x2c0] sm:$0xff]  ;;  %v202_v3 = vld [vmem:[#allocation2 + $0x290] sm:$0xff] }
  0x7e   :  { %v7023_v4 = vpack.c.bf16 %v211_v61, %v203_v60  ;;  %v210_v5 = vld [vmem:[#allocation2 + $0x2d0] sm:$0xff]  ;;  %v217_v6 = vld [vmem:[#allocation2 + $0x308] sm:$0xff]  ;;  %v219_v8 = vld [vmem:[#allocation2 + $0x318] sm:$0xff]  ;;  %v6449_v10 = vpack.c.bf16 %v208_v2, %v200_v1 }
  0x7f   :  { %6442 = vmatpush1.bf16.msra.mxu0 %v6441_v50  ;;  %v225_v7 = vld [vmem:[#allocation2 + $0x348] sm:$0xff]  ;;  %v227_v9 = vld [vmem:[#allocation2 + $0x358] sm:$0xff]  ;;  %v7025_v11 = vpack.c.bf16 %v210_v5, %v202_v3  ;;  %v216_v13 = vld [vmem:[#allocation2 + $0x300] sm:$0xff] }
  0x80   :  { %7018 = vmatpush1.bf16.msra.mxu1 %v7017_v51  ;;  %6444 = vmatprep.subr.bf16.mxu0 %v6443_v52  ;;  %v6451_v12 = vpack.c.bf16 %v225_v7, %v217_v6  ;;  %v224_v14 = vld [vmem:[#allocation2 + $0x340] sm:$0xff]  ;;  %v218_v15 = vld [vmem:[#allocation2 + $0x310] sm:$0xff]  ;;  %v7027_v16 = vpack.c.bf16 %v227_v9, %v219_v8  ;;  %v233_v18 = vld [vmem:[#allocation2 + $0x388] sm:$0xff] }
  0x81   :  { %7020 = vmatprep.subr.bf16.mxu1 %v7019_v56  ;;  %v226_v17 = vld [vmem:[#allocation2 + $0x350] sm:$0xff]  ;;  %v241_v19 = vld [vmem:[#allocation2 + $0x3c8] sm:$0xff]  ;;  %v235_v20 = vld [vmem:[#allocation2 + $0x398] sm:$0xff]  ;;  %v6453_v22 = vpack.c.bf16 %v224_v14, %v216_v13 }
  0x82   :  { %v243_v21 = vld [vmem:[#allocation2 + $0x3d8] sm:$0xff]  ;;  %v7029_v23 = vpack.c.bf16 %v226_v17, %v218_v15  ;;  %v6455_v24 = vpack.c.bf16 %v241_v19, %v233_v18  ;;  %v232_v25 = vld [vmem:[#allocation2 + $0x380] sm:$0xff]  ;;  %v234_v27 = vld [vmem:[#allocation2 + $0x390] sm:$0xff] }
  0x83   :  { %6446 = vmatpush1.bf16.msra.mxu0 %v6445_v62  ;;  %v240_v26 = vld [vmem:[#allocation2 + $0x3c0] sm:$0xff]  ;;  %v7031_v28 = vpack.c.bf16 %v243_v21, %v235_v20  ;;  %v242_v29 = vld [vmem:[#allocation2 + $0x3d0] sm:$0xff]  ;;  %v249_v30 = vld [vmem:[#allocation2 + $0x408] sm:$0xff] }
  0x84   :  { %7022 = vmatpush1.bf16.msra.mxu1 %v7021_v63  ;;  %6448 = vmatprep.subr.bf16.mxu0 %v6447_v0  ;;  %v257_v31 = vld [vmem:[#allocation2 + $0x448] sm:$0xff]  ;;  %v251_v32 = vld [vmem:[#allocation2 + $0x418] sm:$0xff]  ;;  %v6457_v34 = vpack.c.bf16 %v240_v26, %v232_v25  ;;  %v7033_v35 = vpack.c.bf16 %v242_v29, %v234_v27  ;;  %v248_v37 = vld [vmem:[#allocation2 + $0x400] sm:$0xff] }
  0x85   :  { %7024 = vmatprep.subr.bf16.mxu1 %v7023_v4  ;;  %v259_v33 = vld [vmem:[#allocation2 + $0x458] sm:$0xff]  ;;  %v6459_v36 = vpack.c.bf16 %v257_v31, %v249_v30  ;;  %v256_v38 = vld [vmem:[#allocation2 + $0x440] sm:$0xff]  ;;  %v250_v39 = vld [vmem:[#allocation2 + $0x410] sm:$0xff] }
  0x86   :  { %v7035_v40 = vpack.c.bf16 %v259_v33, %v251_v32  ;;  %v258_v41 = vld [vmem:[#allocation2 + $0x450] sm:$0xff]  ;;  %v265_v42 = vld [vmem:[#allocation2 + $0x488] sm:$0xff]  ;;  %v267_v44 = vld [vmem:[#allocation2 + $0x498] sm:$0xff]  ;;  %v6461_v46 = vpack.c.bf16 %v256_v38, %v248_v37 }
  0x87   :  { %6450 = vmatpush1.bf16.msra.mxu0 %v6449_v10  ;;  %v273_v43 = vld [vmem:[#allocation2 + $0x4c8] sm:$0xff]  ;;  %v275_v45 = vld [vmem:[#allocation2 + $0x4d8] sm:$0xff]  ;;  %v7037_v47 = vpack.c.bf16 %v258_v41, %v250_v39  ;;  %v264_v49 = vld [vmem:[#allocation2 + $0x480] sm:$0xff] }
  0x88   :  { %7026 = vmatpush1.bf16.msra.mxu1 %v7025_v11  ;;  %6452 = vmatprep.subr.bf16.mxu0 %v6451_v12  ;;  %v6463_v48 = vpack.c.bf16 %v273_v43, %v265_v42  ;;  %v272_v50 = vld [vmem:[#allocation2 + $0x4c0] sm:$0xff]  ;;  %v266_v51 = vld [vmem:[#allocation2 + $0x490] sm:$0xff]  ;;  %v7039_v52 = vpack.c.bf16 %v275_v45, %v267_v44  ;;  %v281_v54 = vld [vmem:[#allocation2 + $0x508] sm:$0xff] }
  0x89   :  { %7028 = vmatprep.subr.bf16.mxu1 %v7027_v16  ;;  %v274_v53 = vld [vmem:[#allocation2 + $0x4d0] sm:$0xff]  ;;  %v289_v55 = vld [vmem:[#allocation2 + $0x548] sm:$0xff]  ;;  %v283_v56 = vld [vmem:[#allocation2 + $0x518] sm:$0xff]  ;;  %v6465_v58 = vpack.c.bf16 %v272_v50, %v264_v49 }
  0x8a   :  { %v291_v57 = vld [vmem:[#allocation2 + $0x558] sm:$0xff]  ;;  %v7041_v59 = vpack.c.bf16 %v274_v53, %v266_v51  ;;  %v6467_v60 = vpack.c.bf16 %v289_v55, %v281_v54  ;;  %v280_v61 = vld [vmem:[#allocation2 + $0x500] sm:$0xff]  ;;  %v282_v63 = vld [vmem:[#allocation2 + $0x510] sm:$0xff] }
  0x8b   :  { %6454 = vmatpush1.bf16.msra.mxu0 %v6453_v22  ;;  %v288_v62 = vld [vmem:[#allocation2 + $0x540] sm:$0xff]  ;;  %v7043_v0 = vpack.c.bf16 %v291_v57, %v283_v56  ;;  %v290_v1 = vld [vmem:[#allocation2 + $0x550] sm:$0xff]  ;;  %v297_v2 = vld [vmem:[#allocation2 + $0x588] sm:$0xff] }
  0x8c   :  { %7030 = vmatpush1.bf16.msra.mxu1 %v7029_v23  ;;  %6456 = vmatprep.subr.bf16.mxu0 %v6455_v24  ;;  %v305_v3 = vld [vmem:[#allocation2 + $0x5c8] sm:$0xff]  ;;  %v299_v4 = vld [vmem:[#allocation2 + $0x598] sm:$0xff]  ;;  %v6469_v6 = vpack.c.bf16 %v288_v62, %v280_v61  ;;  %v296_v7 = vld [vmem:[#allocation2 + $0x580] sm:$0xff]  ;;  %v7045_v8 = vpack.c.bf16 %v290_v1, %v282_v63 }
  0x8d   :  { %7032 = vmatprep.subr.bf16.mxu1 %v7031_v28  ;;  %v307_v5 = vld [vmem:[#allocation2 + $0x5d8] sm:$0xff]  ;;  %v6471_v9 = vpack.c.bf16 %v305_v3, %v297_v2  ;;  %v304_v10 = vld [vmem:[#allocation2 + $0x5c0] sm:$0xff]  ;;  %v298_v11 = vld [vmem:[#allocation2 + $0x590] sm:$0xff] }
  0x8e   :  { %v306_v12 = vld [vmem:[#allocation2 + $0x5d0] sm:$0xff]  ;;  %v7047_v13 = vpack.c.bf16 %v307_v5, %v299_v4  ;;  %v313_v14 = vld [vmem:[#allocation2 + $0x608] sm:$0xff]  ;;  %v315_v17 = vld [vmem:[#allocation2 + $0x618] sm:$0xff]  ;;  %v6473_v19 = vpack.c.bf16 %v304_v10, %v296_v7 }
  0x8f   :  { %6458 = vmatpush1.bf16.msra.mxu0 %v6457_v34  ;;  %v321_v15 = vld [vmem:[#allocation2 + $0x648] sm:$0xff]  ;;  %v323_v18 = vld [vmem:[#allocation2 + $0x658] sm:$0xff]  ;;  %v7049_v20 = vpack.c.bf16 %v306_v12, %v298_v11  ;;  %v312_v22 = vld [vmem:[#allocation2 + $0x600] sm:$0xff] }
  0x90   :  { %7034 = vmatpush1.bf16.msra.mxu1 %v7033_v35  ;;  %6460 = vmatprep.subr.bf16.mxu0 %v6459_v36  ;;  %v103_v16 = vld [vmem:[%s9854_s0 + $0x8] sm:$0xff]  ;;  %v6475_v21 = vpack.c.bf16 %v321_v15, %v313_v14  ;;  %v320_v23 = vld [vmem:[#allocation2 + $0x640] sm:$0xff]  ;;  %v314_v24 = vld [vmem:[#allocation2 + $0x610] sm:$0xff]  ;;  %v7051_v25 = vpack.c.bf16 %v323_v18, %v315_v17 }
  0x91   :  { %7036 = vmatprep.subr.bf16.mxu1 %v7035_v40  ;;  %2530 = vmatprep.mubr.f32.mxu0 %v103_v16  ;;  %v322_v26 = vld [vmem:[#allocation2 + $0x650] sm:$0xff]  ;;  %v329_v27 = vld [vmem:[#allocation2 + $0x688] sm:$0xff]  ;;  %v331_v29 = vld [vmem:[#allocation2 + $0x698] sm:$0xff]  ;;  %v6477_v31 = vpack.c.bf16 %v320_v23, %v312_v22 }
  0x92   :  { %3169 = vmatprep.mubr.f32.mxu1 %v103_v16  ;;  %v337_v28 = vld [vmem:[#allocation2 + $0x6c8] sm:$0xff]  ;;  %v339_v30 = vld [vmem:[#allocation2 + $0x6d8] sm:$0xff]  ;;  %v7053_v32 = vpack.c.bf16 %v322_v26, %v314_v24  ;;  %v328_v34 = vld [vmem:[#allocation2 + $0x680] sm:$0xff] }
  0x93   :  { %6462 = vmatpush1.bf16.msra.mxu0 %v6461_v46  ;;  %v6479_v33 = vpack.c.bf16 %v337_v28, %v329_v27  ;;  %v336_v35 = vld [vmem:[#allocation2 + $0x6c0] sm:$0xff]  ;;  %v330_v36 = vld [vmem:[#allocation2 + $0x690] sm:$0xff]  ;;  %v7055_v37 = vpack.c.bf16 %v339_v30, %v331_v29  ;;  %v345_v39 = vld [vmem:[#allocation2 + $0x708] sm:$0xff] }
  0x94   :  { %7038 = vmatpush1.bf16.msra.mxu1 %v7037_v47  ;;  %6464 = vmatprep.subr.bf16.mxu0 %v6463_v48  ;;  %v338_v38 = vld [vmem:[#allocation2 + $0x6d0] sm:$0xff]  ;;  %v353_v40 = vld [vmem:[#allocation2 + $0x748] sm:$0xff]  ;;  %v347_v41 = vld [vmem:[#allocation2 + $0x718] sm:$0xff]  ;;  %v6481_v43 = vpack.c.bf16 %v336_v35, %v328_v34 }
  0x95   :  { %7040 = vmatprep.subr.bf16.mxu1 %v7039_v52  ;;  %v355_v42 = vld [vmem:[#allocation2 + $0x758] sm:$0xff]  ;;  %v7057_v44 = vpack.c.bf16 %v338_v38, %v330_v36  ;;  %v6483_v45 = vpack.c.bf16 %v353_v40, %v345_v39  ;;  %v344_v46 = vld [vmem:[#allocation2 + $0x700] sm:$0xff]  ;;  %v346_v48 = vld [vmem:[#allocation2 + $0x710] sm:$0xff] }
  0x96   :  { %v352_v47 = vld [vmem:[#allocation2 + $0x740] sm:$0xff]  ;;  %v7059_v49 = vpack.c.bf16 %v355_v42, %v347_v41  ;;  %v354_v50 = vld [vmem:[#allocation2 + $0x750] sm:$0xff]  ;;  %v361_v51 = vld [vmem:[#allocation2 + $0x788] sm:$0xff] }
  0x97   :  { %6466 = vmatpush1.bf16.msra.mxu0 %v6465_v58  ;;  %v369_v52 = vld [vmem:[#allocation2 + $0x7c8] sm:$0xff]  ;;  %v363_v53 = vld [vmem:[#allocation2 + $0x798] sm:$0xff]  ;;  %v6485_v55 = vpack.c.bf16 %v352_v47, %v344_v46  ;;  %v7061_v56 = vpack.c.bf16 %v354_v50, %v346_v48  ;;  %v360_v58 = vld [vmem:[#allocation2 + $0x780] sm:$0xff] }
  0x98   :  { %7042 = vmatpush1.bf16.msra.mxu1 %v7041_v59  ;;  %6468 = vmatprep.subr.bf16.mxu0 %v6467_v60  ;;  %v371_v54 = vld [vmem:[#allocation2 + $0x7d8] sm:$0xff]  ;;  %v6487_v57 = vpack.c.bf16 %v369_v52, %v361_v51  ;;  %v368_v59 = vld [vmem:[#allocation2 + $0x7c0] sm:$0xff]  ;;  %v362_v60 = vld [vmem:[#allocation2 + $0x790] sm:$0xff] }
  0x99   :  { %7044 = vmatprep.subr.bf16.mxu1 %v7043_v0  ;;  %v7063_v61 = vpack.c.bf16 %v371_v54, %v363_v53  ;;  %v370_v62 = vld [vmem:[#allocation2 + $0x7d0] sm:$0xff]  ;;  %v377_v63 = vld [vmem:[#allocation2 + $0x808] sm:$0xff]  ;;  %v379_v1 = vld [vmem:[#allocation2 + $0x818] sm:$0xff]  ;;  %v6489_v3 = vpack.c.bf16 %v368_v59, %v360_v58 }
  0x9a   :  { %v385_v0 = vld [vmem:[#allocation2 + $0x848] sm:$0xff]  ;;  %v387_v2 = vld [vmem:[#allocation2 + $0x858] sm:$0xff]  ;;  %v7065_v4 = vpack.c.bf16 %v370_v62, %v362_v60  ;;  %v384_v7 = vld [vmem:[#allocation2 + $0x840] sm:$0xff] }
  0x9b   :  { %6470 = vmatpush1.bf16.msra.mxu0 %v6469_v6  ;;  %v6491_v5 = vpack.c.bf16 %v385_v0, %v377_v63  ;;  %v376_v6 = vld [vmem:[#allocation2 + $0x800] sm:$0xff]  ;;  %v386_v10 = vld [vmem:[#allocation2 + $0x850] sm:$0xff]  ;;  %v393_v11 = vld [vmem:[#allocation2 + $0x888] sm:$0xff] }
  0x9c   :  { %7046 = vmatpush1.bf16.msra.mxu1 %v7045_v8  ;;  %6472 = vmatprep.subr.bf16.mxu0 %v6471_v9  ;;  %v378_v8 = vld [vmem:[#allocation2 + $0x810] sm:$0xff]  ;;  %v7067_v9 = vpack.c.bf16 %v387_v2, %v379_v1  ;;  %v401_v12 = vld [vmem:[#allocation2 + $0x8c8] sm:$0xff]  ;;  %v403_v14 = vld [vmem:[#allocation2 + $0x8d8] sm:$0xff]  ;;  %v6493_v16 = vpack.c.bf16 %v384_v7, %v376_v6 }
  0x9d   :  { %7048 = vmatprep.subr.bf16.mxu1 %v7047_v13  ;;  %v395_v13 = vld [vmem:[#allocation2 + $0x898] sm:$0xff]  ;;  %v102_v15 = vld [vmem:[%s9854_s0] sm:$0xff]  ;;  %v7069_v17 = vpack.c.bf16 %v386_v10, %v378_v8  ;;  %v6495_v18 = vpack.c.bf16 %v401_v12, %v393_v11  ;;  %v402_v23 = vld [vmem:[#allocation2 + $0x8d0] sm:$0xff] }
  0x9e   :  { %v7071_v22 = vpack.c.bf16 %v403_v14, %v395_v13  ;;  %v409_v24 = vld [vmem:[#allocation2 + $0x908] sm:$0xff]  ;;  %v411_v26 = vld [vmem:[#allocation2 + $0x918] sm:$0xff]  ;;  %v418_v35 = vld [vmem:[#allocation2 + $0x950] sm:$0xff] }
  0x9f   :  { %6474 = vmatpush1.bf16.msra.mxu0 %v6473_v19  ;;  %v392_v19 = vld [vmem:[#allocation2 + $0x880] sm:$0xff]  ;;  %v419_v27 = vld [vmem:[#allocation2 + $0x958] sm:$0xff]  ;;  %v425_v36 = vld [vmem:[#allocation2 + $0x988] sm:$0xff] }
  0xa0   :  { %7050 = vmatpush1.bf16.msra.mxu1 %v7049_v20  ;;  %6476 = vmatprep.subr.bf16.mxu0 %v6475_v21  ;;  %v400_v20 = vld [vmem:[#allocation2 + $0x8c0] sm:$0xff]  ;;  %v394_v21 = vld [vmem:[#allocation2 + $0x890] sm:$0xff]  ;;  %v7075_v34 = vpack.c.bf16 %v419_v27, %v411_v26  ;;  %v427_v38 = vld [vmem:[#allocation2 + $0x998] sm:$0xff] }
  0xa1   :  { %7052 = vmatprep.subr.bf16.mxu1 %v7051_v25  ;;  %v417_v25 = vld [vmem:[#allocation2 + $0x948] sm:$0xff]  ;;  %v6497_v28 = vpack.c.bf16 %v400_v20, %v392_v19  ;;  %v7073_v29 = vpack.c.bf16 %v402_v23, %v394_v21  ;;  %v435_v39 = vld [vmem:[#allocation2 + $0x9d8] sm:$0xff]  ;;  %v434_v47 = vld [vmem:[#allocation2 + $0x9d0] sm:$0xff] }
  0xa2   :  { %v6499_v30 = vpack.c.bf16 %v417_v25, %v409_v24  ;;  %v7079_v46 = vpack.c.bf16 %v435_v39, %v427_v38  ;;  %v441_v48 = vld [vmem:[#allocation2 + $0xa08] sm:$0xff]  ;;  %v443_v50 = vld [vmem:[#allocation2 + $0xa18] sm:$0xff]  ;;  %v450_v59 = vld [vmem:[#allocation2 + $0xa50] sm:$0xff] }
  0xa3   :  { %6478 = vmatpush1.bf16.msra.mxu0 %v6477_v31  ;;  %v408_v31 = vld [vmem:[#allocation2 + $0x900] sm:$0xff]  ;;  %v451_v51 = vld [vmem:[#allocation2 + $0xa58] sm:$0xff]  ;;  %v457_v60 = vld [vmem:[#allocation2 + $0xa88] sm:$0xff] }
  0xa4   :  { %7054 = vmatpush1.bf16.msra.mxu1 %v7053_v32  ;;  %6480 = vmatprep.subr.bf16.mxu0 %v6479_v33  ;;  %v416_v32 = vld [vmem:[#allocation2 + $0x940] sm:$0xff]  ;;  %v410_v33 = vld [vmem:[#allocation2 + $0x910] sm:$0xff]  ;;  %v7083_v58 = vpack.c.bf16 %v451_v51, %v443_v50  ;;  %v459_v62 = vld [vmem:[#allocation2 + $0xa98] sm:$0xff] }
  0xa5   :  { %7056 = vmatprep.subr.bf16.mxu1 %v7055_v37  ;;  %v433_v37 = vld [vmem:[#allocation2 + $0x9c8] sm:$0xff]  ;;  %v6501_v40 = vpack.c.bf16 %v416_v32, %v408_v31  ;;  %v7077_v41 = vpack.c.bf16 %v418_v35, %v410_v33  ;;  %v467_v63 = vld [vmem:[#allocation2 + $0xad8] sm:$0xff]  ;;  %v466_v7 = vld [vmem:[#allocation2 + $0xad0] sm:$0xff] }
  0xa6   :  { %v6503_v42 = vpack.c.bf16 %v433_v37, %v425_v36  ;;  %v7087_v6 = vpack.c.bf16 %v467_v63, %v459_v62  ;;  %v473_v8 = vld [vmem:[#allocation2 + $0xb08] sm:$0xff]  ;;  %v475_v10 = vld [vmem:[#allocation2 + $0xb18] sm:$0xff]  ;;  %v472_v13 = vld [vmem:[#allocation2 + $0xb00] sm:$0xff] }
  0xa7   :  { %6482 = vmatpush1.bf16.msra.mxu0 %v6481_v43  ;;  %v424_v43 = vld [vmem:[#allocation2 + $0x980] sm:$0xff]  ;;  %v483_v11 = vld [vmem:[#allocation2 + $0xb58] sm:$0xff]  ;;  %v489_v20 = vld [vmem:[#allocation2 + $0xb88] sm:$0xff] }
  0xa8   :  { %7058 = vmatpush1.bf16.msra.mxu1 %v7057_v44  ;;  %6484 = vmatprep.subr.bf16.mxu0 %v6483_v45  ;;  %v432_v44 = vld [vmem:[#allocation2 + $0x9c0] sm:$0xff]  ;;  %v426_v45 = vld [vmem:[#allocation2 + $0x990] sm:$0xff]  ;;  %v7091_v19 = vpack.c.bf16 %v483_v11, %v475_v10  ;;  %v497_v21 = vld [vmem:[#allocation2 + $0xbc8] sm:$0xff] }
  0xa9   :  { %7060 = vmatprep.subr.bf16.mxu1 %v7059_v49  ;;  %v449_v49 = vld [vmem:[#allocation2 + $0xa48] sm:$0xff]  ;;  %v6505_v52 = vpack.c.bf16 %v432_v44, %v424_v43  ;;  %v7081_v53 = vpack.c.bf16 %v434_v47, %v426_v45  ;;  %v491_v23 = vld [vmem:[#allocation2 + $0xb98] sm:$0xff]  ;;  %v6519_v27 = vpack.c.bf16 %v497_v21, %v489_v20  ;;  %v498_v32 = vld [vmem:[#allocation2 + $0xbd0] sm:$0xff] }
  0xaa   :  { %v6507_v54 = vpack.c.bf16 %v449_v49, %v441_v48  ;;  %v499_v24 = vld [vmem:[#allocation2 + $0xbd8] sm:$0xff]  ;;  %v505_v33 = vld [vmem:[#allocation2 + $0xc08] sm:$0xff]  ;;  %v514_v44 = vld [vmem:[#allocation2 + $0xc50] sm:$0xff] }
  0xab   :  { %6486 = vmatpush1.bf16.msra.mxu0 %v6485_v55  ;;  %v440_v55 = vld [vmem:[#allocation2 + $0xa00] sm:$0xff]  ;;  %v7095_v31 = vpack.c.bf16 %v499_v24, %v491_v23  ;;  %v507_v35 = vld [vmem:[#allocation2 + $0xc18] sm:$0xff]  ;;  %v521_v45 = vld [vmem:[#allocation2 + $0xc88] sm:$0xff] }
  0xac   :  { %7062 = vmatpush1.bf16.msra.mxu1 %v7061_v56  ;;  %6488 = vmatprep.subr.bf16.mxu0 %v6487_v57  ;;  %v448_v56 = vld [vmem:[#allocation2 + $0xa40] sm:$0xff]  ;;  %v442_v57 = vld [vmem:[#allocation2 + $0xa10] sm:$0xff]  ;;  %v515_v36 = vld [vmem:[#allocation2 + $0xc58] sm:$0xff] }
  0xad   :  { %7064 = vmatprep.subr.bf16.mxu1 %v7063_v61  ;;  %v465_v61 = vld [vmem:[#allocation2 + $0xac8] sm:$0xff]  ;;  %v6509_v0 = vpack.c.bf16 %v448_v56, %v440_v55  ;;  %v7085_v1 = vpack.c.bf16 %v450_v59, %v442_v57  ;;  %v7099_v43 = vpack.c.bf16 %v515_v36, %v507_v35  ;;  %v523_v47 = vld [vmem:[#allocation2 + $0xc98] sm:$0xff]  ;;  %v530_v56 = vld [vmem:[#allocation2 + $0xcd0] sm:$0xff] }
  0xae   :  { %v6511_v2 = vpack.c.bf16 %v465_v61, %v457_v60  ;;  %v531_v48 = vld [vmem:[#allocation2 + $0xcd8] sm:$0xff]  ;;  %v537_v57 = vld [vmem:[#allocation2 + $0xd08] sm:$0xff]  ;;  %v568_v24 = vld [vmem:[#allocation2 + $0xe00] sm:$0xff] }
  0xaf   :  { %6490 = vmatpush1.bf16.msra.mxu0 %v6489_v3  ;;  %v456_v3 = vld [vmem:[#allocation2 + $0xa80] sm:$0xff]  ;;  %v7103_v55 = vpack.c.bf16 %v531_v48, %v523_v47  ;;  %v539_v59 = vld [vmem:[#allocation2 + $0xd18] sm:$0xff] }
  0xb0   :  { %7066 = vmatpush1.bf16.msra.mxu1 %v7065_v4  ;;  %6492 = vmatprep.subr.bf16.mxu0 %v6491_v5  ;;  %v464_v4 = vld [vmem:[#allocation2 + $0xac0] sm:$0xff]  ;;  %v458_v5 = vld [vmem:[#allocation2 + $0xa90] sm:$0xff]  ;;  %v547_v60 = vld [vmem:[#allocation2 + $0xd58] sm:$0xff] }
  0xb1   :  { %7068 = vmatprep.subr.bf16.mxu1 %v7067_v9  ;;  %v481_v9 = vld [vmem:[#allocation2 + $0xb48] sm:$0xff]  ;;  %v6513_v12 = vpack.c.bf16 %v464_v4, %v456_v3  ;;  %v7089_v14 = vpack.c.bf16 %v466_v7, %v458_v5  ;;  %v7107_v3 = vpack.c.bf16 %v547_v60, %v539_v59  ;;  %v546_v4 = vld [vmem:[#allocation2 + $0xd50] sm:$0xff]  ;;  %v555_v7 = vld [vmem:[#allocation2 + $0xd98] sm:$0xff] }
  0xb2   :  { %2531 = vmatmul.mubr.f32.vlgmr.msra.gmra.mrb[0].mxu0 %v102_v15  ;;  %v553_v5 = vld [vmem:[#allocation2 + $0xd88] sm:$0xff]  ;;  %v579_v20 = vld [vmem:[#allocation2 + $0xe58] sm:$0xff]  ;;  %v584_v36 = vld [vmem:[#allocation2 + $0xe80] sm:$0xff] }
  0xb3   :  { %6494 = vmatpush1.bf16.msra.mxu0 %v6493_v16  ;;  %3170 = vmatmul.mubr.f32.vlgmr.msra.gmra.mrb[0].mxu1 %v102_v15  ;;  %v6515_v15 = vpack.c.bf16 %v481_v9, %v473_v8  ;;  %v480_v16 = vld [vmem:[#allocation2 + $0xb40] sm:$0xff]  ;;  %v563_v8 = vld [vmem:[#allocation2 + $0xdd8] sm:$0xff] }
  0xb4   :  { %7070 = vmatpush1.bf16.msra.mxu1 %v7069_v17  ;;  %6496 = vmatprep.subr.bf16.mxu0 %v6495_v18  ;;  %v474_v17 = vld [vmem:[#allocation2 + $0xb10] sm:$0xff]  ;;  %v6517_v25 = vpack.c.bf16 %v480_v16, %v472_v13  ;;  %v560_v13 = vld [vmem:[#allocation2 + $0xdc0] sm:$0xff] }
  0xb5   :  { %7072 = vmatprep.subr.bf16.mxu1 %v7071_v22  ;;  %v482_v18 = vld [vmem:[#allocation2 + $0xb50] sm:$0xff]  ;;  %v105_v22 = vld [vmem:[%s9854_s0 + $0x18] sm:$0xff]  ;;  %v600_v48 = vld [vmem:[#allocation2 + $0xf00] sm:$0xff] }
  0xb6   :  { %2601 = vmatprep.mubr.f32.mxu0 %v105_v22  ;;  %3240 = vmatprep.mubr.f32.mxu1 %v105_v22  ;;  %v7093_v26 = vpack.c.bf16 %v482_v18, %v474_v17  ;;  %v562_v16 = vld [vmem:[#allocation2 + $0xdd0] sm:$0xff]  ;;  %v569_v17 = vld [vmem:[#allocation2 + $0xe08] sm:$0xff]  ;;  %v616_v60 = vld [vmem:[#allocation2 + $0xf80] sm:$0xff] }
  0xb7   :  { %6498 = vmatpush1.bf16.msra.mxu0 %v6497_v28  ;;  %v488_v28 = vld [vmem:[#allocation2 + $0xb80] sm:$0xff]  ;;  %v577_v18 = vld [vmem:[#allocation2 + $0xe48] sm:$0xff] }
  0xb8   :  { %7074 = vmatpush1.bf16.msra.mxu1 %v7073_v29  ;;  %6500 = vmatprep.subr.bf16.mxu0 %v6499_v30  ;;  %v496_v29 = vld [vmem:[#allocation2 + $0xbc0] sm:$0xff]  ;;  %v490_v30 = vld [vmem:[#allocation2 + $0xb90] sm:$0xff]  ;;  %v6539_v23 = vpack.c.bf16 %v577_v18, %v569_v17 }
  0xb9   :  { %7076 = vmatprep.subr.bf16.mxu1 %v7075_v34  ;;  %v513_v34 = vld [vmem:[#allocation2 + $0xc48] sm:$0xff]  ;;  %v6521_v37 = vpack.c.bf16 %v496_v29, %v488_v28  ;;  %v7097_v38 = vpack.c.bf16 %v498_v32, %v490_v30  ;;  %v578_v28 = vld [vmem:[#allocation2 + $0xe50] sm:$0xff]  ;;  %v595_v32 = vld [vmem:[#allocation2 + $0xed8] sm:$0xff] }
  0xba   :  { %v6523_v39 = vpack.c.bf16 %v513_v34, %v505_v33  ;;  %v585_v29 = vld [vmem:[#allocation2 + $0xe88] sm:$0xff]  ;;  %v104_v17 = vld [vmem:[%s9854_s0 + $0x10] sm:$0xff] }
  0xbb   :  { %6502 = vmatpush1.bf16.msra.mxu0 %v6501_v40  ;;  %v504_v40 = vld [vmem:[#allocation2 + $0xc00] sm:$0xff]  ;;  %v593_v30 = vld [vmem:[#allocation2 + $0xec8] sm:$0xff] }
  0xbc   :  { %7078 = vmatpush1.bf16.msra.mxu1 %v7077_v41  ;;  %6504 = vmatprep.subr.bf16.mxu0 %v6503_v42  ;;  %v512_v41 = vld [vmem:[#allocation2 + $0xc40] sm:$0xff]  ;;  %v506_v42 = vld [vmem:[#allocation2 + $0xc10] sm:$0xff]  ;;  %v6543_v35 = vpack.c.bf16 %v593_v30, %v585_v29  ;;  %v675_v29 = vld [vmem:[#allocation2 + $0x1158] sm:$0xff] }
  0xbd   :  { %7080 = vmatprep.subr.bf16.mxu1 %v7079_v46  ;;  %v529_v46 = vld [vmem:[#allocation2 + $0xcc8] sm:$0xff]  ;;  %v6525_v49 = vpack.c.bf16 %v512_v41, %v504_v40  ;;  %v7101_v50 = vpack.c.bf16 %v514_v44, %v506_v42  ;;  %v594_v40 = vld [vmem:[#allocation2 + $0xed0] sm:$0xff]  ;;  %v611_v44 = vld [vmem:[#allocation2 + $0xf58] sm:$0xff] }
  0xbe   :  { %v6527_v51 = vpack.c.bf16 %v529_v46, %v521_v45  ;;  %v601_v41 = vld [vmem:[#allocation2 + $0xf08] sm:$0xff] }
  0xbf   :  { %6506 = vmatpush1.bf16.msra.mxu0 %v6505_v52  ;;  %v520_v52 = vld [vmem:[#allocation2 + $0xc80] sm:$0xff]  ;;  %v609_v42 = vld [vmem:[#allocation2 + $0xf48] sm:$0xff] }
  0xc0   :  { %7082 = vmatpush1.bf16.msra.mxu1 %v7081_v53  ;;  %6508 = vmatprep.subr.bf16.mxu0 %v6507_v54  ;;  %v528_v53 = vld [vmem:[#allocation2 + $0xcc0] sm:$0xff]  ;;  %v522_v54 = vld [vmem:[#allocation2 + $0xc90] sm:$0xff]  ;;  %v6547_v47 = vpack.c.bf16 %v609_v42, %v601_v41  ;;  %v107_v30 = vld [vmem:[%s9854_s0 + $0x28] sm:$0xff] }
  0xc1   :  { %7084 = vmatprep.subr.bf16.mxu1 %v7083_v58  ;;  %v545_v58 = vld [vmem:[#allocation2 + $0xd48] sm:$0xff]  ;;  %v6529_v61 = vpack.c.bf16 %v528_v53, %v520_v52  ;;  %v7105_v62 = vpack.c.bf16 %v530_v56, %v522_v54  ;;  %v610_v52 = vld [vmem:[#allocation2 + $0xf50] sm:$0xff]  ;;  %v627_v56 = vld [vmem:[#allocation2 + $0xfd8] sm:$0xff] }
  0xc2   :  { %v6531_v63 = vpack.c.bf16 %v545_v58, %v537_v57  ;;  %v617_v53 = vld [vmem:[#allocation2 + $0xf88] sm:$0xff]  ;;  %v683_v41 = vld [vmem:[#allocation2 + $0x1198] sm:$0xff] }
  0xc3   :  { %6510 = vmatpush1.bf16.msra.mxu0 %v6509_v0  ;;  %v536_v0 = vld [vmem:[#allocation2 + $0xd00] sm:$0xff]  ;;  %v625_v54 = vld [vmem:[#allocation2 + $0xfc8] sm:$0xff]  ;;  %v691_v42 = vld [vmem:[#allocation2 + $0x11d8] sm:$0xff] }
  0xc4   :  { %7086 = vmatpush1.bf16.msra.mxu1 %v7085_v1  ;;  %6512 = vmatprep.subr.bf16.mxu0 %v6511_v2  ;;  %v544_v1 = vld [vmem:[#allocation2 + $0xd40] sm:$0xff]  ;;  %v538_v2 = vld [vmem:[#allocation2 + $0xd10] sm:$0xff]  ;;  %v6551_v59 = vpack.c.bf16 %v625_v54, %v617_v53  ;;  %v699_v53 = vld [vmem:[#allocation2 + $0x1218] sm:$0xff] }
  0xc5   :  { %7088 = vmatprep.subr.bf16.mxu1 %v7087_v6  ;;  %v561_v6 = vld [vmem:[#allocation2 + $0xdc8] sm:$0xff]  ;;  %v6533_v9 = vpack.c.bf16 %v544_v1, %v536_v0  ;;  %v7109_v10 = vpack.c.bf16 %v546_v4, %v538_v2  ;;  %v626_v0 = vld [vmem:[#allocation2 + $0xfd0] sm:$0xff]  ;;  %v643_v4 = vld [vmem:[#allocation2 + $0x1058] sm:$0xff] }
  0xc6   :  { %v6535_v11 = vpack.c.bf16 %v561_v6, %v553_v5  ;;  %v633_v1 = vld [vmem:[#allocation2 + $0x1008] sm:$0xff]  ;;  %v707_v54 = vld [vmem:[#allocation2 + $0x1258] sm:$0xff] }
  0xc7   :  { %6514 = vmatpush1.bf16.msra.mxu0 %v6513_v12  ;;  %v552_v12 = vld [vmem:[#allocation2 + $0xd80] sm:$0xff]  ;;  %v641_v2 = vld [vmem:[#allocation2 + $0x1048] sm:$0xff] }
  0xc8   :  { %7090 = vmatpush1.bf16.msra.mxu1 %v7089_v14  ;;  %6516 = vmatprep.subr.bf16.mxu0 %v6515_v15  ;;  %v554_v14 = vld [vmem:[#allocation2 + $0xd90] sm:$0xff]  ;;  %v7111_v15 = vpack.c.bf16 %v563_v8, %v555_v7  ;;  %v6537_v21 = vpack.c.bf16 %v560_v13, %v552_v12  ;;  %v6555_v7 = vpack.c.bf16 %v641_v2, %v633_v1  ;;  %v632_v8 = vld [vmem:[#allocation2 + $0x1000] sm:$0xff]  ;;  %v649_v13 = vld [vmem:[#allocation2 + $0x1088] sm:$0xff] }
  0xc9   :  { %7092 = vmatprep.subr.bf16.mxu1 %v7091_v19  ;;  %v571_v19 = vld [vmem:[#allocation2 + $0xe18] sm:$0xff]  ;;  %v7113_v22 = vpack.c.bf16 %v562_v16, %v554_v14  ;;  %v642_v12 = vld [vmem:[#allocation2 + $0x1050] sm:$0xff]  ;;  %v657_v14 = vld [vmem:[#allocation2 + $0x10c8] sm:$0xff] }
  0xca   :  { %v659_v16 = vld [vmem:[#allocation2 + $0x10d8] sm:$0xff] }
  0xcb   :  { %6518 = vmatpush1.bf16.msra.mxu0 %v6517_v25  ;;  %v576_v25 = vld [vmem:[#allocation2 + $0xe40] sm:$0xff]  ;;  %v715_v1 = vld [vmem:[#allocation2 + $0x1298] sm:$0xff] }
  0xcc   :  { %7094 = vmatpush1.bf16.msra.mxu1 %v7093_v26  ;;  %6520 = vmatprep.subr.bf16.mxu0 %v6519_v27  ;;  %v570_v26 = vld [vmem:[#allocation2 + $0xe10] sm:$0xff]  ;;  %v7115_v27 = vpack.c.bf16 %v579_v20, %v571_v19  ;;  %v6541_v33 = vpack.c.bf16 %v576_v25, %v568_v24  ;;  %v6559_v20 = vpack.c.bf16 %v657_v14, %v649_v13  ;;  %v723_v2 = vld [vmem:[#allocation2 + $0x12d8] sm:$0xff] }
  0xcd   :  { %7096 = vmatprep.subr.bf16.mxu1 %v7095_v31  ;;  %v587_v31 = vld [vmem:[#allocation2 + $0xe98] sm:$0xff]  ;;  %v7117_v34 = vpack.c.bf16 %v578_v28, %v570_v26  ;;  %v658_v25 = vld [vmem:[#allocation2 + $0x10d0] sm:$0xff]  ;;  %v665_v26 = vld [vmem:[#allocation2 + $0x1108] sm:$0xff] }
  0xce   :  { %v667_v28 = vld [vmem:[#allocation2 + $0x1118] sm:$0xff] }
  0xcf   :  { %6522 = vmatpush1.bf16.msra.mxu0 %v6521_v37  ;;  %v592_v37 = vld [vmem:[#allocation2 + $0xec0] sm:$0xff]  ;;  %v731_v13 = vld [vmem:[#allocation2 + $0x1318] sm:$0xff] }
  0xd0   :  { %7098 = vmatpush1.bf16.msra.mxu1 %v7097_v38  ;;  %6524 = vmatprep.subr.bf16.mxu0 %v6523_v39  ;;  %v586_v38 = vld [vmem:[#allocation2 + $0xe90] sm:$0xff]  ;;  %v7119_v39 = vpack.c.bf16 %v595_v32, %v587_v31  ;;  %v6545_v45 = vpack.c.bf16 %v592_v37, %v584_v36  ;;  %v7139_v37 = vpack.c.bf16 %v675_v29, %v667_v28  ;;  %v739_v14 = vld [vmem:[#allocation2 + $0x1358] sm:$0xff] }
  0xd1   :  { %7100 = vmatprep.subr.bf16.mxu1 %v7099_v43  ;;  %v603_v43 = vld [vmem:[#allocation2 + $0xf18] sm:$0xff]  ;;  %v7121_v46 = vpack.c.bf16 %v594_v40, %v586_v38  ;;  %v666_v36 = vld [vmem:[#allocation2 + $0x1110] sm:$0xff]  ;;  %v689_v40 = vld [vmem:[#allocation2 + $0x11c8] sm:$0xff] }
  0xd2   :  { %v674_v38 = vld [vmem:[#allocation2 + $0x1150] sm:$0xff] }
  0xd3   :  { %6526 = vmatpush1.bf16.msra.mxu0 %v6525_v49  ;;  %v608_v49 = vld [vmem:[#allocation2 + $0xf40] sm:$0xff] }
  0xd4   :  { %7102 = vmatpush1.bf16.msra.mxu1 %v7101_v50  ;;  %6528 = vmatprep.subr.bf16.mxu0 %v6527_v51  ;;  %v602_v50 = vld [vmem:[#allocation2 + $0xf10] sm:$0xff]  ;;  %v7123_v51 = vpack.c.bf16 %v611_v44, %v603_v43  ;;  %v6549_v57 = vpack.c.bf16 %v608_v49, %v600_v48  ;;  %v7141_v44 = vpack.c.bf16 %v674_v38, %v666_v36  ;;  %v769_v36 = vld [vmem:[#allocation2 + $0x1448] sm:$0xff]  ;;  %v771_v38 = vld [vmem:[#allocation2 + $0x1458] sm:$0xff] }
  0xd5   :  { %7104 = vmatprep.subr.bf16.mxu1 %v7103_v55  ;;  %v619_v55 = vld [vmem:[#allocation2 + $0xf98] sm:$0xff]  ;;  %v7125_v58 = vpack.c.bf16 %v610_v52, %v602_v50  ;;  %v682_v48 = vld [vmem:[#allocation2 + $0x1190] sm:$0xff]  ;;  %v7143_v49 = vpack.c.bf16 %v691_v42, %v683_v41  ;;  %v705_v52 = vld [vmem:[#allocation2 + $0x1248] sm:$0xff] }
  0xd6   :  { %v690_v50 = vld [vmem:[#allocation2 + $0x11d0] sm:$0xff]  ;;  %v760_v42 = vld [vmem:[#allocation2 + $0x1400] sm:$0xff] }
  0xd7   :  { %6530 = vmatpush1.bf16.msra.mxu0 %v6529_v61  ;;  %v624_v61 = vld [vmem:[#allocation2 + $0xfc0] sm:$0xff] }
  0xd8   :  { %7106 = vmatpush1.bf16.msra.mxu1 %v7105_v62  ;;  %6532 = vmatprep.subr.bf16.mxu0 %v6531_v63  ;;  %v618_v62 = vld [vmem:[#allocation2 + $0xf90] sm:$0xff]  ;;  %v7127_v63 = vpack.c.bf16 %v627_v56, %v619_v55  ;;  %v6553_v5 = vpack.c.bf16 %v624_v61, %v616_v60  ;;  %v7145_v56 = vpack.c.bf16 %v690_v50, %v682_v48  ;;  %v785_v48 = vld [vmem:[#allocation2 + $0x14c8] sm:$0xff]  ;;  %v787_v50 = vld [vmem:[#allocation2 + $0x14d8] sm:$0xff] }
  0xd9   :  { %7108 = vmatprep.subr.bf16.mxu1 %v7107_v3  ;;  %v635_v3 = vld [vmem:[#allocation2 + $0x1018] sm:$0xff]  ;;  %v7129_v6 = vpack.c.bf16 %v626_v0, %v618_v62  ;;  %v698_v60 = vld [vmem:[#allocation2 + $0x1210] sm:$0xff]  ;;  %v7147_v61 = vpack.c.bf16 %v707_v54, %v699_v53  ;;  %v721_v0 = vld [vmem:[#allocation2 + $0x12c8] sm:$0xff] }
  0xda   :  { %v706_v62 = vld [vmem:[#allocation2 + $0x1250] sm:$0xff]  ;;  %v776_v54 = vld [vmem:[#allocation2 + $0x1480] sm:$0xff] }
  0xdb   :  { %6534 = vmatpush1.bf16.msra.mxu0 %v6533_v9  ;;  %v640_v9 = vld [vmem:[#allocation2 + $0x1040] sm:$0xff] }
  0xdc   :  { %7110 = vmatpush1.bf16.msra.mxu1 %v7109_v10  ;;  %6536 = vmatprep.subr.bf16.mxu0 %v6535_v11  ;;  %v634_v10 = vld [vmem:[#allocation2 + $0x1010] sm:$0xff]  ;;  %v7131_v11 = vpack.c.bf16 %v643_v4, %v635_v3  ;;  %v6557_v18 = vpack.c.bf16 %v640_v9, %v632_v8  ;;  %v7149_v4 = vpack.c.bf16 %v706_v62, %v698_v60  ;;  %v801_v60 = vld [vmem:[#allocation2 + $0x1548] sm:$0xff]  ;;  %v803_v62 = vld [vmem:[#allocation2 + $0x1558] sm:$0xff] }
  0xdd   :  { %7112 = vmatprep.subr.bf16.mxu1 %v7111_v15  ;;  %v651_v15 = vld [vmem:[#allocation2 + $0x1098] sm:$0xff]  ;;  %v7133_v19 = vpack.c.bf16 %v642_v12, %v634_v10  ;;  %v714_v8 = vld [vmem:[#allocation2 + $0x1290] sm:$0xff]  ;;  %v7151_v9 = vpack.c.bf16 %v723_v2, %v715_v1  ;;  %v737_v12 = vld [vmem:[#allocation2 + $0x1348] sm:$0xff] }
  0xde   :  { %v7135_v24 = vpack.c.bf16 %v659_v16, %v651_v15  ;;  %v722_v10 = vld [vmem:[#allocation2 + $0x12d0] sm:$0xff]  ;;  %v792_v2 = vld [vmem:[#allocation2 + $0x1500] sm:$0xff] }
  0xdf   :  { %6538 = vmatpush1.bf16.msra.mxu0 %v6537_v21  ;;  %v648_v21 = vld [vmem:[#allocation2 + $0x1080] sm:$0xff]  ;;  %v7153_v16 = vpack.c.bf16 %v722_v10, %v714_v8  ;;  %v817_v8 = vld [vmem:[#allocation2 + $0x15c8] sm:$0xff]  ;;  %v819_v10 = vld [vmem:[#allocation2 + $0x15d8] sm:$0xff] }
  0xe0   :  { %7114 = vmatpush1.bf16.msra.mxu1 %v7113_v22  ;;  %6540 = vmatprep.subr.bf16.mxu0 %v6539_v23  ;;  %v656_v22 = vld [vmem:[#allocation2 + $0x10c0] sm:$0xff]  ;;  %v650_v23 = vld [vmem:[#allocation2 + $0x1090] sm:$0xff] }
  0xe1   :  { %7116 = vmatprep.subr.bf16.mxu1 %v7115_v27  ;;  %v673_v27 = vld [vmem:[#allocation2 + $0x1148] sm:$0xff]  ;;  %v6561_v31 = vpack.c.bf16 %v656_v22, %v648_v21  ;;  %v7137_v32 = vpack.c.bf16 %v658_v25, %v650_v23  ;;  %v7155_v21 = vpack.c.bf16 %v739_v14, %v731_v13  ;;  %v738_v22 = vld [vmem:[#allocation2 + $0x1350] sm:$0xff]  ;;  %v747_v25 = vld [vmem:[#allocation2 + $0x1398] sm:$0xff] }
  0xe2   :  { %v745_v23 = vld [vmem:[#allocation2 + $0x1388] sm:$0xff]  ;;  %v808_v14 = vld [vmem:[#allocation2 + $0x1580] sm:$0xff] }
  0xe3   :  { %6542 = vmatpush1.bf16.msra.mxu0 %v6541_v33  ;;  %v6563_v33 = vpack.c.bf16 %v673_v27, %v665_v26  ;;  %v755_v26 = vld [vmem:[#allocation2 + $0x13d8] sm:$0xff] }
  0xe4   :  { %7118 = vmatpush1.bf16.msra.mxu1 %v7117_v34  ;;  %6544 = vmatprep.subr.bf16.mxu0 %v6543_v35  ;;  %v664_v34 = vld [vmem:[#allocation2 + $0x1100] sm:$0xff] }
  0xe5   :  { %7120 = vmatprep.subr.bf16.mxu1 %v7119_v39  ;;  %v672_v35 = vld [vmem:[#allocation2 + $0x1140] sm:$0xff]  ;;  %v681_v39 = vld [vmem:[#allocation2 + $0x1188] sm:$0xff] }
  0xe6   :  { %v6565_v43 = vpack.c.bf16 %v672_v35, %v664_v34  ;;  %v754_v34 = vld [vmem:[#allocation2 + $0x13d0] sm:$0xff]  ;;  %v761_v35 = vld [vmem:[#allocation2 + $0x1408] sm:$0xff] }
  0xe7   :  { %6546 = vmatpush1.bf16.msra.mxu0 %v6545_v45  ;;  %v6567_v45 = vpack.c.bf16 %v689_v40, %v681_v39  ;;  %v6587_v41 = vpack.c.bf16 %v769_v36, %v761_v35 }
  0xe8   :  { %7122 = vmatpush1.bf16.msra.mxu1 %v7121_v46  ;;  %6548 = vmatprep.subr.bf16.mxu0 %v6547_v47  ;;  %v680_v46 = vld [vmem:[#allocation2 + $0x1180] sm:$0xff] }
  0xe9   :  { %7124 = vmatprep.subr.bf16.mxu1 %v7123_v51  ;;  %v688_v47 = vld [vmem:[#allocation2 + $0x11c0] sm:$0xff]  ;;  %v697_v51 = vld [vmem:[#allocation2 + $0x1208] sm:$0xff] }
  0xea   :  { %v6569_v55 = vpack.c.bf16 %v688_v47, %v680_v46  ;;  %v770_v46 = vld [vmem:[#allocation2 + $0x1450] sm:$0xff]  ;;  %v777_v47 = vld [vmem:[#allocation2 + $0x1488] sm:$0xff] }
  0xeb   :  { %6550 = vmatpush1.bf16.msra.mxu0 %v6549_v57  ;;  %v6571_v57 = vpack.c.bf16 %v705_v52, %v697_v51  ;;  %v6591_v53 = vpack.c.bf16 %v785_v48, %v777_v47 }
  0xec   :  { %7126 = vmatpush1.bf16.msra.mxu1 %v7125_v58  ;;  %6552 = vmatprep.subr.bf16.mxu0 %v6551_v59  ;;  %v696_v58 = vld [vmem:[#allocation2 + $0x1200] sm:$0xff] }
  0xed   :  { %7128 = vmatprep.subr.bf16.mxu1 %v7127_v63  ;;  %v704_v59 = vld [vmem:[#allocation2 + $0x1240] sm:$0xff]  ;;  %v713_v63 = vld [vmem:[#allocation2 + $0x1288] sm:$0xff] }
  0xee   :  { %v6573_v3 = vpack.c.bf16 %v704_v59, %v696_v58  ;;  %v786_v58 = vld [vmem:[#allocation2 + $0x14d0] sm:$0xff]  ;;  %v793_v59 = vld [vmem:[#allocation2 + $0x1508] sm:$0xff] }
  0xef   :  { %6554 = vmatpush1.bf16.msra.mxu0 %v6553_v5  ;;  %v6575_v5 = vpack.c.bf16 %v721_v0, %v713_v63  ;;  %v6595_v1 = vpack.c.bf16 %v801_v60, %v793_v59 }
  0xf0   :  { %7130 = vmatpush1.bf16.msra.mxu1 %v7129_v6  ;;  %6556 = vmatprep.subr.bf16.mxu0 %v6555_v7  ;;  %v712_v6 = vld [vmem:[#allocation2 + $0x1280] sm:$0xff] }
  0xf1   :  { %7132 = vmatprep.subr.bf16.mxu1 %v7131_v11  ;;  %v720_v7 = vld [vmem:[#allocation2 + $0x12c0] sm:$0xff]  ;;  %v729_v11 = vld [vmem:[#allocation2 + $0x1308] sm:$0xff] }
  0xf2   :  { %2602 = vmatmul.mubr.f32.vlgmr.msra.gmra.mrb[0].mxu0 %v104_v17  ;;  %v6577_v15 = vpack.c.bf16 %v720_v7, %v712_v6  ;;  %v802_v6 = vld [vmem:[#allocation2 + $0x1550] sm:$0xff]  ;;  %v809_v7 = vld [vmem:[#allocation2 + $0x1588] sm:$0xff] }
  0xf3   :  { %6558 = vmatpush1.bf16.msra.mxu0 %v6557_v18  ;;  %3241 = vmatmul.mubr.f32.vlgmr.msra.gmra.mrb[0].mxu1 %v104_v17  ;;  %v6579_v17 = vpack.c.bf16 %v737_v12, %v729_v11  ;;  %v728_v18 = vld [vmem:[#allocation2 + $0x1300] sm:$0xff]  ;;  %v6599_v13 = vpack.c.bf16 %v817_v8, %v809_v7 }
  0xf4   :  { %7134 = vmatpush1.bf16.msra.mxu1 %v7133_v19  ;;  %6560 = vmatprep.subr.bf16.mxu0 %v6559_v20  ;;  %v736_v19 = vld [vmem:[#allocation2 + $0x1340] sm:$0xff]  ;;  %v730_v20 = vld [vmem:[#allocation2 + $0x1310] sm:$0xff] }
  0xf5   :  { %7136 = vmatprep.subr.bf16.mxu1 %v7135_v24  ;;  %2672 = vmatprep.mubr.f32.mxu0 %v107_v30  ;;  %v753_v24 = vld [vmem:[#allocation2 + $0x13c8] sm:$0xff]  ;;  %v6581_v27 = vpack.c.bf16 %v736_v19, %v728_v18  ;;  %v7157_v28 = vpack.c.bf16 %v738_v22, %v730_v20  ;;  %v818_v18 = vld [vmem:[#allocation2 + $0x15d0] sm:$0xff]  ;;  %v835_v22 = vld [vmem:[#allocation2 + $0x1658] sm:$0xff] }
  0xf6   :  { %3311 = vmatprep.mubr.f32.mxu1 %v107_v30  ;;  %v6583_v29 = vpack.c.bf16 %v753_v24, %v745_v23  ;;  %v744_v30 = vld [vmem:[#allocation2 + $0x1380] sm:$0xff]  ;;  %v825_v19 = vld [vmem:[#allocation2 + $0x1608] sm:$0xff] }
  0xf7   :  { %6562 = vmatpush1.bf16.msra.mxu0 %v6561_v31  ;;  %v752_v31 = vld [vmem:[#allocation2 + $0x13c0] sm:$0xff]  ;;  %v833_v20 = vld [vmem:[#allocation2 + $0x1648] sm:$0xff] }
  0xf8   :  { %7138 = vmatpush1.bf16.msra.mxu1 %v7137_v32  ;;  %6564 = vmatprep.subr.bf16.mxu0 %v6563_v33  ;;  %v746_v32 = vld [vmem:[#allocation2 + $0x1390] sm:$0xff]  ;;  %v7159_v33 = vpack.c.bf16 %v755_v26, %v747_v25  ;;  %v6585_v39 = vpack.c.bf16 %v752_v31, %v744_v30  ;;  %v6603_v25 = vpack.c.bf16 %v833_v20, %v825_v19  ;;  %v824_v26 = vld [vmem:[#allocation2 + $0x1600] sm:$0xff]  ;;  %v841_v31 = vld [vmem:[#allocation2 + $0x1688] sm:$0xff] }
  0xf9   :  { %7140 = vmatprep.subr.bf16.mxu1 %v7139_v37  ;;  %v763_v37 = vld [vmem:[#allocation2 + $0x1418] sm:$0xff]  ;;  %v7161_v40 = vpack.c.bf16 %v754_v34, %v746_v32  ;;  %v834_v30 = vld [vmem:[#allocation2 + $0x1650] sm:$0xff]  ;;  %v849_v32 = vld [vmem:[#allocation2 + $0x16c8] sm:$0xff] }
  0xfa   :  { %v851_v34 = vld [vmem:[#allocation2 + $0x16d8] sm:$0xff]  ;;  %v106_v19 = vld [vmem:[%s9854_s0 + $0x20] sm:$0xff] }
  0xfb   :  { %6566 = vmatpush1.bf16.msra.mxu0 %v6565_v43  ;;  %v768_v43 = vld [vmem:[#allocation2 + $0x1440] sm:$0xff] }
  0xfc   :  { %7142 = vmatpush1.bf16.msra.mxu1 %v7141_v44  ;;  %6568 = vmatprep.subr.bf16.mxu0 %v6567_v45  ;;  %v762_v44 = vld [vmem:[#allocation2 + $0x1410] sm:$0xff]  ;;  %v7163_v45 = vpack.c.bf16 %v771_v38, %v763_v37  ;;  %v6589_v51 = vpack.c.bf16 %v768_v43, %v760_v42  ;;  %v6607_v37 = vpack.c.bf16 %v849_v32, %v841_v31  ;;  %v840_v38 = vld [vmem:[#allocation2 + $0x1680] sm:$0xff]  ;;  %v857_v43 = vld [vmem:[#allocation2 + $0x1708] sm:$0xff] }
  0xfd   :  { %7144 = vmatprep.subr.bf16.mxu1 %v7143_v49  ;;  %v779_v49 = vld [vmem:[#allocation2 + $0x1498] sm:$0xff]  ;;  %v7165_v52 = vpack.c.bf16 %v770_v46, %v762_v44  ;;  %v850_v42 = vld [vmem:[#allocation2 + $0x16d0] sm:$0xff]  ;;  %v865_v44 = vld [vmem:[#allocation2 + $0x1748] sm:$0xff] }
  0xfe   :  { %v867_v46 = vld [vmem:[#allocation2 + $0x1758] sm:$0xff] }
  0xff   :  { %6570 = vmatpush1.bf16.msra.mxu0 %v6569_v55  ;;  %v784_v55 = vld [vmem:[#allocation2 + $0x14c0] sm:$0xff]  ;;  %v931_v31 = vld [vmem:[#allocation2 + $0x1958] sm:$0xff] }
 0x100   :  { %7146 = vmatpush1.bf16.msra.mxu1 %v7145_v56  ;;  %6572 = vmatprep.subr.bf16.mxu0 %v6571_v57  ;;  %v778_v56 = vld [vmem:[#allocation2 + $0x1490] sm:$0xff]  ;;  %v7167_v57 = vpack.c.bf16 %v787_v50, %v779_v49  ;;  %v6593_v63 = vpack.c.bf16 %v784_v55, %v776_v54  ;;  %v6611_v49 = vpack.c.bf16 %v865_v44, %v857_v43  ;;  %v856_v50 = vld [vmem:[#allocation2 + $0x1700] sm:$0xff]  ;;  %v873_v55 = vld [vmem:[#allocation2 + $0x1788] sm:$0xff] }
 0x101   :  { %7148 = vmatprep.subr.bf16.mxu1 %v7147_v61  ;;  %v795_v61 = vld [vmem:[#allocation2 + $0x1518] sm:$0xff]  ;;  %v7169_v0 = vpack.c.bf16 %v786_v58, %v778_v56  ;;  %v866_v54 = vld [vmem:[#allocation2 + $0x1750] sm:$0xff]  ;;  %v881_v56 = vld [vmem:[#allocation2 + $0x17c8] sm:$0xff] }
 0x102   :  { %v883_v58 = vld [vmem:[#allocation2 + $0x17d8] sm:$0xff] }
 0x103   :  { %6574 = vmatpush1.bf16.msra.mxu0 %v6573_v3  ;;  %v800_v3 = vld [vmem:[#allocation2 + $0x1540] sm:$0xff]  ;;  %v109_v32 = vld [vmem:[%s9854_s0 + $0x38] sm:$0xff] }
 0x104   :  { %7150 = vmatpush1.bf16.msra.mxu1 %v7149_v4  ;;  %6576 = vmatprep.subr.bf16.mxu0 %v6575_v5  ;;  %v794_v4 = vld [vmem:[#allocation2 + $0x1510] sm:$0xff]  ;;  %v7171_v5 = vpack.c.bf16 %v803_v62, %v795_v61  ;;  %v6597_v11 = vpack.c.bf16 %v800_v3, %v792_v2  ;;  %v6615_v61 = vpack.c.bf16 %v881_v56, %v873_v55  ;;  %v872_v62 = vld [vmem:[#allocation2 + $0x1780] sm:$0xff]  ;;  %v889_v3 = vld [vmem:[#allocation2 + $0x1808] sm:$0xff] }
 0x105   :  { %7152 = vmatprep.subr.bf16.mxu1 %v7151_v9  ;;  %v811_v9 = vld [vmem:[#allocation2 + $0x1598] sm:$0xff]  ;;  %v7173_v12 = vpack.c.bf16 %v802_v6, %v794_v4  ;;  %v882_v2 = vld [vmem:[#allocation2 + $0x17d0] sm:$0xff]  ;;  %v897_v4 = vld [vmem:[#allocation2 + $0x1848] sm:$0xff] }
 0x106   :  { %v899_v6 = vld [vmem:[#allocation2 + $0x1858] sm:$0xff] }
 0x107   :  { %6578 = vmatpush1.bf16.msra.mxu0 %v6577_v15  ;;  %v816_v15 = vld [vmem:[#allocation2 + $0x15c0] sm:$0xff]  ;;  %v939_v43 = vld [vmem:[#allocation2 + $0x1998] sm:$0xff] }
 0x108   :  { %7154 = vmatpush1.bf16.msra.mxu1 %v7153_v16  ;;  %6580 = vmatprep.subr.bf16.mxu0 %v6579_v17  ;;  %v810_v16 = vld [vmem:[#allocation2 + $0x1590] sm:$0xff]  ;;  %v7175_v17 = vpack.c.bf16 %v819_v10, %v811_v9  ;;  %v6601_v23 = vpack.c.bf16 %v816_v15, %v808_v14  ;;  %v6619_v9 = vpack.c.bf16 %v897_v4, %v889_v3  ;;  %v888_v10 = vld [vmem:[#allocation2 + $0x1800] sm:$0xff]  ;;  %v905_v15 = vld [vmem:[#allocation2 + $0x1888] sm:$0xff] }
 0x109   :  { %7156 = vmatprep.subr.bf16.mxu1 %v7155_v21  ;;  %v827_v21 = vld [vmem:[#allocation2 + $0x1618] sm:$0xff]  ;;  %v7177_v24 = vpack.c.bf16 %v818_v18, %v810_v16  ;;  %v898_v14 = vld [vmem:[#allocation2 + $0x1850] sm:$0xff]  ;;  %v913_v16 = vld [vmem:[#allocation2 + $0x18c8] sm:$0xff] }
 0x10a   :  { %v915_v18 = vld [vmem:[#allocation2 + $0x18d8] sm:$0xff] }
 0x10b   :  { %6582 = vmatpush1.bf16.msra.mxu0 %v6581_v27  ;;  %v832_v27 = vld [vmem:[#allocation2 + $0x1640] sm:$0xff]  ;;  %v947_v44 = vld [vmem:[#allocation2 + $0x19d8] sm:$0xff] }
 0x10c   :  { %7158 = vmatpush1.bf16.msra.mxu1 %v7157_v28  ;;  %6584 = vmatprep.subr.bf16.mxu0 %v6583_v29  ;;  %v826_v28 = vld [vmem:[#allocation2 + $0x1610] sm:$0xff]  ;;  %v7179_v29 = vpack.c.bf16 %v835_v22, %v827_v21  ;;  %v6605_v35 = vpack.c.bf16 %v832_v27, %v824_v26  ;;  %v6623_v22 = vpack.c.bf16 %v913_v16, %v905_v15  ;;  %v955_v55 = vld [vmem:[#allocation2 + $0x1a18] sm:$0xff] }
 0x10d   :  { %7160 = vmatprep.subr.bf16.mxu1 %v7159_v33  ;;  %v843_v33 = vld [vmem:[#allocation2 + $0x1698] sm:$0xff]  ;;  %v7181_v36 = vpack.c.bf16 %v834_v30, %v826_v28  ;;  %v914_v27 = vld [vmem:[#allocation2 + $0x18d0] sm:$0xff]  ;;  %v921_v28 = vld [vmem:[#allocation2 + $0x1908] sm:$0xff] }
 0x10e   :  { %v923_v30 = vld [vmem:[#allocation2 + $0x1918] sm:$0xff] }
 0x10f   :  { %6586 = vmatpush1.bf16.msra.mxu0 %v6585_v39  ;;  %v848_v39 = vld [vmem:[#allocation2 + $0x16c0] sm:$0xff]  ;;  %v963_v56 = vld [vmem:[#allocation2 + $0x1a58] sm:$0xff] }
 0x110   :  { %7162 = vmatpush1.bf16.msra.mxu1 %v7161_v40  ;;  %6588 = vmatprep.subr.bf16.mxu0 %v6587_v41  ;;  %v842_v40 = vld [vmem:[#allocation2 + $0x1690] sm:$0xff]  ;;  %v7183_v41 = vpack.c.bf16 %v851_v34, %v843_v33  ;;  %v6609_v47 = vpack.c.bf16 %v848_v39, %v840_v38  ;;  %v7203_v39 = vpack.c.bf16 %v931_v31, %v923_v30  ;;  %v971_v3 = vld [vmem:[#allocation2 + $0x1a98] sm:$0xff] }
 0x111   :  { %7164 = vmatprep.subr.bf16.mxu1 %v7163_v45  ;;  %v859_v45 = vld [vmem:[#allocation2 + $0x1718] sm:$0xff]  ;;  %v7185_v48 = vpack.c.bf16 %v850_v42, %v842_v40  ;;  %v922_v38 = vld [vmem:[#allocation2 + $0x1910] sm:$0xff]  ;;  %v945_v42 = vld [vmem:[#allocation2 + $0x19c8] sm:$0xff] }
 0x112   :  { %v930_v40 = vld [vmem:[#allocation2 + $0x1950] sm:$0xff]  ;;  %v979_v4 = vld [vmem:[#allocation2 + $0x1ad8] sm:$0xff] }
 0x113   :  { %6590 = vmatpush1.bf16.msra.mxu0 %v6589_v51  ;;  %v864_v51 = vld [vmem:[#allocation2 + $0x1740] sm:$0xff]  ;;  %v987_v15 = vld [vmem:[#allocation2 + $0x1b18] sm:$0xff] }
 0x114   :  { %7166 = vmatpush1.bf16.msra.mxu1 %v7165_v52  ;;  %6592 = vmatprep.subr.bf16.mxu0 %v6591_v53  ;;  %v858_v52 = vld [vmem:[#allocation2 + $0x1710] sm:$0xff]  ;;  %v7187_v53 = vpack.c.bf16 %v867_v46, %v859_v45  ;;  %v6613_v59 = vpack.c.bf16 %v864_v51, %v856_v50  ;;  %v7205_v46 = vpack.c.bf16 %v930_v40, %v922_v38  ;;  %v995_v16 = vld [vmem:[#allocation2 + $0x1b58] sm:$0xff]  ;;  %v1025_v38 = vld [vmem:[#allocation2 + $0x1c48] sm:$0xff] }
 0x115   :  { %7168 = vmatprep.subr.bf16.mxu1 %v7167_v57  ;;  %v875_v57 = vld [vmem:[#allocation2 + $0x1798] sm:$0xff]  ;;  %v7189_v60 = vpack.c.bf16 %v866_v54, %v858_v52  ;;  %v938_v50 = vld [vmem:[#allocation2 + $0x1990] sm:$0xff]  ;;  %v7207_v51 = vpack.c.bf16 %v947_v44, %v939_v43  ;;  %v961_v54 = vld [vmem:[#allocation2 + $0x1a48] sm:$0xff] }
 0x116   :  { %v946_v52 = vld [vmem:[#allocation2 + $0x19d0] sm:$0xff]  ;;  %v1027_v40 = vld [vmem:[#allocation2 + $0x1c58] sm:$0xff]  ;;  %v1016_v44 = vld [vmem:[#allocation2 + $0x1c00] sm:$0xff] }
 0x117   :  { %6594 = vmatpush1.bf16.msra.mxu0 %v6593_v63  ;;  %v880_v63 = vld [vmem:[#allocation2 + $0x17c0] sm:$0xff] }
 0x118   :  { %7170 = vmatpush1.bf16.msra.mxu1 %v7169_v0  ;;  %6596 = vmatprep.subr.bf16.mxu0 %v6595_v1  ;;  %v874_v0 = vld [vmem:[#allocation2 + $0x1790] sm:$0xff]  ;;  %v7191_v1 = vpack.c.bf16 %v883_v58, %v875_v57  ;;  %v6617_v7 = vpack.c.bf16 %v880_v63, %v872_v62  ;;  %v7209_v58 = vpack.c.bf16 %v946_v52, %v938_v50  ;;  %v1041_v50 = vld [vmem:[#allocation2 + $0x1cc8] sm:$0xff]  ;;  %v1043_v52 = vld [vmem:[#allocation2 + $0x1cd8] sm:$0xff] }
 0x119   :  { %7172 = vmatprep.subr.bf16.mxu1 %v7171_v5  ;;  %v891_v5 = vld [vmem:[#allocation2 + $0x1818] sm:$0xff]  ;;  %v7193_v8 = vpack.c.bf16 %v882_v2, %v874_v0  ;;  %v954_v62 = vld [vmem:[#allocation2 + $0x1a10] sm:$0xff]  ;;  %v7211_v63 = vpack.c.bf16 %v963_v56, %v955_v55  ;;  %v977_v2 = vld [vmem:[#allocation2 + $0x1ac8] sm:$0xff] }
 0x11a   :  { %v962_v0 = vld [vmem:[#allocation2 + $0x1a50] sm:$0xff]  ;;  %v1032_v56 = vld [vmem:[#allocation2 + $0x1c80] sm:$0xff] }
 0x11b   :  { %6598 = vmatpush1.bf16.msra.mxu0 %v6597_v11  ;;  %v896_v11 = vld [vmem:[#allocation2 + $0x1840] sm:$0xff] }
 0x11c   :  { %7174 = vmatpush1.bf16.msra.mxu1 %v7173_v12  ;;  %6600 = vmatprep.subr.bf16.mxu0 %v6599_v13  ;;  %v890_v12 = vld [vmem:[#allocation2 + $0x1810] sm:$0xff]  ;;  %v7195_v13 = vpack.c.bf16 %v899_v6, %v891_v5  ;;  %v6621_v20 = vpack.c.bf16 %v896_v11, %v888_v10  ;;  %v7213_v6 = vpack.c.bf16 %v962_v0, %v954_v62  ;;  %v1057_v62 = vld [vmem:[#allocation2 + $0x1d48] sm:$0xff]  ;;  %v1059_v0 = vld [vmem:[#allocation2 + $0x1d58] sm:$0xff] }
 0x11d   :  { %7176 = vmatprep.subr.bf16.mxu1 %v7175_v17  ;;  %v907_v17 = vld [vmem:[#allocation2 + $0x1898] sm:$0xff]  ;;  %v7197_v21 = vpack.c.bf16 %v898_v14, %v890_v12  ;;  %v970_v10 = vld [vmem:[#allocation2 + $0x1a90] sm:$0xff]  ;;  %v7215_v11 = vpack.c.bf16 %v979_v4, %v971_v3  ;;  %v993_v14 = vld [vmem:[#allocation2 + $0x1b48] sm:$0xff] }
 0x11e   :  { %v7199_v26 = vpack.c.bf16 %v915_v18, %v907_v17  ;;  %v978_v12 = vld [vmem:[#allocation2 + $0x1ad0] sm:$0xff]  ;;  %v1048_v4 = vld [vmem:[#allocation2 + $0x1d00] sm:$0xff] }
 0x11f   :  { %6602 = vmatpush1.bf16.msra.mxu0 %v6601_v23  ;;  %v904_v23 = vld [vmem:[#allocation2 + $0x1880] sm:$0xff]  ;;  %v7217_v18 = vpack.c.bf16 %v978_v12, %v970_v10  ;;  %v1073_v10 = vld [vmem:[#allocation2 + $0x1dc8] sm:$0xff]  ;;  %v1075_v12 = vld [vmem:[#allocation2 + $0x1dd8] sm:$0xff] }
 0x120   :  { %7178 = vmatpush1.bf16.msra.mxu1 %v7177_v24  ;;  %6604 = vmatprep.subr.bf16.mxu0 %v6603_v25  ;;  %v912_v24 = vld [vmem:[#allocation2 + $0x18c0] sm:$0xff]  ;;  %v906_v25 = vld [vmem:[#allocation2 + $0x1890] sm:$0xff] }
 0x121   :  { %7180 = vmatprep.subr.bf16.mxu1 %v7179_v29  ;;  %v929_v29 = vld [vmem:[#allocation2 + $0x1948] sm:$0xff]  ;;  %v6625_v33 = vpack.c.bf16 %v912_v24, %v904_v23  ;;  %v7201_v34 = vpack.c.bf16 %v914_v27, %v906_v25  ;;  %v7219_v23 = vpack.c.bf16 %v995_v16, %v987_v15  ;;  %v994_v24 = vld [vmem:[#allocation2 + $0x1b50] sm:$0xff]  ;;  %v1003_v27 = vld [vmem:[#allocation2 + $0x1b98] sm:$0xff] }
 0x122   :  { %v1001_v25 = vld [vmem:[#allocation2 + $0x1b88] sm:$0xff]  ;;  %v1064_v16 = vld [vmem:[#allocation2 + $0x1d80] sm:$0xff] }
 0x123   :  { %6606 = vmatpush1.bf16.msra.mxu0 %v6605_v35  ;;  %v6627_v35 = vpack.c.bf16 %v929_v29, %v921_v28  ;;  %v1011_v28 = vld [vmem:[#allocation2 + $0x1bd8] sm:$0xff] }
 0x124   :  { %7182 = vmatpush1.bf16.msra.mxu1 %v7181_v36  ;;  %6608 = vmatprep.subr.bf16.mxu0 %v6607_v37  ;;  %v920_v36 = vld [vmem:[#allocation2 + $0x1900] sm:$0xff] }
 0x125   :  { %7184 = vmatprep.subr.bf16.mxu1 %v7183_v41  ;;  %v928_v37 = vld [vmem:[#allocation2 + $0x1940] sm:$0xff]  ;;  %v937_v41 = vld [vmem:[#allocation2 + $0x1988] sm:$0xff] }
 0x126   :  { %v6629_v45 = vpack.c.bf16 %v928_v37, %v920_v36  ;;  %v1010_v36 = vld [vmem:[#allocation2 + $0x1bd0] sm:$0xff]  ;;  %v1017_v37 = vld [vmem:[#allocation2 + $0x1c08] sm:$0xff] }
 0x127   :  { %6610 = vmatpush1.bf16.msra.mxu0 %v6609_v47  ;;  %v6631_v47 = vpack.c.bf16 %v945_v42, %v937_v41  ;;  %v6651_v43 = vpack.c.bf16 %v1025_v38, %v1017_v37 }
 0x128   :  { %7186 = vmatpush1.bf16.msra.mxu1 %v7185_v48  ;;  %6612 = vmatprep.subr.bf16.mxu0 %v6611_v49  ;;  %v936_v48 = vld [vmem:[#allocation2 + $0x1980] sm:$0xff] }
 0x129   :  { %7188 = vmatprep.subr.bf16.mxu1 %v7187_v53  ;;  %v944_v49 = vld [vmem:[#allocation2 + $0x19c0] sm:$0xff]  ;;  %v953_v53 = vld [vmem:[#allocation2 + $0x1a08] sm:$0xff] }
 0x12a   :  { %v6633_v57 = vpack.c.bf16 %v944_v49, %v936_v48  ;;  %v1026_v48 = vld [vmem:[#allocation2 + $0x1c50] sm:$0xff]  ;;  %v1033_v49 = vld [vmem:[#allocation2 + $0x1c88] sm:$0xff] }
 0x12b   :  { %6614 = vmatpush1.bf16.msra.mxu0 %v6613_v59  ;;  %v6635_v59 = vpack.c.bf16 %v961_v54, %v953_v53  ;;  %v6655_v55 = vpack.c.bf16 %v1041_v50, %v1033_v49 }
 0x12c   :  { %7190 = vmatpush1.bf16.msra.mxu1 %v7189_v60  ;;  %6616 = vmatprep.subr.bf16.mxu0 %v6615_v61  ;;  %v952_v60 = vld [vmem:[#allocation2 + $0x1a00] sm:$0xff] }
 0x12d   :  { %7192 = vmatprep.subr.bf16.mxu1 %v7191_v1  ;;  %v960_v61 = vld [vmem:[#allocation2 + $0x1a40] sm:$0xff]  ;;  %v969_v1 = vld [vmem:[#allocation2 + $0x1a88] sm:$0xff] }
 0x12e   :  { %v6637_v5 = vpack.c.bf16 %v960_v61, %v952_v60  ;;  %v1042_v60 = vld [vmem:[#allocation2 + $0x1cd0] sm:$0xff]  ;;  %v1049_v61 = vld [vmem:[#allocation2 + $0x1d08] sm:$0xff] }
 0x12f   :  { %6618 = vmatpush1.bf16.msra.mxu0 %v6617_v7  ;;  %v6639_v7 = vpack.c.bf16 %v977_v2, %v969_v1  ;;  %v6659_v3 = vpack.c.bf16 %v1057_v62, %v1049_v61 }
 0x130   :  { %7194 = vmatpush1.bf16.msra.mxu1 %v7193_v8  ;;  %6620 = vmatprep.subr.bf16.mxu0 %v6619_v9  ;;  %v968_v8 = vld [vmem:[#allocation2 + $0x1a80] sm:$0xff] }
 0x131   :  { %7196 = vmatprep.subr.bf16.mxu1 %v7195_v13  ;;  %v976_v9 = vld [vmem:[#allocation2 + $0x1ac0] sm:$0xff]  ;;  %v985_v13 = vld [vmem:[#allocation2 + $0x1b08] sm:$0xff] }
 0x132   :  { %2673 = vmatmul.mubr.f32.vlgmr.msra.gmra.mrb[0].mxu0 %v106_v19  ;;  %v6641_v17 = vpack.c.bf16 %v976_v9, %v968_v8  ;;  %v1058_v8 = vld [vmem:[#allocation2 + $0x1d50] sm:$0xff]  ;;  %v1065_v9 = vld [vmem:[#allocation2 + $0x1d88] sm:$0xff] }
 0x133   :  { %6622 = vmatpush1.bf16.msra.mxu0 %v6621_v20  ;;  %3312 = vmatmul.mubr.f32.vlgmr.msra.gmra.mrb[0].mxu1 %v106_v19  ;;  %v6643_v19 = vpack.c.bf16 %v993_v14, %v985_v13  ;;  %v984_v20 = vld [vmem:[#allocation2 + $0x1b00] sm:$0xff]  ;;  %v6663_v15 = vpack.c.bf16 %v1073_v10, %v1065_v9 }
 0x134   :  { %7198 = vmatpush1.bf16.msra.mxu1 %v7197_v21  ;;  %6624 = vmatprep.subr.bf16.mxu0 %v6623_v22  ;;  %v992_v21 = vld [vmem:[#allocation2 + $0x1b40] sm:$0xff]  ;;  %v986_v22 = vld [vmem:[#allocation2 + $0x1b10] sm:$0xff] }
 0x135   :  { %7200 = vmatprep.subr.bf16.mxu1 %v7199_v26  ;;  %2743 = vmatprep.mubr.f32.mxu0 %v109_v32  ;;  %v1009_v26 = vld [vmem:[#allocation2 + $0x1bc8] sm:$0xff]  ;;  %v6645_v29 = vpack.c.bf16 %v992_v21, %v984_v20  ;;  %v7221_v30 = vpack.c.bf16 %v994_v24, %v986_v22  ;;  %v1074_v20 = vld [vmem:[#allocation2 + $0x1dd0] sm:$0xff]  ;;  %v1091_v24 = vld [vmem:[#allocation2 + $0x1e58] sm:$0xff] }
 0x136   :  { %3382 = vmatprep.mubr.f32.mxu1 %v109_v32  ;;  %v6647_v31 = vpack.c.bf16 %v1009_v26, %v1001_v25  ;;  %v1000_v32 = vld [vmem:[#allocation2 + $0x1b80] sm:$0xff]  ;;  %v1081_v21 = vld [vmem:[#allocation2 + $0x1e08] sm:$0xff] }
 0x137   :  { %6626 = vmatpush1.bf16.msra.mxu0 %v6625_v33  ;;  %v1008_v33 = vld [vmem:[#allocation2 + $0x1bc0] sm:$0xff]  ;;  %v1089_v22 = vld [vmem:[#allocation2 + $0x1e48] sm:$0xff] }
 0x138   :  { %7202 = vmatpush1.bf16.msra.mxu1 %v7201_v34  ;;  %6628 = vmatprep.subr.bf16.mxu0 %v6627_v35  ;;  %v1002_v34 = vld [vmem:[#allocation2 + $0x1b90] sm:$0xff]  ;;  %v7223_v35 = vpack.c.bf16 %v1011_v28, %v1003_v27  ;;  %v6649_v41 = vpack.c.bf16 %v1008_v33, %v1000_v32  ;;  %v6667_v27 = vpack.c.bf16 %v1089_v22, %v1081_v21  ;;  %v1080_v28 = vld [vmem:[#allocation2 + $0x1e00] sm:$0xff]  ;;  %v1097_v33 = vld [vmem:[#allocation2 + $0x1e88] sm:$0xff] }
 0x139   :  { %7204 = vmatprep.subr.bf16.mxu1 %v7203_v39  ;;  %v1019_v39 = vld [vmem:[#allocation2 + $0x1c18] sm:$0xff]  ;;  %v7225_v42 = vpack.c.bf16 %v1010_v36, %v1002_v34  ;;  %v1090_v32 = vld [vmem:[#allocation2 + $0x1e50] sm:$0xff]  ;;  %v1105_v34 = vld [vmem:[#allocation2 + $0x1ec8] sm:$0xff] }
 0x13a   :  { %v1107_v36 = vld [vmem:[#allocation2 + $0x1ed8] sm:$0xff]  ;;  %v108_v21 = vld [vmem:[%s9854_s0 + $0x30] sm:$0xff] }
 0x13b   :  { %6630 = vmatpush1.bf16.msra.mxu0 %v6629_v45  ;;  %v1024_v45 = vld [vmem:[#allocation2 + $0x1c40] sm:$0xff] }
 0x13c   :  { %7206 = vmatpush1.bf16.msra.mxu1 %v7205_v46  ;;  %6632 = vmatprep.subr.bf16.mxu0 %v6631_v47  ;;  %v1018_v46 = vld [vmem:[#allocation2 + $0x1c10] sm:$0xff]  ;;  %v7227_v47 = vpack.c.bf16 %v1027_v40, %v1019_v39  ;;  %v6653_v53 = vpack.c.bf16 %v1024_v45, %v1016_v44  ;;  %v6671_v39 = vpack.c.bf16 %v1105_v34, %v1097_v33  ;;  %v1096_v40 = vld [vmem:[#allocation2 + $0x1e80] sm:$0xff]  ;;  %v1113_v45 = vld [vmem:[#allocation2 + $0x1f08] sm:$0xff] }
 0x13d   :  { %7208 = vmatprep.subr.bf16.mxu1 %v7207_v51  ;;  %v1035_v51 = vld [vmem:[#allocation2 + $0x1c98] sm:$0xff]  ;;  %v7229_v54 = vpack.c.bf16 %v1026_v48, %v1018_v46  ;;  %v1106_v44 = vld [vmem:[#allocation2 + $0x1ed0] sm:$0xff]  ;;  %v1121_v46 = vld [vmem:[#allocation2 + $0x1f48] sm:$0xff] }
 0x13e   :  { %v1123_v48 = vld [vmem:[#allocation2 + $0x1f58] sm:$0xff]  ;;  %v111_v34 = vld [vmem:[%s9854_s0 + $0x48] sm:$0xff] }
 0x13f   :  { %6634 = vmatpush1.bf16.msra.mxu0 %v6633_v57  ;;  %v1040_v57 = vld [vmem:[#allocation2 + $0x1cc0] sm:$0xff]  ;;  %v1187_v33 = vld [vmem:[#allocation2 + $0x2158] sm:$0xff] }
 0x140   :  { %7210 = vmatpush1.bf16.msra.mxu1 %v7209_v58  ;;  %6636 = vmatprep.subr.bf16.mxu0 %v6635_v59  ;;  %v1034_v58 = vld [vmem:[#allocation2 + $0x1c90] sm:$0xff]  ;;  %v7231_v59 = vpack.c.bf16 %v1043_v52, %v1035_v51  ;;  %v6657_v1 = vpack.c.bf16 %v1040_v57, %v1032_v56  ;;  %v6675_v51 = vpack.c.bf16 %v1121_v46, %v1113_v45  ;;  %v1112_v52 = vld [vmem:[#allocation2 + $0x1f00] sm:$0xff]  ;;  %v1129_v57 = vld [vmem:[#allocation2 + $0x1f88] sm:$0xff] }
 0x141   :  { %7212 = vmatprep.subr.bf16.mxu1 %v7211_v63  ;;  %v1051_v63 = vld [vmem:[#allocation2 + $0x1d18] sm:$0xff]  ;;  %v7233_v2 = vpack.c.bf16 %v1042_v60, %v1034_v58  ;;  %v1122_v56 = vld [vmem:[#allocation2 + $0x1f50] sm:$0xff]  ;;  %v1137_v58 = vld [vmem:[#allocation2 + $0x1fc8] sm:$0xff] }
 0x142   :  { %v1139_v60 = vld [vmem:[#allocation2 + $0x1fd8] sm:$0xff] }
 0x143   :  { %6638 = vmatpush1.bf16.msra.mxu0 %v6637_v5  ;;  %v1056_v5 = vld [vmem:[#allocation2 + $0x1d40] sm:$0xff]  ;;  %v1195_v45 = vld [vmem:[#allocation2 + $0x2198] sm:$0xff] }
 0x144   :  { %7214 = vmatpush1.bf16.msra.mxu1 %v7213_v6  ;;  %6640 = vmatprep.subr.bf16.mxu0 %v6639_v7  ;;  %v1050_v6 = vld [vmem:[#allocation2 + $0x1d10] sm:$0xff]  ;;  %v7235_v7 = vpack.c.bf16 %v1059_v0, %v1051_v63  ;;  %v6661_v13 = vpack.c.bf16 %v1056_v5, %v1048_v4  ;;  %v6679_v63 = vpack.c.bf16 %v1137_v58, %v1129_v57  ;;  %v1128_v0 = vld [vmem:[#allocation2 + $0x1f80] sm:$0xff]  ;;  %v1145_v5 = vld [vmem:[#allocation2 + $0x2008] sm:$0xff] }
 0x145   :  { %7216 = vmatprep.subr.bf16.mxu1 %v7215_v11  ;;  %v1067_v11 = vld [vmem:[#allocation2 + $0x1d98] sm:$0xff]  ;;  %v7237_v14 = vpack.c.bf16 %v1058_v8, %v1050_v6  ;;  %v1138_v4 = vld [vmem:[#allocation2 + $0x1fd0] sm:$0xff]  ;;  %v1153_v6 = vld [vmem:[#allocation2 + $0x2048] sm:$0xff] }
 0x146   :  { %v1155_v8 = vld [vmem:[#allocation2 + $0x2058] sm:$0xff] }
 0x147   :  { %6642 = vmatpush1.bf16.msra.mxu0 %v6641_v17  ;;  %v1072_v17 = vld [vmem:[#allocation2 + $0x1dc0] sm:$0xff]  ;;  %v1203_v46 = vld [vmem:[#allocation2 + $0x21d8] sm:$0xff] }
 0x148   :  { %7218 = vmatpush1.bf16.msra.mxu1 %v7217_v18  ;;  %6644 = vmatprep.subr.bf16.mxu0 %v6643_v19  ;;  %v1066_v18 = vld [vmem:[#allocation2 + $0x1d90] sm:$0xff]  ;;  %v7239_v19 = vpack.c.bf16 %v1075_v12, %v1067_v11  ;;  %v6665_v25 = vpack.c.bf16 %v1072_v17, %v1064_v16  ;;  %v6683_v11 = vpack.c.bf16 %v1153_v6, %v1145_v5  ;;  %v1144_v12 = vld [vmem:[#allocation2 + $0x2000] sm:$0xff]  ;;  %v1161_v17 = vld [vmem:[#allocation2 + $0x2088] sm:$0xff] }
 0x149   :  { %7220 = vmatprep.subr.bf16.mxu1 %v7219_v23  ;;  %v1083_v23 = vld [vmem:[#allocation2 + $0x1e18] sm:$0xff]  ;;  %v7241_v26 = vpack.c.bf16 %v1074_v20, %v1066_v18  ;;  %v1154_v16 = vld [vmem:[#allocation2 + $0x2050] sm:$0xff]  ;;  %v1169_v18 = vld [vmem:[#allocation2 + $0x20c8] sm:$0xff] }
 0x14a   :  { %v1171_v20 = vld [vmem:[#allocation2 + $0x20d8] sm:$0xff] }
 0x14b   :  { %6646 = vmatpush1.bf16.msra.mxu0 %v6645_v29  ;;  %v1088_v29 = vld [vmem:[#allocation2 + $0x1e40] sm:$0xff]  ;;  %v1211_v57 = vld [vmem:[#allocation2 + $0x2218] sm:$0xff] }
 0x14c   :  { %7222 = vmatpush1.bf16.msra.mxu1 %v7221_v30  ;;  %6648 = vmatprep.subr.bf16.mxu0 %v6647_v31  ;;  %v1082_v30 = vld [vmem:[#allocation2 + $0x1e10] sm:$0xff]  ;;  %v7243_v31 = vpack.c.bf16 %v1091_v24, %v1083_v23  ;;  %v6669_v37 = vpack.c.bf16 %v1088_v29, %v1080_v28  ;;  %v6687_v24 = vpack.c.bf16 %v1169_v18, %v1161_v17  ;;  %v1219_v58 = vld [vmem:[#allocation2 + $0x2258] sm:$0xff] }
 0x14d   :  { %7224 = vmatprep.subr.bf16.mxu1 %v7223_v35  ;;  %v1099_v35 = vld [vmem:[#allocation2 + $0x1e98] sm:$0xff]  ;;  %v7245_v38 = vpack.c.bf16 %v1090_v32, %v1082_v30  ;;  %v1170_v29 = vld [vmem:[#allocation2 + $0x20d0] sm:$0xff]  ;;  %v1177_v30 = vld [vmem:[#allocation2 + $0x2108] sm:$0xff] }
 0x14e   :  { %v1179_v32 = vld [vmem:[#allocation2 + $0x2118] sm:$0xff] }
 0x14f   :  { %6650 = vmatpush1.bf16.msra.mxu0 %v6649_v41  ;;  %v1104_v41 = vld [vmem:[#allocation2 + $0x1ec0] sm:$0xff]  ;;  %v1227_v5 = vld [vmem:[#allocation2 + $0x2298] sm:$0xff] }
 0x150   :  { %7226 = vmatpush1.bf16.msra.mxu1 %v7225_v42  ;;  %6652 = vmatprep.subr.bf16.mxu0 %v6651_v43  ;;  %v1098_v42 = vld [vmem:[#allocation2 + $0x1e90] sm:$0xff]  ;;  %v7247_v43 = vpack.c.bf16 %v1107_v36, %v1099_v35  ;;  %v6673_v49 = vpack.c.bf16 %v1104_v41, %v1096_v40  ;;  %v7267_v41 = vpack.c.bf16 %v1187_v33, %v1179_v32  ;;  %v1235_v6 = vld [vmem:[#allocation2 + $0x22d8] sm:$0xff] }
 0x151   :  { %7228 = vmatprep.subr.bf16.mxu1 %v7227_v47  ;;  %v1115_v47 = vld [vmem:[#allocation2 + $0x1f18] sm:$0xff]  ;;  %v7249_v50 = vpack.c.bf16 %v1106_v44, %v1098_v42  ;;  %v1178_v40 = vld [vmem:[#allocation2 + $0x2110] sm:$0xff]  ;;  %v1201_v44 = vld [vmem:[#allocation2 + $0x21c8] sm:$0xff] }
 0x152   :  { %v1186_v42 = vld [vmem:[#allocation2 + $0x2150] sm:$0xff]  ;;  %v1243_v17 = vld [vmem:[#allocation2 + $0x2318] sm:$0xff] }
 0x153   :  { %6654 = vmatpush1.bf16.msra.mxu0 %v6653_v53  ;;  %v1120_v53 = vld [vmem:[#allocation2 + $0x1f40] sm:$0xff]  ;;  %v1251_v18 = vld [vmem:[#allocation2 + $0x2358] sm:$0xff] }
 0x154   :  { %7230 = vmatpush1.bf16.msra.mxu1 %v7229_v54  ;;  %6656 = vmatprep.subr.bf16.mxu0 %v6655_v55  ;;  %v1114_v54 = vld [vmem:[#allocation2 + $0x1f10] sm:$0xff]  ;;  %v7251_v55 = vpack.c.bf16 %v1123_v48, %v1115_v47  ;;  %v6677_v61 = vpack.c.bf16 %v1120_v53, %v1112_v52  ;;  %v7269_v48 = vpack.c.bf16 %v1186_v42, %v1178_v40  ;;  %v1281_v40 = vld [vmem:[#allocation2 + $0x2448] sm:$0xff]  ;;  %v1283_v42 = vld [vmem:[#allocation2 + $0x2458] sm:$0xff] }
 0x155   :  { %7232 = vmatprep.subr.bf16.mxu1 %v7231_v59  ;;  %v1131_v59 = vld [vmem:[#allocation2 + $0x1f98] sm:$0xff]  ;;  %v7253_v62 = vpack.c.bf16 %v1122_v56, %v1114_v54  ;;  %v1194_v52 = vld [vmem:[#allocation2 + $0x2190] sm:$0xff]  ;;  %v7271_v53 = vpack.c.bf16 %v1203_v46, %v1195_v45  ;;  %v1217_v56 = vld [vmem:[#allocation2 + $0x2248] sm:$0xff] }
 0x156   :  { %v1202_v54 = vld [vmem:[#allocation2 + $0x21d0] sm:$0xff]  ;;  %v1272_v46 = vld [vmem:[#allocation2 + $0x2400] sm:$0xff] }
 0x157   :  { %6658 = vmatpush1.bf16.msra.mxu0 %v6657_v1  ;;  %v1136_v1 = vld [vmem:[#allocation2 + $0x1fc0] sm:$0xff] }
 0x158   :  { %7234 = vmatpush1.bf16.msra.mxu1 %v7233_v2  ;;  %6660 = vmatprep.subr.bf16.mxu0 %v6659_v3  ;;  %v1130_v2 = vld [vmem:[#allocation2 + $0x1f90] sm:$0xff]  ;;  %v7255_v3 = vpack.c.bf16 %v1139_v60, %v1131_v59  ;;  %v6681_v9 = vpack.c.bf16 %v1136_v1, %v1128_v0  ;;  %v7273_v60 = vpack.c.bf16 %v1202_v54, %v1194_v52  ;;  %v1297_v52 = vld [vmem:[#allocation2 + $0x24c8] sm:$0xff]  ;;  %v1299_v54 = vld [vmem:[#allocation2 + $0x24d8] sm:$0xff] }
 0x159   :  { %7236 = vmatprep.subr.bf16.mxu1 %v7235_v7  ;;  %v1147_v7 = vld [vmem:[#allocation2 + $0x2018] sm:$0xff]  ;;  %v7257_v10 = vpack.c.bf16 %v1138_v4, %v1130_v2  ;;  %v1210_v0 = vld [vmem:[#allocation2 + $0x2210] sm:$0xff]  ;;  %v7275_v1 = vpack.c.bf16 %v1219_v58, %v1211_v57  ;;  %v1233_v4 = vld [vmem:[#allocation2 + $0x22c8] sm:$0xff] }
 0x15a   :  { %v1218_v2 = vld [vmem:[#allocation2 + $0x2250] sm:$0xff]  ;;  %v1288_v58 = vld [vmem:[#allocation2 + $0x2480] sm:$0xff] }
 0x15b   :  { %6662 = vmatpush1.bf16.msra.mxu0 %v6661_v13  ;;  %v1152_v13 = vld [vmem:[#allocation2 + $0x2040] sm:$0xff] }
 0x15c   :  { %7238 = vmatpush1.bf16.msra.mxu1 %v7237_v14  ;;  %6664 = vmatprep.subr.bf16.mxu0 %v6663_v15  ;;  %v1146_v14 = vld [vmem:[#allocation2 + $0x2010] sm:$0xff]  ;;  %v7259_v15 = vpack.c.bf16 %v1155_v8, %v1147_v7  ;;  %v6685_v22 = vpack.c.bf16 %v1152_v13, %v1144_v12  ;;  %v7277_v8 = vpack.c.bf16 %v1218_v2, %v1210_v0  ;;  %v1313_v0 = vld [vmem:[#allocation2 + $0x2548] sm:$0xff]  ;;  %v1315_v2 = vld [vmem:[#allocation2 + $0x2558] sm:$0xff] }
 0x15d   :  { %7240 = vmatprep.subr.bf16.mxu1 %v7239_v19  ;;  %v1163_v19 = vld [vmem:[#allocation2 + $0x2098] sm:$0xff]  ;;  %v7261_v23 = vpack.c.bf16 %v1154_v16, %v1146_v14  ;;  %v1226_v12 = vld [vmem:[#allocation2 + $0x2290] sm:$0xff]  ;;  %v7279_v13 = vpack.c.bf16 %v1235_v6, %v1227_v5  ;;  %v1249_v16 = vld [vmem:[#allocation2 + $0x2348] sm:$0xff] }
 0x15e   :  { %v7263_v28 = vpack.c.bf16 %v1171_v20, %v1163_v19  ;;  %v1234_v14 = vld [vmem:[#allocation2 + $0x22d0] sm:$0xff]  ;;  %v1304_v6 = vld [vmem:[#allocation2 + $0x2500] sm:$0xff] }
 0x15f   :  { %6666 = vmatpush1.bf16.msra.mxu0 %v6665_v25  ;;  %v1160_v25 = vld [vmem:[#allocation2 + $0x2080] sm:$0xff]  ;;  %v7281_v20 = vpack.c.bf16 %v1234_v14, %v1226_v12  ;;  %v1329_v12 = vld [vmem:[#allocation2 + $0x25c8] sm:$0xff]  ;;  %v1331_v14 = vld [vmem:[#allocation2 + $0x25d8] sm:$0xff] }
 0x160   :  { %7242 = vmatpush1.bf16.msra.mxu1 %v7241_v26  ;;  %6668 = vmatprep.subr.bf16.mxu0 %v6667_v27  ;;  %v1168_v26 = vld [vmem:[#allocation2 + $0x20c0] sm:$0xff]  ;;  %v1162_v27 = vld [vmem:[#allocation2 + $0x2090] sm:$0xff] }
 0x161   :  { %7244 = vmatprep.subr.bf16.mxu1 %v7243_v31  ;;  %v1185_v31 = vld [vmem:[#allocation2 + $0x2148] sm:$0xff]  ;;  %v6689_v35 = vpack.c.bf16 %v1168_v26, %v1160_v25  ;;  %v7265_v36 = vpack.c.bf16 %v1170_v29, %v1162_v27  ;;  %v7283_v25 = vpack.c.bf16 %v1251_v18, %v1243_v17  ;;  %v1250_v26 = vld [vmem:[#allocation2 + $0x2350] sm:$0xff]  ;;  %v1259_v29 = vld [vmem:[#allocation2 + $0x2398] sm:$0xff] }
 0x162   :  { %v1257_v27 = vld [vmem:[#allocation2 + $0x2388] sm:$0xff]  ;;  %v1320_v18 = vld [vmem:[#allocation2 + $0x2580] sm:$0xff] }
 0x163   :  { %6670 = vmatpush1.bf16.msra.mxu0 %v6669_v37  ;;  %v6691_v37 = vpack.c.bf16 %v1185_v31, %v1177_v30  ;;  %v1267_v30 = vld [vmem:[#allocation2 + $0x23d8] sm:$0xff] }
 0x164   :  { %7246 = vmatpush1.bf16.msra.mxu1 %v7245_v38  ;;  %6672 = vmatprep.subr.bf16.mxu0 %v6671_v39  ;;  %v1176_v38 = vld [vmem:[#allocation2 + $0x2100] sm:$0xff] }
 0x165   :  { %7248 = vmatprep.subr.bf16.mxu1 %v7247_v43  ;;  %v1184_v39 = vld [vmem:[#allocation2 + $0x2140] sm:$0xff]  ;;  %v1193_v43 = vld [vmem:[#allocation2 + $0x2188] sm:$0xff] }
 0x166   :  { %v6693_v47 = vpack.c.bf16 %v1184_v39, %v1176_v38  ;;  %v1266_v38 = vld [vmem:[#allocation2 + $0x23d0] sm:$0xff]  ;;  %v1273_v39 = vld [vmem:[#allocation2 + $0x2408] sm:$0xff] }
 0x167   :  { %6674 = vmatpush1.bf16.msra.mxu0 %v6673_v49  ;;  %v6695_v49 = vpack.c.bf16 %v1201_v44, %v1193_v43  ;;  %v6715_v45 = vpack.c.bf16 %v1281_v40, %v1273_v39 }
 0x168   :  { %7250 = vmatpush1.bf16.msra.mxu1 %v7249_v50  ;;  %6676 = vmatprep.subr.bf16.mxu0 %v6675_v51  ;;  %v1192_v50 = vld [vmem:[#allocation2 + $0x2180] sm:$0xff] }
 0x169   :  { %7252 = vmatprep.subr.bf16.mxu1 %v7251_v55  ;;  %v1200_v51 = vld [vmem:[#allocation2 + $0x21c0] sm:$0xff]  ;;  %v1209_v55 = vld [vmem:[#allocation2 + $0x2208] sm:$0xff] }
 0x16a   :  { %v6697_v59 = vpack.c.bf16 %v1200_v51, %v1192_v50  ;;  %v1282_v50 = vld [vmem:[#allocation2 + $0x2450] sm:$0xff]  ;;  %v1289_v51 = vld [vmem:[#allocation2 + $0x2488] sm:$0xff] }
 0x16b   :  { %6678 = vmatpush1.bf16.msra.mxu0 %v6677_v61  ;;  %v6699_v61 = vpack.c.bf16 %v1217_v56, %v1209_v55  ;;  %v6719_v57 = vpack.c.bf16 %v1297_v52, %v1289_v51 }
 0x16c   :  { %7254 = vmatpush1.bf16.msra.mxu1 %v7253_v62  ;;  %6680 = vmatprep.subr.bf16.mxu0 %v6679_v63  ;;  %v1208_v62 = vld [vmem:[#allocation2 + $0x2200] sm:$0xff] }
 0x16d   :  { %7256 = vmatprep.subr.bf16.mxu1 %v7255_v3  ;;  %v1216_v63 = vld [vmem:[#allocation2 + $0x2240] sm:$0xff]  ;;  %v1225_v3 = vld [vmem:[#allocation2 + $0x2288] sm:$0xff] }
 0x16e   :  { %v6701_v7 = vpack.c.bf16 %v1216_v63, %v1208_v62  ;;  %v1298_v62 = vld [vmem:[#allocation2 + $0x24d0] sm:$0xff]  ;;  %v1305_v63 = vld [vmem:[#allocation2 + $0x2508] sm:$0xff] }
 0x16f   :  { %6682 = vmatpush1.bf16.msra.mxu0 %v6681_v9  ;;  %v6703_v9 = vpack.c.bf16 %v1233_v4, %v1225_v3  ;;  %v6723_v5 = vpack.c.bf16 %v1313_v0, %v1305_v63 }
 0x170   :  { %7258 = vmatpush1.bf16.msra.mxu1 %v7257_v10  ;;  %6684 = vmatprep.subr.bf16.mxu0 %v6683_v11  ;;  %v1224_v10 = vld [vmem:[#allocation2 + $0x2280] sm:$0xff] }
 0x171   :  { %7260 = vmatprep.subr.bf16.mxu1 %v7259_v15  ;;  %v1232_v11 = vld [vmem:[#allocation2 + $0x22c0] sm:$0xff]  ;;  %v1241_v15 = vld [vmem:[#allocation2 + $0x2308] sm:$0xff] }
 0x172   :  { %2744 = vmatmul.mubr.f32.vlgmr.msra.gmra.mrb[0].mxu0 %v108_v21  ;;  %v6705_v19 = vpack.c.bf16 %v1232_v11, %v1224_v10  ;;  %v1314_v10 = vld [vmem:[#allocation2 + $0x2550] sm:$0xff]  ;;  %v1321_v11 = vld [vmem:[#allocation2 + $0x2588] sm:$0xff] }
 0x173   :  { %6686 = vmatpush1.bf16.msra.mxu0 %v6685_v22  ;;  %3383 = vmatmul.mubr.f32.vlgmr.msra.gmra.mrb[0].mxu1 %v108_v21  ;;  %v6707_v21 = vpack.c.bf16 %v1249_v16, %v1241_v15  ;;  %v1240_v22 = vld [vmem:[#allocation2 + $0x2300] sm:$0xff]  ;;  %v6727_v17 = vpack.c.bf16 %v1329_v12, %v1321_v11 }
 0x174   :  { %7262 = vmatpush1.bf16.msra.mxu1 %v7261_v23  ;;  %6688 = vmatprep.subr.bf16.mxu0 %v6687_v24  ;;  %v1248_v23 = vld [vmem:[#allocation2 + $0x2340] sm:$0xff]  ;;  %v1242_v24 = vld [vmem:[#allocation2 + $0x2310] sm:$0xff] }
 0x175   :  { %7264 = vmatprep.subr.bf16.mxu1 %v7263_v28  ;;  %2814 = vmatprep.mubr.f32.mxu0 %v111_v34  ;;  %v1265_v28 = vld [vmem:[#allocation2 + $0x23c8] sm:$0xff]  ;;  %v6709_v31 = vpack.c.bf16 %v1248_v23, %v1240_v22  ;;  %v7285_v32 = vpack.c.bf16 %v1250_v26, %v1242_v24  ;;  %v1330_v22 = vld [vmem:[#allocation2 + $0x25d0] sm:$0xff]  ;;  %v1347_v26 = vld [vmem:[#allocation2 + $0x2658] sm:$0xff] }
 0x176   :  { %3453 = vmatprep.mubr.f32.mxu1 %v111_v34  ;;  %v6711_v33 = vpack.c.bf16 %v1265_v28, %v1257_v27  ;;  %v1256_v34 = vld [vmem:[#allocation2 + $0x2380] sm:$0xff]  ;;  %v1337_v23 = vld [vmem:[#allocation2 + $0x2608] sm:$0xff] }
 0x177   :  { %6690 = vmatpush1.bf16.msra.mxu0 %v6689_v35  ;;  %v1264_v35 = vld [vmem:[#allocation2 + $0x23c0] sm:$0xff]  ;;  %v1345_v24 = vld [vmem:[#allocation2 + $0x2648] sm:$0xff] }
 0x178   :  { %7266 = vmatpush1.bf16.msra.mxu1 %v7265_v36  ;;  %6692 = vmatprep.subr.bf16.mxu0 %v6691_v37  ;;  %v1258_v36 = vld [vmem:[#allocation2 + $0x2390] sm:$0xff]  ;;  %v7287_v37 = vpack.c.bf16 %v1267_v30, %v1259_v29  ;;  %v6713_v43 = vpack.c.bf16 %v1264_v35, %v1256_v34  ;;  %v6731_v29 = vpack.c.bf16 %v1345_v24, %v1337_v23  ;;  %v1336_v30 = vld [vmem:[#allocation2 + $0x2600] sm:$0xff]  ;;  %v1353_v35 = vld [vmem:[#allocation2 + $0x2688] sm:$0xff] }
 0x179   :  { %7268 = vmatprep.subr.bf16.mxu1 %v7267_v41  ;;  %v1275_v41 = vld [vmem:[#allocation2 + $0x2418] sm:$0xff]  ;;  %v7289_v44 = vpack.c.bf16 %v1266_v38, %v1258_v36  ;;  %v1346_v34 = vld [vmem:[#allocation2 + $0x2650] sm:$0xff]  ;;  %v1361_v36 = vld [vmem:[#allocation2 + $0x26c8] sm:$0xff] }
 0x17a   :  { %v1363_v38 = vld [vmem:[#allocation2 + $0x26d8] sm:$0xff]  ;;  %v110_v23 = vld [vmem:[%s9854_s0 + $0x40] sm:$0xff] }
 0x17b   :  { %6694 = vmatpush1.bf16.msra.mxu0 %v6693_v47  ;;  %v1280_v47 = vld [vmem:[#allocation2 + $0x2440] sm:$0xff] }
 0x17c   :  { %7270 = vmatpush1.bf16.msra.mxu1 %v7269_v48  ;;  %6696 = vmatprep.subr.bf16.mxu0 %v6695_v49  ;;  %v1274_v48 = vld [vmem:[#allocation2 + $0x2410] sm:$0xff]  ;;  %v7291_v49 = vpack.c.bf16 %v1283_v42, %v1275_v41  ;;  %v6717_v55 = vpack.c.bf16 %v1280_v47, %v1272_v46  ;;  %v6735_v41 = vpack.c.bf16 %v1361_v36, %v1353_v35  ;;  %v1352_v42 = vld [vmem:[#allocation2 + $0x2680] sm:$0xff]  ;;  %v1369_v47 = vld [vmem:[#allocation2 + $0x2708] sm:$0xff] }
 0x17d   :  { %7272 = vmatprep.subr.bf16.mxu1 %v7271_v53  ;;  %v1291_v53 = vld [vmem:[#allocation2 + $0x2498] sm:$0xff]  ;;  %v7293_v56 = vpack.c.bf16 %v1282_v50, %v1274_v48  ;;  %v1362_v46 = vld [vmem:[#allocation2 + $0x26d0] sm:$0xff]  ;;  %v1377_v48 = vld [vmem:[#allocation2 + $0x2748] sm:$0xff] }
 0x17e   :  { %v1379_v50 = vld [vmem:[#allocation2 + $0x2758] sm:$0xff] }
 0x17f   :  { %6698 = vmatpush1.bf16.msra.mxu0 %v6697_v59  ;;  %v1296_v59 = vld [vmem:[#allocation2 + $0x24c0] sm:$0xff]  ;;  %v1443_v35 = vld [vmem:[#allocation2 + $0x2958] sm:$0xff] }
 0x180   :  { %7274 = vmatpush1.bf16.msra.mxu1 %v7273_v60  ;;  %6700 = vmatprep.subr.bf16.mxu0 %v6699_v61  ;;  %v1290_v60 = vld [vmem:[#allocation2 + $0x2490] sm:$0xff]  ;;  %v7295_v61 = vpack.c.bf16 %v1299_v54, %v1291_v53  ;;  %v6721_v3 = vpack.c.bf16 %v1296_v59, %v1288_v58  ;;  %v6739_v53 = vpack.c.bf16 %v1377_v48, %v1369_v47  ;;  %v1368_v54 = vld [vmem:[#allocation2 + $0x2700] sm:$0xff]  ;;  %v1385_v59 = vld [vmem:[#allocation2 + $0x2788] sm:$0xff] }
 0x181   :  { %7276 = vmatprep.subr.bf16.mxu1 %v7275_v1  ;;  %v1307_v1 = vld [vmem:[#allocation2 + $0x2518] sm:$0xff]  ;;  %v7297_v4 = vpack.c.bf16 %v1298_v62, %v1290_v60  ;;  %v1378_v58 = vld [vmem:[#allocation2 + $0x2750] sm:$0xff]  ;;  %v1393_v60 = vld [vmem:[#allocation2 + $0x27c8] sm:$0xff] }
 0x182   :  { %v1395_v62 = vld [vmem:[#allocation2 + $0x27d8] sm:$0xff] }
 0x183   :  { %6702 = vmatpush1.bf16.msra.mxu0 %v6701_v7  ;;  %v1312_v7 = vld [vmem:[#allocation2 + $0x2540] sm:$0xff]  ;;  %v113_v36 = vld [vmem:[%s9854_s0 + $0x58] sm:$0xff] }
 0x184   :  { %7278 = vmatpush1.bf16.msra.mxu1 %v7277_v8  ;;  %6704 = vmatprep.subr.bf16.mxu0 %v6703_v9  ;;  %v1306_v8 = vld [vmem:[#allocation2 + $0x2510] sm:$0xff]  ;;  %v7299_v9 = vpack.c.bf16 %v1315_v2, %v1307_v1  ;;  %v6725_v15 = vpack.c.bf16 %v1312_v7, %v1304_v6  ;;  %v6743_v1 = vpack.c.bf16 %v1393_v60, %v1385_v59  ;;  %v1384_v2 = vld [vmem:[#allocation2 + $0x2780] sm:$0xff]  ;;  %v1401_v7 = vld [vmem:[#allocation2 + $0x2808] sm:$0xff] }
 0x185   :  { %7280 = vmatprep.subr.bf16.mxu1 %v7279_v13  ;;  %v1323_v13 = vld [vmem:[#allocation2 + $0x2598] sm:$0xff]  ;;  %v7301_v16 = vpack.c.bf16 %v1314_v10, %v1306_v8  ;;  %v1394_v6 = vld [vmem:[#allocation2 + $0x27d0] sm:$0xff]  ;;  %v1409_v8 = vld [vmem:[#allocation2 + $0x2848] sm:$0xff] }
 0x186   :  { %v1411_v10 = vld [vmem:[#allocation2 + $0x2858] sm:$0xff] }
 0x187   :  { %6706 = vmatpush1.bf16.msra.mxu0 %v6705_v19  ;;  %v1328_v19 = vld [vmem:[#allocation2 + $0x25c0] sm:$0xff]  ;;  %v1451_v47 = vld [vmem:[#allocation2 + $0x2998] sm:$0xff] }
 0x188   :  { %7282 = vmatpush1.bf16.msra.mxu1 %v7281_v20  ;;  %6708 = vmatprep.subr.bf16.mxu0 %v6707_v21  ;;  %v1322_v20 = vld [vmem:[#allocation2 + $0x2590] sm:$0xff]  ;;  %v7303_v21 = vpack.c.bf16 %v1331_v14, %v1323_v13  ;;  %v6729_v27 = vpack.c.bf16 %v1328_v19, %v1320_v18  ;;  %v6747_v13 = vpack.c.bf16 %v1409_v8, %v1401_v7  ;;  %v1400_v14 = vld [vmem:[#allocation2 + $0x2800] sm:$0xff]  ;;  %v1417_v19 = vld [vmem:[#allocation2 + $0x2888] sm:$0xff] }
 0x189   :  { %7284 = vmatprep.subr.bf16.mxu1 %v7283_v25  ;;  %v1339_v25 = vld [vmem:[#allocation2 + $0x2618] sm:$0xff]  ;;  %v7305_v28 = vpack.c.bf16 %v1330_v22, %v1322_v20  ;;  %v1410_v18 = vld [vmem:[#allocation2 + $0x2850] sm:$0xff]  ;;  %v1425_v20 = vld [vmem:[#allocation2 + $0x28c8] sm:$0xff] }
 0x18a   :  { %v1427_v22 = vld [vmem:[#allocation2 + $0x28d8] sm:$0xff] }
 0x18b   :  { %6710 = vmatpush1.bf16.msra.mxu0 %v6709_v31  ;;  %v1344_v31 = vld [vmem:[#allocation2 + $0x2640] sm:$0xff]  ;;  %v1459_v48 = vld [vmem:[#allocation2 + $0x29d8] sm:$0xff] }
 0x18c   :  { %7286 = vmatpush1.bf16.msra.mxu1 %v7285_v32  ;;  %6712 = vmatprep.subr.bf16.mxu0 %v6711_v33  ;;  %v1338_v32 = vld [vmem:[#allocation2 + $0x2610] sm:$0xff]  ;;  %v7307_v33 = vpack.c.bf16 %v1347_v26, %v1339_v25  ;;  %v6733_v39 = vpack.c.bf16 %v1344_v31, %v1336_v30  ;;  %v6751_v26 = vpack.c.bf16 %v1425_v20, %v1417_v19  ;;  %v1467_v59 = vld [vmem:[#allocation2 + $0x2a18] sm:$0xff] }
 0x18d   :  { %7288 = vmatprep.subr.bf16.mxu1 %v7287_v37  ;;  %v1355_v37 = vld [vmem:[#allocation2 + $0x2698] sm:$0xff]  ;;  %v7309_v40 = vpack.c.bf16 %v1346_v34, %v1338_v32  ;;  %v1426_v31 = vld [vmem:[#allocation2 + $0x28d0] sm:$0xff]  ;;  %v1433_v32 = vld [vmem:[#allocation2 + $0x2908] sm:$0xff] }
 0x18e   :  { %v1435_v34 = vld [vmem:[#allocation2 + $0x2918] sm:$0xff] }
 0x18f   :  { %6714 = vmatpush1.bf16.msra.mxu0 %v6713_v43  ;;  %v1360_v43 = vld [vmem:[#allocation2 + $0x26c0] sm:$0xff]  ;;  %v1475_v60 = vld [vmem:[#allocation2 + $0x2a58] sm:$0xff] }
 0x190   :  { %7290 = vmatpush1.bf16.msra.mxu1 %v7289_v44  ;;  %6716 = vmatprep.subr.bf16.mxu0 %v6715_v45  ;;  %v1354_v44 = vld [vmem:[#allocation2 + $0x2690] sm:$0xff]  ;;  %v7311_v45 = vpack.c.bf16 %v1363_v38, %v1355_v37  ;;  %v6737_v51 = vpack.c.bf16 %v1360_v43, %v1352_v42  ;;  %v7331_v43 = vpack.c.bf16 %v1443_v35, %v1435_v34  ;;  %v1483_v7 = vld [vmem:[#allocation2 + $0x2a98] sm:$0xff] }
 0x191   :  { %7292 = vmatprep.subr.bf16.mxu1 %v7291_v49  ;;  %v1371_v49 = vld [vmem:[#allocation2 + $0x2718] sm:$0xff]  ;;  %v7313_v52 = vpack.c.bf16 %v1362_v46, %v1354_v44  ;;  %v1434_v42 = vld [vmem:[#allocation2 + $0x2910] sm:$0xff]  ;;  %v1457_v46 = vld [vmem:[#allocation2 + $0x29c8] sm:$0xff] }
 0x192   :  { %v1442_v44 = vld [vmem:[#allocation2 + $0x2950] sm:$0xff]  ;;  %v1491_v8 = vld [vmem:[#allocation2 + $0x2ad8] sm:$0xff] }
 0x193   :  { %6718 = vmatpush1.bf16.msra.mxu0 %v6717_v55  ;;  %v1376_v55 = vld [vmem:[#allocation2 + $0x2740] sm:$0xff]  ;;  %v1499_v19 = vld [vmem:[#allocation2 + $0x2b18] sm:$0xff] }
 0x194   :  { %7294 = vmatpush1.bf16.msra.mxu1 %v7293_v56  ;;  %6720 = vmatprep.subr.bf16.mxu0 %v6719_v57  ;;  %v1370_v56 = vld [vmem:[#allocation2 + $0x2710] sm:$0xff]  ;;  %v7315_v57 = vpack.c.bf16 %v1379_v50, %v1371_v49  ;;  %v6741_v63 = vpack.c.bf16 %v1376_v55, %v1368_v54  ;;  %v7333_v50 = vpack.c.bf16 %v1442_v44, %v1434_v42  ;;  %v1507_v20 = vld [vmem:[#allocation2 + $0x2b58] sm:$0xff]  ;;  %v1537_v42 = vld [vmem:[#allocation2 + $0x2c48] sm:$0xff] }
 0x195   :  { %7296 = vmatprep.subr.bf16.mxu1 %v7295_v61  ;;  %v1387_v61 = vld [vmem:[#allocation2 + $0x2798] sm:$0xff]  ;;  %v7317_v0 = vpack.c.bf16 %v1378_v58, %v1370_v56  ;;  %v1450_v54 = vld [vmem:[#allocation2 + $0x2990] sm:$0xff]  ;;  %v7335_v55 = vpack.c.bf16 %v1459_v48, %v1451_v47  ;;  %v1473_v58 = vld [vmem:[#allocation2 + $0x2a48] sm:$0xff] }
 0x196   :  { %v1458_v56 = vld [vmem:[#allocation2 + $0x29d0] sm:$0xff]  ;;  %v1539_v44 = vld [vmem:[#allocation2 + $0x2c58] sm:$0xff]  ;;  %v1528_v48 = vld [vmem:[#allocation2 + $0x2c00] sm:$0xff] }
 0x197   :  { %6722 = vmatpush1.bf16.msra.mxu0 %v6721_v3  ;;  %v1392_v3 = vld [vmem:[#allocation2 + $0x27c0] sm:$0xff] }
 0x198   :  { %7298 = vmatpush1.bf16.msra.mxu1 %v7297_v4  ;;  %6724 = vmatprep.subr.bf16.mxu0 %v6723_v5  ;;  %v1386_v4 = vld [vmem:[#allocation2 + $0x2790] sm:$0xff]  ;;  %v7319_v5 = vpack.c.bf16 %v1395_v62, %v1387_v61  ;;  %v6745_v11 = vpack.c.bf16 %v1392_v3, %v1384_v2  ;;  %v7337_v62 = vpack.c.bf16 %v1458_v56, %v1450_v54  ;;  %v1553_v54 = vld [vmem:[#allocation2 + $0x2cc8] sm:$0xff]  ;;  %v1555_v56 = vld [vmem:[#allocation2 + $0x2cd8] sm:$0xff] }
 0x199   :  { %7300 = vmatprep.subr.bf16.mxu1 %v7299_v9  ;;  %v1403_v9 = vld [vmem:[#allocation2 + $0x2818] sm:$0xff]  ;;  %v7321_v12 = vpack.c.bf16 %v1394_v6, %v1386_v4  ;;  %v1466_v2 = vld [vmem:[#allocation2 + $0x2a10] sm:$0xff]  ;;  %v7339_v3 = vpack.c.bf16 %v1475_v60, %v1467_v59  ;;  %v1489_v6 = vld [vmem:[#allocation2 + $0x2ac8] sm:$0xff] }
 0x19a   :  { %v1474_v4 = vld [vmem:[#allocation2 + $0x2a50] sm:$0xff]  ;;  %v1544_v60 = vld [vmem:[#allocation2 + $0x2c80] sm:$0xff] }
 0x19b   :  { %6726 = vmatpush1.bf16.msra.mxu0 %v6725_v15  ;;  %v1408_v15 = vld [vmem:[#allocation2 + $0x2840] sm:$0xff] }
 0x19c   :  { %7302 = vmatpush1.bf16.msra.mxu1 %v7301_v16  ;;  %6728 = vmatprep.subr.bf16.mxu0 %v6727_v17  ;;  %v1402_v16 = vld [vmem:[#allocation2 + $0x2810] sm:$0xff]  ;;  %v7323_v17 = vpack.c.bf16 %v1411_v10, %v1403_v9  ;;  %v6749_v24 = vpack.c.bf16 %v1408_v15, %v1400_v14  ;;  %v7341_v10 = vpack.c.bf16 %v1474_v4, %v1466_v2  ;;  %v1569_v2 = vld [vmem:[#allocation2 + $0x2d48] sm:$0xff]  ;;  %v1571_v4 = vld [vmem:[#allocation2 + $0x2d58] sm:$0xff] }
 0x19d   :  { %7304 = vmatprep.subr.bf16.mxu1 %v7303_v21  ;;  %v1419_v21 = vld [vmem:[#allocation2 + $0x2898] sm:$0xff]  ;;  %v7325_v25 = vpack.c.bf16 %v1410_v18, %v1402_v16  ;;  %v1482_v14 = vld [vmem:[#allocation2 + $0x2a90] sm:$0xff]  ;;  %v7343_v15 = vpack.c.bf16 %v1491_v8, %v1483_v7  ;;  %v1505_v18 = vld [vmem:[#allocation2 + $0x2b48] sm:$0xff] }
 0x19e   :  { %v7327_v30 = vpack.c.bf16 %v1427_v22, %v1419_v21  ;;  %v1490_v16 = vld [vmem:[#allocation2 + $0x2ad0] sm:$0xff]  ;;  %v1560_v8 = vld [vmem:[#allocation2 + $0x2d00] sm:$0xff] }
 0x19f   :  { %6730 = vmatpush1.bf16.msra.mxu0 %v6729_v27  ;;  %v1416_v27 = vld [vmem:[#allocation2 + $0x2880] sm:$0xff]  ;;  %v7345_v22 = vpack.c.bf16 %v1490_v16, %v1482_v14  ;;  %v1585_v14 = vld [vmem:[#allocation2 + $0x2dc8] sm:$0xff]  ;;  %v1587_v16 = vld [vmem:[#allocation2 + $0x2dd8] sm:$0xff] }
 0x1a0   :  { %7306 = vmatpush1.bf16.msra.mxu1 %v7305_v28  ;;  %6732 = vmatprep.subr.bf16.mxu0 %v6731_v29  ;;  %v1424_v28 = vld [vmem:[#allocation2 + $0x28c0] sm:$0xff]  ;;  %v1418_v29 = vld [vmem:[#allocation2 + $0x2890] sm:$0xff] }
 0x1a1   :  { %7308 = vmatprep.subr.bf16.mxu1 %v7307_v33  ;;  %v1441_v33 = vld [vmem:[#allocation2 + $0x2948] sm:$0xff]  ;;  %v6753_v37 = vpack.c.bf16 %v1424_v28, %v1416_v27  ;;  %v7329_v38 = vpack.c.bf16 %v1426_v31, %v1418_v29  ;;  %v7347_v27 = vpack.c.bf16 %v1507_v20, %v1499_v19  ;;  %v1506_v28 = vld [vmem:[#allocation2 + $0x2b50] sm:$0xff]  ;;  %v1515_v31 = vld [vmem:[#allocation2 + $0x2b98] sm:$0xff] }
 0x1a2   :  { %v1513_v29 = vld [vmem:[#allocation2 + $0x2b88] sm:$0xff]  ;;  %v1576_v20 = vld [vmem:[#allocation2 + $0x2d80] sm:$0xff] }
 0x1a3   :  { %6734 = vmatpush1.bf16.msra.mxu0 %v6733_v39  ;;  %v6755_v39 = vpack.c.bf16 %v1441_v33, %v1433_v32  ;;  %v1523_v32 = vld [vmem:[#allocation2 + $0x2bd8] sm:$0xff] }
 0x1a4   :  { %7310 = vmatpush1.bf16.msra.mxu1 %v7309_v40  ;;  %6736 = vmatprep.subr.bf16.mxu0 %v6735_v41  ;;  %v1432_v40 = vld [vmem:[#allocation2 + $0x2900] sm:$0xff] }
 0x1a5   :  { %7312 = vmatprep.subr.bf16.mxu1 %v7311_v45  ;;  %v1440_v41 = vld [vmem:[#allocation2 + $0x2940] sm:$0xff]  ;;  %v1449_v45 = vld [vmem:[#allocation2 + $0x2988] sm:$0xff] }
 0x1a6   :  { %v6757_v49 = vpack.c.bf16 %v1440_v41, %v1432_v40  ;;  %v1522_v40 = vld [vmem:[#allocation2 + $0x2bd0] sm:$0xff]  ;;  %v1529_v41 = vld [vmem:[#allocation2 + $0x2c08] sm:$0xff] }
 0x1a7   :  { %6738 = vmatpush1.bf16.msra.mxu0 %v6737_v51  ;;  %v6759_v51 = vpack.c.bf16 %v1457_v46, %v1449_v45  ;;  %v6779_v47 = vpack.c.bf16 %v1537_v42, %v1529_v41 }
 0x1a8   :  { %7314 = vmatpush1.bf16.msra.mxu1 %v7313_v52  ;;  %6740 = vmatprep.subr.bf16.mxu0 %v6739_v53  ;;  %v1448_v52 = vld [vmem:[#allocation2 + $0x2980] sm:$0xff] }
 0x1a9   :  { %7316 = vmatprep.subr.bf16.mxu1 %v7315_v57  ;;  %v1456_v53 = vld [vmem:[#allocation2 + $0x29c0] sm:$0xff]  ;;  %v1465_v57 = vld [vmem:[#allocation2 + $0x2a08] sm:$0xff] }
 0x1aa   :  { %v6761_v61 = vpack.c.bf16 %v1456_v53, %v1448_v52  ;;  %v1538_v52 = vld [vmem:[#allocation2 + $0x2c50] sm:$0xff]  ;;  %v1545_v53 = vld [vmem:[#allocation2 + $0x2c88] sm:$0xff] }
 0x1ab   :  { %6742 = vmatpush1.bf16.msra.mxu0 %v6741_v63  ;;  %v6763_v63 = vpack.c.bf16 %v1473_v58, %v1465_v57  ;;  %v6783_v59 = vpack.c.bf16 %v1553_v54, %v1545_v53 }
 0x1ac   :  { %7318 = vmatpush1.bf16.msra.mxu1 %v7317_v0  ;;  %6744 = vmatprep.subr.bf16.mxu0 %v6743_v1  ;;  %v1464_v0 = vld [vmem:[#allocation2 + $0x2a00] sm:$0xff] }
 0x1ad   :  { %7320 = vmatprep.subr.bf16.mxu1 %v7319_v5  ;;  %v1472_v1 = vld [vmem:[#allocation2 + $0x2a40] sm:$0xff]  ;;  %v1481_v5 = vld [vmem:[#allocation2 + $0x2a88] sm:$0xff] }
 0x1ae   :  { %v6765_v9 = vpack.c.bf16 %v1472_v1, %v1464_v0  ;;  %v1554_v0 = vld [vmem:[#allocation2 + $0x2cd0] sm:$0xff]  ;;  %v1561_v1 = vld [vmem:[#allocation2 + $0x2d08] sm:$0xff] }
 0x1af   :  { %6746 = vmatpush1.bf16.msra.mxu0 %v6745_v11  ;;  %v6767_v11 = vpack.c.bf16 %v1489_v6, %v1481_v5  ;;  %v6787_v7 = vpack.c.bf16 %v1569_v2, %v1561_v1 }
 0x1b0   :  { %7322 = vmatpush1.bf16.msra.mxu1 %v7321_v12  ;;  %6748 = vmatprep.subr.bf16.mxu0 %v6747_v13  ;;  %v1480_v12 = vld [vmem:[#allocation2 + $0x2a80] sm:$0xff] }
 0x1b1   :  { %7324 = vmatprep.subr.bf16.mxu1 %v7323_v17  ;;  %v1488_v13 = vld [vmem:[#allocation2 + $0x2ac0] sm:$0xff]  ;;  %v1497_v17 = vld [vmem:[#allocation2 + $0x2b08] sm:$0xff] }
 0x1b2   :  { %2815 = vmatmul.mubr.f32.vlgmr.msra.gmra.mrb[0].mxu0 %v110_v23  ;;  %v6769_v21 = vpack.c.bf16 %v1488_v13, %v1480_v12  ;;  %v1570_v12 = vld [vmem:[#allocation2 + $0x2d50] sm:$0xff]  ;;  %v1577_v13 = vld [vmem:[#allocation2 + $0x2d88] sm:$0xff] }
 0x1b3   :  { %6750 = vmatpush1.bf16.msra.mxu0 %v6749_v24  ;;  %3454 = vmatmul.mubr.f32.vlgmr.msra.gmra.mrb[0].mxu1 %v110_v23  ;;  %v6771_v23 = vpack.c.bf16 %v1505_v18, %v1497_v17  ;;  %v1496_v24 = vld [vmem:[#allocation2 + $0x2b00] sm:$0xff]  ;;  %v6791_v19 = vpack.c.bf16 %v1585_v14, %v1577_v13 }
 0x1b4   :  { %7326 = vmatpush1.bf16.msra.mxu1 %v7325_v25  ;;  %6752 = vmatprep.subr.bf16.mxu0 %v6751_v26  ;;  %v1504_v25 = vld [vmem:[#allocation2 + $0x2b40] sm:$0xff]  ;;  %v1498_v26 = vld [vmem:[#allocation2 + $0x2b10] sm:$0xff] }
 0x1b5   :  { %7328 = vmatprep.subr.bf16.mxu1 %v7327_v30  ;;  %2885 = vmatprep.mubr.f32.mxu0 %v113_v36  ;;  %v1521_v30 = vld [vmem:[#allocation2 + $0x2bc8] sm:$0xff]  ;;  %v6773_v33 = vpack.c.bf16 %v1504_v25, %v1496_v24  ;;  %v7349_v34 = vpack.c.bf16 %v1506_v28, %v1498_v26  ;;  %v1586_v24 = vld [vmem:[#allocation2 + $0x2dd0] sm:$0xff]  ;;  %v1603_v28 = vld [vmem:[#allocation2 + $0x2e58] sm:$0xff] }
 0x1b6   :  { %3524 = vmatprep.mubr.f32.mxu1 %v113_v36  ;;  %v6775_v35 = vpack.c.bf16 %v1521_v30, %v1513_v29  ;;  %v1512_v36 = vld [vmem:[#allocation2 + $0x2b80] sm:$0xff]  ;;  %v1593_v25 = vld [vmem:[#allocation2 + $0x2e08] sm:$0xff] }
 0x1b7   :  { %6754 = vmatpush1.bf16.msra.mxu0 %v6753_v37  ;;  %v1520_v37 = vld [vmem:[#allocation2 + $0x2bc0] sm:$0xff]  ;;  %v1601_v26 = vld [vmem:[#allocation2 + $0x2e48] sm:$0xff] }
 0x1b8   :  { %7330 = vmatpush1.bf16.msra.mxu1 %v7329_v38  ;;  %6756 = vmatprep.subr.bf16.mxu0 %v6755_v39  ;;  %v1514_v38 = vld [vmem:[#allocation2 + $0x2b90] sm:$0xff]  ;;  %v7351_v39 = vpack.c.bf16 %v1523_v32, %v1515_v31  ;;  %v6777_v45 = vpack.c.bf16 %v1520_v37, %v1512_v36  ;;  %v6795_v31 = vpack.c.bf16 %v1601_v26, %v1593_v25  ;;  %v1592_v32 = vld [vmem:[#allocation2 + $0x2e00] sm:$0xff]  ;;  %v1609_v37 = vld [vmem:[#allocation2 + $0x2e88] sm:$0xff] }
 0x1b9   :  { %7332 = vmatprep.subr.bf16.mxu1 %v7331_v43  ;;  %v1531_v43 = vld [vmem:[#allocation2 + $0x2c18] sm:$0xff]  ;;  %v7353_v46 = vpack.c.bf16 %v1522_v40, %v1514_v38  ;;  %v1602_v36 = vld [vmem:[#allocation2 + $0x2e50] sm:$0xff]  ;;  %v1617_v38 = vld [vmem:[#allocation2 + $0x2ec8] sm:$0xff] }
 0x1ba   :  { %v1619_v40 = vld [vmem:[#allocation2 + $0x2ed8] sm:$0xff]  ;;  %v112_v25 = vld [vmem:[%s9854_s0 + $0x50] sm:$0xff] }
 0x1bb   :  { %6758 = vmatpush1.bf16.msra.mxu0 %v6757_v49  ;;  %v1536_v49 = vld [vmem:[#allocation2 + $0x2c40] sm:$0xff] }
 0x1bc   :  { %7334 = vmatpush1.bf16.msra.mxu1 %v7333_v50  ;;  %6760 = vmatprep.subr.bf16.mxu0 %v6759_v51  ;;  %v1530_v50 = vld [vmem:[#allocation2 + $0x2c10] sm:$0xff]  ;;  %v7355_v51 = vpack.c.bf16 %v1539_v44, %v1531_v43  ;;  %v6781_v57 = vpack.c.bf16 %v1536_v49, %v1528_v48  ;;  %v6799_v43 = vpack.c.bf16 %v1617_v38, %v1609_v37  ;;  %v1608_v44 = vld [vmem:[#allocation2 + $0x2e80] sm:$0xff]  ;;  %v1625_v49 = vld [vmem:[#allocation2 + $0x2f08] sm:$0xff] }
 0x1bd   :  { %7336 = vmatprep.subr.bf16.mxu1 %v7335_v55  ;;  %v1547_v55 = vld [vmem:[#allocation2 + $0x2c98] sm:$0xff]  ;;  %v7357_v58 = vpack.c.bf16 %v1538_v52, %v1530_v50  ;;  %v1618_v48 = vld [vmem:[#allocation2 + $0x2ed0] sm:$0xff]  ;;  %v1633_v50 = vld [vmem:[#allocation2 + $0x2f48] sm:$0xff] }
 0x1be   :  { %v1635_v52 = vld [vmem:[#allocation2 + $0x2f58] sm:$0xff]  ;;  %v115_v38 = vld [vmem:[%s9854_s0 + $0x68] sm:$0xff] }
 0x1bf   :  { %6762 = vmatpush1.bf16.msra.mxu0 %v6761_v61  ;;  %v1552_v61 = vld [vmem:[#allocation2 + $0x2cc0] sm:$0xff]  ;;  %v1699_v37 = vld [vmem:[#allocation2 + $0x3158] sm:$0xff] }
 0x1c0   :  { %7338 = vmatpush1.bf16.msra.mxu1 %v7337_v62  ;;  %6764 = vmatprep.subr.bf16.mxu0 %v6763_v63  ;;  %v1546_v62 = vld [vmem:[#allocation2 + $0x2c90] sm:$0xff]  ;;  %v7359_v63 = vpack.c.bf16 %v1555_v56, %v1547_v55  ;;  %v6785_v5 = vpack.c.bf16 %v1552_v61, %v1544_v60  ;;  %v6803_v55 = vpack.c.bf16 %v1633_v50, %v1625_v49  ;;  %v1624_v56 = vld [vmem:[#allocation2 + $0x2f00] sm:$0xff]  ;;  %v1641_v61 = vld [vmem:[#allocation2 + $0x2f88] sm:$0xff] }
 0x1c1   :  { %7340 = vmatprep.subr.bf16.mxu1 %v7339_v3  ;;  %v1563_v3 = vld [vmem:[#allocation2 + $0x2d18] sm:$0xff]  ;;  %v7361_v6 = vpack.c.bf16 %v1554_v0, %v1546_v62  ;;  %v1634_v60 = vld [vmem:[#allocation2 + $0x2f50] sm:$0xff]  ;;  %v1649_v62 = vld [vmem:[#allocation2 + $0x2fc8] sm:$0xff] }
 0x1c2   :  { %v1651_v0 = vld [vmem:[#allocation2 + $0x2fd8] sm:$0xff] }
 0x1c3   :  { %6766 = vmatpush1.bf16.msra.mxu0 %v6765_v9  ;;  %v1568_v9 = vld [vmem:[#allocation2 + $0x2d40] sm:$0xff]  ;;  %v1707_v49 = vld [vmem:[#allocation2 + $0x3198] sm:$0xff] }
 0x1c4   :  { %7342 = vmatpush1.bf16.msra.mxu1 %v7341_v10  ;;  %6768 = vmatprep.subr.bf16.mxu0 %v6767_v11  ;;  %v1562_v10 = vld [vmem:[#allocation2 + $0x2d10] sm:$0xff]  ;;  %v7363_v11 = vpack.c.bf16 %v1571_v4, %v1563_v3  ;;  %v6789_v17 = vpack.c.bf16 %v1568_v9, %v1560_v8  ;;  %v6807_v3 = vpack.c.bf16 %v1649_v62, %v1641_v61  ;;  %v1640_v4 = vld [vmem:[#allocation2 + $0x2f80] sm:$0xff]  ;;  %v1657_v9 = vld [vmem:[#allocation2 + $0x3008] sm:$0xff] }
 0x1c5   :  { %7344 = vmatprep.subr.bf16.mxu1 %v7343_v15  ;;  %v1579_v15 = vld [vmem:[#allocation2 + $0x2d98] sm:$0xff]  ;;  %v7365_v18 = vpack.c.bf16 %v1570_v12, %v1562_v10  ;;  %v1650_v8 = vld [vmem:[#allocation2 + $0x2fd0] sm:$0xff]  ;;  %v1665_v10 = vld [vmem:[#allocation2 + $0x3048] sm:$0xff] }
 0x1c6   :  { %v1667_v12 = vld [vmem:[#allocation2 + $0x3058] sm:$0xff] }
 0x1c7   :  { %6770 = vmatpush1.bf16.msra.mxu0 %v6769_v21  ;;  %v1584_v21 = vld [vmem:[#allocation2 + $0x2dc0] sm:$0xff]  ;;  %v1715_v50 = vld [vmem:[#allocation2 + $0x31d8] sm:$0xff] }
 0x1c8   :  { %7346 = vmatpush1.bf16.msra.mxu1 %v7345_v22  ;;  %6772 = vmatprep.subr.bf16.mxu0 %v6771_v23  ;;  %v1578_v22 = vld [vmem:[#allocation2 + $0x2d90] sm:$0xff]  ;;  %v7367_v23 = vpack.c.bf16 %v1587_v16, %v1579_v15  ;;  %v6793_v29 = vpack.c.bf16 %v1584_v21, %v1576_v20  ;;  %v6811_v15 = vpack.c.bf16 %v1665_v10, %v1657_v9  ;;  %v1656_v16 = vld [vmem:[#allocation2 + $0x3000] sm:$0xff]  ;;  %v1673_v21 = vld [vmem:[#allocation2 + $0x3088] sm:$0xff] }
 0x1c9   :  { %7348 = vmatprep.subr.bf16.mxu1 %v7347_v27  ;;  %v1595_v27 = vld [vmem:[#allocation2 + $0x2e18] sm:$0xff]  ;;  %v7369_v30 = vpack.c.bf16 %v1586_v24, %v1578_v22  ;;  %v1666_v20 = vld [vmem:[#allocation2 + $0x3050] sm:$0xff]  ;;  %v1681_v22 = vld [vmem:[#allocation2 + $0x30c8] sm:$0xff] }
 0x1ca   :  { %v1683_v24 = vld [vmem:[#allocation2 + $0x30d8] sm:$0xff] }
 0x1cb   :  { %6774 = vmatpush1.bf16.msra.mxu0 %v6773_v33  ;;  %v1600_v33 = vld [vmem:[#allocation2 + $0x2e40] sm:$0xff]  ;;  %v1723_v61 = vld [vmem:[#allocation2 + $0x3218] sm:$0xff] }
 0x1cc   :  { %7350 = vmatpush1.bf16.msra.mxu1 %v7349_v34  ;;  %6776 = vmatprep.subr.bf16.mxu0 %v6775_v35  ;;  %v1594_v34 = vld [vmem:[#allocation2 + $0x2e10] sm:$0xff]  ;;  %v7371_v35 = vpack.c.bf16 %v1603_v28, %v1595_v27  ;;  %v6797_v41 = vpack.c.bf16 %v1600_v33, %v1592_v32  ;;  %v6815_v28 = vpack.c.bf16 %v1681_v22, %v1673_v21  ;;  %v1731_v62 = vld [vmem:[#allocation2 + $0x3258] sm:$0xff] }
 0x1cd   :  { %7352 = vmatprep.subr.bf16.mxu1 %v7351_v39  ;;  %v1611_v39 = vld [vmem:[#allocation2 + $0x2e98] sm:$0xff]  ;;  %v7373_v42 = vpack.c.bf16 %v1602_v36, %v1594_v34  ;;  %v1682_v33 = vld [vmem:[#allocation2 + $0x30d0] sm:$0xff]  ;;  %v1689_v34 = vld [vmem:[#allocation2 + $0x3108] sm:$0xff] }
 0x1ce   :  { %v1691_v36 = vld [vmem:[#allocation2 + $0x3118] sm:$0xff] }
 0x1cf   :  { %6778 = vmatpush1.bf16.msra.mxu0 %v6777_v45  ;;  %v1616_v45 = vld [vmem:[#allocation2 + $0x2ec0] sm:$0xff]  ;;  %v1739_v9 = vld [vmem:[#allocation2 + $0x3298] sm:$0xff] }
 0x1d0   :  { %7354 = vmatpush1.bf16.msra.mxu1 %v7353_v46  ;;  %6780 = vmatprep.subr.bf16.mxu0 %v6779_v47  ;;  %v1610_v46 = vld [vmem:[#allocation2 + $0x2e90] sm:$0xff]  ;;  %v7375_v47 = vpack.c.bf16 %v1619_v40, %v1611_v39  ;;  %v6801_v53 = vpack.c.bf16 %v1616_v45, %v1608_v44  ;;  %v7395_v45 = vpack.c.bf16 %v1699_v37, %v1691_v36  ;;  %v1747_v10 = vld [vmem:[#allocation2 + $0x32d8] sm:$0xff] }
 0x1d1   :  { %7356 = vmatprep.subr.bf16.mxu1 %v7355_v51  ;;  %v1627_v51 = vld [vmem:[#allocation2 + $0x2f18] sm:$0xff]  ;;  %v7377_v54 = vpack.c.bf16 %v1618_v48, %v1610_v46  ;;  %v1690_v44 = vld [vmem:[#allocation2 + $0x3110] sm:$0xff]  ;;  %v1713_v48 = vld [vmem:[#allocation2 + $0x31c8] sm:$0xff] }
 0x1d2   :  { %v1698_v46 = vld [vmem:[#allocation2 + $0x3150] sm:$0xff]  ;;  %v1755_v21 = vld [vmem:[#allocation2 + $0x3318] sm:$0xff] }
 0x1d3   :  { %6782 = vmatpush1.bf16.msra.mxu0 %v6781_v57  ;;  %v1632_v57 = vld [vmem:[#allocation2 + $0x2f40] sm:$0xff]  ;;  %v1763_v22 = vld [vmem:[#allocation2 + $0x3358] sm:$0xff] }
 0x1d4   :  { %7358 = vmatpush1.bf16.msra.mxu1 %v7357_v58  ;;  %6784 = vmatprep.subr.bf16.mxu0 %v6783_v59  ;;  %v1626_v58 = vld [vmem:[#allocation2 + $0x2f10] sm:$0xff]  ;;  %v7379_v59 = vpack.c.bf16 %v1635_v52, %v1627_v51  ;;  %v6805_v1 = vpack.c.bf16 %v1632_v57, %v1624_v56  ;;  %v7397_v52 = vpack.c.bf16 %v1698_v46, %v1690_v44  ;;  %v1793_v44 = vld [vmem:[#allocation2 + $0x3448] sm:$0xff]  ;;  %v1795_v46 = vld [vmem:[#allocation2 + $0x3458] sm:$0xff] }
 0x1d5   :  { %7360 = vmatprep.subr.bf16.mxu1 %v7359_v63  ;;  %v1643_v63 = vld [vmem:[#allocation2 + $0x2f98] sm:$0xff]  ;;  %v7381_v2 = vpack.c.bf16 %v1634_v60, %v1626_v58  ;;  %v1706_v56 = vld [vmem:[#allocation2 + $0x3190] sm:$0xff]  ;;  %v7399_v57 = vpack.c.bf16 %v1715_v50, %v1707_v49  ;;  %v1729_v60 = vld [vmem:[#allocation2 + $0x3248] sm:$0xff] }
 0x1d6   :  { %v1714_v58 = vld [vmem:[#allocation2 + $0x31d0] sm:$0xff]  ;;  %v1784_v50 = vld [vmem:[#allocation2 + $0x3400] sm:$0xff] }
 0x1d7   :  { %6786 = vmatpush1.bf16.msra.mxu0 %v6785_v5  ;;  %v1648_v5 = vld [vmem:[#allocation2 + $0x2fc0] sm:$0xff] }
 0x1d8   :  { %7362 = vmatpush1.bf16.msra.mxu1 %v7361_v6  ;;  %6788 = vmatprep.subr.bf16.mxu0 %v6787_v7  ;;  %v1642_v6 = vld [vmem:[#allocation2 + $0x2f90] sm:$0xff]  ;;  %v7383_v7 = vpack.c.bf16 %v1651_v0, %v1643_v63  ;;  %v6809_v13 = vpack.c.bf16 %v1648_v5, %v1640_v4  ;;  %v7401_v0 = vpack.c.bf16 %v1714_v58, %v1706_v56  ;;  %v1809_v56 = vld [vmem:[#allocation2 + $0x34c8] sm:$0xff]  ;;  %v1811_v58 = vld [vmem:[#allocation2 + $0x34d8] sm:$0xff] }
 0x1d9   :  { %7364 = vmatprep.subr.bf16.mxu1 %v7363_v11  ;;  %v1659_v11 = vld [vmem:[#allocation2 + $0x3018] sm:$0xff]  ;;  %v7385_v14 = vpack.c.bf16 %v1650_v8, %v1642_v6  ;;  %v1722_v4 = vld [vmem:[#allocation2 + $0x3210] sm:$0xff]  ;;  %v7403_v5 = vpack.c.bf16 %v1731_v62, %v1723_v61  ;;  %v1745_v8 = vld [vmem:[#allocation2 + $0x32c8] sm:$0xff] }
 0x1da   :  { %v1730_v6 = vld [vmem:[#allocation2 + $0x3250] sm:$0xff]  ;;  %v1800_v62 = vld [vmem:[#allocation2 + $0x3480] sm:$0xff] }
 0x1db   :  { %6790 = vmatpush1.bf16.msra.mxu0 %v6789_v17  ;;  %v1664_v17 = vld [vmem:[#allocation2 + $0x3040] sm:$0xff] }
 0x1dc   :  { %7366 = vmatpush1.bf16.msra.mxu1 %v7365_v18  ;;  %6792 = vmatprep.subr.bf16.mxu0 %v6791_v19  ;;  %v1658_v18 = vld [vmem:[#allocation2 + $0x3010] sm:$0xff]  ;;  %v7387_v19 = vpack.c.bf16 %v1667_v12, %v1659_v11  ;;  %v6813_v26 = vpack.c.bf16 %v1664_v17, %v1656_v16  ;;  %v7405_v12 = vpack.c.bf16 %v1730_v6, %v1722_v4  ;;  %v1825_v4 = vld [vmem:[#allocation2 + $0x3548] sm:$0xff]  ;;  %v1827_v6 = vld [vmem:[#allocation2 + $0x3558] sm:$0xff] }
 0x1dd   :  { %7368 = vmatprep.subr.bf16.mxu1 %v7367_v23  ;;  %v1675_v23 = vld [vmem:[#allocation2 + $0x3098] sm:$0xff]  ;;  %v7389_v27 = vpack.c.bf16 %v1666_v20, %v1658_v18  ;;  %v1738_v16 = vld [vmem:[#allocation2 + $0x3290] sm:$0xff]  ;;  %v7407_v17 = vpack.c.bf16 %v1747_v10, %v1739_v9  ;;  %v1761_v20 = vld [vmem:[#allocation2 + $0x3348] sm:$0xff] }
 0x1de   :  { %v7391_v32 = vpack.c.bf16 %v1683_v24, %v1675_v23  ;;  %v1746_v18 = vld [vmem:[#allocation2 + $0x32d0] sm:$0xff]  ;;  %v1816_v10 = vld [vmem:[#allocation2 + $0x3500] sm:$0xff] }
 0x1df   :  { %6794 = vmatpush1.bf16.msra.mxu0 %v6793_v29  ;;  %v1672_v29 = vld [vmem:[#allocation2 + $0x3080] sm:$0xff]  ;;  %v7409_v24 = vpack.c.bf16 %v1746_v18, %v1738_v16  ;;  %v1841_v16 = vld [vmem:[#allocation2 + $0x35c8] sm:$0xff]  ;;  %v1843_v18 = vld [vmem:[#allocation2 + $0x35d8] sm:$0xff] }
 0x1e0   :  { %7370 = vmatpush1.bf16.msra.mxu1 %v7369_v30  ;;  %6796 = vmatprep.subr.bf16.mxu0 %v6795_v31  ;;  %v1680_v30 = vld [vmem:[#allocation2 + $0x30c0] sm:$0xff]  ;;  %v1674_v31 = vld [vmem:[#allocation2 + $0x3090] sm:$0xff] }
 0x1e1   :  { %7372 = vmatprep.subr.bf16.mxu1 %v7371_v35  ;;  %v1697_v35 = vld [vmem:[#allocation2 + $0x3148] sm:$0xff]  ;;  %v6817_v39 = vpack.c.bf16 %v1680_v30, %v1672_v29  ;;  %v7393_v40 = vpack.c.bf16 %v1682_v33, %v1674_v31  ;;  %v7411_v29 = vpack.c.bf16 %v1763_v22, %v1755_v21  ;;  %v1762_v30 = vld [vmem:[#allocation2 + $0x3350] sm:$0xff]  ;;  %v1771_v33 = vld [vmem:[#allocation2 + $0x3398] sm:$0xff] }
 0x1e2   :  { %v1769_v31 = vld [vmem:[#allocation2 + $0x3388] sm:$0xff]  ;;  %v1832_v22 = vld [vmem:[#allocation2 + $0x3580] sm:$0xff] }
 0x1e3   :  { %6798 = vmatpush1.bf16.msra.mxu0 %v6797_v41  ;;  %v6819_v41 = vpack.c.bf16 %v1697_v35, %v1689_v34  ;;  %v1779_v34 = vld [vmem:[#allocation2 + $0x33d8] sm:$0xff] }
 0x1e4   :  { %7374 = vmatpush1.bf16.msra.mxu1 %v7373_v42  ;;  %6800 = vmatprep.subr.bf16.mxu0 %v6799_v43  ;;  %v1688_v42 = vld [vmem:[#allocation2 + $0x3100] sm:$0xff] }
 0x1e5   :  { %7376 = vmatprep.subr.bf16.mxu1 %v7375_v47  ;;  %v1696_v43 = vld [vmem:[#allocation2 + $0x3140] sm:$0xff]  ;;  %v1705_v47 = vld [vmem:[#allocation2 + $0x3188] sm:$0xff] }
 0x1e6   :  { %v6821_v51 = vpack.c.bf16 %v1696_v43, %v1688_v42  ;;  %v1778_v42 = vld [vmem:[#allocation2 + $0x33d0] sm:$0xff]  ;;  %v1785_v43 = vld [vmem:[#allocation2 + $0x3408] sm:$0xff] }
 0x1e7   :  { %6802 = vmatpush1.bf16.msra.mxu0 %v6801_v53  ;;  %v6823_v53 = vpack.c.bf16 %v1713_v48, %v1705_v47  ;;  %v6843_v49 = vpack.c.bf16 %v1793_v44, %v1785_v43 }
 0x1e8   :  { %7378 = vmatpush1.bf16.msra.mxu1 %v7377_v54  ;;  %6804 = vmatprep.subr.bf16.mxu0 %v6803_v55  ;;  %v1704_v54 = vld [vmem:[#allocation2 + $0x3180] sm:$0xff] }
 0x1e9   :  { %7380 = vmatprep.subr.bf16.mxu1 %v7379_v59  ;;  %v1712_v55 = vld [vmem:[#allocation2 + $0x31c0] sm:$0xff]  ;;  %v1721_v59 = vld [vmem:[#allocation2 + $0x3208] sm:$0xff] }
 0x1ea   :  { %v6825_v63 = vpack.c.bf16 %v1712_v55, %v1704_v54  ;;  %v1794_v54 = vld [vmem:[#allocation2 + $0x3450] sm:$0xff]  ;;  %v1801_v55 = vld [vmem:[#allocation2 + $0x3488] sm:$0xff] }
 0x1eb   :  { %6806 = vmatpush1.bf16.msra.mxu0 %v6805_v1  ;;  %v6827_v1 = vpack.c.bf16 %v1729_v60, %v1721_v59  ;;  %v6847_v61 = vpack.c.bf16 %v1809_v56, %v1801_v55 }
 0x1ec   :  { %7382 = vmatpush1.bf16.msra.mxu1 %v7381_v2  ;;  %6808 = vmatprep.subr.bf16.mxu0 %v6807_v3  ;;  %v1720_v2 = vld [vmem:[#allocation2 + $0x3200] sm:$0xff] }
 0x1ed   :  { %7384 = vmatprep.subr.bf16.mxu1 %v7383_v7  ;;  %v1728_v3 = vld [vmem:[#allocation2 + $0x3240] sm:$0xff]  ;;  %v1737_v7 = vld [vmem:[#allocation2 + $0x3288] sm:$0xff] }
 0x1ee   :  { %v6829_v11 = vpack.c.bf16 %v1728_v3, %v1720_v2  ;;  %v1810_v2 = vld [vmem:[#allocation2 + $0x34d0] sm:$0xff]  ;;  %v1817_v3 = vld [vmem:[#allocation2 + $0x3508] sm:$0xff] }
 0x1ef   :  { %6810 = vmatpush1.bf16.msra.mxu0 %v6809_v13  ;;  %v6831_v13 = vpack.c.bf16 %v1745_v8, %v1737_v7  ;;  %v6851_v9 = vpack.c.bf16 %v1825_v4, %v1817_v3 }
 0x1f0   :  { %7386 = vmatpush1.bf16.msra.mxu1 %v7385_v14  ;;  %6812 = vmatprep.subr.bf16.mxu0 %v6811_v15  ;;  %v1736_v14 = vld [vmem:[#allocation2 + $0x3280] sm:$0xff] }
 0x1f1   :  { %7388 = vmatprep.subr.bf16.mxu1 %v7387_v19  ;;  %v1744_v15 = vld [vmem:[#allocation2 + $0x32c0] sm:$0xff]  ;;  %v1753_v19 = vld [vmem:[#allocation2 + $0x3308] sm:$0xff] }
 0x1f2   :  { %2886 = vmatmul.mubr.f32.vlgmr.msra.gmra.mrb[0].mxu0 %v112_v25  ;;  %v6833_v23 = vpack.c.bf16 %v1744_v15, %v1736_v14  ;;  %v1826_v14 = vld [vmem:[#allocation2 + $0x3550] sm:$0xff]  ;;  %v1833_v15 = vld [vmem:[#allocation2 + $0x3588] sm:$0xff] }
 0x1f3   :  { %6814 = vmatpush1.bf16.msra.mxu0 %v6813_v26  ;;  %3525 = vmatmul.mubr.f32.vlgmr.msra.gmra.mrb[0].mxu1 %v112_v25  ;;  %v6835_v25 = vpack.c.bf16 %v1761_v20, %v1753_v19  ;;  %v1752_v26 = vld [vmem:[#allocation2 + $0x3300] sm:$0xff]  ;;  %v6855_v21 = vpack.c.bf16 %v1841_v16, %v1833_v15 }
 0x1f4   :  { %7390 = vmatpush1.bf16.msra.mxu1 %v7389_v27  ;;  %6816 = vmatprep.subr.bf16.mxu0 %v6815_v28  ;;  %v1760_v27 = vld [vmem:[#allocation2 + $0x3340] sm:$0xff]  ;;  %v1754_v28 = vld [vmem:[#allocation2 + $0x3310] sm:$0xff] }
 0x1f5   :  { %7392 = vmatprep.subr.bf16.mxu1 %v7391_v32  ;;  %2956 = vmatprep.mubr.f32.mxu0 %v115_v38  ;;  %v1777_v32 = vld [vmem:[#allocation2 + $0x33c8] sm:$0xff]  ;;  %v6837_v35 = vpack.c.bf16 %v1760_v27, %v1752_v26  ;;  %v7413_v36 = vpack.c.bf16 %v1762_v30, %v1754_v28  ;;  %v1842_v26 = vld [vmem:[#allocation2 + $0x35d0] sm:$0xff]  ;;  %v1859_v30 = vld [vmem:[#allocation2 + $0x3658] sm:$0xff] }
 0x1f6   :  { %3595 = vmatprep.mubr.f32.mxu1 %v115_v38  ;;  %v6839_v37 = vpack.c.bf16 %v1777_v32, %v1769_v31  ;;  %v1768_v38 = vld [vmem:[#allocation2 + $0x3380] sm:$0xff]  ;;  %v1849_v27 = vld [vmem:[#allocation2 + $0x3608] sm:$0xff] }
 0x1f7   :  { %6818 = vmatpush1.bf16.msra.mxu0 %v6817_v39  ;;  %v1776_v39 = vld [vmem:[#allocation2 + $0x33c0] sm:$0xff]  ;;  %v1857_v28 = vld [vmem:[#allocation2 + $0x3648] sm:$0xff] }
 0x1f8   :  { %7394 = vmatpush1.bf16.msra.mxu1 %v7393_v40  ;;  %6820 = vmatprep.subr.bf16.mxu0 %v6819_v41  ;;  %v1770_v40 = vld [vmem:[#allocation2 + $0x3390] sm:$0xff]  ;;  %v7415_v41 = vpack.c.bf16 %v1779_v34, %v1771_v33  ;;  %v6841_v47 = vpack.c.bf16 %v1776_v39, %v1768_v38  ;;  %v6859_v33 = vpack.c.bf16 %v1857_v28, %v1849_v27  ;;  %v1848_v34 = vld [vmem:[#allocation2 + $0x3600] sm:$0xff]  ;;  %v1865_v39 = vld [vmem:[#allocation2 + $0x3688] sm:$0xff] }
 0x1f9   :  { %7396 = vmatprep.subr.bf16.mxu1 %v7395_v45  ;;  %v1787_v45 = vld [vmem:[#allocation2 + $0x3418] sm:$0xff]  ;;  %v7417_v48 = vpack.c.bf16 %v1778_v42, %v1770_v40  ;;  %v1858_v38 = vld [vmem:[#allocation2 + $0x3650] sm:$0xff]  ;;  %v1873_v40 = vld [vmem:[#allocation2 + $0x36c8] sm:$0xff] }
 0x1fa   :  { %v1875_v42 = vld [vmem:[#allocation2 + $0x36d8] sm:$0xff]  ;;  %v114_v27 = vld [vmem:[%s9854_s0 + $0x60] sm:$0xff] }
 0x1fb   :  { %6822 = vmatpush1.bf16.msra.mxu0 %v6821_v51  ;;  %v1792_v51 = vld [vmem:[#allocation2 + $0x3440] sm:$0xff] }
 0x1fc   :  { %7398 = vmatpush1.bf16.msra.mxu1 %v7397_v52  ;;  %6824 = vmatprep.subr.bf16.mxu0 %v6823_v53  ;;  %v1786_v52 = vld [vmem:[#allocation2 + $0x3410] sm:$0xff]  ;;  %v7419_v53 = vpack.c.bf16 %v1795_v46, %v1787_v45  ;;  %v6845_v59 = vpack.c.bf16 %v1792_v51, %v1784_v50  ;;  %v6863_v45 = vpack.c.bf16 %v1873_v40, %v1865_v39  ;;  %v1864_v46 = vld [vmem:[#allocation2 + $0x3680] sm:$0xff]  ;;  %v1881_v51 = vld [vmem:[#allocation2 + $0x3708] sm:$0xff] }
 0x1fd   :  { %7400 = vmatprep.subr.bf16.mxu1 %v7399_v57  ;;  %v1803_v57 = vld [vmem:[#allocation2 + $0x3498] sm:$0xff]  ;;  %v7421_v60 = vpack.c.bf16 %v1794_v54, %v1786_v52  ;;  %v1874_v50 = vld [vmem:[#allocation2 + $0x36d0] sm:$0xff]  ;;  %v1889_v52 = vld [vmem:[#allocation2 + $0x3748] sm:$0xff] }
 0x1fe   :  { %v1891_v54 = vld [vmem:[#allocation2 + $0x3758] sm:$0xff] }
 0x1ff   :  { %6826 = vmatpush1.bf16.msra.mxu0 %v6825_v63  ;;  %v1808_v63 = vld [vmem:[#allocation2 + $0x34c0] sm:$0xff]  ;;  %v1955_v39 = vld [vmem:[#allocation2 + $0x3958] sm:$0xff] }
 0x200   :  { %7402 = vmatpush1.bf16.msra.mxu1 %v7401_v0  ;;  %6828 = vmatprep.subr.bf16.mxu0 %v6827_v1  ;;  %v1802_v0 = vld [vmem:[#allocation2 + $0x3490] sm:$0xff]  ;;  %v7423_v1 = vpack.c.bf16 %v1811_v58, %v1803_v57  ;;  %v6849_v7 = vpack.c.bf16 %v1808_v63, %v1800_v62  ;;  %v6867_v57 = vpack.c.bf16 %v1889_v52, %v1881_v51  ;;  %v1880_v58 = vld [vmem:[#allocation2 + $0x3700] sm:$0xff]  ;;  %v1897_v63 = vld [vmem:[#allocation2 + $0x3788] sm:$0xff] }
 0x201   :  { %7404 = vmatprep.subr.bf16.mxu1 %v7403_v5  ;;  %v1819_v5 = vld [vmem:[#allocation2 + $0x3518] sm:$0xff]  ;;  %v7425_v8 = vpack.c.bf16 %v1810_v2, %v1802_v0  ;;  %v1890_v62 = vld [vmem:[#allocation2 + $0x3750] sm:$0xff]  ;;  %v1905_v0 = vld [vmem:[#allocation2 + $0x37c8] sm:$0xff] }
 0x202   :  { %v1907_v2 = vld [vmem:[#allocation2 + $0x37d8] sm:$0xff] }
 0x203   :  { %6830 = vmatpush1.bf16.msra.mxu0 %v6829_v11  ;;  %v1824_v11 = vld [vmem:[#allocation2 + $0x3540] sm:$0xff]  ;;  %v117_v40 = vld [vmem:[%s9854_s0 + $0x78] sm:$0xff] }
 0x204   :  { %7406 = vmatpush1.bf16.msra.mxu1 %v7405_v12  ;;  %6832 = vmatprep.subr.bf16.mxu0 %v6831_v13  ;;  %v1818_v12 = vld [vmem:[#allocation2 + $0x3510] sm:$0xff]  ;;  %v7427_v13 = vpack.c.bf16 %v1827_v6, %v1819_v5  ;;  %v6853_v19 = vpack.c.bf16 %v1824_v11, %v1816_v10  ;;  %v6871_v5 = vpack.c.bf16 %v1905_v0, %v1897_v63  ;;  %v1896_v6 = vld [vmem:[#allocation2 + $0x3780] sm:$0xff]  ;;  %v1913_v11 = vld [vmem:[#allocation2 + $0x3808] sm:$0xff] }
 0x205   :  { %7408 = vmatprep.subr.bf16.mxu1 %v7407_v17  ;;  %v1835_v17 = vld [vmem:[#allocation2 + $0x3598] sm:$0xff]  ;;  %v7429_v20 = vpack.c.bf16 %v1826_v14, %v1818_v12  ;;  %v1906_v10 = vld [vmem:[#allocation2 + $0x37d0] sm:$0xff]  ;;  %v1921_v12 = vld [vmem:[#allocation2 + $0x3848] sm:$0xff] }
 0x206   :  { %v1923_v14 = vld [vmem:[#allocation2 + $0x3858] sm:$0xff] }
 0x207   :  { %6834 = vmatpush1.bf16.msra.mxu0 %v6833_v23  ;;  %v1840_v23 = vld [vmem:[#allocation2 + $0x35c0] sm:$0xff]  ;;  %v1963_v51 = vld [vmem:[#allocation2 + $0x3998] sm:$0xff] }
 0x208   :  { %7410 = vmatpush1.bf16.msra.mxu1 %v7409_v24  ;;  %6836 = vmatprep.subr.bf16.mxu0 %v6835_v25  ;;  %v1834_v24 = vld [vmem:[#allocation2 + $0x3590] sm:$0xff]  ;;  %v7431_v25 = vpack.c.bf16 %v1843_v18, %v1835_v17  ;;  %v6857_v31 = vpack.c.bf16 %v1840_v23, %v1832_v22  ;;  %v6875_v17 = vpack.c.bf16 %v1921_v12, %v1913_v11  ;;  %v1912_v18 = vld [vmem:[#allocation2 + $0x3800] sm:$0xff]  ;;  %v1929_v23 = vld [vmem:[#allocation2 + $0x3888] sm:$0xff] }
 0x209   :  { %7412 = vmatprep.subr.bf16.mxu1 %v7411_v29  ;;  %v1851_v29 = vld [vmem:[#allocation2 + $0x3618] sm:$0xff]  ;;  %v7433_v32 = vpack.c.bf16 %v1842_v26, %v1834_v24  ;;  %v1922_v22 = vld [vmem:[#allocation2 + $0x3850] sm:$0xff]  ;;  %v1937_v24 = vld [vmem:[#allocation2 + $0x38c8] sm:$0xff] }
 0x20a   :  { %v1939_v26 = vld [vmem:[#allocation2 + $0x38d8] sm:$0xff] }
 0x20b   :  { %6838 = vmatpush1.bf16.msra.mxu0 %v6837_v35  ;;  %v1856_v35 = vld [vmem:[#allocation2 + $0x3640] sm:$0xff]  ;;  %v1971_v52 = vld [vmem:[#allocation2 + $0x39d8] sm:$0xff] }
 0x20c   :  { %7414 = vmatpush1.bf16.msra.mxu1 %v7413_v36  ;;  %6840 = vmatprep.subr.bf16.mxu0 %v6839_v37  ;;  %v1850_v36 = vld [vmem:[#allocation2 + $0x3610] sm:$0xff]  ;;  %v7435_v37 = vpack.c.bf16 %v1859_v30, %v1851_v29  ;;  %v6861_v43 = vpack.c.bf16 %v1856_v35, %v1848_v34  ;;  %v6879_v30 = vpack.c.bf16 %v1937_v24, %v1929_v23  ;;  %v1979_v63 = vld [vmem:[#allocation2 + $0x3a18] sm:$0xff] }
 0x20d   :  { %7416 = vmatprep.subr.bf16.mxu1 %v7415_v41  ;;  %v1867_v41 = vld [vmem:[#allocation2 + $0x3698] sm:$0xff]  ;;  %v7437_v44 = vpack.c.bf16 %v1858_v38, %v1850_v36  ;;  %v1938_v35 = vld [vmem:[#allocation2 + $0x38d0] sm:$0xff]  ;;  %v1945_v36 = vld [vmem:[#allocation2 + $0x3908] sm:$0xff] }
 0x20e   :  { %v1947_v38 = vld [vmem:[#allocation2 + $0x3918] sm:$0xff] }
 0x20f   :  { %6842 = vmatpush1.bf16.msra.mxu0 %v6841_v47  ;;  %v1872_v47 = vld [vmem:[#allocation2 + $0x36c0] sm:$0xff]  ;;  %v1987_v0 = vld [vmem:[#allocation2 + $0x3a58] sm:$0xff] }
 0x210   :  { %7418 = vmatpush1.bf16.msra.mxu1 %v7417_v48  ;;  %6844 = vmatprep.subr.bf16.mxu0 %v6843_v49  ;;  %v1866_v48 = vld [vmem:[#allocation2 + $0x3690] sm:$0xff]  ;;  %v7439_v49 = vpack.c.bf16 %v1875_v42, %v1867_v41  ;;  %v6865_v55 = vpack.c.bf16 %v1872_v47, %v1864_v46  ;;  %v7459_v47 = vpack.c.bf16 %v1955_v39, %v1947_v38  ;;  %v1995_v11 = vld [vmem:[#allocation2 + $0x3a98] sm:$0xff] }
 0x211   :  { %7420 = vmatprep.subr.bf16.mxu1 %v7419_v53  ;;  %v1883_v53 = vld [vmem:[#allocation2 + $0x3718] sm:$0xff]  ;;  %v7441_v56 = vpack.c.bf16 %v1874_v50, %v1866_v48  ;;  %v1946_v46 = vld [vmem:[#allocation2 + $0x3910] sm:$0xff]  ;;  %v1969_v50 = vld [vmem:[#allocation2 + $0x39c8] sm:$0xff] }
 0x212   :  { %v1954_v48 = vld [vmem:[#allocation2 + $0x3950] sm:$0xff]  ;;  %v2003_v12 = vld [vmem:[#allocation2 + $0x3ad8] sm:$0xff] }
 0x213   :  { %6846 = vmatpush1.bf16.msra.mxu0 %v6845_v59  ;;  %v1888_v59 = vld [vmem:[#allocation2 + $0x3740] sm:$0xff]  ;;  %v2011_v23 = vld [vmem:[#allocation2 + $0x3b18] sm:$0xff] }
 0x214   :  { %7422 = vmatpush1.bf16.msra.mxu1 %v7421_v60  ;;  %6848 = vmatprep.subr.bf16.mxu0 %v6847_v61  ;;  %v1882_v60 = vld [vmem:[#allocation2 + $0x3710] sm:$0xff]  ;;  %v7443_v61 = vpack.c.bf16 %v1891_v54, %v1883_v53  ;;  %v6869_v3 = vpack.c.bf16 %v1888_v59, %v1880_v58  ;;  %v7461_v54 = vpack.c.bf16 %v1954_v48, %v1946_v46  ;;  %v2019_v24 = vld [vmem:[#allocation2 + $0x3b58] sm:$0xff]  ;;  %v2049_v46 = vld [vmem:[#allocation2 + $0x3c48] sm:$0xff] }
 0x215   :  { %7424 = vmatprep.subr.bf16.mxu1 %v7423_v1  ;;  %v1899_v1 = vld [vmem:[#allocation2 + $0x3798] sm:$0xff]  ;;  %v7445_v4 = vpack.c.bf16 %v1890_v62, %v1882_v60  ;;  %v1962_v58 = vld [vmem:[#allocation2 + $0x3990] sm:$0xff]  ;;  %v7463_v59 = vpack.c.bf16 %v1971_v52, %v1963_v51  ;;  %v1985_v62 = vld [vmem:[#allocation2 + $0x3a48] sm:$0xff] }
 0x216   :  { %v1970_v60 = vld [vmem:[#allocation2 + $0x39d0] sm:$0xff]  ;;  %v2051_v48 = vld [vmem:[#allocation2 + $0x3c58] sm:$0xff]  ;;  %v2040_v52 = vld [vmem:[#allocation2 + $0x3c00] sm:$0xff] }
 0x217   :  { %6850 = vmatpush1.bf16.msra.mxu0 %v6849_v7  ;;  %v1904_v7 = vld [vmem:[#allocation2 + $0x37c0] sm:$0xff] }
 0x218   :  { %7426 = vmatpush1.bf16.msra.mxu1 %v7425_v8  ;;  %6852 = vmatprep.subr.bf16.mxu0 %v6851_v9  ;;  %v1898_v8 = vld [vmem:[#allocation2 + $0x3790] sm:$0xff]  ;;  %v7447_v9 = vpack.c.bf16 %v1907_v2, %v1899_v1  ;;  %v6873_v15 = vpack.c.bf16 %v1904_v7, %v1896_v6  ;;  %v7465_v2 = vpack.c.bf16 %v1970_v60, %v1962_v58  ;;  %v2065_v58 = vld [vmem:[#allocation2 + $0x3cc8] sm:$0xff]  ;;  %v2067_v60 = vld [vmem:[#allocation2 + $0x3cd8] sm:$0xff] }
 0x219   :  { %7428 = vmatprep.subr.bf16.mxu1 %v7427_v13  ;;  %v1915_v13 = vld [vmem:[#allocation2 + $0x3818] sm:$0xff]  ;;  %v7449_v16 = vpack.c.bf16 %v1906_v10, %v1898_v8  ;;  %v1978_v6 = vld [vmem:[#allocation2 + $0x3a10] sm:$0xff]  ;;  %v7467_v7 = vpack.c.bf16 %v1987_v0, %v1979_v63  ;;  %v2001_v10 = vld [vmem:[#allocation2 + $0x3ac8] sm:$0xff] }
 0x21a   :  { %v1986_v8 = vld [vmem:[#allocation2 + $0x3a50] sm:$0xff]  ;;  %v2056_v0 = vld [vmem:[#allocation2 + $0x3c80] sm:$0xff] }
 0x21b   :  { %6854 = vmatpush1.bf16.msra.mxu0 %v6853_v19  ;;  %v1920_v19 = vld [vmem:[#allocation2 + $0x3840] sm:$0xff] }
 0x21c   :  { %7430 = vmatpush1.bf16.msra.mxu1 %v7429_v20  ;;  %6856 = vmatprep.subr.bf16.mxu0 %v6855_v21  ;;  %v1914_v20 = vld [vmem:[#allocation2 + $0x3810] sm:$0xff]  ;;  %v7451_v21 = vpack.c.bf16 %v1923_v14, %v1915_v13  ;;  %v6877_v28 = vpack.c.bf16 %v1920_v19, %v1912_v18  ;;  %v7469_v14 = vpack.c.bf16 %v1986_v8, %v1978_v6  ;;  %v2081_v6 = vld [vmem:[#allocation2 + $0x3d48] sm:$0xff]  ;;  %v2083_v8 = vld [vmem:[#allocation2 + $0x3d58] sm:$0xff] }
 0x21d   :  { %7432 = vmatprep.subr.bf16.mxu1 %v7431_v25  ;;  %v1931_v25 = vld [vmem:[#allocation2 + $0x3898] sm:$0xff]  ;;  %v7453_v29 = vpack.c.bf16 %v1922_v22, %v1914_v20  ;;  %v1994_v18 = vld [vmem:[#allocation2 + $0x3a90] sm:$0xff]  ;;  %v7471_v19 = vpack.c.bf16 %v2003_v12, %v1995_v11  ;;  %v2017_v22 = vld [vmem:[#allocation2 + $0x3b48] sm:$0xff] }
 0x21e   :  { %v7455_v34 = vpack.c.bf16 %v1939_v26, %v1931_v25  ;;  %v2002_v20 = vld [vmem:[#allocation2 + $0x3ad0] sm:$0xff]  ;;  %v2072_v12 = vld [vmem:[#allocation2 + $0x3d00] sm:$0xff] }
 0x21f   :  { %6858 = vmatpush1.bf16.msra.mxu0 %v6857_v31  ;;  %v1928_v31 = vld [vmem:[#allocation2 + $0x3880] sm:$0xff]  ;;  %v7473_v26 = vpack.c.bf16 %v2002_v20, %v1994_v18  ;;  %v2097_v18 = vld [vmem:[#allocation2 + $0x3dc8] sm:$0xff]  ;;  %v2099_v20 = vld [vmem:[#allocation2 + $0x3dd8] sm:$0xff] }
 0x220   :  { %7434 = vmatpush1.bf16.msra.mxu1 %v7433_v32  ;;  %6860 = vmatprep.subr.bf16.mxu0 %v6859_v33  ;;  %v1936_v32 = vld [vmem:[#allocation2 + $0x38c0] sm:$0xff]  ;;  %v1930_v33 = vld [vmem:[#allocation2 + $0x3890] sm:$0xff] }
 0x221   :  { %7436 = vmatprep.subr.bf16.mxu1 %v7435_v37  ;;  %v1953_v37 = vld [vmem:[#allocation2 + $0x3948] sm:$0xff]  ;;  %v6881_v41 = vpack.c.bf16 %v1936_v32, %v1928_v31  ;;  %v7457_v42 = vpack.c.bf16 %v1938_v35, %v1930_v33  ;;  %v7475_v31 = vpack.c.bf16 %v2019_v24, %v2011_v23  ;;  %v2018_v32 = vld [vmem:[#allocation2 + $0x3b50] sm:$0xff]  ;;  %v2027_v35 = vld [vmem:[#allocation2 + $0x3b98] sm:$0xff] }
 0x222   :  { %v2025_v33 = vld [vmem:[#allocation2 + $0x3b88] sm:$0xff]  ;;  %v2088_v24 = vld [vmem:[#allocation2 + $0x3d80] sm:$0xff] }
 0x223   :  { %6862 = vmatpush1.bf16.msra.mxu0 %v6861_v43  ;;  %v6883_v43 = vpack.c.bf16 %v1953_v37, %v1945_v36  ;;  %v2035_v36 = vld [vmem:[#allocation2 + $0x3bd8] sm:$0xff] }
 0x224   :  { %7438 = vmatpush1.bf16.msra.mxu1 %v7437_v44  ;;  %6864 = vmatprep.subr.bf16.mxu0 %v6863_v45  ;;  %v1944_v44 = vld [vmem:[#allocation2 + $0x3900] sm:$0xff] }
 0x225   :  { %7440 = vmatprep.subr.bf16.mxu1 %v7439_v49  ;;  %v1952_v45 = vld [vmem:[#allocation2 + $0x3940] sm:$0xff]  ;;  %v1961_v49 = vld [vmem:[#allocation2 + $0x3988] sm:$0xff] }
 0x226   :  { %v6885_v53 = vpack.c.bf16 %v1952_v45, %v1944_v44  ;;  %v2034_v44 = vld [vmem:[#allocation2 + $0x3bd0] sm:$0xff]  ;;  %v2041_v45 = vld [vmem:[#allocation2 + $0x3c08] sm:$0xff] }
 0x227   :  { %6866 = vmatpush1.bf16.msra.mxu0 %v6865_v55  ;;  %v6887_v55 = vpack.c.bf16 %v1969_v50, %v1961_v49  ;;  %v6907_v51 = vpack.c.bf16 %v2049_v46, %v2041_v45 }
 0x228   :  { %7442 = vmatpush1.bf16.msra.mxu1 %v7441_v56  ;;  %6868 = vmatprep.subr.bf16.mxu0 %v6867_v57  ;;  %v1960_v56 = vld [vmem:[#allocation2 + $0x3980] sm:$0xff] }
 0x229   :  { %7444 = vmatprep.subr.bf16.mxu1 %v7443_v61  ;;  %v1968_v57 = vld [vmem:[#allocation2 + $0x39c0] sm:$0xff]  ;;  %v1977_v61 = vld [vmem:[#allocation2 + $0x3a08] sm:$0xff] }
 0x22a   :  { %v6889_v1 = vpack.c.bf16 %v1968_v57, %v1960_v56  ;;  %v2050_v56 = vld [vmem:[#allocation2 + $0x3c50] sm:$0xff]  ;;  %v2057_v57 = vld [vmem:[#allocation2 + $0x3c88] sm:$0xff] }
 0x22b   :  { %6870 = vmatpush1.bf16.msra.mxu0 %v6869_v3  ;;  %v6891_v3 = vpack.c.bf16 %v1985_v62, %v1977_v61  ;;  %v6911_v63 = vpack.c.bf16 %v2065_v58, %v2057_v57 }
 0x22c   :  { %7446 = vmatpush1.bf16.msra.mxu1 %v7445_v4  ;;  %6872 = vmatprep.subr.bf16.mxu0 %v6871_v5  ;;  %v1976_v4 = vld [vmem:[#allocation2 + $0x3a00] sm:$0xff] }
 0x22d   :  { %7448 = vmatprep.subr.bf16.mxu1 %v7447_v9  ;;  %v1984_v5 = vld [vmem:[#allocation2 + $0x3a40] sm:$0xff]  ;;  %v1993_v9 = vld [vmem:[#allocation2 + $0x3a88] sm:$0xff] }
 0x22e   :  { %v6893_v13 = vpack.c.bf16 %v1984_v5, %v1976_v4  ;;  %v2066_v4 = vld [vmem:[#allocation2 + $0x3cd0] sm:$0xff]  ;;  %v2073_v5 = vld [vmem:[#allocation2 + $0x3d08] sm:$0xff] }
 0x22f   :  { %6874 = vmatpush1.bf16.msra.mxu0 %v6873_v15  ;;  %v6895_v15 = vpack.c.bf16 %v2001_v10, %v1993_v9  ;;  %v6915_v11 = vpack.c.bf16 %v2081_v6, %v2073_v5 }
 0x230   :  { %7450 = vmatpush1.bf16.msra.mxu1 %v7449_v16  ;;  %6876 = vmatprep.subr.bf16.mxu0 %v6875_v17  ;;  %v1992_v16 = vld [vmem:[#allocation2 + $0x3a80] sm:$0xff] }
 0x231   :  { %7452 = vmatprep.subr.bf16.mxu1 %v7451_v21  ;;  %v2000_v17 = vld [vmem:[#allocation2 + $0x3ac0] sm:$0xff]  ;;  %v2009_v21 = vld [vmem:[#allocation2 + $0x3b08] sm:$0xff] }
 0x232   :  { %2957 = vmatmul.mubr.f32.vlgmr.msra.gmra.mrb[0].mxu0 %v114_v27  ;;  %v6897_v25 = vpack.c.bf16 %v2000_v17, %v1992_v16  ;;  %v2082_v16 = vld [vmem:[#allocation2 + $0x3d50] sm:$0xff]  ;;  %v2089_v17 = vld [vmem:[#allocation2 + $0x3d88] sm:$0xff] }
 0x233   :  { %6878 = vmatpush1.bf16.msra.mxu0 %v6877_v28  ;;  %3596 = vmatmul.mubr.f32.vlgmr.msra.gmra.mrb[0].mxu1 %v114_v27  ;;  %v6899_v27 = vpack.c.bf16 %v2017_v22, %v2009_v21  ;;  %v2008_v28 = vld [vmem:[#allocation2 + $0x3b00] sm:$0xff]  ;;  %v6919_v23 = vpack.c.bf16 %v2097_v18, %v2089_v17 }
 0x234   :  { %7454 = vmatpush1.bf16.msra.mxu1 %v7453_v29  ;;  %6880 = vmatprep.subr.bf16.mxu0 %v6879_v30  ;;  %v2016_v29 = vld [vmem:[#allocation2 + $0x3b40] sm:$0xff]  ;;  %v2010_v30 = vld [vmem:[#allocation2 + $0x3b10] sm:$0xff] }
 0x235   :  { %7456 = vmatprep.subr.bf16.mxu1 %v7455_v34  ;;  %3027 = vmatprep.mubr.f32.mxu0 %v117_v40  ;;  %v2033_v34 = vld [vmem:[#allocation2 + $0x3bc8] sm:$0xff]  ;;  %v6901_v37 = vpack.c.bf16 %v2016_v29, %v2008_v28  ;;  %v7477_v38 = vpack.c.bf16 %v2018_v32, %v2010_v30  ;;  %v2098_v28 = vld [vmem:[#allocation2 + $0x3dd0] sm:$0xff]  ;;  %v2115_v32 = vld [vmem:[#allocation2 + $0x3e58] sm:$0xff] }
 0x236   :  { %3666 = vmatprep.mubr.f32.mxu1 %v117_v40  ;;  %v6903_v39 = vpack.c.bf16 %v2033_v34, %v2025_v33  ;;  %v2024_v40 = vld [vmem:[#allocation2 + $0x3b80] sm:$0xff]  ;;  %v2105_v29 = vld [vmem:[#allocation2 + $0x3e08] sm:$0xff] }
 0x237   :  { %6882 = vmatpush1.bf16.msra.mxu0 %v6881_v41  ;;  %v2032_v41 = vld [vmem:[#allocation2 + $0x3bc0] sm:$0xff]  ;;  %v2113_v30 = vld [vmem:[#allocation2 + $0x3e48] sm:$0xff] }
 0x238   :  { %7458 = vmatpush1.bf16.msra.mxu1 %v7457_v42  ;;  %6884 = vmatprep.subr.bf16.mxu0 %v6883_v43  ;;  %v2026_v42 = vld [vmem:[#allocation2 + $0x3b90] sm:$0xff]  ;;  %v7479_v43 = vpack.c.bf16 %v2035_v36, %v2027_v35  ;;  %v6905_v49 = vpack.c.bf16 %v2032_v41, %v2024_v40  ;;  %v6923_v35 = vpack.c.bf16 %v2113_v30, %v2105_v29  ;;  %v2104_v36 = vld [vmem:[#allocation2 + $0x3e00] sm:$0xff]  ;;  %v2121_v41 = vld [vmem:[#allocation2 + $0x3e88] sm:$0xff] }
 0x239   :  { %7460 = vmatprep.subr.bf16.mxu1 %v7459_v47  ;;  %v2043_v47 = vld [vmem:[#allocation2 + $0x3c18] sm:$0xff]  ;;  %v7481_v50 = vpack.c.bf16 %v2034_v44, %v2026_v42  ;;  %v2114_v40 = vld [vmem:[#allocation2 + $0x3e50] sm:$0xff]  ;;  %v2129_v42 = vld [vmem:[#allocation2 + $0x3ec8] sm:$0xff] }
 0x23a   :  { %v2131_v44 = vld [vmem:[#allocation2 + $0x3ed8] sm:$0xff]  ;;  %v116_v29 = vld [vmem:[%s9854_s0 + $0x70] sm:$0xff] }
 0x23b   :  { %6886 = vmatpush1.bf16.msra.mxu0 %v6885_v53  ;;  %v2048_v53 = vld [vmem:[#allocation2 + $0x3c40] sm:$0xff] }
 0x23c   :  { %7462 = vmatpush1.bf16.msra.mxu1 %v7461_v54  ;;  %6888 = vmatprep.subr.bf16.mxu0 %v6887_v55  ;;  %v2042_v54 = vld [vmem:[#allocation2 + $0x3c10] sm:$0xff]  ;;  %v7483_v55 = vpack.c.bf16 %v2051_v48, %v2043_v47  ;;  %v6909_v61 = vpack.c.bf16 %v2048_v53, %v2040_v52  ;;  %v6927_v47 = vpack.c.bf16 %v2129_v42, %v2121_v41  ;;  %v2120_v48 = vld [vmem:[#allocation2 + $0x3e80] sm:$0xff]  ;;  %v2137_v53 = vld [vmem:[#allocation2 + $0x3f08] sm:$0xff] }
 0x23d   :  { %7464 = vmatprep.subr.bf16.mxu1 %v7463_v59  ;;  %v2059_v59 = vld [vmem:[#allocation2 + $0x3c98] sm:$0xff]  ;;  %v7485_v62 = vpack.c.bf16 %v2050_v56, %v2042_v54  ;;  %v2130_v52 = vld [vmem:[#allocation2 + $0x3ed0] sm:$0xff]  ;;  %v2145_v54 = vld [vmem:[#allocation2 + $0x3f48] sm:$0xff] }
 0x23e   :  { %v2147_v56 = vld [vmem:[#allocation2 + $0x3f58] sm:$0xff]  ;;  %v119_v42 = vld [vmem:[%s9854_s0 + $0x88] sm:$0xff] }
 0x23f   :  { %6890 = vmatpush1.bf16.msra.mxu0 %v6889_v1  ;;  %v2064_v1 = vld [vmem:[#allocation2 + $0x3cc0] sm:$0xff]  ;;  %v2211_v41 = vld [vmem:[#allocation2 + $0x4158] sm:$0xff] }
 0x240   :  { %7466 = vmatpush1.bf16.msra.mxu1 %v7465_v2  ;;  %6892 = vmatprep.subr.bf16.mxu0 %v6891_v3  ;;  %v2058_v2 = vld [vmem:[#allocation2 + $0x3c90] sm:$0xff]  ;;  %v7487_v3 = vpack.c.bf16 %v2067_v60, %v2059_v59  ;;  %v6913_v9 = vpack.c.bf16 %v2064_v1, %v2056_v0  ;;  %v6931_v59 = vpack.c.bf16 %v2145_v54, %v2137_v53  ;;  %v2136_v60 = vld [vmem:[#allocation2 + $0x3f00] sm:$0xff]  ;;  %v2153_v1 = vld [vmem:[#allocation2 + $0x3f88] sm:$0xff] }
 0x241   :  { %7468 = vmatprep.subr.bf16.mxu1 %v7467_v7  ;;  %v2075_v7 = vld [vmem:[#allocation2 + $0x3d18] sm:$0xff]  ;;  %v7489_v10 = vpack.c.bf16 %v2066_v4, %v2058_v2  ;;  %v2146_v0 = vld [vmem:[#allocation2 + $0x3f50] sm:$0xff]  ;;  %v2161_v2 = vld [vmem:[#allocation2 + $0x3fc8] sm:$0xff] }
 0x242   :  { %v2163_v4 = vld [vmem:[#allocation2 + $0x3fd8] sm:$0xff] }
 0x243   :  { %6894 = vmatpush1.bf16.msra.mxu0 %v6893_v13  ;;  %v2080_v13 = vld [vmem:[#allocation2 + $0x3d40] sm:$0xff]  ;;  %v2219_v53 = vld [vmem:[#allocation2 + $0x4198] sm:$0xff] }
 0x244   :  { %7470 = vmatpush1.bf16.msra.mxu1 %v7469_v14  ;;  %6896 = vmatprep.subr.bf16.mxu0 %v6895_v15  ;;  %v2074_v14 = vld [vmem:[#allocation2 + $0x3d10] sm:$0xff]  ;;  %v7491_v15 = vpack.c.bf16 %v2083_v8, %v2075_v7  ;;  %v6917_v21 = vpack.c.bf16 %v2080_v13, %v2072_v12  ;;  %v6935_v7 = vpack.c.bf16 %v2161_v2, %v2153_v1  ;;  %v2152_v8 = vld [vmem:[#allocation2 + $0x3f80] sm:$0xff]  ;;  %v2169_v13 = vld [vmem:[#allocation2 + $0x4008] sm:$0xff] }
 0x245   :  { %7472 = vmatprep.subr.bf16.mxu1 %v7471_v19  ;;  %v2091_v19 = vld [vmem:[#allocation2 + $0x3d98] sm:$0xff]  ;;  %v7493_v22 = vpack.c.bf16 %v2082_v16, %v2074_v14  ;;  %v2162_v12 = vld [vmem:[#allocation2 + $0x3fd0] sm:$0xff]  ;;  %v2177_v14 = vld [vmem:[#allocation2 + $0x4048] sm:$0xff] }
 0x246   :  { %v2179_v16 = vld [vmem:[#allocation2 + $0x4058] sm:$0xff] }
 0x247   :  { %6898 = vmatpush1.bf16.msra.mxu0 %v6897_v25  ;;  %v2096_v25 = vld [vmem:[#allocation2 + $0x3dc0] sm:$0xff]  ;;  %v2227_v54 = vld [vmem:[#allocation2 + $0x41d8] sm:$0xff] }
 0x248   :  { %7474 = vmatpush1.bf16.msra.mxu1 %v7473_v26  ;;  %6900 = vmatprep.subr.bf16.mxu0 %v6899_v27  ;;  %v2090_v26 = vld [vmem:[#allocation2 + $0x3d90] sm:$0xff]  ;;  %v7495_v27 = vpack.c.bf16 %v2099_v20, %v2091_v19  ;;  %v6921_v33 = vpack.c.bf16 %v2096_v25, %v2088_v24  ;;  %v6939_v19 = vpack.c.bf16 %v2177_v14, %v2169_v13  ;;  %v2168_v20 = vld [vmem:[#allocation2 + $0x4000] sm:$0xff]  ;;  %v2185_v25 = vld [vmem:[#allocation2 + $0x4088] sm:$0xff] }
 0x249   :  { %7476 = vmatprep.subr.bf16.mxu1 %v7475_v31  ;;  %v2107_v31 = vld [vmem:[#allocation2 + $0x3e18] sm:$0xff]  ;;  %v7497_v34 = vpack.c.bf16 %v2098_v28, %v2090_v26  ;;  %v2178_v24 = vld [vmem:[#allocation2 + $0x4050] sm:$0xff]  ;;  %v2193_v26 = vld [vmem:[#allocation2 + $0x40c8] sm:$0xff] }
 0x24a   :  { %v2195_v28 = vld [vmem:[#allocation2 + $0x40d8] sm:$0xff] }
 0x24b   :  { %6902 = vmatpush1.bf16.msra.mxu0 %v6901_v37  ;;  %v2112_v37 = vld [vmem:[#allocation2 + $0x3e40] sm:$0xff]  ;;  %v2235_v1 = vld [vmem:[#allocation2 + $0x4218] sm:$0xff] }
 0x24c   :  { %7478 = vmatpush1.bf16.msra.mxu1 %v7477_v38  ;;  %6904 = vmatprep.subr.bf16.mxu0 %v6903_v39  ;;  %v2106_v38 = vld [vmem:[#allocation2 + $0x3e10] sm:$0xff]  ;;  %v7499_v39 = vpack.c.bf16 %v2115_v32, %v2107_v31  ;;  %v6925_v45 = vpack.c.bf16 %v2112_v37, %v2104_v36  ;;  %v6943_v32 = vpack.c.bf16 %v2193_v26, %v2185_v25  ;;  %v2243_v2 = vld [vmem:[#allocation2 + $0x4258] sm:$0xff] }
 0x24d   :  { %7480 = vmatprep.subr.bf16.mxu1 %v7479_v43  ;;  %v2123_v43 = vld [vmem:[#allocation2 + $0x3e98] sm:$0xff]  ;;  %v7501_v46 = vpack.c.bf16 %v2114_v40, %v2106_v38  ;;  %v2194_v37 = vld [vmem:[#allocation2 + $0x40d0] sm:$0xff]  ;;  %v2201_v38 = vld [vmem:[#allocation2 + $0x4108] sm:$0xff] }
 0x24e   :  { %v2203_v40 = vld [vmem:[#allocation2 + $0x4118] sm:$0xff] }
 0x24f   :  { %6906 = vmatpush1.bf16.msra.mxu0 %v6905_v49  ;;  %v2128_v49 = vld [vmem:[#allocation2 + $0x3ec0] sm:$0xff]  ;;  %v2251_v13 = vld [vmem:[#allocation2 + $0x4298] sm:$0xff] }
 0x250   :  { %7482 = vmatpush1.bf16.msra.mxu1 %v7481_v50  ;;  %6908 = vmatprep.subr.bf16.mxu0 %v6907_v51  ;;  %v2122_v50 = vld [vmem:[#allocation2 + $0x3e90] sm:$0xff]  ;;  %v7503_v51 = vpack.c.bf16 %v2131_v44, %v2123_v43  ;;  %v6929_v57 = vpack.c.bf16 %v2128_v49, %v2120_v48  ;;  %v7523_v49 = vpack.c.bf16 %v2211_v41, %v2203_v40  ;;  %v2259_v14 = vld [vmem:[#allocation2 + $0x42d8] sm:$0xff] }
 0x251   :  { %7484 = vmatprep.subr.bf16.mxu1 %v7483_v55  ;;  %v2139_v55 = vld [vmem:[#allocation2 + $0x3f18] sm:$0xff]  ;;  %v7505_v58 = vpack.c.bf16 %v2130_v52, %v2122_v50  ;;  %v2202_v48 = vld [vmem:[#allocation2 + $0x4110] sm:$0xff]  ;;  %v2225_v52 = vld [vmem:[#allocation2 + $0x41c8] sm:$0xff] }
 0x252   :  { %v2210_v50 = vld [vmem:[#allocation2 + $0x4150] sm:$0xff]  ;;  %v2267_v25 = vld [vmem:[#allocation2 + $0x4318] sm:$0xff] }
 0x253   :  { %6910 = vmatpush1.bf16.msra.mxu0 %v6909_v61  ;;  %v2144_v61 = vld [vmem:[#allocation2 + $0x3f40] sm:$0xff]  ;;  %v2275_v26 = vld [vmem:[#allocation2 + $0x4358] sm:$0xff] }
 0x254   :  { %7486 = vmatpush1.bf16.msra.mxu1 %v7485_v62  ;;  %6912 = vmatprep.subr.bf16.mxu0 %v6911_v63  ;;  %v2138_v62 = vld [vmem:[#allocation2 + $0x3f10] sm:$0xff]  ;;  %v7507_v63 = vpack.c.bf16 %v2147_v56, %v2139_v55  ;;  %v6933_v5 = vpack.c.bf16 %v2144_v61, %v2136_v60  ;;  %v7525_v56 = vpack.c.bf16 %v2210_v50, %v2202_v48  ;;  %v2305_v48 = vld [vmem:[#allocation2 + $0x4448] sm:$0xff]  ;;  %v2307_v50 = vld [vmem:[#allocation2 + $0x4458] sm:$0xff] }
 0x255   :  { %7488 = vmatprep.subr.bf16.mxu1 %v7487_v3  ;;  %v2155_v3 = vld [vmem:[#allocation2 + $0x3f98] sm:$0xff]  ;;  %v7509_v6 = vpack.c.bf16 %v2146_v0, %v2138_v62  ;;  %v2218_v60 = vld [vmem:[#allocation2 + $0x4190] sm:$0xff]  ;;  %v7527_v61 = vpack.c.bf16 %v2227_v54, %v2219_v53  ;;  %v2241_v0 = vld [vmem:[#allocation2 + $0x4248] sm:$0xff] }
 0x256   :  { %v2226_v62 = vld [vmem:[#allocation2 + $0x41d0] sm:$0xff]  ;;  %v2296_v54 = vld [vmem:[#allocation2 + $0x4400] sm:$0xff] }
 0x257   :  { %6914 = vmatpush1.bf16.msra.mxu0 %v6913_v9  ;;  %v2160_v9 = vld [vmem:[#allocation2 + $0x3fc0] sm:$0xff] }
 0x258   :  { %7490 = vmatpush1.bf16.msra.mxu1 %v7489_v10  ;;  %6916 = vmatprep.subr.bf16.mxu0 %v6915_v11  ;;  %v2154_v10 = vld [vmem:[#allocation2 + $0x3f90] sm:$0xff]  ;;  %v7511_v11 = vpack.c.bf16 %v2163_v4, %v2155_v3  ;;  %v6937_v17 = vpack.c.bf16 %v2160_v9, %v2152_v8  ;;  %v7529_v4 = vpack.c.bf16 %v2226_v62, %v2218_v60  ;;  %v2321_v60 = vld [vmem:[#allocation2 + $0x44c8] sm:$0xff]  ;;  %v2323_v62 = vld [vmem:[#allocation2 + $0x44d8] sm:$0xff] }
 0x259   :  { %7492 = vmatprep.subr.bf16.mxu1 %v7491_v15  ;;  %v2171_v15 = vld [vmem:[#allocation2 + $0x4018] sm:$0xff]  ;;  %v7513_v18 = vpack.c.bf16 %v2162_v12, %v2154_v10  ;;  %v2234_v8 = vld [vmem:[#allocation2 + $0x4210] sm:$0xff]  ;;  %v7531_v9 = vpack.c.bf16 %v2243_v2, %v2235_v1  ;;  %v2257_v12 = vld [vmem:[#allocation2 + $0x42c8] sm:$0xff] }
 0x25a   :  { %v2242_v10 = vld [vmem:[#allocation2 + $0x4250] sm:$0xff]  ;;  %v2312_v2 = vld [vmem:[#allocation2 + $0x4480] sm:$0xff] }
 0x25b   :  { %6918 = vmatpush1.bf16.msra.mxu0 %v6917_v21  ;;  %v2176_v21 = vld [vmem:[#allocation2 + $0x4040] sm:$0xff] }
 0x25c   :  { %7494 = vmatpush1.bf16.msra.mxu1 %v7493_v22  ;;  %6920 = vmatprep.subr.bf16.mxu0 %v6919_v23  ;;  %v2170_v22 = vld [vmem:[#allocation2 + $0x4010] sm:$0xff]  ;;  %v7515_v23 = vpack.c.bf16 %v2179_v16, %v2171_v15  ;;  %v6941_v30 = vpack.c.bf16 %v2176_v21, %v2168_v20  ;;  %v7533_v16 = vpack.c.bf16 %v2242_v10, %v2234_v8  ;;  %v2337_v8 = vld [vmem:[#allocation2 + $0x4548] sm:$0xff]  ;;  %v2339_v10 = vld [vmem:[#allocation2 + $0x4558] sm:$0xff] }
 0x25d   :  { %7496 = vmatprep.subr.bf16.mxu1 %v7495_v27  ;;  %v2187_v27 = vld [vmem:[#allocation2 + $0x4098] sm:$0xff]  ;;  %v7517_v31 = vpack.c.bf16 %v2178_v24, %v2170_v22  ;;  %v2250_v20 = vld [vmem:[#allocation2 + $0x4290] sm:$0xff]  ;;  %v7535_v21 = vpack.c.bf16 %v2259_v14, %v2251_v13  ;;  %v2273_v24 = vld [vmem:[#allocation2 + $0x4348] sm:$0xff] }
 0x25e   :  { %v7519_v36 = vpack.c.bf16 %v2195_v28, %v2187_v27  ;;  %v2258_v22 = vld [vmem:[#allocation2 + $0x42d0] sm:$0xff]  ;;  %v2328_v14 = vld [vmem:[#allocation2 + $0x4500] sm:$0xff] }
 0x25f   :  { %6922 = vmatpush1.bf16.msra.mxu0 %v6921_v33  ;;  %v2184_v33 = vld [vmem:[#allocation2 + $0x4080] sm:$0xff]  ;;  %v7537_v28 = vpack.c.bf16 %v2258_v22, %v2250_v20  ;;  %v2353_v20 = vld [vmem:[#allocation2 + $0x45c8] sm:$0xff]  ;;  %v2355_v22 = vld [vmem:[#allocation2 + $0x45d8] sm:$0xff] }
 0x260   :  { %7498 = vmatpush1.bf16.msra.mxu1 %v7497_v34  ;;  %6924 = vmatprep.subr.bf16.mxu0 %v6923_v35  ;;  %v2192_v34 = vld [vmem:[#allocation2 + $0x40c0] sm:$0xff]  ;;  %v2186_v35 = vld [vmem:[#allocation2 + $0x4090] sm:$0xff] }
 0x261   :  { %7500 = vmatprep.subr.bf16.mxu1 %v7499_v39  ;;  %v2209_v39 = vld [vmem:[#allocation2 + $0x4148] sm:$0xff]  ;;  %v6945_v43 = vpack.c.bf16 %v2192_v34, %v2184_v33  ;;  %v7521_v44 = vpack.c.bf16 %v2194_v37, %v2186_v35  ;;  %v7539_v33 = vpack.c.bf16 %v2275_v26, %v2267_v25  ;;  %v2274_v34 = vld [vmem:[#allocation2 + $0x4350] sm:$0xff]  ;;  %v2283_v37 = vld [vmem:[#allocation2 + $0x4398] sm:$0xff] }
 0x262   :  { %v2281_v35 = vld [vmem:[#allocation2 + $0x4388] sm:$0xff]  ;;  %v2344_v26 = vld [vmem:[#allocation2 + $0x4580] sm:$0xff] }
 0x263   :  { %6926 = vmatpush1.bf16.msra.mxu0 %v6925_v45  ;;  %v6947_v45 = vpack.c.bf16 %v2209_v39, %v2201_v38  ;;  %v2291_v38 = vld [vmem:[#allocation2 + $0x43d8] sm:$0xff] }
 0x264   :  { %7502 = vmatpush1.bf16.msra.mxu1 %v7501_v46  ;;  %6928 = vmatprep.subr.bf16.mxu0 %v6927_v47  ;;  %v2200_v46 = vld [vmem:[#allocation2 + $0x4100] sm:$0xff] }
 0x265   :  { %7504 = vmatprep.subr.bf16.mxu1 %v7503_v51  ;;  %v2208_v47 = vld [vmem:[#allocation2 + $0x4140] sm:$0xff]  ;;  %v2217_v51 = vld [vmem:[#allocation2 + $0x4188] sm:$0xff] }
 0x266   :  { %v6949_v55 = vpack.c.bf16 %v2208_v47, %v2200_v46  ;;  %v2290_v46 = vld [vmem:[#allocation2 + $0x43d0] sm:$0xff]  ;;  %v2297_v47 = vld [vmem:[#allocation2 + $0x4408] sm:$0xff] }
 0x267   :  { %6930 = vmatpush1.bf16.msra.mxu0 %v6929_v57  ;;  %v6951_v57 = vpack.c.bf16 %v2225_v52, %v2217_v51  ;;  %v6971_v53 = vpack.c.bf16 %v2305_v48, %v2297_v47 }
 0x268   :  { %7506 = vmatpush1.bf16.msra.mxu1 %v7505_v58  ;;  %6932 = vmatprep.subr.bf16.mxu0 %v6931_v59  ;;  %v2216_v58 = vld [vmem:[#allocation2 + $0x4180] sm:$0xff] }
 0x269   :  { %7508 = vmatprep.subr.bf16.mxu1 %v7507_v63  ;;  %v2224_v59 = vld [vmem:[#allocation2 + $0x41c0] sm:$0xff]  ;;  %v2233_v63 = vld [vmem:[#allocation2 + $0x4208] sm:$0xff] }
 0x26a   :  { %v6953_v3 = vpack.c.bf16 %v2224_v59, %v2216_v58  ;;  %v2306_v58 = vld [vmem:[#allocation2 + $0x4450] sm:$0xff]  ;;  %v2313_v59 = vld [vmem:[#allocation2 + $0x4488] sm:$0xff] }
 0x26b   :  { %6934 = vmatpush1.bf16.msra.mxu0 %v6933_v5  ;;  %v6955_v5 = vpack.c.bf16 %v2241_v0, %v2233_v63  ;;  %v6975_v1 = vpack.c.bf16 %v2321_v60, %v2313_v59 }
 0x26c   :  { %7510 = vmatpush1.bf16.msra.mxu1 %v7509_v6  ;;  %6936 = vmatprep.subr.bf16.mxu0 %v6935_v7  ;;  %v2232_v6 = vld [vmem:[#allocation2 + $0x4200] sm:$0xff] }
 0x26d   :  { %7512 = vmatprep.subr.bf16.mxu1 %v7511_v11  ;;  %v2240_v7 = vld [vmem:[#allocation2 + $0x4240] sm:$0xff]  ;;  %v2249_v11 = vld [vmem:[#allocation2 + $0x4288] sm:$0xff] }
 0x26e   :  { %v6957_v15 = vpack.c.bf16 %v2240_v7, %v2232_v6  ;;  %v2322_v6 = vld [vmem:[#allocation2 + $0x44d0] sm:$0xff]  ;;  %v2329_v7 = vld [vmem:[#allocation2 + $0x4508] sm:$0xff] }
 0x26f   :  { %6938 = vmatpush1.bf16.msra.mxu0 %v6937_v17  ;;  %v6959_v17 = vpack.c.bf16 %v2257_v12, %v2249_v11  ;;  %v6979_v13 = vpack.c.bf16 %v2337_v8, %v2329_v7 }
 0x270   :  { %7514 = vmatpush1.bf16.msra.mxu1 %v7513_v18  ;;  %6940 = vmatprep.subr.bf16.mxu0 %v6939_v19  ;;  %v2248_v18 = vld [vmem:[#allocation2 + $0x4280] sm:$0xff] }
 0x271   :  { %7516 = vmatprep.subr.bf16.mxu1 %v7515_v23  ;;  %v2256_v19 = vld [vmem:[#allocation2 + $0x42c0] sm:$0xff]  ;;  %v2265_v23 = vld [vmem:[#allocation2 + $0x4308] sm:$0xff] }
 0x272   :  { %3028 = vmatmul.mubr.f32.vlgmr.msra.gmra.mrb[0].mxu0 %v116_v29  ;;  %v6961_v27 = vpack.c.bf16 %v2256_v19, %v2248_v18  ;;  %v2338_v18 = vld [vmem:[#allocation2 + $0x4550] sm:$0xff]  ;;  %v2345_v19 = vld [vmem:[#allocation2 + $0x4588] sm:$0xff] }
 0x273   :  { %6942 = vmatpush1.bf16.msra.mxu0 %v6941_v30  ;;  %3667 = vmatmul.mubr.f32.vlgmr.msra.gmra.mrb[0].mxu1 %v116_v29  ;;  %v6963_v29 = vpack.c.bf16 %v2273_v24, %v2265_v23  ;;  %v2264_v30 = vld [vmem:[#allocation2 + $0x4300] sm:$0xff]  ;;  %v6983_v25 = vpack.c.bf16 %v2353_v20, %v2345_v19 }
 0x274   :  { %7518 = vmatpush1.bf16.msra.mxu1 %v7517_v31  ;;  %6944 = vmatprep.subr.bf16.mxu0 %v6943_v32  ;;  %v2272_v31 = vld [vmem:[#allocation2 + $0x4340] sm:$0xff]  ;;  %v2266_v32 = vld [vmem:[#allocation2 + $0x4310] sm:$0xff] }
 0x275   :  { %7520 = vmatprep.subr.bf16.mxu1 %v7519_v36  ;;  %3098 = vmatprep.mubr.f32.mxu0 %v119_v42  ;;  %v2289_v36 = vld [vmem:[#allocation2 + $0x43c8] sm:$0xff]  ;;  %v6965_v39 = vpack.c.bf16 %v2272_v31, %v2264_v30  ;;  %v7541_v40 = vpack.c.bf16 %v2274_v34, %v2266_v32  ;;  %v2354_v30 = vld [vmem:[#allocation2 + $0x45d0] sm:$0xff]  ;;  %v2371_v34 = vld [vmem:[#allocation2 + $0x4658] sm:$0xff] }
 0x276   :  { %3737 = vmatprep.mubr.f32.mxu1 %v119_v42  ;;  %v6967_v41 = vpack.c.bf16 %v2289_v36, %v2281_v35  ;;  %v2280_v42 = vld [vmem:[#allocation2 + $0x4380] sm:$0xff]  ;;  %v2361_v31 = vld [vmem:[#allocation2 + $0x4608] sm:$0xff] }
 0x277   :  { %6946 = vmatpush1.bf16.msra.mxu0 %v6945_v43  ;;  %v2288_v43 = vld [vmem:[#allocation2 + $0x43c0] sm:$0xff]  ;;  %v2369_v32 = vld [vmem:[#allocation2 + $0x4648] sm:$0xff] }
 0x278   :  { %7522 = vmatpush1.bf16.msra.mxu1 %v7521_v44  ;;  %6948 = vmatprep.subr.bf16.mxu0 %v6947_v45  ;;  %v2282_v44 = vld [vmem:[#allocation2 + $0x4390] sm:$0xff]  ;;  %v7543_v45 = vpack.c.bf16 %v2291_v38, %v2283_v37  ;;  %v6969_v51 = vpack.c.bf16 %v2288_v43, %v2280_v42  ;;  %v6987_v37 = vpack.c.bf16 %v2369_v32, %v2361_v31  ;;  %v2360_v38 = vld [vmem:[#allocation2 + $0x4600] sm:$0xff]  ;;  %v2377_v43 = vld [vmem:[#allocation2 + $0x4688] sm:$0xff] }
 0x279   :  { %7524 = vmatprep.subr.bf16.mxu1 %v7523_v49  ;;  %v2299_v49 = vld [vmem:[#allocation2 + $0x4418] sm:$0xff]  ;;  %v7545_v52 = vpack.c.bf16 %v2290_v46, %v2282_v44  ;;  %v2370_v42 = vld [vmem:[#allocation2 + $0x4650] sm:$0xff]  ;;  %v2385_v44 = vld [vmem:[#allocation2 + $0x46c8] sm:$0xff] }
 0x27a   :  { %v2387_v46 = vld [vmem:[#allocation2 + $0x46d8] sm:$0xff]  ;;  %v118_v31 = vld [vmem:[%s9854_s0 + $0x80] sm:$0xff] }
 0x27b   :  { %6950 = vmatpush1.bf16.msra.mxu0 %v6949_v55  ;;  %v2304_v55 = vld [vmem:[#allocation2 + $0x4440] sm:$0xff] }
 0x27c   :  { %7526 = vmatpush1.bf16.msra.mxu1 %v7525_v56  ;;  %6952 = vmatprep.subr.bf16.mxu0 %v6951_v57  ;;  %v2298_v56 = vld [vmem:[#allocation2 + $0x4410] sm:$0xff]  ;;  %v7547_v57 = vpack.c.bf16 %v2307_v50, %v2299_v49  ;;  %v6973_v63 = vpack.c.bf16 %v2304_v55, %v2296_v54  ;;  %v6991_v49 = vpack.c.bf16 %v2385_v44, %v2377_v43  ;;  %v2376_v50 = vld [vmem:[#allocation2 + $0x4680] sm:$0xff]  ;;  %v2393_v55 = vld [vmem:[#allocation2 + $0x4708] sm:$0xff] }
 0x27d   :  { %7528 = vmatprep.subr.bf16.mxu1 %v7527_v61  ;;  %v2315_v61 = vld [vmem:[#allocation2 + $0x4498] sm:$0xff]  ;;  %v7549_v0 = vpack.c.bf16 %v2306_v58, %v2298_v56  ;;  %v2386_v54 = vld [vmem:[#allocation2 + $0x46d0] sm:$0xff]  ;;  %v2401_v56 = vld [vmem:[#allocation2 + $0x4748] sm:$0xff] }
 0x27e   :  { %v2403_v58 = vld [vmem:[#allocation2 + $0x4758] sm:$0xff] }
 0x27f   :  { %6954 = vmatpush1.bf16.msra.mxu0 %v6953_v3  ;;  %v2320_v3 = vld [vmem:[#allocation2 + $0x44c0] sm:$0xff]  ;;  %v167_v43 = vld [vmem:[#allocation2 + $0x178] sm:$0xff] }
 0x280   :  { %7530 = vmatpush1.bf16.msra.mxu1 %v7529_v4  ;;  %6956 = vmatprep.subr.bf16.mxu0 %v6955_v5  ;;  %v2314_v4 = vld [vmem:[#allocation2 + $0x4490] sm:$0xff]  ;;  %v7551_v5 = vpack.c.bf16 %v2323_v62, %v2315_v61  ;;  %v6977_v11 = vpack.c.bf16 %v2320_v3, %v2312_v2  ;;  %v6995_v61 = vpack.c.bf16 %v2401_v56, %v2393_v55  ;;  %v2392_v62 = vld [vmem:[#allocation2 + $0x4700] sm:$0xff]  ;;  %v2409_v3 = vld [vmem:[#allocation2 + $0x4788] sm:$0xff] }
 0x281   :  { %7532 = vmatprep.subr.bf16.mxu1 %v7531_v9  ;;  %v2331_v9 = vld [vmem:[#allocation2 + $0x4518] sm:$0xff]  ;;  %v7553_v12 = vpack.c.bf16 %v2322_v6, %v2314_v4  ;;  %v2402_v2 = vld [vmem:[#allocation2 + $0x4750] sm:$0xff]  ;;  %v2417_v4 = vld [vmem:[#allocation2 + $0x47c8] sm:$0xff] }
 0x282   :  { %v2419_v6 = vld [vmem:[#allocation2 + $0x47d8] sm:$0xff] }
 0x283   :  { %6958 = vmatpush1.bf16.msra.mxu0 %v6957_v15  ;;  %v2336_v15 = vld [vmem:[#allocation2 + $0x4540] sm:$0xff]  ;;  %v175_v55 = vld [vmem:[#allocation2 + $0x1b8] sm:$0xff] }
 0x284   :  { %7534 = vmatpush1.bf16.msra.mxu1 %v7533_v16  ;;  %6960 = vmatprep.subr.bf16.mxu0 %v6959_v17  ;;  %v2330_v16 = vld [vmem:[#allocation2 + $0x4510] sm:$0xff]  ;;  %v7555_v17 = vpack.c.bf16 %v2339_v10, %v2331_v9  ;;  %v6981_v23 = vpack.c.bf16 %v2336_v15, %v2328_v14  ;;  %v6999_v9 = vpack.c.bf16 %v2417_v4, %v2409_v3  ;;  %v2408_v10 = vld [vmem:[#allocation2 + $0x4780] sm:$0xff]  ;;  %v125_v15 = vld [vmem:[#allocation2 + $0x28] sm:$0xff] }
 0x285   :  { %7536 = vmatprep.subr.bf16.mxu1 %v7535_v21  ;;  %v2347_v21 = vld [vmem:[#allocation2 + $0x4598] sm:$0xff]  ;;  %v7557_v24 = vpack.c.bf16 %v2338_v18, %v2330_v16  ;;  %v2418_v14 = vld [vmem:[#allocation2 + $0x47d0] sm:$0xff]  ;;  %v133_v16 = vld [vmem:[#allocation2 + $0x68] sm:$0xff] }
 0x286   :  { %v135_v18 = vld [vmem:[#allocation2 + $0x78] sm:$0xff] }
 0x287   :  { %6962 = vmatpush1.bf16.msra.mxu0 %v6961_v27  ;;  %v2352_v27 = vld [vmem:[#allocation2 + $0x45c0] sm:$0xff]  ;;  %v183_v56 = vld [vmem:[#allocation2 + $0x1f8] sm:$0xff] }
 0x288   :  { %7538 = vmatpush1.bf16.msra.mxu1 %v7537_v28  ;;  %6964 = vmatprep.subr.bf16.mxu0 %v6963_v29  ;;  %v2346_v28 = vld [vmem:[#allocation2 + $0x4590] sm:$0xff]  ;;  %v7559_v29 = vpack.c.bf16 %v2355_v22, %v2347_v21  ;;  %v6985_v35 = vpack.c.bf16 %v2352_v27, %v2344_v26  ;;  %v7579_v21 = vpack.c.bf16 %v133_v16, %v125_v15  ;;  %v124_v22 = vld [vmem:[#allocation2 + $0x20] sm:$0xff]  ;;  %v141_v27 = vld [vmem:[#allocation2 + $0xa8] sm:$0xff] }
 0x289   :  { %7540 = vmatprep.subr.bf16.mxu1 %v7539_v33  ;;  %v2363_v33 = vld [vmem:[#allocation2 + $0x4618] sm:$0xff]  ;;  %v7561_v36 = vpack.c.bf16 %v2354_v30, %v2346_v28  ;;  %v134_v26 = vld [vmem:[#allocation2 + $0x70] sm:$0xff]  ;;  %v149_v28 = vld [vmem:[#allocation2 + $0xe8] sm:$0xff] }
 0x28a   :  { %v151_v30 = vld [vmem:[#allocation2 + $0xf8] sm:$0xff] }
 0x28b   :  { %6966 = vmatpush1.bf16.msra.mxu0 %v6965_v39  ;;  %v2368_v39 = vld [vmem:[#allocation2 + $0x4640] sm:$0xff]  ;;  %v191_v3 = vld [vmem:[#allocation2 + $0x238] sm:$0xff] }
 0x28c   :  { %7542 = vmatpush1.bf16.msra.mxu1 %v7541_v40  ;;  %6968 = vmatprep.subr.bf16.mxu0 %v6967_v41  ;;  %v2362_v40 = vld [vmem:[#allocation2 + $0x4610] sm:$0xff]  ;;  %v7563_v41 = vpack.c.bf16 %v2371_v34, %v2363_v33  ;;  %v6989_v47 = vpack.c.bf16 %v2368_v39, %v2360_v38  ;;  %v7583_v34 = vpack.c.bf16 %v149_v28, %v141_v27  ;;  %v199_v4 = vld [vmem:[#allocation2 + $0x278] sm:$0xff] }
 0x28d   :  { %7544 = vmatprep.subr.bf16.mxu1 %v7543_v45  ;;  %v2379_v45 = vld [vmem:[#allocation2 + $0x4698] sm:$0xff]  ;;  %v7565_v48 = vpack.c.bf16 %v2370_v42, %v2362_v40  ;;  %v150_v39 = vld [vmem:[#allocation2 + $0xf0] sm:$0xff]  ;;  %v157_v40 = vld [vmem:[#allocation2 + $0x128] sm:$0xff] }
 0x28e   :  { %v159_v42 = vld [vmem:[#allocation2 + $0x138] sm:$0xff] }
 0x28f   :  { %6970 = vmatpush1.bf16.msra.mxu0 %v6969_v51  ;;  %v2384_v51 = vld [vmem:[#allocation2 + $0x46c0] sm:$0xff]  ;;  %v207_v15 = vld [vmem:[#allocation2 + $0x2b8] sm:$0xff] }
 0x290   :  { %7546 = vmatpush1.bf16.msra.mxu1 %v7545_v52  ;;  %6972 = vmatprep.subr.bf16.mxu0 %v6971_v53  ;;  %v2378_v52 = vld [vmem:[#allocation2 + $0x4690] sm:$0xff]  ;;  %v7567_v53 = vpack.c.bf16 %v2387_v46, %v2379_v45  ;;  %v6993_v59 = vpack.c.bf16 %v2384_v51, %v2376_v50  ;;  %v8163_v50 = vpack.c.bf16 %v167_v43, %v159_v42  ;;  %v215_v16 = vld [vmem:[#allocation2 + $0x2f8] sm:$0xff] }
 0x291   :  { %7548 = vmatprep.subr.bf16.mxu1 %v7547_v57  ;;  %v2395_v57 = vld [vmem:[#allocation2 + $0x4718] sm:$0xff]  ;;  %v7569_v60 = vpack.c.bf16 %v2386_v54, %v2378_v52  ;;  %v166_v51 = vld [vmem:[#allocation2 + $0x170] sm:$0xff]  ;;  %v173_v52 = vld [vmem:[#allocation2 + $0x1a8] sm:$0xff] }
 0x292   :  { %v9407_v54 = vld [vmem:[%s9854_s0 + $0x8] sm:$0xff]  ;;  %v223_v27 = vld [vmem:[#allocation2 + $0x338] sm:$0xff] }
 0x293   :  { %6974 = vmatpush1.bf16.msra.mxu0 %v6973_v63  ;;  %v2400_v63 = vld [vmem:[#allocation2 + $0x4740] sm:$0xff]  ;;  %v231_v28 = vld [vmem:[#allocation2 + $0x378] sm:$0xff] }
 0x294   :  { %7550 = vmatpush1.bf16.msra.mxu1 %v7549_v0  ;;  %6976 = vmatprep.subr.bf16.mxu0 %v6975_v1  ;;  %v2394_v0 = vld [vmem:[#allocation2 + $0x4710] sm:$0xff]  ;;  %v7571_v1 = vpack.c.bf16 %v2403_v58, %v2395_v57  ;;  %v6997_v7 = vpack.c.bf16 %v2400_v63, %v2392_v62  ;;  %v8167_v63 = vpack.c.bf16 %v183_v56, %v175_v55  ;;  %v252_v56 = vld [vmem:[#allocation2 + $0x420] sm:$0xff] }
 0x295   :  { %7552 = vmatprep.subr.bf16.mxu1 %v7551_v5  ;;  %v2411_v5 = vld [vmem:[#allocation2 + $0x4798] sm:$0xff]  ;;  %v7573_v8 = vpack.c.bf16 %v2402_v2, %v2394_v0  ;;  %v174_v62 = vld [vmem:[#allocation2 + $0x1b0] sm:$0xff]  ;;  %v197_v2 = vld [vmem:[#allocation2 + $0x268] sm:$0xff] }
 0x296   :  { %v182_v0 = vld [vmem:[#allocation2 + $0x1f0] sm:$0xff] }
 0x297   :  { %6978 = vmatpush1.bf16.msra.mxu0 %v6977_v11  ;;  %v2416_v11 = vld [vmem:[#allocation2 + $0x47c0] sm:$0xff] }
 0x298   :  { %7554 = vmatpush1.bf16.msra.mxu1 %v7553_v12  ;;  %6980 = vmatprep.subr.bf16.mxu0 %v6979_v13  ;;  %v2410_v12 = vld [vmem:[#allocation2 + $0x4790] sm:$0xff]  ;;  %v7575_v13 = vpack.c.bf16 %v2419_v6, %v2411_v5  ;;  %v7001_v19 = vpack.c.bf16 %v2416_v11, %v2408_v10  ;;  %v8169_v6 = vpack.c.bf16 %v182_v0, %v174_v62  ;;  %v277_v62 = vld [vmem:[#allocation2 + $0x4e8] sm:$0xff]  ;;  %v279_v0 = vld [vmem:[#allocation2 + $0x4f8] sm:$0xff] }
 0x299   :  { %7556 = vmatprep.subr.bf16.mxu1 %v7555_v17  ;;  %v127_v17 = vld [vmem:[#allocation2 + $0x38] sm:$0xff]  ;;  %v7577_v20 = vpack.c.bf16 %v2418_v14, %v2410_v12  ;;  %v190_v10 = vld [vmem:[#allocation2 + $0x230] sm:$0xff]  ;;  %v8171_v11 = vpack.c.bf16 %v199_v4, %v191_v3  ;;  %v213_v14 = vld [vmem:[#allocation2 + $0x2e8] sm:$0xff] }
 0x29a   :  { %v198_v12 = vld [vmem:[#allocation2 + $0x270] sm:$0xff]  ;;  %v268_v4 = vld [vmem:[#allocation2 + $0x4a0] sm:$0xff] }
 0x29b   :  { %6982 = vmatpush1.bf16.msra.mxu0 %v6981_v23  ;;  %v132_v23 = vld [vmem:[#allocation2 + $0x60] sm:$0xff] }
 0x29c   :  { %7558 = vmatpush1.bf16.msra.mxu1 %v7557_v24  ;;  %6984 = vmatprep.subr.bf16.mxu0 %v6983_v25  ;;  %v126_v24 = vld [vmem:[#allocation2 + $0x30] sm:$0xff]  ;;  %v8155_v25 = vpack.c.bf16 %v135_v18, %v127_v17  ;;  %v7581_v32 = vpack.c.bf16 %v132_v23, %v124_v22  ;;  %v8173_v18 = vpack.c.bf16 %v198_v12, %v190_v10  ;;  %v293_v10 = vld [vmem:[#allocation2 + $0x568] sm:$0xff]  ;;  %v295_v12 = vld [vmem:[#allocation2 + $0x578] sm:$0xff] }
 0x29d   :  { %7560 = vmatprep.subr.bf16.mxu1 %v7559_v29  ;;  %v143_v29 = vld [vmem:[#allocation2 + $0xb8] sm:$0xff]  ;;  %v8157_v33 = vpack.c.bf16 %v134_v26, %v126_v24  ;;  %v206_v22 = vld [vmem:[#allocation2 + $0x2b0] sm:$0xff]  ;;  %v8175_v23 = vpack.c.bf16 %v215_v16, %v207_v15  ;;  %v229_v26 = vld [vmem:[#allocation2 + $0x368] sm:$0xff] }
 0x29e   :  { %v8159_v38 = vpack.c.bf16 %v151_v30, %v143_v29  ;;  %v214_v24 = vld [vmem:[#allocation2 + $0x2f0] sm:$0xff]  ;;  %v284_v16 = vld [vmem:[#allocation2 + $0x520] sm:$0xff] }
 0x29f   :  { %6986 = vmatpush1.bf16.msra.mxu0 %v6985_v35  ;;  %v140_v35 = vld [vmem:[#allocation2 + $0xa0] sm:$0xff]  ;;  %v8177_v30 = vpack.c.bf16 %v214_v24, %v206_v22  ;;  %v309_v22 = vld [vmem:[#allocation2 + $0x5e8] sm:$0xff]  ;;  %v311_v24 = vld [vmem:[#allocation2 + $0x5f8] sm:$0xff] }
 0x2a0   :  { %7562 = vmatpush1.bf16.msra.mxu1 %v7561_v36  ;;  %6988 = vmatprep.subr.bf16.mxu0 %v6987_v37  ;;  %v148_v36 = vld [vmem:[#allocation2 + $0xe0] sm:$0xff]  ;;  %v142_v37 = vld [vmem:[#allocation2 + $0xb0] sm:$0xff] }
 0x2a1   :  { %7564 = vmatprep.subr.bf16.mxu1 %v7563_v41  ;;  %v165_v41 = vld [vmem:[#allocation2 + $0x168] sm:$0xff]  ;;  %v7585_v44 = vpack.c.bf16 %v148_v36, %v140_v35  ;;  %v8161_v45 = vpack.c.bf16 %v150_v39, %v142_v37  ;;  %v8179_v35 = vpack.c.bf16 %v231_v28, %v223_v27  ;;  %v230_v36 = vld [vmem:[#allocation2 + $0x370] sm:$0xff]  ;;  %v239_v39 = vld [vmem:[#allocation2 + $0x3b8] sm:$0xff] }
 0x2a2   :  { %v7587_v46 = vpack.c.bf16 %v165_v41, %v157_v40  ;;  %v237_v37 = vld [vmem:[#allocation2 + $0x3a8] sm:$0xff]  ;;  %v247_v40 = vld [vmem:[#allocation2 + $0x3f8] sm:$0xff]  ;;  %v300_v28 = vld [vmem:[#allocation2 + $0x5a0] sm:$0xff] }
 0x2a3   :  { %6990 = vmatpush1.bf16.msra.mxu0 %v6989_v47  ;;  %v156_v47 = vld [vmem:[#allocation2 + $0x120] sm:$0xff] }
 0x2a4   :  { %7566 = vmatpush1.bf16.msra.mxu1 %v7565_v48  ;;  %6992 = vmatprep.subr.bf16.mxu0 %v6991_v49  ;;  %v164_v48 = vld [vmem:[#allocation2 + $0x160] sm:$0xff]  ;;  %v158_v49 = vld [vmem:[#allocation2 + $0x130] sm:$0xff] }
 0x2a5   :  { %7568 = vmatprep.subr.bf16.mxu1 %v7567_v53  ;;  %v181_v53 = vld [vmem:[#allocation2 + $0x1e8] sm:$0xff]  ;;  %v7589_v57 = vpack.c.bf16 %v164_v48, %v156_v47  ;;  %v8165_v58 = vpack.c.bf16 %v166_v51, %v158_v49  ;;  %v8183_v47 = vpack.c.bf16 %v247_v40, %v239_v39  ;;  %v246_v48 = vld [vmem:[#allocation2 + $0x3f0] sm:$0xff]  ;;  %v255_v51 = vld [vmem:[#allocation2 + $0x438] sm:$0xff] }
 0x2a6   :  { %v253_v49 = vld [vmem:[#allocation2 + $0x428] sm:$0xff]  ;;  %v316_v40 = vld [vmem:[#allocation2 + $0x620] sm:$0xff] }
 0x2a7   :  { %6994 = vmatpush1.bf16.msra.mxu0 %v6993_v59  ;;  %v7591_v59 = vpack.c.bf16 %v181_v53, %v173_v52  ;;  %v263_v52 = vld [vmem:[#allocation2 + $0x478] sm:$0xff] }
 0x2a8   :  { %7570 = vmatpush1.bf16.msra.mxu1 %v7569_v60  ;;  %6996 = vmatprep.subr.bf16.mxu0 %v6995_v61  ;;  %v172_v60 = vld [vmem:[#allocation2 + $0x1a0] sm:$0xff] }
 0x2a9   :  { %7572 = vmatprep.subr.bf16.mxu1 %v7571_v1  ;;  %v180_v61 = vld [vmem:[#allocation2 + $0x1e0] sm:$0xff]  ;;  %v189_v1 = vld [vmem:[#allocation2 + $0x228] sm:$0xff] }
 0x2aa   :  { %v7593_v5 = vpack.c.bf16 %v180_v61, %v172_v60  ;;  %v262_v60 = vld [vmem:[#allocation2 + $0x470] sm:$0xff]  ;;  %v269_v61 = vld [vmem:[#allocation2 + $0x4a8] sm:$0xff] }
 0x2ab   :  { %6998 = vmatpush1.bf16.msra.mxu0 %v6997_v7  ;;  %v7595_v7 = vpack.c.bf16 %v197_v2, %v189_v1  ;;  %v7615_v3 = vpack.c.bf16 %v277_v62, %v269_v61 }
 0x2ac   :  { %7574 = vmatpush1.bf16.msra.mxu1 %v7573_v8  ;;  %7000 = vmatprep.subr.bf16.mxu0 %v6999_v9  ;;  %v188_v8 = vld [vmem:[#allocation2 + $0x220] sm:$0xff] }
 0x2ad   :  { %7576 = vmatprep.subr.bf16.mxu1 %v7575_v13  ;;  %v196_v9 = vld [vmem:[#allocation2 + $0x260] sm:$0xff]  ;;  %v205_v13 = vld [vmem:[#allocation2 + $0x2a8] sm:$0xff] }
 0x2ae   :  { %v7597_v17 = vpack.c.bf16 %v196_v9, %v188_v8  ;;  %v278_v8 = vld [vmem:[#allocation2 + $0x4f0] sm:$0xff]  ;;  %v285_v9 = vld [vmem:[#allocation2 + $0x528] sm:$0xff] }
 0x2af   :  { %7002 = vmatpush1.bf16.msra.mxu0 %v7001_v19  ;;  %v7599_v19 = vpack.c.bf16 %v213_v14, %v205_v13  ;;  %v7619_v15 = vpack.c.bf16 %v293_v10, %v285_v9 }
 0x2b0   :  { %7578 = vmatpush1.bf16.msra.mxu1 %v7577_v20  ;;  %7580 = vmatprep.subr.bf16.mxu0 %v7579_v21  ;;  %v204_v20 = vld [vmem:[#allocation2 + $0x2a0] sm:$0xff] }
 0x2b1   :  { %8156 = vmatprep.subr.bf16.mxu1 %v8155_v25  ;;  %v212_v21 = vld [vmem:[#allocation2 + $0x2e0] sm:$0xff]  ;;  %v221_v25 = vld [vmem:[#allocation2 + $0x328] sm:$0xff] }
 0x2b2   :  { %3099 = vmatmul.mubr.f32.vlgmr.msra.gmra.mrb[0].mxu0 %v118_v31  ;;  %v7601_v29 = vpack.c.bf16 %v212_v21, %v204_v20  ;;  %v294_v20 = vld [vmem:[#allocation2 + $0x570] sm:$0xff]  ;;  %v301_v21 = vld [vmem:[#allocation2 + $0x5a8] sm:$0xff] }
 0x2b3   :  { %3738 = vmatmul.mubr.f32.vlgmr.msra.gmra.mrb[0].mxu1 %v118_v31  ;;  %7582 = vmatpush1.bf16.msra.mxu0 %v7581_v32  ;;  %v7603_v31 = vpack.c.bf16 %v229_v26, %v221_v25  ;;  %v220_v32 = vld [vmem:[#allocation2 + $0x320] sm:$0xff]  ;;  %v7623_v27 = vpack.c.bf16 %v309_v22, %v301_v21 }
 0x2b4   :  { %8158 = vmatpush1.bf16.msra.mxu1 %v8157_v33  ;;  %7584 = vmatprep.subr.bf16.mxu0 %v7583_v34  ;;  %v228_v33 = vld [vmem:[#allocation2 + $0x360] sm:$0xff]  ;;  %v222_v34 = vld [vmem:[#allocation2 + $0x330] sm:$0xff] }
 0x2b5   :  { %8160 = vmatprep.subr.bf16.mxu1 %v8159_v38  ;;  %3808 = vmatprep.mubr.f32.mxu0 %v9407_v54  ;;  %v245_v38 = vld [vmem:[#allocation2 + $0x3e8] sm:$0xff]  ;;  %v7605_v41 = vpack.c.bf16 %v228_v33, %v220_v32  ;;  %v8181_v42 = vpack.c.bf16 %v230_v36, %v222_v34  ;;  %v310_v32 = vld [vmem:[#allocation2 + $0x5f0] sm:$0xff]  ;;  %v327_v36 = vld [vmem:[#allocation2 + $0x678] sm:$0xff] }
 0x2b6   :  { %4447 = vmatprep.mubr.f32.mxu1 %v9407_v54  ;;  %v7607_v43 = vpack.c.bf16 %v245_v38, %v237_v37  ;;  %v317_v33 = vld [vmem:[#allocation2 + $0x628] sm:$0xff] }
 0x2b7   :  { %7586 = vmatpush1.bf16.msra.mxu0 %v7585_v44  ;;  %v236_v44 = vld [vmem:[#allocation2 + $0x3a0] sm:$0xff]  ;;  %v325_v34 = vld [vmem:[#allocation2 + $0x668] sm:$0xff] }
 0x2b8   :  { %8162 = vmatpush1.bf16.msra.mxu1 %v8161_v45  ;;  %7588 = vmatprep.subr.bf16.mxu0 %v7587_v46  ;;  %v244_v45 = vld [vmem:[#allocation2 + $0x3e0] sm:$0xff]  ;;  %v238_v46 = vld [vmem:[#allocation2 + $0x3b0] sm:$0xff]  ;;  %v7627_v39 = vpack.c.bf16 %v325_v34, %v317_v33 }
 0x2b9   :  { %8164 = vmatprep.subr.bf16.mxu1 %v8163_v50  ;;  %v261_v50 = vld [vmem:[#allocation2 + $0x468] sm:$0xff]  ;;  %v7609_v53 = vpack.c.bf16 %v244_v45, %v236_v44  ;;  %v8185_v54 = vpack.c.bf16 %v246_v48, %v238_v46  ;;  %v326_v44 = vld [vmem:[#allocation2 + $0x670] sm:$0xff]  ;;  %v343_v48 = vld [vmem:[#allocation2 + $0x6f8] sm:$0xff] }
 0x2ba   :  { %v7611_v55 = vpack.c.bf16 %v261_v50, %v253_v49  ;;  %v333_v45 = vld [vmem:[#allocation2 + $0x6a8] sm:$0xff] }
 0x2bb   :  { %7590 = vmatpush1.bf16.msra.mxu0 %v7589_v57  ;;  %v260_v57 = vld [vmem:[#allocation2 + $0x460] sm:$0xff]  ;;  %v341_v46 = vld [vmem:[#allocation2 + $0x6e8] sm:$0xff] }
 0x2bc   :  { %8166 = vmatpush1.bf16.msra.mxu1 %v8165_v58  ;;  %7592 = vmatprep.subr.bf16.mxu0 %v7591_v59  ;;  %v254_v58 = vld [vmem:[#allocation2 + $0x430] sm:$0xff]  ;;  %v8187_v59 = vpack.c.bf16 %v263_v52, %v255_v51  ;;  %v7613_v1 = vpack.c.bf16 %v260_v57, %v252_v56  ;;  %v7631_v51 = vpack.c.bf16 %v341_v46, %v333_v45  ;;  %v332_v52 = vld [vmem:[#allocation2 + $0x6a0] sm:$0xff]  ;;  %v349_v57 = vld [vmem:[#allocation2 + $0x728] sm:$0xff] }
 0x2bd   :  { %8168 = vmatprep.subr.bf16.mxu1 %v8167_v63  ;;  %v271_v63 = vld [vmem:[#allocation2 + $0x4b8] sm:$0xff]  ;;  %v8189_v2 = vpack.c.bf16 %v262_v60, %v254_v58  ;;  %v342_v56 = vld [vmem:[#allocation2 + $0x6f0] sm:$0xff]  ;;  %v357_v58 = vld [vmem:[#allocation2 + $0x768] sm:$0xff] }
 0x2be   :  { %v359_v60 = vld [vmem:[#allocation2 + $0x778] sm:$0xff] }
 0x2bf   :  { %7594 = vmatpush1.bf16.msra.mxu0 %v7593_v5  ;;  %v276_v5 = vld [vmem:[#allocation2 + $0x4e0] sm:$0xff]  ;;  %v423_v45 = vld [vmem:[#allocation2 + $0x978] sm:$0xff] }
 0x2c0   :  { %8170 = vmatpush1.bf16.msra.mxu1 %v8169_v6  ;;  %7596 = vmatprep.subr.bf16.mxu0 %v7595_v7  ;;  %v270_v6 = vld [vmem:[#allocation2 + $0x4b0] sm:$0xff]  ;;  %v8191_v7 = vpack.c.bf16 %v279_v0, %v271_v63  ;;  %v7617_v13 = vpack.c.bf16 %v276_v5, %v268_v4  ;;  %v7635_v63 = vpack.c.bf16 %v357_v58, %v349_v57  ;;  %v348_v0 = vld [vmem:[#allocation2 + $0x720] sm:$0xff]  ;;  %v365_v5 = vld [vmem:[#allocation2 + $0x7a8] sm:$0xff] }
 0x2c1   :  { %8172 = vmatprep.subr.bf16.mxu1 %v8171_v11  ;;  %v287_v11 = vld [vmem:[#allocation2 + $0x538] sm:$0xff]  ;;  %v8193_v14 = vpack.c.bf16 %v278_v8, %v270_v6  ;;  %v358_v4 = vld [vmem:[#allocation2 + $0x770] sm:$0xff]  ;;  %v373_v6 = vld [vmem:[#allocation2 + $0x7e8] sm:$0xff] }
 0x2c2   :  { %v375_v8 = vld [vmem:[#allocation2 + $0x7f8] sm:$0xff] }
 0x2c3   :  { %7598 = vmatpush1.bf16.msra.mxu0 %v7597_v17  ;;  %v292_v17 = vld [vmem:[#allocation2 + $0x560] sm:$0xff]  ;;  %v431_v57 = vld [vmem:[#allocation2 + $0x9b8] sm:$0xff] }
 0x2c4   :  { %8174 = vmatpush1.bf16.msra.mxu1 %v8173_v18  ;;  %7600 = vmatprep.subr.bf16.mxu0 %v7599_v19  ;;  %v286_v18 = vld [vmem:[#allocation2 + $0x530] sm:$0xff]  ;;  %v8195_v19 = vpack.c.bf16 %v295_v12, %v287_v11  ;;  %v7621_v25 = vpack.c.bf16 %v292_v17, %v284_v16  ;;  %v7639_v11 = vpack.c.bf16 %v373_v6, %v365_v5  ;;  %v364_v12 = vld [vmem:[#allocation2 + $0x7a0] sm:$0xff]  ;;  %v381_v17 = vld [vmem:[#allocation2 + $0x828] sm:$0xff] }
 0x2c5   :  { %8176 = vmatprep.subr.bf16.mxu1 %v8175_v23  ;;  %v303_v23 = vld [vmem:[#allocation2 + $0x5b8] sm:$0xff]  ;;  %v8197_v26 = vpack.c.bf16 %v294_v20, %v286_v18  ;;  %v374_v16 = vld [vmem:[#allocation2 + $0x7f0] sm:$0xff]  ;;  %v389_v18 = vld [vmem:[#allocation2 + $0x868] sm:$0xff] }
 0x2c6   :  { %v391_v20 = vld [vmem:[#allocation2 + $0x878] sm:$0xff] }
 0x2c7   :  { %7602 = vmatpush1.bf16.msra.mxu0 %v7601_v29  ;;  %v308_v29 = vld [vmem:[#allocation2 + $0x5e0] sm:$0xff]  ;;  %v439_v58 = vld [vmem:[#allocation2 + $0x9f8] sm:$0xff] }
 0x2c8   :  { %8178 = vmatpush1.bf16.msra.mxu1 %v8177_v30  ;;  %7604 = vmatprep.subr.bf16.mxu0 %v7603_v31  ;;  %v302_v30 = vld [vmem:[#allocation2 + $0x5b0] sm:$0xff]  ;;  %v8199_v31 = vpack.c.bf16 %v311_v24, %v303_v23  ;;  %v7625_v37 = vpack.c.bf16 %v308_v29, %v300_v28  ;;  %v7643_v23 = vpack.c.bf16 %v389_v18, %v381_v17  ;;  %v380_v24 = vld [vmem:[#allocation2 + $0x820] sm:$0xff]  ;;  %v397_v29 = vld [vmem:[#allocation2 + $0x8a8] sm:$0xff] }
 0x2c9   :  { %8180 = vmatprep.subr.bf16.mxu1 %v8179_v35  ;;  %v319_v35 = vld [vmem:[#allocation2 + $0x638] sm:$0xff]  ;;  %v8201_v38 = vpack.c.bf16 %v310_v32, %v302_v30  ;;  %v390_v28 = vld [vmem:[#allocation2 + $0x870] sm:$0xff]  ;;  %v405_v30 = vld [vmem:[#allocation2 + $0x8e8] sm:$0xff] }
 0x2ca   :  { %v407_v32 = vld [vmem:[#allocation2 + $0x8f8] sm:$0xff] }
 0x2cb   :  { %7606 = vmatpush1.bf16.msra.mxu0 %v7605_v41  ;;  %v324_v41 = vld [vmem:[#allocation2 + $0x660] sm:$0xff]  ;;  %v447_v5 = vld [vmem:[#allocation2 + $0xa38] sm:$0xff] }
 0x2cc   :  { %8182 = vmatpush1.bf16.msra.mxu1 %v8181_v42  ;;  %7608 = vmatprep.subr.bf16.mxu0 %v7607_v43  ;;  %v318_v42 = vld [vmem:[#allocation2 + $0x630] sm:$0xff]  ;;  %v8203_v43 = vpack.c.bf16 %v327_v36, %v319_v35  ;;  %v7629_v49 = vpack.c.bf16 %v324_v41, %v316_v40  ;;  %v7647_v35 = vpack.c.bf16 %v405_v30, %v397_v29  ;;  %v396_v36 = vld [vmem:[#allocation2 + $0x8a0] sm:$0xff]  ;;  %v413_v41 = vld [vmem:[#allocation2 + $0x928] sm:$0xff] }
 0x2cd   :  { %8184 = vmatprep.subr.bf16.mxu1 %v8183_v47  ;;  %v335_v47 = vld [vmem:[#allocation2 + $0x6b8] sm:$0xff]  ;;  %v8205_v50 = vpack.c.bf16 %v326_v44, %v318_v42  ;;  %v406_v40 = vld [vmem:[#allocation2 + $0x8f0] sm:$0xff]  ;;  %v421_v42 = vld [vmem:[#allocation2 + $0x968] sm:$0xff] }
 0x2ce   :  { %v415_v44 = vld [vmem:[#allocation2 + $0x938] sm:$0xff] }
 0x2cf   :  { %7610 = vmatpush1.bf16.msra.mxu0 %v7609_v53  ;;  %v340_v53 = vld [vmem:[#allocation2 + $0x6e0] sm:$0xff]  ;;  %v455_v6 = vld [vmem:[#allocation2 + $0xa78] sm:$0xff] }
 0x2d0   :  { %8186 = vmatpush1.bf16.msra.mxu1 %v8185_v54  ;;  %7612 = vmatprep.subr.bf16.mxu0 %v7611_v55  ;;  %v334_v54 = vld [vmem:[#allocation2 + $0x6b0] sm:$0xff]  ;;  %v8207_v55 = vpack.c.bf16 %v343_v48, %v335_v47  ;;  %v7633_v61 = vpack.c.bf16 %v340_v53, %v332_v52  ;;  %v7651_v48 = vpack.c.bf16 %v421_v42, %v413_v41  ;;  %v463_v17 = vld [vmem:[#allocation2 + $0xab8] sm:$0xff] }
 0x2d1   :  { %8188 = vmatprep.subr.bf16.mxu1 %v8187_v59  ;;  %v351_v59 = vld [vmem:[#allocation2 + $0x738] sm:$0xff]  ;;  %v8209_v62 = vpack.c.bf16 %v342_v56, %v334_v54  ;;  %v8227_v52 = vpack.c.bf16 %v423_v45, %v415_v44  ;;  %v422_v53 = vld [vmem:[#allocation2 + $0x970] sm:$0xff]  ;;  %v429_v54 = vld [vmem:[#allocation2 + $0x9a8] sm:$0xff] }
 0x2d2   :  { %v9409_v56 = vld [vmem:[%s9854_s0 + $0x18] sm:$0xff] }
 0x2d3   :  { %7614 = vmatpush1.bf16.msra.mxu0 %v7613_v1  ;;  %v356_v1 = vld [vmem:[#allocation2 + $0x760] sm:$0xff]  ;;  %v471_v18 = vld [vmem:[#allocation2 + $0xaf8] sm:$0xff] }
 0x2d4   :  { %8190 = vmatpush1.bf16.msra.mxu1 %v8189_v2  ;;  %7616 = vmatprep.subr.bf16.mxu0 %v7615_v3  ;;  %v350_v2 = vld [vmem:[#allocation2 + $0x730] sm:$0xff]  ;;  %v8211_v3 = vpack.c.bf16 %v359_v60, %v351_v59  ;;  %v7637_v9 = vpack.c.bf16 %v356_v1, %v348_v0  ;;  %v8231_v1 = vpack.c.bf16 %v439_v58, %v431_v57  ;;  %v479_v29 = vld [vmem:[#allocation2 + $0xb38] sm:$0xff]  ;;  %v508_v58 = vld [vmem:[#allocation2 + $0xc20] sm:$0xff] }
 0x2d5   :  { %8192 = vmatprep.subr.bf16.mxu1 %v8191_v7  ;;  %v367_v7 = vld [vmem:[#allocation2 + $0x7b8] sm:$0xff]  ;;  %v8213_v10 = vpack.c.bf16 %v358_v4, %v350_v2  ;;  %v430_v0 = vld [vmem:[#allocation2 + $0x9b0] sm:$0xff]  ;;  %v453_v4 = vld [vmem:[#allocation2 + $0xa68] sm:$0xff] }
 0x2d6   :  { %v438_v2 = vld [vmem:[#allocation2 + $0x9f0] sm:$0xff]  ;;  %v487_v30 = vld [vmem:[#allocation2 + $0xb78] sm:$0xff] }
 0x2d7   :  { %7618 = vmatpush1.bf16.msra.mxu0 %v7617_v13  ;;  %v372_v13 = vld [vmem:[#allocation2 + $0x7e0] sm:$0xff]  ;;  %v495_v41 = vld [vmem:[#allocation2 + $0xbb8] sm:$0xff] }
 0x2d8   :  { %8194 = vmatpush1.bf16.msra.mxu1 %v8193_v14  ;;  %7620 = vmatprep.subr.bf16.mxu0 %v7619_v15  ;;  %v366_v14 = vld [vmem:[#allocation2 + $0x7b0] sm:$0xff]  ;;  %v8215_v15 = vpack.c.bf16 %v375_v8, %v367_v7  ;;  %v7641_v21 = vpack.c.bf16 %v372_v13, %v364_v12  ;;  %v8233_v8 = vpack.c.bf16 %v438_v2, %v430_v0  ;;  %v503_v42 = vld [vmem:[#allocation2 + $0xbf8] sm:$0xff]  ;;  %v533_v0 = vld [vmem:[#allocation2 + $0xce8] sm:$0xff] }
 0x2d9   :  { %8196 = vmatprep.subr.bf16.mxu1 %v8195_v19  ;;  %v383_v19 = vld [vmem:[#allocation2 + $0x838] sm:$0xff]  ;;  %v8217_v22 = vpack.c.bf16 %v374_v16, %v366_v14  ;;  %v446_v12 = vld [vmem:[#allocation2 + $0xa30] sm:$0xff]  ;;  %v8235_v13 = vpack.c.bf16 %v455_v6, %v447_v5  ;;  %v469_v16 = vld [vmem:[#allocation2 + $0xae8] sm:$0xff] }
 0x2da   :  { %v454_v14 = vld [vmem:[#allocation2 + $0xa70] sm:$0xff]  ;;  %v535_v2 = vld [vmem:[#allocation2 + $0xcf8] sm:$0xff]  ;;  %v524_v6 = vld [vmem:[#allocation2 + $0xca0] sm:$0xff] }
 0x2db   :  { %7622 = vmatpush1.bf16.msra.mxu0 %v7621_v25  ;;  %v388_v25 = vld [vmem:[#allocation2 + $0x860] sm:$0xff] }
 0x2dc   :  { %8198 = vmatpush1.bf16.msra.mxu1 %v8197_v26  ;;  %7624 = vmatprep.subr.bf16.mxu0 %v7623_v27  ;;  %v382_v26 = vld [vmem:[#allocation2 + $0x830] sm:$0xff]  ;;  %v8219_v27 = vpack.c.bf16 %v391_v20, %v383_v19  ;;  %v7645_v33 = vpack.c.bf16 %v388_v25, %v380_v24  ;;  %v8237_v20 = vpack.c.bf16 %v454_v14, %v446_v12  ;;  %v549_v12 = vld [vmem:[#allocation2 + $0xd68] sm:$0xff]  ;;  %v551_v14 = vld [vmem:[#allocation2 + $0xd78] sm:$0xff] }
 0x2dd   :  { %8200 = vmatprep.subr.bf16.mxu1 %v8199_v31  ;;  %v399_v31 = vld [vmem:[#allocation2 + $0x8b8] sm:$0xff]  ;;  %v8221_v34 = vpack.c.bf16 %v390_v28, %v382_v26  ;;  %v462_v24 = vld [vmem:[#allocation2 + $0xab0] sm:$0xff]  ;;  %v8239_v25 = vpack.c.bf16 %v471_v18, %v463_v17  ;;  %v485_v28 = vld [vmem:[#allocation2 + $0xb68] sm:$0xff] }
 0x2de   :  { %v470_v26 = vld [vmem:[#allocation2 + $0xaf0] sm:$0xff]  ;;  %v540_v18 = vld [vmem:[#allocation2 + $0xd20] sm:$0xff] }
 0x2df   :  { %7626 = vmatpush1.bf16.msra.mxu0 %v7625_v37  ;;  %v404_v37 = vld [vmem:[#allocation2 + $0x8e0] sm:$0xff] }
 0x2e0   :  { %8202 = vmatpush1.bf16.msra.mxu1 %v8201_v38  ;;  %7628 = vmatprep.subr.bf16.mxu0 %v7627_v39  ;;  %v398_v38 = vld [vmem:[#allocation2 + $0x8b0] sm:$0xff]  ;;  %v8223_v39 = vpack.c.bf16 %v407_v32, %v399_v31  ;;  %v7649_v46 = vpack.c.bf16 %v404_v37, %v396_v36  ;;  %v8241_v32 = vpack.c.bf16 %v470_v26, %v462_v24  ;;  %v565_v24 = vld [vmem:[#allocation2 + $0xde8] sm:$0xff]  ;;  %v567_v26 = vld [vmem:[#allocation2 + $0xdf8] sm:$0xff] }
 0x2e1   :  { %8204 = vmatprep.subr.bf16.mxu1 %v8203_v43  ;;  %v9408_v43 = vld [vmem:[%s9854_s0] sm:$0xff]  ;;  %v8225_v47 = vpack.c.bf16 %v406_v40, %v398_v38  ;;  %v478_v36 = vld [vmem:[#allocation2 + $0xb30] sm:$0xff]  ;;  %v8243_v37 = vpack.c.bf16 %v487_v30, %v479_v29  ;;  %v501_v40 = vld [vmem:[#allocation2 + $0xbe8] sm:$0xff] }
 0x2e2   :  { %v486_v38 = vld [vmem:[#allocation2 + $0xb70] sm:$0xff]  ;;  %v556_v30 = vld [vmem:[#allocation2 + $0xda0] sm:$0xff] }
 0x2e3   :  { %7630 = vmatpush1.bf16.msra.mxu0 %v7629_v49  ;;  %v412_v49 = vld [vmem:[#allocation2 + $0x920] sm:$0xff]  ;;  %v8245_v44 = vpack.c.bf16 %v486_v38, %v478_v36  ;;  %v581_v36 = vld [vmem:[#allocation2 + $0xe68] sm:$0xff]  ;;  %v583_v38 = vld [vmem:[#allocation2 + $0xe78] sm:$0xff] }
 0x2e4   :  { %8206 = vmatpush1.bf16.msra.mxu1 %v8205_v50  ;;  %7632 = vmatprep.subr.bf16.mxu0 %v7631_v51  ;;  %v420_v50 = vld [vmem:[#allocation2 + $0x960] sm:$0xff]  ;;  %v414_v51 = vld [vmem:[#allocation2 + $0x930] sm:$0xff] }
 0x2e5   :  { %8208 = vmatprep.subr.bf16.mxu1 %v8207_v55  ;;  %v437_v55 = vld [vmem:[#allocation2 + $0x9e8] sm:$0xff]  ;;  %v7653_v59 = vpack.c.bf16 %v420_v50, %v412_v49  ;;  %v8229_v60 = vpack.c.bf16 %v422_v53, %v414_v51  ;;  %v8247_v49 = vpack.c.bf16 %v503_v42, %v495_v41  ;;  %v502_v50 = vld [vmem:[#allocation2 + $0xbf0] sm:$0xff]  ;;  %v511_v53 = vld [vmem:[#allocation2 + $0xc38] sm:$0xff] }
 0x2e6   :  { %v509_v51 = vld [vmem:[#allocation2 + $0xc28] sm:$0xff]  ;;  %v572_v42 = vld [vmem:[#allocation2 + $0xe20] sm:$0xff] }
 0x2e7   :  { %7634 = vmatpush1.bf16.msra.mxu0 %v7633_v61  ;;  %v7655_v61 = vpack.c.bf16 %v437_v55, %v429_v54  ;;  %v519_v54 = vld [vmem:[#allocation2 + $0xc78] sm:$0xff] }
 0x2e8   :  { %8210 = vmatpush1.bf16.msra.mxu1 %v8209_v62  ;;  %7636 = vmatprep.subr.bf16.mxu0 %v7635_v63  ;;  %v428_v62 = vld [vmem:[#allocation2 + $0x9a0] sm:$0xff] }
 0x2e9   :  { %8212 = vmatprep.subr.bf16.mxu1 %v8211_v3  ;;  %v436_v63 = vld [vmem:[#allocation2 + $0x9e0] sm:$0xff]  ;;  %v445_v3 = vld [vmem:[#allocation2 + $0xa28] sm:$0xff] }
 0x2ea   :  { %v7657_v7 = vpack.c.bf16 %v436_v63, %v428_v62  ;;  %v518_v62 = vld [vmem:[#allocation2 + $0xc70] sm:$0xff]  ;;  %v525_v63 = vld [vmem:[#allocation2 + $0xca8] sm:$0xff] }
 0x2eb   :  { %7638 = vmatpush1.bf16.msra.mxu0 %v7637_v9  ;;  %v7659_v9 = vpack.c.bf16 %v453_v4, %v445_v3  ;;  %v7679_v5 = vpack.c.bf16 %v533_v0, %v525_v63 }
 0x2ec   :  { %8214 = vmatpush1.bf16.msra.mxu1 %v8213_v10  ;;  %7640 = vmatprep.subr.bf16.mxu0 %v7639_v11  ;;  %v444_v10 = vld [vmem:[#allocation2 + $0xa20] sm:$0xff] }
 0x2ed   :  { %8216 = vmatprep.subr.bf16.mxu1 %v8215_v15  ;;  %v452_v11 = vld [vmem:[#allocation2 + $0xa60] sm:$0xff]  ;;  %v461_v15 = vld [vmem:[#allocation2 + $0xaa8] sm:$0xff] }
 0x2ee   :  { %v7661_v19 = vpack.c.bf16 %v452_v11, %v444_v10  ;;  %v534_v10 = vld [vmem:[#allocation2 + $0xcf0] sm:$0xff]  ;;  %v541_v11 = vld [vmem:[#allocation2 + $0xd28] sm:$0xff] }
 0x2ef   :  { %7642 = vmatpush1.bf16.msra.mxu0 %v7641_v21  ;;  %v7663_v21 = vpack.c.bf16 %v469_v16, %v461_v15  ;;  %v7683_v17 = vpack.c.bf16 %v549_v12, %v541_v11 }
 0x2f0   :  { %8218 = vmatpush1.bf16.msra.mxu1 %v8217_v22  ;;  %7644 = vmatprep.subr.bf16.mxu0 %v7643_v23  ;;  %v460_v22 = vld [vmem:[#allocation2 + $0xaa0] sm:$0xff] }
 0x2f1   :  { %8220 = vmatprep.subr.bf16.mxu1 %v8219_v27  ;;  %v468_v23 = vld [vmem:[#allocation2 + $0xae0] sm:$0xff]  ;;  %v477_v27 = vld [vmem:[#allocation2 + $0xb28] sm:$0xff] }
 0x2f2   :  { %3809 = vmatmul.mubr.f32.vlgmr.msra.gmra.mrb[2].mxu0 %v9408_v43  ;;  %v7665_v31 = vpack.c.bf16 %v468_v23, %v460_v22  ;;  %v550_v22 = vld [vmem:[#allocation2 + $0xd70] sm:$0xff]  ;;  %v557_v23 = vld [vmem:[#allocation2 + $0xda8] sm:$0xff] }
 0x2f3   :  { %7646 = vmatpush1.bf16.msra.mxu0 %v7645_v33  ;;  %4448 = vmatmul.mubr.f32.vlgmr.msra.gmra.mrb[2].mxu1 %v9408_v43  ;;  %v7667_v33 = vpack.c.bf16 %v485_v28, %v477_v27  ;;  %v7687_v29 = vpack.c.bf16 %v565_v24, %v557_v23 }
 0x2f4   :  { %8222 = vmatpush1.bf16.msra.mxu1 %v8221_v34  ;;  %7648 = vmatprep.subr.bf16.mxu0 %v7647_v35  ;;  %v476_v34 = vld [vmem:[#allocation2 + $0xb20] sm:$0xff] }
 0x2f5   :  { %8224 = vmatprep.subr.bf16.mxu1 %v8223_v39  ;;  %3879 = vmatprep.mubr.f32.mxu0 %v9409_v56  ;;  %v484_v35 = vld [vmem:[#allocation2 + $0xb60] sm:$0xff]  ;;  %v493_v39 = vld [vmem:[#allocation2 + $0xba8] sm:$0xff] }
 0x2f6   :  { %4518 = vmatprep.mubr.f32.mxu1 %v9409_v56  ;;  %v7669_v43 = vpack.c.bf16 %v484_v35, %v476_v34  ;;  %v7671_v45 = vpack.c.bf16 %v501_v40, %v493_v39  ;;  %v566_v34 = vld [vmem:[#allocation2 + $0xdf0] sm:$0xff]  ;;  %v573_v35 = vld [vmem:[#allocation2 + $0xe28] sm:$0xff] }
 0x2f7   :  { %7650 = vmatpush1.bf16.msra.mxu0 %v7649_v46  ;;  %v492_v46 = vld [vmem:[#allocation2 + $0xba0] sm:$0xff]  ;;  %v7691_v41 = vpack.c.bf16 %v581_v36, %v573_v35 }
 0x2f8   :  { %8226 = vmatpush1.bf16.msra.mxu1 %v8225_v47  ;;  %7652 = vmatprep.subr.bf16.mxu0 %v7651_v48  ;;  %v500_v47 = vld [vmem:[#allocation2 + $0xbe0] sm:$0xff]  ;;  %v494_v48 = vld [vmem:[#allocation2 + $0xbb0] sm:$0xff] }
 0x2f9   :  { %8228 = vmatprep.subr.bf16.mxu1 %v8227_v52  ;;  %v517_v52 = vld [vmem:[#allocation2 + $0xc68] sm:$0xff]  ;;  %v7673_v55 = vpack.c.bf16 %v500_v47, %v492_v46  ;;  %v8249_v56 = vpack.c.bf16 %v502_v50, %v494_v48  ;;  %v582_v46 = vld [vmem:[#allocation2 + $0xe70] sm:$0xff]  ;;  %v599_v50 = vld [vmem:[#allocation2 + $0xef8] sm:$0xff] }
 0x2fa   :  { %v7675_v57 = vpack.c.bf16 %v517_v52, %v509_v51  ;;  %v589_v47 = vld [vmem:[#allocation2 + $0xea8] sm:$0xff] }
 0x2fb   :  { %7654 = vmatpush1.bf16.msra.mxu0 %v7653_v59  ;;  %v516_v59 = vld [vmem:[#allocation2 + $0xc60] sm:$0xff]  ;;  %v597_v48 = vld [vmem:[#allocation2 + $0xee8] sm:$0xff] }
 0x2fc   :  { %8230 = vmatpush1.bf16.msra.mxu1 %v8229_v60  ;;  %7656 = vmatprep.subr.bf16.mxu0 %v7655_v61  ;;  %v510_v60 = vld [vmem:[#allocation2 + $0xc30] sm:$0xff]  ;;  %v8251_v61 = vpack.c.bf16 %v519_v54, %v511_v53  ;;  %v7677_v3 = vpack.c.bf16 %v516_v59, %v508_v58  ;;  %v7695_v53 = vpack.c.bf16 %v597_v48, %v589_v47  ;;  %v588_v54 = vld [vmem:[#allocation2 + $0xea0] sm:$0xff]  ;;  %v605_v59 = vld [vmem:[#allocation2 + $0xf28] sm:$0xff] }
 0x2fd   :  { %8232 = vmatprep.subr.bf16.mxu1 %v8231_v1  ;;  %v527_v1 = vld [vmem:[#allocation2 + $0xcb8] sm:$0xff]  ;;  %v8253_v4 = vpack.c.bf16 %v518_v62, %v510_v60  ;;  %v598_v58 = vld [vmem:[#allocation2 + $0xef0] sm:$0xff]  ;;  %v613_v60 = vld [vmem:[#allocation2 + $0xf68] sm:$0xff] }
 0x2fe   :  { %v615_v62 = vld [vmem:[#allocation2 + $0xf78] sm:$0xff] }
 0x2ff   :  { %7658 = vmatpush1.bf16.msra.mxu0 %v7657_v7  ;;  %v532_v7 = vld [vmem:[#allocation2 + $0xce0] sm:$0xff]  ;;  %v679_v47 = vld [vmem:[#allocation2 + $0x1178] sm:$0xff] }
 0x300   :  { %8234 = vmatpush1.bf16.msra.mxu1 %v8233_v8  ;;  %7660 = vmatprep.subr.bf16.mxu0 %v7659_v9  ;;  %v526_v8 = vld [vmem:[#allocation2 + $0xcb0] sm:$0xff]  ;;  %v8255_v9 = vpack.c.bf16 %v535_v2, %v527_v1  ;;  %v7681_v15 = vpack.c.bf16 %v532_v7, %v524_v6  ;;  %v7699_v1 = vpack.c.bf16 %v613_v60, %v605_v59  ;;  %v604_v2 = vld [vmem:[#allocation2 + $0xf20] sm:$0xff]  ;;  %v621_v7 = vld [vmem:[#allocation2 + $0xfa8] sm:$0xff] }
 0x301   :  { %8236 = vmatprep.subr.bf16.mxu1 %v8235_v13  ;;  %v543_v13 = vld [vmem:[#allocation2 + $0xd38] sm:$0xff]  ;;  %v8257_v16 = vpack.c.bf16 %v534_v10, %v526_v8  ;;  %v614_v6 = vld [vmem:[#allocation2 + $0xf70] sm:$0xff]  ;;  %v629_v8 = vld [vmem:[#allocation2 + $0xfe8] sm:$0xff] }
 0x302   :  { %v631_v10 = vld [vmem:[#allocation2 + $0xff8] sm:$0xff] }
 0x303   :  { %7662 = vmatpush1.bf16.msra.mxu0 %v7661_v19  ;;  %v548_v19 = vld [vmem:[#allocation2 + $0xd60] sm:$0xff]  ;;  %v687_v59 = vld [vmem:[#allocation2 + $0x11b8] sm:$0xff] }
 0x304   :  { %8238 = vmatpush1.bf16.msra.mxu1 %v8237_v20  ;;  %7664 = vmatprep.subr.bf16.mxu0 %v7663_v21  ;;  %v542_v20 = vld [vmem:[#allocation2 + $0xd30] sm:$0xff]  ;;  %v8259_v21 = vpack.c.bf16 %v551_v14, %v543_v13  ;;  %v7685_v27 = vpack.c.bf16 %v548_v19, %v540_v18  ;;  %v7703_v13 = vpack.c.bf16 %v629_v8, %v621_v7  ;;  %v620_v14 = vld [vmem:[#allocation2 + $0xfa0] sm:$0xff]  ;;  %v637_v19 = vld [vmem:[#allocation2 + $0x1028] sm:$0xff] }
 0x305   :  { %8240 = vmatprep.subr.bf16.mxu1 %v8239_v25  ;;  %v559_v25 = vld [vmem:[#allocation2 + $0xdb8] sm:$0xff]  ;;  %v8261_v28 = vpack.c.bf16 %v550_v22, %v542_v20  ;;  %v630_v18 = vld [vmem:[#allocation2 + $0xff0] sm:$0xff]  ;;  %v645_v20 = vld [vmem:[#allocation2 + $0x1068] sm:$0xff] }
 0x306   :  { %v647_v22 = vld [vmem:[#allocation2 + $0x1078] sm:$0xff] }
 0x307   :  { %7666 = vmatpush1.bf16.msra.mxu0 %v7665_v31  ;;  %v564_v31 = vld [vmem:[#allocation2 + $0xde0] sm:$0xff]  ;;  %v695_v60 = vld [vmem:[#allocation2 + $0x11f8] sm:$0xff] }
 0x308   :  { %8242 = vmatpush1.bf16.msra.mxu1 %v8241_v32  ;;  %7668 = vmatprep.subr.bf16.mxu0 %v7667_v33  ;;  %v558_v32 = vld [vmem:[#allocation2 + $0xdb0] sm:$0xff]  ;;  %v8263_v33 = vpack.c.bf16 %v567_v26, %v559_v25  ;;  %v7689_v39 = vpack.c.bf16 %v564_v31, %v556_v30  ;;  %v7707_v25 = vpack.c.bf16 %v645_v20, %v637_v19  ;;  %v636_v26 = vld [vmem:[#allocation2 + $0x1020] sm:$0xff]  ;;  %v653_v31 = vld [vmem:[#allocation2 + $0x10a8] sm:$0xff] }
 0x309   :  { %8244 = vmatprep.subr.bf16.mxu1 %v8243_v37  ;;  %v575_v37 = vld [vmem:[#allocation2 + $0xe38] sm:$0xff]  ;;  %v8265_v40 = vpack.c.bf16 %v566_v34, %v558_v32  ;;  %v646_v30 = vld [vmem:[#allocation2 + $0x1070] sm:$0xff]  ;;  %v661_v32 = vld [vmem:[#allocation2 + $0x10e8] sm:$0xff] }
 0x30a   :  { %v663_v34 = vld [vmem:[#allocation2 + $0x10f8] sm:$0xff] }
 0x30b   :  { %7670 = vmatpush1.bf16.msra.mxu0 %v7669_v43  ;;  %v580_v43 = vld [vmem:[#allocation2 + $0xe60] sm:$0xff]  ;;  %v703_v7 = vld [vmem:[#allocation2 + $0x1238] sm:$0xff] }
 0x30c   :  { %8246 = vmatpush1.bf16.msra.mxu1 %v8245_v44  ;;  %7672 = vmatprep.subr.bf16.mxu0 %v7671_v45  ;;  %v574_v44 = vld [vmem:[#allocation2 + $0xe30] sm:$0xff]  ;;  %v8267_v45 = vpack.c.bf16 %v583_v38, %v575_v37  ;;  %v7693_v51 = vpack.c.bf16 %v580_v43, %v572_v42  ;;  %v7711_v37 = vpack.c.bf16 %v661_v32, %v653_v31  ;;  %v652_v38 = vld [vmem:[#allocation2 + $0x10a0] sm:$0xff]  ;;  %v669_v43 = vld [vmem:[#allocation2 + $0x1128] sm:$0xff] }
 0x30d   :  { %8248 = vmatprep.subr.bf16.mxu1 %v8247_v49  ;;  %v591_v49 = vld [vmem:[#allocation2 + $0xeb8] sm:$0xff]  ;;  %v8269_v52 = vpack.c.bf16 %v582_v46, %v574_v44  ;;  %v662_v42 = vld [vmem:[#allocation2 + $0x10f0] sm:$0xff]  ;;  %v677_v44 = vld [vmem:[#allocation2 + $0x1168] sm:$0xff] }
 0x30e   :  { %v671_v46 = vld [vmem:[#allocation2 + $0x1138] sm:$0xff] }
 0x30f   :  { %7674 = vmatpush1.bf16.msra.mxu0 %v7673_v55  ;;  %v596_v55 = vld [vmem:[#allocation2 + $0xee0] sm:$0xff]  ;;  %v711_v8 = vld [vmem:[#allocation2 + $0x1278] sm:$0xff] }
 0x310   :  { %8250 = vmatpush1.bf16.msra.mxu1 %v8249_v56  ;;  %7676 = vmatprep.subr.bf16.mxu0 %v7675_v57  ;;  %v590_v56 = vld [vmem:[#allocation2 + $0xeb0] sm:$0xff]  ;;  %v8271_v57 = vpack.c.bf16 %v599_v50, %v591_v49  ;;  %v7697_v63 = vpack.c.bf16 %v596_v55, %v588_v54  ;;  %v7715_v50 = vpack.c.bf16 %v677_v44, %v669_v43  ;;  %v719_v19 = vld [vmem:[#allocation2 + $0x12b8] sm:$0xff] }
 0x311   :  { %8252 = vmatprep.subr.bf16.mxu1 %v8251_v61  ;;  %v607_v61 = vld [vmem:[#allocation2 + $0xf38] sm:$0xff]  ;;  %v8273_v0 = vpack.c.bf16 %v598_v58, %v590_v56  ;;  %v8291_v54 = vpack.c.bf16 %v679_v47, %v671_v46  ;;  %v678_v55 = vld [vmem:[#allocation2 + $0x1170] sm:$0xff]  ;;  %v685_v56 = vld [vmem:[#allocation2 + $0x11a8] sm:$0xff] }
 0x312   :  { %v9411_v58 = vld [vmem:[%s9854_s0 + $0x28] sm:$0xff]  ;;  %v727_v20 = vld [vmem:[#allocation2 + $0x12f8] sm:$0xff] }
 0x313   :  { %7678 = vmatpush1.bf16.msra.mxu0 %v7677_v3  ;;  %v612_v3 = vld [vmem:[#allocation2 + $0xf60] sm:$0xff]  ;;  %v735_v31 = vld [vmem:[#allocation2 + $0x1338] sm:$0xff] }
 0x314   :  { %8254 = vmatpush1.bf16.msra.mxu1 %v8253_v4  ;;  %7680 = vmatprep.subr.bf16.mxu0 %v7679_v5  ;;  %v606_v4 = vld [vmem:[#allocation2 + $0xf30] sm:$0xff]  ;;  %v8275_v5 = vpack.c.bf16 %v615_v62, %v607_v61  ;;  %v7701_v11 = vpack.c.bf16 %v612_v3, %v604_v2  ;;  %v8295_v3 = vpack.c.bf16 %v695_v60, %v687_v59  ;;  %v743_v32 = vld [vmem:[#allocation2 + $0x1378] sm:$0xff]  ;;  %v764_v60 = vld [vmem:[#allocation2 + $0x1420] sm:$0xff] }
 0x315   :  { %8256 = vmatprep.subr.bf16.mxu1 %v8255_v9  ;;  %v623_v9 = vld [vmem:[#allocation2 + $0xfb8] sm:$0xff]  ;;  %v8277_v12 = vpack.c.bf16 %v614_v6, %v606_v4  ;;  %v686_v2 = vld [vmem:[#allocation2 + $0x11b0] sm:$0xff]  ;;  %v709_v6 = vld [vmem:[#allocation2 + $0x1268] sm:$0xff] }
 0x316   :  { %v694_v4 = vld [vmem:[#allocation2 + $0x11f0] sm:$0xff]  ;;  %v751_v43 = vld [vmem:[#allocation2 + $0x13b8] sm:$0xff] }
 0x317   :  { %7682 = vmatpush1.bf16.msra.mxu0 %v7681_v15  ;;  %v628_v15 = vld [vmem:[#allocation2 + $0xfe0] sm:$0xff]  ;;  %v759_v44 = vld [vmem:[#allocation2 + $0x13f8] sm:$0xff] }
 0x318   :  { %8258 = vmatpush1.bf16.msra.mxu1 %v8257_v16  ;;  %7684 = vmatprep.subr.bf16.mxu0 %v7683_v17  ;;  %v622_v16 = vld [vmem:[#allocation2 + $0xfb0] sm:$0xff]  ;;  %v8279_v17 = vpack.c.bf16 %v631_v10, %v623_v9  ;;  %v7705_v23 = vpack.c.bf16 %v628_v15, %v620_v14  ;;  %v8297_v10 = vpack.c.bf16 %v694_v4, %v686_v2  ;;  %v789_v2 = vld [vmem:[#allocation2 + $0x14e8] sm:$0xff]  ;;  %v791_v4 = vld [vmem:[#allocation2 + $0x14f8] sm:$0xff] }
 0x319   :  { %8260 = vmatprep.subr.bf16.mxu1 %v8259_v21  ;;  %v639_v21 = vld [vmem:[#allocation2 + $0x1038] sm:$0xff]  ;;  %v8281_v24 = vpack.c.bf16 %v630_v18, %v622_v16  ;;  %v702_v14 = vld [vmem:[#allocation2 + $0x1230] sm:$0xff]  ;;  %v8299_v15 = vpack.c.bf16 %v711_v8, %v703_v7  ;;  %v725_v18 = vld [vmem:[#allocation2 + $0x12e8] sm:$0xff] }
 0x31a   :  { %v710_v16 = vld [vmem:[#allocation2 + $0x1270] sm:$0xff]  ;;  %v780_v8 = vld [vmem:[#allocation2 + $0x14a0] sm:$0xff] }
 0x31b   :  { %7686 = vmatpush1.bf16.msra.mxu0 %v7685_v27  ;;  %v644_v27 = vld [vmem:[#allocation2 + $0x1060] sm:$0xff] }
 0x31c   :  { %8262 = vmatpush1.bf16.msra.mxu1 %v8261_v28  ;;  %7688 = vmatprep.subr.bf16.mxu0 %v7687_v29  ;;  %v638_v28 = vld [vmem:[#allocation2 + $0x1030] sm:$0xff]  ;;  %v8283_v29 = vpack.c.bf16 %v647_v22, %v639_v21  ;;  %v7709_v35 = vpack.c.bf16 %v644_v27, %v636_v26  ;;  %v8301_v22 = vpack.c.bf16 %v710_v16, %v702_v14  ;;  %v805_v14 = vld [vmem:[#allocation2 + $0x1568] sm:$0xff]  ;;  %v807_v16 = vld [vmem:[#allocation2 + $0x1578] sm:$0xff] }
 0x31d   :  { %8264 = vmatprep.subr.bf16.mxu1 %v8263_v33  ;;  %v655_v33 = vld [vmem:[#allocation2 + $0x10b8] sm:$0xff]  ;;  %v8285_v36 = vpack.c.bf16 %v646_v30, %v638_v28  ;;  %v718_v26 = vld [vmem:[#allocation2 + $0x12b0] sm:$0xff]  ;;  %v8303_v27 = vpack.c.bf16 %v727_v20, %v719_v19  ;;  %v741_v30 = vld [vmem:[#allocation2 + $0x1368] sm:$0xff] }
 0x31e   :  { %v726_v28 = vld [vmem:[#allocation2 + $0x12f0] sm:$0xff]  ;;  %v796_v20 = vld [vmem:[#allocation2 + $0x1520] sm:$0xff] }
 0x31f   :  { %7690 = vmatpush1.bf16.msra.mxu0 %v7689_v39  ;;  %v660_v39 = vld [vmem:[#allocation2 + $0x10e0] sm:$0xff] }
 0x320   :  { %8266 = vmatpush1.bf16.msra.mxu1 %v8265_v40  ;;  %7692 = vmatprep.subr.bf16.mxu0 %v7691_v41  ;;  %v654_v40 = vld [vmem:[#allocation2 + $0x10b0] sm:$0xff]  ;;  %v8287_v41 = vpack.c.bf16 %v663_v34, %v655_v33  ;;  %v7713_v48 = vpack.c.bf16 %v660_v39, %v652_v38  ;;  %v8305_v34 = vpack.c.bf16 %v726_v28, %v718_v26  ;;  %v821_v26 = vld [vmem:[#allocation2 + $0x15e8] sm:$0xff]  ;;  %v823_v28 = vld [vmem:[#allocation2 + $0x15f8] sm:$0xff] }
 0x321   :  { %8268 = vmatprep.subr.bf16.mxu1 %v8267_v45  ;;  %v9410_v45 = vld [vmem:[%s9854_s0 + $0x10] sm:$0xff]  ;;  %v8289_v49 = vpack.c.bf16 %v662_v42, %v654_v40  ;;  %v8307_v39 = vpack.c.bf16 %v743_v32, %v735_v31  ;;  %v757_v42 = vld [vmem:[#allocation2 + $0x13e8] sm:$0xff]  ;;  %v812_v32 = vld [vmem:[#allocation2 + $0x15a0] sm:$0xff] }
 0x322   :  { %v734_v38 = vld [vmem:[#allocation2 + $0x1330] sm:$0xff] }
 0x323   :  { %7694 = vmatpush1.bf16.msra.mxu0 %v7693_v51  ;;  %v668_v51 = vld [vmem:[#allocation2 + $0x1120] sm:$0xff]  ;;  %v742_v40 = vld [vmem:[#allocation2 + $0x1370] sm:$0xff] }
 0x324   :  { %8270 = vmatpush1.bf16.msra.mxu1 %v8269_v52  ;;  %7696 = vmatprep.subr.bf16.mxu0 %v7695_v53  ;;  %v676_v52 = vld [vmem:[#allocation2 + $0x1160] sm:$0xff]  ;;  %v670_v53 = vld [vmem:[#allocation2 + $0x1130] sm:$0xff]  ;;  %v8309_v46 = vpack.c.bf16 %v742_v40, %v734_v38  ;;  %v837_v38 = vld [vmem:[#allocation2 + $0x1668] sm:$0xff] }
 0x325   :  { %8272 = vmatprep.subr.bf16.mxu1 %v8271_v57  ;;  %v693_v57 = vld [vmem:[#allocation2 + $0x11e8] sm:$0xff]  ;;  %v7717_v61 = vpack.c.bf16 %v676_v52, %v668_v51  ;;  %v8293_v62 = vpack.c.bf16 %v678_v55, %v670_v53  ;;  %v8311_v51 = vpack.c.bf16 %v759_v44, %v751_v43  ;;  %v758_v52 = vld [vmem:[#allocation2 + $0x13f0] sm:$0xff]  ;;  %v767_v55 = vld [vmem:[#allocation2 + $0x1438] sm:$0xff] }
 0x326   :  { %v765_v53 = vld [vmem:[#allocation2 + $0x1428] sm:$0xff]  ;;  %v839_v40 = vld [vmem:[#allocation2 + $0x1678] sm:$0xff]  ;;  %v828_v44 = vld [vmem:[#allocation2 + $0x1620] sm:$0xff] }
 0x327   :  { %7698 = vmatpush1.bf16.msra.mxu0 %v7697_v63  ;;  %v7719_v63 = vpack.c.bf16 %v693_v57, %v685_v56  ;;  %v775_v56 = vld [vmem:[#allocation2 + $0x1478] sm:$0xff] }
 0x328   :  { %8274 = vmatpush1.bf16.msra.mxu1 %v8273_v0  ;;  %7700 = vmatprep.subr.bf16.mxu0 %v7699_v1  ;;  %v684_v0 = vld [vmem:[#allocation2 + $0x11a0] sm:$0xff] }
 0x329   :  { %8276 = vmatprep.subr.bf16.mxu1 %v8275_v5  ;;  %v692_v1 = vld [vmem:[#allocation2 + $0x11e0] sm:$0xff]  ;;  %v701_v5 = vld [vmem:[#allocation2 + $0x1228] sm:$0xff] }
 0x32a   :  { %v7721_v9 = vpack.c.bf16 %v692_v1, %v684_v0  ;;  %v774_v0 = vld [vmem:[#allocation2 + $0x1470] sm:$0xff]  ;;  %v781_v1 = vld [vmem:[#allocation2 + $0x14a8] sm:$0xff] }
 0x32b   :  { %7702 = vmatpush1.bf16.msra.mxu0 %v7701_v11  ;;  %v7723_v11 = vpack.c.bf16 %v709_v6, %v701_v5  ;;  %v7743_v7 = vpack.c.bf16 %v789_v2, %v781_v1 }
 0x32c   :  { %8278 = vmatpush1.bf16.msra.mxu1 %v8277_v12  ;;  %7704 = vmatprep.subr.bf16.mxu0 %v7703_v13  ;;  %v700_v12 = vld [vmem:[#allocation2 + $0x1220] sm:$0xff] }
 0x32d   :  { %8280 = vmatprep.subr.bf16.mxu1 %v8279_v17  ;;  %v708_v13 = vld [vmem:[#allocation2 + $0x1260] sm:$0xff]  ;;  %v717_v17 = vld [vmem:[#allocation2 + $0x12a8] sm:$0xff] }
 0x32e   :  { %v7725_v21 = vpack.c.bf16 %v708_v13, %v700_v12  ;;  %v790_v12 = vld [vmem:[#allocation2 + $0x14f0] sm:$0xff]  ;;  %v797_v13 = vld [vmem:[#allocation2 + $0x1528] sm:$0xff] }
 0x32f   :  { %7706 = vmatpush1.bf16.msra.mxu0 %v7705_v23  ;;  %v7727_v23 = vpack.c.bf16 %v725_v18, %v717_v17  ;;  %v7747_v19 = vpack.c.bf16 %v805_v14, %v797_v13 }
 0x330   :  { %8282 = vmatpush1.bf16.msra.mxu1 %v8281_v24  ;;  %7708 = vmatprep.subr.bf16.mxu0 %v7707_v25  ;;  %v716_v24 = vld [vmem:[#allocation2 + $0x12a0] sm:$0xff] }
 0x331   :  { %8284 = vmatprep.subr.bf16.mxu1 %v8283_v29  ;;  %v724_v25 = vld [vmem:[#allocation2 + $0x12e0] sm:$0xff]  ;;  %v733_v29 = vld [vmem:[#allocation2 + $0x1328] sm:$0xff] }
 0x332   :  { %3880 = vmatmul.mubr.f32.vlgmr.msra.gmra.mrb[2].mxu0 %v9410_v45  ;;  %v7729_v33 = vpack.c.bf16 %v724_v25, %v716_v24  ;;  %v806_v24 = vld [vmem:[#allocation2 + $0x1570] sm:$0xff]  ;;  %v813_v25 = vld [vmem:[#allocation2 + $0x15a8] sm:$0xff] }
 0x333   :  { %7710 = vmatpush1.bf16.msra.mxu0 %v7709_v35  ;;  %4519 = vmatmul.mubr.f32.vlgmr.msra.gmra.mrb[2].mxu1 %v9410_v45  ;;  %v7731_v35 = vpack.c.bf16 %v741_v30, %v733_v29  ;;  %v7751_v31 = vpack.c.bf16 %v821_v26, %v813_v25 }
 0x334   :  { %8286 = vmatpush1.bf16.msra.mxu1 %v8285_v36  ;;  %7712 = vmatprep.subr.bf16.mxu0 %v7711_v37  ;;  %v732_v36 = vld [vmem:[#allocation2 + $0x1320] sm:$0xff] }
 0x335   :  { %8288 = vmatprep.subr.bf16.mxu1 %v8287_v41  ;;  %3950 = vmatprep.mubr.f32.mxu0 %v9411_v58  ;;  %v740_v37 = vld [vmem:[#allocation2 + $0x1360] sm:$0xff]  ;;  %v749_v41 = vld [vmem:[#allocation2 + $0x13a8] sm:$0xff] }
 0x336   :  { %4589 = vmatprep.mubr.f32.mxu1 %v9411_v58  ;;  %v7733_v45 = vpack.c.bf16 %v740_v37, %v732_v36  ;;  %v7735_v47 = vpack.c.bf16 %v757_v42, %v749_v41  ;;  %v822_v36 = vld [vmem:[#allocation2 + $0x15f0] sm:$0xff]  ;;  %v829_v37 = vld [vmem:[#allocation2 + $0x1628] sm:$0xff] }
 0x337   :  { %7714 = vmatpush1.bf16.msra.mxu0 %v7713_v48  ;;  %v748_v48 = vld [vmem:[#allocation2 + $0x13a0] sm:$0xff]  ;;  %v7755_v43 = vpack.c.bf16 %v837_v38, %v829_v37 }
 0x338   :  { %8290 = vmatpush1.bf16.msra.mxu1 %v8289_v49  ;;  %7716 = vmatprep.subr.bf16.mxu0 %v7715_v50  ;;  %v756_v49 = vld [vmem:[#allocation2 + $0x13e0] sm:$0xff]  ;;  %v750_v50 = vld [vmem:[#allocation2 + $0x13b0] sm:$0xff] }
 0x339   :  { %8292 = vmatprep.subr.bf16.mxu1 %v8291_v54  ;;  %v773_v54 = vld [vmem:[#allocation2 + $0x1468] sm:$0xff]  ;;  %v7737_v57 = vpack.c.bf16 %v756_v49, %v748_v48  ;;  %v8313_v58 = vpack.c.bf16 %v758_v52, %v750_v50  ;;  %v838_v48 = vld [vmem:[#allocation2 + $0x1670] sm:$0xff]  ;;  %v855_v52 = vld [vmem:[#allocation2 + $0x16f8] sm:$0xff] }
 0x33a   :  { %v7739_v59 = vpack.c.bf16 %v773_v54, %v765_v53  ;;  %v845_v49 = vld [vmem:[#allocation2 + $0x16a8] sm:$0xff] }
 0x33b   :  { %7718 = vmatpush1.bf16.msra.mxu0 %v7717_v61  ;;  %v772_v61 = vld [vmem:[#allocation2 + $0x1460] sm:$0xff]  ;;  %v853_v50 = vld [vmem:[#allocation2 + $0x16e8] sm:$0xff] }
 0x33c   :  { %8294 = vmatpush1.bf16.msra.mxu1 %v8293_v62  ;;  %7720 = vmatprep.subr.bf16.mxu0 %v7719_v63  ;;  %v766_v62 = vld [vmem:[#allocation2 + $0x1430] sm:$0xff]  ;;  %v8315_v63 = vpack.c.bf16 %v775_v56, %v767_v55  ;;  %v7741_v5 = vpack.c.bf16 %v772_v61, %v764_v60  ;;  %v7759_v55 = vpack.c.bf16 %v853_v50, %v845_v49  ;;  %v844_v56 = vld [vmem:[#allocation2 + $0x16a0] sm:$0xff]  ;;  %v861_v61 = vld [vmem:[#allocation2 + $0x1728] sm:$0xff] }
 0x33d   :  { %8296 = vmatprep.subr.bf16.mxu1 %v8295_v3  ;;  %v783_v3 = vld [vmem:[#allocation2 + $0x14b8] sm:$0xff]  ;;  %v8317_v6 = vpack.c.bf16 %v774_v0, %v766_v62  ;;  %v854_v60 = vld [vmem:[#allocation2 + $0x16f0] sm:$0xff]  ;;  %v869_v62 = vld [vmem:[#allocation2 + $0x1768] sm:$0xff] }
 0x33e   :  { %v871_v0 = vld [vmem:[#allocation2 + $0x1778] sm:$0xff] }
 0x33f   :  { %7722 = vmatpush1.bf16.msra.mxu0 %v7721_v9  ;;  %v788_v9 = vld [vmem:[#allocation2 + $0x14e0] sm:$0xff]  ;;  %v935_v49 = vld [vmem:[#allocation2 + $0x1978] sm:$0xff] }
 0x340   :  { %8298 = vmatpush1.bf16.msra.mxu1 %v8297_v10  ;;  %7724 = vmatprep.subr.bf16.mxu0 %v7723_v11  ;;  %v782_v10 = vld [vmem:[#allocation2 + $0x14b0] sm:$0xff]  ;;  %v8319_v11 = vpack.c.bf16 %v791_v4, %v783_v3  ;;  %v7745_v17 = vpack.c.bf16 %v788_v9, %v780_v8  ;;  %v7763_v3 = vpack.c.bf16 %v869_v62, %v861_v61  ;;  %v860_v4 = vld [vmem:[#allocation2 + $0x1720] sm:$0xff]  ;;  %v877_v9 = vld [vmem:[#allocation2 + $0x17a8] sm:$0xff] }
 0x341   :  { %8300 = vmatprep.subr.bf16.mxu1 %v8299_v15  ;;  %v799_v15 = vld [vmem:[#allocation2 + $0x1538] sm:$0xff]  ;;  %v8321_v18 = vpack.c.bf16 %v790_v12, %v782_v10  ;;  %v870_v8 = vld [vmem:[#allocation2 + $0x1770] sm:$0xff]  ;;  %v885_v10 = vld [vmem:[#allocation2 + $0x17e8] sm:$0xff] }
 0x342   :  { %v887_v12 = vld [vmem:[#allocation2 + $0x17f8] sm:$0xff] }
 0x343   :  { %7726 = vmatpush1.bf16.msra.mxu0 %v7725_v21  ;;  %v804_v21 = vld [vmem:[#allocation2 + $0x1560] sm:$0xff]  ;;  %v943_v61 = vld [vmem:[#allocation2 + $0x19b8] sm:$0xff] }
 0x344   :  { %8302 = vmatpush1.bf16.msra.mxu1 %v8301_v22  ;;  %7728 = vmatprep.subr.bf16.mxu0 %v7727_v23  ;;  %v798_v22 = vld [vmem:[#allocation2 + $0x1530] sm:$0xff]  ;;  %v8323_v23 = vpack.c.bf16 %v807_v16, %v799_v15  ;;  %v7749_v29 = vpack.c.bf16 %v804_v21, %v796_v20  ;;  %v7767_v15 = vpack.c.bf16 %v885_v10, %v877_v9  ;;  %v876_v16 = vld [vmem:[#allocation2 + $0x17a0] sm:$0xff]  ;;  %v893_v21 = vld [vmem:[#allocation2 + $0x1828] sm:$0xff] }
 0x345   :  { %8304 = vmatprep.subr.bf16.mxu1 %v8303_v27  ;;  %v815_v27 = vld [vmem:[#allocation2 + $0x15b8] sm:$0xff]  ;;  %v8325_v30 = vpack.c.bf16 %v806_v24, %v798_v22  ;;  %v886_v20 = vld [vmem:[#allocation2 + $0x17f0] sm:$0xff]  ;;  %v901_v22 = vld [vmem:[#allocation2 + $0x1868] sm:$0xff] }
 0x346   :  { %v903_v24 = vld [vmem:[#allocation2 + $0x1878] sm:$0xff] }
 0x347   :  { %7730 = vmatpush1.bf16.msra.mxu0 %v7729_v33  ;;  %v820_v33 = vld [vmem:[#allocation2 + $0x15e0] sm:$0xff]  ;;  %v951_v62 = vld [vmem:[#allocation2 + $0x19f8] sm:$0xff] }
 0x348   :  { %8306 = vmatpush1.bf16.msra.mxu1 %v8305_v34  ;;  %7732 = vmatprep.subr.bf16.mxu0 %v7731_v35  ;;  %v814_v34 = vld [vmem:[#allocation2 + $0x15b0] sm:$0xff]  ;;  %v8327_v35 = vpack.c.bf16 %v823_v28, %v815_v27  ;;  %v7753_v41 = vpack.c.bf16 %v820_v33, %v812_v32  ;;  %v7771_v27 = vpack.c.bf16 %v901_v22, %v893_v21  ;;  %v892_v28 = vld [vmem:[#allocation2 + $0x1820] sm:$0xff]  ;;  %v909_v33 = vld [vmem:[#allocation2 + $0x18a8] sm:$0xff] }
 0x349   :  { %8308 = vmatprep.subr.bf16.mxu1 %v8307_v39  ;;  %v831_v39 = vld [vmem:[#allocation2 + $0x1638] sm:$0xff]  ;;  %v8329_v42 = vpack.c.bf16 %v822_v36, %v814_v34  ;;  %v902_v32 = vld [vmem:[#allocation2 + $0x1870] sm:$0xff]  ;;  %v917_v34 = vld [vmem:[#allocation2 + $0x18e8] sm:$0xff] }
 0x34a   :  { %v919_v36 = vld [vmem:[#allocation2 + $0x18f8] sm:$0xff] }
 0x34b   :  { %7734 = vmatpush1.bf16.msra.mxu0 %v7733_v45  ;;  %v836_v45 = vld [vmem:[#allocation2 + $0x1660] sm:$0xff]  ;;  %v959_v9 = vld [vmem:[#allocation2 + $0x1a38] sm:$0xff] }
 0x34c   :  { %8310 = vmatpush1.bf16.msra.mxu1 %v8309_v46  ;;  %7736 = vmatprep.subr.bf16.mxu0 %v7735_v47  ;;  %v830_v46 = vld [vmem:[#allocation2 + $0x1630] sm:$0xff]  ;;  %v8331_v47 = vpack.c.bf16 %v839_v40, %v831_v39  ;;  %v7757_v53 = vpack.c.bf16 %v836_v45, %v828_v44  ;;  %v7775_v39 = vpack.c.bf16 %v917_v34, %v909_v33  ;;  %v908_v40 = vld [vmem:[#allocation2 + $0x18a0] sm:$0xff]  ;;  %v925_v45 = vld [vmem:[#allocation2 + $0x1928] sm:$0xff] }
 0x34d   :  { %8312 = vmatprep.subr.bf16.mxu1 %v8311_v51  ;;  %v847_v51 = vld [vmem:[#allocation2 + $0x16b8] sm:$0xff]  ;;  %v8333_v54 = vpack.c.bf16 %v838_v48, %v830_v46  ;;  %v918_v44 = vld [vmem:[#allocation2 + $0x18f0] sm:$0xff]  ;;  %v933_v46 = vld [vmem:[#allocation2 + $0x1968] sm:$0xff] }
 0x34e   :  { %v927_v48 = vld [vmem:[#allocation2 + $0x1938] sm:$0xff] }
 0x34f   :  { %7738 = vmatpush1.bf16.msra.mxu0 %v7737_v57  ;;  %v852_v57 = vld [vmem:[#allocation2 + $0x16e0] sm:$0xff]  ;;  %v967_v10 = vld [vmem:[#allocation2 + $0x1a78] sm:$0xff] }
 0x350   :  { %8314 = vmatpush1.bf16.msra.mxu1 %v8313_v58  ;;  %7740 = vmatprep.subr.bf16.mxu0 %v7739_v59  ;;  %v846_v58 = vld [vmem:[#allocation2 + $0x16b0] sm:$0xff]  ;;  %v8335_v59 = vpack.c.bf16 %v855_v52, %v847_v51  ;;  %v7761_v1 = vpack.c.bf16 %v852_v57, %v844_v56  ;;  %v7779_v52 = vpack.c.bf16 %v933_v46, %v925_v45  ;;  %v975_v21 = vld [vmem:[#allocation2 + $0x1ab8] sm:$0xff]  ;;  %v1013_v45 = vld [vmem:[#allocation2 + $0x1be8] sm:$0xff] }
 0x351   :  { %8316 = vmatprep.subr.bf16.mxu1 %v8315_v63  ;;  %v863_v63 = vld [vmem:[#allocation2 + $0x1738] sm:$0xff]  ;;  %v8337_v2 = vpack.c.bf16 %v854_v60, %v846_v58  ;;  %v8355_v56 = vpack.c.bf16 %v935_v49, %v927_v48  ;;  %v934_v57 = vld [vmem:[#allocation2 + $0x1970] sm:$0xff]  ;;  %v941_v58 = vld [vmem:[#allocation2 + $0x19a8] sm:$0xff] }
 0x352   :  { %v9413_v60 = vld [vmem:[%s9854_s0 + $0x38] sm:$0xff] }
 0x353   :  { %7742 = vmatpush1.bf16.msra.mxu0 %v7741_v5  ;;  %v868_v5 = vld [vmem:[#allocation2 + $0x1760] sm:$0xff]  ;;  %v983_v22 = vld [vmem:[#allocation2 + $0x1af8] sm:$0xff] }
 0x354   :  { %8318 = vmatpush1.bf16.msra.mxu1 %v8317_v6  ;;  %7744 = vmatprep.subr.bf16.mxu0 %v7743_v7  ;;  %v862_v6 = vld [vmem:[#allocation2 + $0x1730] sm:$0xff]  ;;  %v8339_v7 = vpack.c.bf16 %v871_v0, %v863_v63  ;;  %v7765_v13 = vpack.c.bf16 %v868_v5, %v860_v4  ;;  %v8359_v5 = vpack.c.bf16 %v951_v62, %v943_v61  ;;  %v991_v33 = vld [vmem:[#allocation2 + $0x1b38] sm:$0xff] }
 0x355   :  { %8320 = vmatprep.subr.bf16.mxu1 %v8319_v11  ;;  %v879_v11 = vld [vmem:[#allocation2 + $0x17b8] sm:$0xff]  ;;  %v8341_v14 = vpack.c.bf16 %v870_v8, %v862_v6  ;;  %v942_v4 = vld [vmem:[#allocation2 + $0x19b0] sm:$0xff]  ;;  %v965_v8 = vld [vmem:[#allocation2 + $0x1a68] sm:$0xff] }
 0x356   :  { %v950_v6 = vld [vmem:[#allocation2 + $0x19f0] sm:$0xff]  ;;  %v999_v34 = vld [vmem:[#allocation2 + $0x1b78] sm:$0xff] }
 0x357   :  { %7746 = vmatpush1.bf16.msra.mxu0 %v7745_v17  ;;  %v884_v17 = vld [vmem:[#allocation2 + $0x17e0] sm:$0xff]  ;;  %v1007_v48 = vld [vmem:[#allocation2 + $0x1bb8] sm:$0xff] }
 0x358   :  { %8322 = vmatpush1.bf16.msra.mxu1 %v8321_v18  ;;  %7748 = vmatprep.subr.bf16.mxu0 %v7747_v19  ;;  %v878_v18 = vld [vmem:[#allocation2 + $0x17b0] sm:$0xff]  ;;  %v8343_v19 = vpack.c.bf16 %v887_v12, %v879_v11  ;;  %v7769_v25 = vpack.c.bf16 %v884_v17, %v876_v16  ;;  %v8361_v12 = vpack.c.bf16 %v950_v6, %v942_v4  ;;  %v1015_v49 = vld [vmem:[#allocation2 + $0x1bf8] sm:$0xff] }
 0x359   :  { %8324 = vmatprep.subr.bf16.mxu1 %v8323_v23  ;;  %v895_v23 = vld [vmem:[#allocation2 + $0x1838] sm:$0xff]  ;;  %v8345_v26 = vpack.c.bf16 %v886_v20, %v878_v18  ;;  %v958_v16 = vld [vmem:[#allocation2 + $0x1a30] sm:$0xff]  ;;  %v8363_v17 = vpack.c.bf16 %v967_v10, %v959_v9  ;;  %v981_v20 = vld [vmem:[#allocation2 + $0x1ae8] sm:$0xff] }
 0x35a   :  { %v966_v18 = vld [vmem:[#allocation2 + $0x1a70] sm:$0xff]  ;;  %v1023_v61 = vld [vmem:[#allocation2 + $0x1c38] sm:$0xff] }
 0x35b   :  { %7750 = vmatpush1.bf16.msra.mxu0 %v7749_v29  ;;  %v900_v29 = vld [vmem:[#allocation2 + $0x1860] sm:$0xff]  ;;  %v1031_v62 = vld [vmem:[#allocation2 + $0x1c78] sm:$0xff]  ;;  %v1022_v4 = vld [vmem:[#allocation2 + $0x1c30] sm:$0xff] }
 0x35c   :  { %8326 = vmatpush1.bf16.msra.mxu1 %v8325_v30  ;;  %7752 = vmatprep.subr.bf16.mxu0 %v7751_v31  ;;  %v894_v30 = vld [vmem:[#allocation2 + $0x1830] sm:$0xff]  ;;  %v8347_v31 = vpack.c.bf16 %v903_v24, %v895_v23  ;;  %v7773_v37 = vpack.c.bf16 %v900_v29, %v892_v28  ;;  %v8365_v24 = vpack.c.bf16 %v966_v18, %v958_v16  ;;  %v1039_v9 = vld [vmem:[#allocation2 + $0x1cb8] sm:$0xff] }
 0x35d   :  { %8328 = vmatprep.subr.bf16.mxu1 %v8327_v35  ;;  %v911_v35 = vld [vmem:[#allocation2 + $0x18b8] sm:$0xff]  ;;  %v8349_v38 = vpack.c.bf16 %v902_v32, %v894_v30  ;;  %v974_v28 = vld [vmem:[#allocation2 + $0x1ab0] sm:$0xff]  ;;  %v8367_v29 = vpack.c.bf16 %v983_v22, %v975_v21  ;;  %v997_v32 = vld [vmem:[#allocation2 + $0x1b68] sm:$0xff] }
 0x35e   :  { %v982_v30 = vld [vmem:[#allocation2 + $0x1af0] sm:$0xff]  ;;  %v1047_v10 = vld [vmem:[#allocation2 + $0x1cf8] sm:$0xff] }
 0x35f   :  { %7754 = vmatpush1.bf16.msra.mxu0 %v7753_v41  ;;  %v916_v41 = vld [vmem:[#allocation2 + $0x18e0] sm:$0xff]  ;;  %v1030_v6 = vld [vmem:[#allocation2 + $0x1c70] sm:$0xff]  ;;  %v1055_v21 = vld [vmem:[#allocation2 + $0x1d38] sm:$0xff] }
 0x360   :  { %8330 = vmatpush1.bf16.msra.mxu1 %v8329_v42  ;;  %7756 = vmatprep.subr.bf16.mxu0 %v7755_v43  ;;  %v910_v42 = vld [vmem:[#allocation2 + $0x18b0] sm:$0xff]  ;;  %v8351_v43 = vpack.c.bf16 %v919_v36, %v911_v35  ;;  %v7777_v50 = vpack.c.bf16 %v916_v41, %v908_v40  ;;  %v8369_v36 = vpack.c.bf16 %v982_v30, %v974_v28  ;;  %v1063_v22 = vld [vmem:[#allocation2 + $0x1d78] sm:$0xff] }
 0x361   :  { %8332 = vmatprep.subr.bf16.mxu1 %v8331_v47  ;;  %v9412_v47 = vld [vmem:[%s9854_s0 + $0x20] sm:$0xff]  ;;  %v8353_v51 = vpack.c.bf16 %v918_v44, %v910_v42  ;;  %v990_v40 = vld [vmem:[#allocation2 + $0x1b30] sm:$0xff]  ;;  %v8371_v42 = vpack.c.bf16 %v999_v34, %v991_v33  ;;  %v1005_v44 = vld [vmem:[#allocation2 + $0x1ba8] sm:$0xff] }
 0x362   :  { %v1038_v16 = vld [vmem:[#allocation2 + $0x1cb0] sm:$0xff]  ;;  %v1071_v33 = vld [vmem:[#allocation2 + $0x1db8] sm:$0xff] }
 0x363   :  { %7758 = vmatpush1.bf16.msra.mxu0 %v7757_v53  ;;  %v924_v53 = vld [vmem:[#allocation2 + $0x1920] sm:$0xff]  ;;  %v1046_v18 = vld [vmem:[#allocation2 + $0x1cf0] sm:$0xff]  ;;  %v1079_v34 = vld [vmem:[#allocation2 + $0x1df8] sm:$0xff] }
 0x364   :  { %8334 = vmatpush1.bf16.msra.mxu1 %v8333_v54  ;;  %7760 = vmatprep.subr.bf16.mxu0 %v7759_v55  ;;  %v932_v54 = vld [vmem:[#allocation2 + $0x1960] sm:$0xff]  ;;  %v926_v55 = vld [vmem:[#allocation2 + $0x1930] sm:$0xff] }
 0x365   :  { %8336 = vmatprep.subr.bf16.mxu1 %v8335_v59  ;;  %v949_v59 = vld [vmem:[#allocation2 + $0x19e8] sm:$0xff]  ;;  %v7781_v63 = vpack.c.bf16 %v932_v54, %v924_v53  ;;  %v8357_v0 = vpack.c.bf16 %v934_v57, %v926_v55  ;;  %v7799_v53 = vpack.c.bf16 %v1013_v45, %v1005_v44  ;;  %v1004_v54 = vld [vmem:[#allocation2 + $0x1ba0] sm:$0xff]  ;;  %v8375_v57 = vpack.c.bf16 %v1015_v49, %v1007_v48  ;;  %v1054_v28 = vld [vmem:[#allocation2 + $0x1d30] sm:$0xff] }
 0x366   :  { %v1012_v55 = vld [vmem:[#allocation2 + $0x1be0] sm:$0xff]  ;;  %v1062_v30 = vld [vmem:[#allocation2 + $0x1d70] sm:$0xff]  ;;  %v1085_v44 = vld [vmem:[#allocation2 + $0x1e28] sm:$0xff] }
 0x367   :  { %7762 = vmatpush1.bf16.msra.mxu0 %v7761_v1  ;;  %v7783_v1 = vpack.c.bf16 %v949_v59, %v941_v58  ;;  %v1014_v58 = vld [vmem:[#allocation2 + $0x1bf0] sm:$0xff]  ;;  %v1021_v59 = vld [vmem:[#allocation2 + $0x1c28] sm:$0xff]  ;;  %v1087_v48 = vld [vmem:[#allocation2 + $0x1e38] sm:$0xff] }
 0x368   :  { %8338 = vmatpush1.bf16.msra.mxu1 %v8337_v2  ;;  %7764 = vmatprep.subr.bf16.mxu0 %v7763_v3  ;;  %v940_v2 = vld [vmem:[#allocation2 + $0x19a0] sm:$0xff]  ;;  %v1093_v45 = vld [vmem:[#allocation2 + $0x1e68] sm:$0xff]  ;;  %v1095_v49 = vld [vmem:[#allocation2 + $0x1e78] sm:$0xff] }
 0x369   :  { %8340 = vmatprep.subr.bf16.mxu1 %v8339_v7  ;;  %v948_v3 = vld [vmem:[#allocation2 + $0x19e0] sm:$0xff]  ;;  %v957_v7 = vld [vmem:[#allocation2 + $0x1a28] sm:$0xff] }
 0x36a   :  { %v7785_v11 = vpack.c.bf16 %v948_v3, %v940_v2  ;;  %v1020_v2 = vld [vmem:[#allocation2 + $0x1c20] sm:$0xff] }
 0x36b   :  { %7766 = vmatpush1.bf16.msra.mxu0 %v7765_v13  ;;  %v7787_v13 = vpack.c.bf16 %v965_v8, %v957_v7  ;;  %v1028_v3 = vld [vmem:[#allocation2 + $0x1c60] sm:$0xff]  ;;  %v1037_v7 = vld [vmem:[#allocation2 + $0x1ca8] sm:$0xff] }
 0x36c   :  { %8342 = vmatpush1.bf16.msra.mxu1 %v8341_v14  ;;  %7768 = vmatprep.subr.bf16.mxu0 %v7767_v15  ;;  %v956_v14 = vld [vmem:[#allocation2 + $0x1a20] sm:$0xff]  ;;  %v1045_v8 = vld [vmem:[#allocation2 + $0x1ce8] sm:$0xff] }
 0x36d   :  { %8344 = vmatprep.subr.bf16.mxu1 %v8343_v19  ;;  %v964_v15 = vld [vmem:[#allocation2 + $0x1a60] sm:$0xff]  ;;  %v973_v19 = vld [vmem:[#allocation2 + $0x1aa8] sm:$0xff] }
 0x36e   :  { %v7789_v23 = vpack.c.bf16 %v964_v15, %v956_v14  ;;  %v1036_v14 = vld [vmem:[#allocation2 + $0x1ca0] sm:$0xff] }
 0x36f   :  { %7770 = vmatpush1.bf16.msra.mxu0 %v7769_v25  ;;  %v7791_v25 = vpack.c.bf16 %v981_v20, %v973_v19  ;;  %v1044_v15 = vld [vmem:[#allocation2 + $0x1ce0] sm:$0xff]  ;;  %v1053_v19 = vld [vmem:[#allocation2 + $0x1d28] sm:$0xff] }
 0x370   :  { %8346 = vmatpush1.bf16.msra.mxu1 %v8345_v26  ;;  %7772 = vmatprep.subr.bf16.mxu0 %v7771_v27  ;;  %v972_v26 = vld [vmem:[#allocation2 + $0x1aa0] sm:$0xff]  ;;  %v1061_v20 = vld [vmem:[#allocation2 + $0x1d68] sm:$0xff] }
 0x371   :  { %8348 = vmatprep.subr.bf16.mxu1 %v8347_v31  ;;  %v980_v27 = vld [vmem:[#allocation2 + $0x1ae0] sm:$0xff]  ;;  %v989_v31 = vld [vmem:[#allocation2 + $0x1b28] sm:$0xff] }
 0x372   :  { %3951 = vmatmul.mubr.f32.vlgmr.msra.gmra.mrb[2].mxu0 %v9412_v47  ;;  %v7793_v35 = vpack.c.bf16 %v980_v27, %v972_v26  ;;  %v1052_v26 = vld [vmem:[#allocation2 + $0x1d20] sm:$0xff] }
 0x373   :  { %7774 = vmatpush1.bf16.msra.mxu0 %v7773_v37  ;;  %4590 = vmatmul.mubr.f32.vlgmr.msra.gmra.mrb[2].mxu1 %v9412_v47  ;;  %v7795_v37 = vpack.c.bf16 %v997_v32, %v989_v31  ;;  %v1060_v27 = vld [vmem:[#allocation2 + $0x1d60] sm:$0xff]  ;;  %v1069_v31 = vld [vmem:[#allocation2 + $0x1da8] sm:$0xff] }
 0x374   :  { %8350 = vmatpush1.bf16.msra.mxu1 %v8349_v38  ;;  %7776 = vmatprep.subr.bf16.mxu0 %v7775_v39  ;;  %v988_v38 = vld [vmem:[#allocation2 + $0x1b20] sm:$0xff]  ;;  %v1077_v32 = vld [vmem:[#allocation2 + $0x1de8] sm:$0xff] }
 0x375   :  { %8352 = vmatprep.subr.bf16.mxu1 %v8351_v43  ;;  %4021 = vmatprep.mubr.f32.mxu0 %v9413_v60  ;;  %v996_v39 = vld [vmem:[#allocation2 + $0x1b60] sm:$0xff]  ;;  %v998_v43 = vld [vmem:[#allocation2 + $0x1b70] sm:$0xff] }
 0x376   :  { %4660 = vmatprep.mubr.f32.mxu1 %v9413_v60  ;;  %v1029_v60 = vld [vmem:[#allocation2 + $0x1c68] sm:$0xff] }
 0x377   :  { %7778 = vmatpush1.bf16.msra.mxu0 %v7777_v50 }
 0x378   :  { %8354 = vmatpush1.bf16.msra.mxu1 %v8353_v51  ;;  %7780 = vmatprep.subr.bf16.mxu0 %v7779_v52  ;;  %v7797_v51 = vpack.c.bf16 %v996_v39, %v988_v38  ;;  %v8373_v52 = vpack.c.bf16 %v998_v43, %v990_v40  ;;  %v1068_v38 = vld [vmem:[#allocation2 + $0x1da0] sm:$0xff]  ;;  %v1070_v40 = vld [vmem:[#allocation2 + $0x1db0] sm:$0xff] }
 0x379   :  { %8356 = vmatprep.subr.bf16.mxu1 %v8355_v56  ;;  %v1006_v56 = vld [vmem:[#allocation2 + $0x1bb0] sm:$0xff]  ;;  %v1076_v39 = vld [vmem:[#allocation2 + $0x1de0] sm:$0xff] }
 0x37a   :  { %v1078_v43 = vld [vmem:[#allocation2 + $0x1df0] sm:$0xff] }
 0x37b   :  { %7782 = vmatpush1.bf16.msra.mxu0 %v7781_v63  ;;  %v7801_v63 = vpack.c.bf16 %v1012_v55, %v1004_v54  ;;  %v1084_v54 = vld [vmem:[#allocation2 + $0x1e20] sm:$0xff] }
 0x37c   :  { %8358 = vmatpush1.bf16.msra.mxu1 %v8357_v0  ;;  %7784 = vmatprep.subr.bf16.mxu0 %v7783_v1  ;;  %v8377_v0 = vpack.c.bf16 %v1014_v58, %v1006_v56  ;;  %v7803_v1 = vpack.c.bf16 %v1029_v60, %v1021_v59  ;;  %v1092_v55 = vld [vmem:[#allocation2 + $0x1e60] sm:$0xff]  ;;  %v1086_v56 = vld [vmem:[#allocation2 + $0x1e30] sm:$0xff]  ;;  %v1101_v59 = vld [vmem:[#allocation2 + $0x1ea8] sm:$0xff] }
 0x37d   :  { %8360 = vmatprep.subr.bf16.mxu1 %v8359_v5  ;;  %v8379_v5 = vpack.c.bf16 %v1031_v62, %v1023_v61  ;;  %v1094_v58 = vld [vmem:[#allocation2 + $0x1e70] sm:$0xff]  ;;  %v1109_v60 = vld [vmem:[#allocation2 + $0x1ee8] sm:$0xff]  ;;  %v1103_v61 = vld [vmem:[#allocation2 + $0x1eb8] sm:$0xff] }
 0x37e   :  { %v1111_v62 = vld [vmem:[#allocation2 + $0x1ef8] sm:$0xff] }
 0x37f   :  { %7786 = vmatpush1.bf16.msra.mxu0 %v7785_v11  ;;  %v7805_v11 = vpack.c.bf16 %v1028_v3, %v1020_v2  ;;  %v1100_v2 = vld [vmem:[#allocation2 + $0x1ea0] sm:$0xff] }
 0x380   :  { %8362 = vmatpush1.bf16.msra.mxu1 %v8361_v12  ;;  %7788 = vmatprep.subr.bf16.mxu0 %v7787_v13  ;;  %v8381_v12 = vpack.c.bf16 %v1030_v6, %v1022_v4  ;;  %v7807_v13 = vpack.c.bf16 %v1045_v8, %v1037_v7  ;;  %v1108_v3 = vld [vmem:[#allocation2 + $0x1ee0] sm:$0xff]  ;;  %v1102_v4 = vld [vmem:[#allocation2 + $0x1eb0] sm:$0xff]  ;;  %v1117_v7 = vld [vmem:[#allocation2 + $0x1f28] sm:$0xff] }
 0x381   :  { %8364 = vmatprep.subr.bf16.mxu1 %v8363_v17  ;;  %v8383_v17 = vpack.c.bf16 %v1047_v10, %v1039_v9  ;;  %v1110_v6 = vld [vmem:[#allocation2 + $0x1ef0] sm:$0xff]  ;;  %v1125_v8 = vld [vmem:[#allocation2 + $0x1f68] sm:$0xff]  ;;  %v1119_v9 = vld [vmem:[#allocation2 + $0x1f38] sm:$0xff] }
 0x382   :  { %v1127_v10 = vld [vmem:[#allocation2 + $0x1f78] sm:$0xff] }
 0x383   :  { %7790 = vmatpush1.bf16.msra.mxu0 %v7789_v23  ;;  %v7809_v23 = vpack.c.bf16 %v1044_v15, %v1036_v14  ;;  %v1116_v14 = vld [vmem:[#allocation2 + $0x1f20] sm:$0xff] }
 0x384   :  { %8366 = vmatpush1.bf16.msra.mxu1 %v8365_v24  ;;  %7792 = vmatprep.subr.bf16.mxu0 %v7791_v25  ;;  %v8385_v24 = vpack.c.bf16 %v1046_v18, %v1038_v16  ;;  %v7811_v25 = vpack.c.bf16 %v1061_v20, %v1053_v19  ;;  %v1124_v15 = vld [vmem:[#allocation2 + $0x1f60] sm:$0xff]  ;;  %v1118_v16 = vld [vmem:[#allocation2 + $0x1f30] sm:$0xff]  ;;  %v1133_v19 = vld [vmem:[#allocation2 + $0x1fa8] sm:$0xff] }
 0x385   :  { %v9766_v41 = vpop.f32.mrb[0].mxu0  ;;  %8368 = vmatprep.subr.bf16.mxu1 %v8367_v29  ;;  %v8387_v29 = vpack.c.bf16 %v1063_v22, %v1055_v21  ;;  %v1126_v18 = vld [vmem:[#allocation2 + $0x1f70] sm:$0xff]  ;;  %v1141_v20 = vld [vmem:[#allocation2 + $0x1fe8] sm:$0xff]  ;;  %v1135_v21 = vld [vmem:[#allocation2 + $0x1fb8] sm:$0xff] }
 0x386   :  { %v9768_v46 = vpop.f32.mrb[0].mxu1  ;;  %v9770_v47 = vpop.f32.mrb[1].mxu0  ;;  %v1143_v22 = vld [vmem:[#allocation2 + $0x1ff8] sm:$0xff] }
 0x387   :  { %v9772_v50 = vpop.f32.mrb[1].mxu1  ;;  %7794 = vmatpush1.bf16.msra.mxu0 %v7793_v35  ;;  %v7813_v35 = vpack.c.bf16 %v1060_v27, %v1052_v26  ;;  %v1132_v26 = vld [vmem:[#allocation2 + $0x1fa0] sm:$0xff] }
 0x388   :  { %8370 = vmatpush1.bf16.msra.mxu1 %v8369_v36  ;;  %7796 = vmatprep.subr.bf16.mxu0 %v7795_v37  ;;  %v8389_v36 = vpack.c.bf16 %v1062_v30, %v1054_v28  ;;  %v7815_v37 = vpack.c.bf16 %v1077_v32, %v1069_v31  ;;  %v1140_v27 = vld [vmem:[#allocation2 + $0x1fe0] sm:$0xff]  ;;  %v1134_v28 = vld [vmem:[#allocation2 + $0x1fb0] sm:$0xff]  ;;  %v1149_v31 = vld [vmem:[#allocation2 + $0x2028] sm:$0xff] }
 0x389   :  { %8372 = vmatprep.subr.bf16.mxu1 %v8371_v42  ;;  %v8391_v42 = vpack.c.bf16 %v1079_v34, %v1071_v33  ;;  %v1142_v30 = vld [vmem:[#allocation2 + $0x1ff0] sm:$0xff]  ;;  %v1157_v32 = vld [vmem:[#allocation2 + $0x2068] sm:$0xff]  ;;  %v1151_v33 = vld [vmem:[#allocation2 + $0x2038] sm:$0xff] }
 0x38a   :  { %v1159_v34 = vld [vmem:[#allocation2 + $0x2078] sm:$0xff] }
 0x38b   :  { %7798 = vmatpush1.bf16.msra.mxu0 %v7797_v51  ;;  %v7817_v51 = vpack.c.bf16 %v1076_v39, %v1068_v38  ;;  %v1148_v38 = vld [vmem:[#allocation2 + $0x2020] sm:$0xff] }
 0x38c   :  { %8374 = vmatpush1.bf16.msra.mxu1 %v8373_v52  ;;  %7800 = vmatprep.subr.bf16.mxu0 %v7799_v53  ;;  %v8393_v52 = vpack.c.bf16 %v1078_v43, %v1070_v40  ;;  %v7819_v53 = vpack.c.bf16 %v1093_v45, %v1085_v44  ;;  %v1156_v39 = vld [vmem:[#allocation2 + $0x2060] sm:$0xff]  ;;  %v1150_v40 = vld [vmem:[#allocation2 + $0x2030] sm:$0xff]  ;;  %v1165_v44 = vld [vmem:[#allocation2 + $0x20a8] sm:$0xff] }
 0x38d   :  { %8376 = vmatprep.subr.bf16.mxu1 %v8375_v57  ;;  %v8395_v57 = vpack.c.bf16 %v1095_v49, %v1087_v48  ;;  %v1158_v43 = vld [vmem:[#allocation2 + $0x2070] sm:$0xff]  ;;  %v1173_v45 = vld [vmem:[#allocation2 + $0x20e8] sm:$0xff]  ;;  %v1167_v48 = vld [vmem:[#allocation2 + $0x20b8] sm:$0xff] }
 0x38e   :  { %v1175_v49 = vld [vmem:[#allocation2 + $0x20f8] sm:$0xff] }
 0x38f   :  { %7802 = vmatpush1.bf16.msra.mxu0 %v7801_v63  ;;  %v7821_v63 = vpack.c.bf16 %v1092_v55, %v1084_v54  ;;  %v1164_v54 = vld [vmem:[#allocation2 + $0x20a0] sm:$0xff] }
 0x390   :  { %8378 = vmatpush1.bf16.msra.mxu1 %v8377_v0  ;;  %7804 = vmatprep.subr.bf16.mxu0 %v7803_v1  ;;  %v8397_v0 = vpack.c.bf16 %v1094_v58, %v1086_v56  ;;  %v7823_v1 = vpack.c.bf16 %v1109_v60, %v1101_v59  ;;  %v1172_v55 = vld [vmem:[#allocation2 + $0x20e0] sm:$0xff]  ;;  %v1166_v56 = vld [vmem:[#allocation2 + $0x20b0] sm:$0xff]  ;;  %v1181_v59 = vld [vmem:[#allocation2 + $0x2128] sm:$0xff] }
 0x391   :  { %8380 = vmatprep.subr.bf16.mxu1 %v8379_v5  ;;  %v8399_v5 = vpack.c.bf16 %v1111_v62, %v1103_v61  ;;  %v1174_v58 = vld [vmem:[#allocation2 + $0x20f0] sm:$0xff]  ;;  %v1189_v60 = vld [vmem:[#allocation2 + $0x2168] sm:$0xff]  ;;  %v1183_v62 = vld [vmem:[#allocation2 + $0x2138] sm:$0xff] }
 0x392   :  { %v9414_v61 = vld [vmem:[%s9854_s0 + $0x30] sm:$0xff] }
 0x393   :  { %7806 = vmatpush1.bf16.msra.mxu0 %v7805_v11  ;;  %v7825_v11 = vpack.c.bf16 %v1108_v3, %v1100_v2  ;;  %v7843_v2 = vpack.c.bf16 %v1189_v60, %v1181_v59  ;;  %v1180_v3 = vld [vmem:[#allocation2 + $0x2120] sm:$0xff]  ;;  %v1254_v60 = vld [vmem:[#allocation2 + $0x2370] sm:$0xff] }
 0x394   :  { %8382 = vmatpush1.bf16.msra.mxu1 %v8381_v12  ;;  %7808 = vmatprep.subr.bf16.mxu0 %v7807_v13  ;;  %v8401_v12 = vpack.c.bf16 %v1110_v6, %v1102_v4  ;;  %v7827_v13 = vpack.c.bf16 %v1125_v8, %v1117_v7  ;;  %v1188_v4 = vld [vmem:[#allocation2 + $0x2160] sm:$0xff]  ;;  %v1190_v7 = vld [vmem:[#allocation2 + $0x2170] sm:$0xff]  ;;  %v1197_v8 = vld [vmem:[#allocation2 + $0x21a8] sm:$0xff] }
 0x395   :  { %8384 = vmatprep.subr.bf16.mxu1 %v8383_v17  ;;  %v8403_v17 = vpack.c.bf16 %v1127_v10, %v1119_v9  ;;  %v1205_v9 = vld [vmem:[#allocation2 + $0x21e8] sm:$0xff] }
 0x396   :  { %v9415_v10 = vld [vmem:[%s9854_s0 + $0x48] sm:$0xff] }
 0x397   :  { %7810 = vmatpush1.bf16.msra.mxu0 %v7809_v23  ;;  %v7829_v23 = vpack.c.bf16 %v1124_v15, %v1116_v14  ;;  %v7847_v15 = vpack.c.bf16 %v1205_v9, %v1197_v8  ;;  %v1270_v8 = vld [vmem:[#allocation2 + $0x23f0] sm:$0xff]  ;;  %v1277_v9 = vld [vmem:[#allocation2 + $0x2428] sm:$0xff] }
 0x398   :  { %8386 = vmatpush1.bf16.msra.mxu1 %v8385_v24  ;;  %7812 = vmatprep.subr.bf16.mxu0 %v7811_v25  ;;  %v8405_v24 = vpack.c.bf16 %v1126_v18, %v1118_v16  ;;  %v7831_v25 = vpack.c.bf16 %v1141_v20, %v1133_v19  ;;  %v1196_v16 = vld [vmem:[#allocation2 + $0x21a0] sm:$0xff]  ;;  %v1198_v18 = vld [vmem:[#allocation2 + $0x21b0] sm:$0xff] }
 0x399   :  { %8388 = vmatprep.subr.bf16.mxu1 %v8387_v29  ;;  %v8407_v29 = vpack.c.bf16 %v1143_v22, %v1135_v21  ;;  %v1206_v20 = vld [vmem:[#allocation2 + $0x21f0] sm:$0xff]  ;;  %v1213_v21 = vld [vmem:[#allocation2 + $0x2228] sm:$0xff] }
 0x39a   :  { %v1221_v22 = vld [vmem:[#allocation2 + $0x2268] sm:$0xff] }
 0x39b   :  { %7814 = vmatpush1.bf16.msra.mxu0 %v7813_v35  ;;  %v7833_v35 = vpack.c.bf16 %v1140_v27, %v1132_v26  ;;  %v8425_v26 = vpack.c.bf16 %v1206_v20, %v1198_v18  ;;  %v7851_v27 = vpack.c.bf16 %v1221_v22, %v1213_v21  ;;  %v1278_v18 = vld [vmem:[#allocation2 + $0x2430] sm:$0xff]  ;;  %v1293_v21 = vld [vmem:[#allocation2 + $0x24a8] sm:$0xff] }
 0x39c   :  { %8390 = vmatpush1.bf16.msra.mxu1 %v8389_v36  ;;  %7816 = vmatprep.subr.bf16.mxu0 %v7815_v37  ;;  %v8409_v36 = vpack.c.bf16 %v1142_v30, %v1134_v28  ;;  %v7835_v37 = vpack.c.bf16 %v1157_v32, %v1149_v31  ;;  %v1212_v28 = vld [vmem:[#allocation2 + $0x2220] sm:$0xff]  ;;  %v1214_v30 = vld [vmem:[#allocation2 + $0x2230] sm:$0xff]  ;;  %v1301_v22 = vld [vmem:[#allocation2 + $0x24e8] sm:$0xff] }
 0x39d   :  { %8392 = vmatprep.subr.bf16.mxu1 %v8391_v42  ;;  %v8411_v42 = vpack.c.bf16 %v1159_v34, %v1151_v33  ;;  %v1222_v32 = vld [vmem:[#allocation2 + $0x2270] sm:$0xff]  ;;  %v1229_v33 = vld [vmem:[#allocation2 + $0x22a8] sm:$0xff] }
 0x39e   :  { %v1237_v34 = vld [vmem:[#allocation2 + $0x22e8] sm:$0xff]  ;;  %v1286_v20 = vld [vmem:[#allocation2 + $0x2470] sm:$0xff] }
 0x39f   :  { %7818 = vmatpush1.bf16.msra.mxu0 %v7817_v51  ;;  %v7837_v51 = vpack.c.bf16 %v1156_v39, %v1148_v38  ;;  %v8429_v38 = vpack.c.bf16 %v1222_v32, %v1214_v30  ;;  %v7855_v39 = vpack.c.bf16 %v1237_v34, %v1229_v33  ;;  %v1294_v30 = vld [vmem:[#allocation2 + $0x24b0] sm:$0xff]  ;;  %v1309_v33 = vld [vmem:[#allocation2 + $0x2528] sm:$0xff] }
 0x3a0   :  { %8394 = vmatpush1.bf16.msra.mxu1 %v8393_v52  ;;  %7820 = vmatprep.subr.bf16.mxu0 %v7819_v53  ;;  %v8413_v52 = vpack.c.bf16 %v1158_v43, %v1150_v40  ;;  %v7839_v53 = vpack.c.bf16 %v1173_v45, %v1165_v44  ;;  %v1228_v40 = vld [vmem:[#allocation2 + $0x22a0] sm:$0xff]  ;;  %v1230_v43 = vld [vmem:[#allocation2 + $0x22b0] sm:$0xff]  ;;  %v1317_v34 = vld [vmem:[#allocation2 + $0x2568] sm:$0xff] }
 0x3a1   :  { %8396 = vmatprep.subr.bf16.mxu1 %v8395_v57  ;;  %v8415_v57 = vpack.c.bf16 %v1175_v49, %v1167_v48  ;;  %v1238_v45 = vld [vmem:[#allocation2 + $0x22f0] sm:$0xff]  ;;  %v1245_v48 = vld [vmem:[#allocation2 + $0x2328] sm:$0xff] }
 0x3a2   :  { %v1253_v49 = vld [vmem:[#allocation2 + $0x2368] sm:$0xff]  ;;  %v1302_v32 = vld [vmem:[#allocation2 + $0x24f0] sm:$0xff] }
 0x3a3   :  { %7822 = vmatpush1.bf16.msra.mxu0 %v7821_v63  ;;  %v1191_v63 = vld [vmem:[#allocation2 + $0x2178] sm:$0xff] }
 0x3a4   :  { %8398 = vmatpush1.bf16.msra.mxu1 %v8397_v0  ;;  %7824 = vmatprep.subr.bf16.mxu0 %v7823_v1  ;;  %v7841_v0 = vpack.c.bf16 %v1172_v55, %v1164_v54  ;;  %v8417_v1 = vpack.c.bf16 %v1174_v58, %v1166_v56  ;;  %v8419_v6 = vpack.c.bf16 %v1191_v63, %v1183_v62  ;;  %v1244_v56 = vld [vmem:[#allocation2 + $0x2320] sm:$0xff]  ;;  %v1246_v58 = vld [vmem:[#allocation2 + $0x2330] sm:$0xff]  ;;  %v1269_v62 = vld [vmem:[#allocation2 + $0x23e8] sm:$0xff] }
 0x3a5   :  { %8400 = vmatprep.subr.bf16.mxu1 %v8399_v5  ;;  %v1182_v5 = vld [vmem:[#allocation2 + $0x2130] sm:$0xff]  ;;  %v8433_v54 = vpack.c.bf16 %v1238_v45, %v1230_v43  ;;  %v7859_v55 = vpack.c.bf16 %v1253_v49, %v1245_v48  ;;  %v1263_v63 = vld [vmem:[#allocation2 + $0x23b8] sm:$0xff]  ;;  %v1325_v48 = vld [vmem:[#allocation2 + $0x25a8] sm:$0xff] }
 0x3a6   :  { %v8421_v14 = vpack.c.bf16 %v1190_v7, %v1182_v5  ;;  %v1268_v5 = vld [vmem:[#allocation2 + $0x23e0] sm:$0xff]  ;;  %v1310_v43 = vld [vmem:[#allocation2 + $0x2530] sm:$0xff]  ;;  %v1333_v49 = vld [vmem:[#allocation2 + $0x25e8] sm:$0xff] }
 0x3a7   :  { %7826 = vmatpush1.bf16.msra.mxu0 %v7825_v11  ;;  %v1199_v11 = vld [vmem:[#allocation2 + $0x21b8] sm:$0xff]  ;;  %v1318_v45 = vld [vmem:[#allocation2 + $0x2570] sm:$0xff] }
 0x3a8   :  { %8402 = vmatpush1.bf16.msra.mxu1 %v8401_v12  ;;  %7828 = vmatprep.subr.bf16.mxu0 %v7827_v13  ;;  %v1207_v12 = vld [vmem:[#allocation2 + $0x21f8] sm:$0xff]  ;;  %v7845_v13 = vpack.c.bf16 %v1188_v4, %v1180_v3  ;;  %v1260_v4 = vld [vmem:[#allocation2 + $0x23a0] sm:$0xff] }
 0x3a9   :  { %8404 = vmatprep.subr.bf16.mxu1 %v8403_v17  ;;  %v1204_v17 = vld [vmem:[#allocation2 + $0x21e0] sm:$0xff]  ;;  %v8423_v19 = vpack.c.bf16 %v1207_v12, %v1199_v11  ;;  %v1279_v11 = vld [vmem:[#allocation2 + $0x2438] sm:$0xff] }
 0x3aa   :  { %v1287_v12 = vld [vmem:[#allocation2 + $0x2478] sm:$0xff] }
 0x3ab   :  { %7830 = vmatpush1.bf16.msra.mxu0 %v7829_v23  ;;  %v1215_v23 = vld [vmem:[#allocation2 + $0x2238] sm:$0xff] }
 0x3ac   :  { %8406 = vmatpush1.bf16.msra.mxu1 %v8405_v24  ;;  %7832 = vmatprep.subr.bf16.mxu0 %v7831_v25  ;;  %v1223_v24 = vld [vmem:[#allocation2 + $0x2278] sm:$0xff]  ;;  %v7849_v25 = vpack.c.bf16 %v1204_v17, %v1196_v16  ;;  %v1276_v16 = vld [vmem:[#allocation2 + $0x2420] sm:$0xff] }
 0x3ad   :  { %8408 = vmatprep.subr.bf16.mxu1 %v8407_v29  ;;  %v1220_v29 = vld [vmem:[#allocation2 + $0x2260] sm:$0xff]  ;;  %v8427_v31 = vpack.c.bf16 %v1223_v24, %v1215_v23  ;;  %v1295_v23 = vld [vmem:[#allocation2 + $0x24b8] sm:$0xff] }
 0x3ae   :  { %v1284_v17 = vld [vmem:[#allocation2 + $0x2460] sm:$0xff]  ;;  %v1303_v24 = vld [vmem:[#allocation2 + $0x24f8] sm:$0xff] }
 0x3af   :  { %7834 = vmatpush1.bf16.msra.mxu0 %v7833_v35  ;;  %v1231_v35 = vld [vmem:[#allocation2 + $0x22b8] sm:$0xff] }
 0x3b0   :  { %8410 = vmatpush1.bf16.msra.mxu1 %v8409_v36  ;;  %7836 = vmatprep.subr.bf16.mxu0 %v7835_v37  ;;  %v1239_v36 = vld [vmem:[#allocation2 + $0x22f8] sm:$0xff]  ;;  %v7853_v37 = vpack.c.bf16 %v1220_v29, %v1212_v28  ;;  %v1292_v28 = vld [vmem:[#allocation2 + $0x24a0] sm:$0xff] }
 0x3b1   :  { %8412 = vmatprep.subr.bf16.mxu1 %v8411_v42  ;;  %v1236_v42 = vld [vmem:[#allocation2 + $0x22e0] sm:$0xff]  ;;  %v8431_v44 = vpack.c.bf16 %v1239_v36, %v1231_v35  ;;  %v1311_v35 = vld [vmem:[#allocation2 + $0x2538] sm:$0xff] }
 0x3b2   :  { %4022 = vmatmul.mubr.f32.vlgmr.msra.gmra.mrb[2].mxu0 %v9414_v61  ;;  %v1300_v29 = vld [vmem:[#allocation2 + $0x24e0] sm:$0xff]  ;;  %v1319_v36 = vld [vmem:[#allocation2 + $0x2578] sm:$0xff] }
 0x3b3   :  { %7838 = vmatpush1.bf16.msra.mxu0 %v7837_v51  ;;  %4661 = vmatmul.mubr.f32.vlgmr.msra.gmra.mrb[2].mxu1 %v9414_v61  ;;  %v1247_v51 = vld [vmem:[#allocation2 + $0x2338] sm:$0xff]  ;;  %v1261_v61 = vld [vmem:[#allocation2 + $0x23a8] sm:$0xff] }
 0x3b4   :  { %8414 = vmatpush1.bf16.msra.mxu1 %v8413_v52  ;;  %7840 = vmatprep.subr.bf16.mxu0 %v7839_v53  ;;  %v1255_v52 = vld [vmem:[#allocation2 + $0x2378] sm:$0xff]  ;;  %v7857_v53 = vpack.c.bf16 %v1236_v42, %v1228_v40  ;;  %v7863_v3 = vpack.c.bf16 %v1269_v62, %v1261_v61  ;;  %v1308_v40 = vld [vmem:[#allocation2 + $0x2520] sm:$0xff]  ;;  %v1341_v61 = vld [vmem:[#allocation2 + $0x2628] sm:$0xff] }
 0x3b5   :  { %8416 = vmatprep.subr.bf16.mxu1 %v8415_v57  ;;  %4092 = vmatprep.mubr.f32.mxu0 %v9415_v10  ;;  %v1252_v57 = vld [vmem:[#allocation2 + $0x2360] sm:$0xff]  ;;  %v8435_v59 = vpack.c.bf16 %v1255_v52, %v1247_v51  ;;  %v1327_v51 = vld [vmem:[#allocation2 + $0x25b8] sm:$0xff]  ;;  %v1349_v62 = vld [vmem:[#allocation2 + $0x2668] sm:$0xff] }
 0x3b6   :  { %4731 = vmatprep.mubr.f32.mxu1 %v9415_v10  ;;  %v1285_v10 = vld [vmem:[#allocation2 + $0x2468] sm:$0xff]  ;;  %v1316_v42 = vld [vmem:[#allocation2 + $0x2560] sm:$0xff]  ;;  %v1335_v52 = vld [vmem:[#allocation2 + $0x25f8] sm:$0xff] }
 0x3b7   :  { %7842 = vmatpush1.bf16.msra.mxu0 %v7841_v0  ;;  %v1271_v0 = vld [vmem:[#allocation2 + $0x23f8] sm:$0xff] }
 0x3b8   :  { %8418 = vmatpush1.bf16.msra.mxu1 %v8417_v1  ;;  %7844 = vmatprep.subr.bf16.mxu0 %v7843_v2  ;;  %v7861_v1 = vpack.c.bf16 %v1252_v57, %v1244_v56  ;;  %v8437_v2 = vpack.c.bf16 %v1254_v60, %v1246_v58  ;;  %v8439_v7 = vpack.c.bf16 %v1271_v0, %v1263_v63  ;;  %v1324_v56 = vld [vmem:[#allocation2 + $0x25a0] sm:$0xff]  ;;  %v1326_v58 = vld [vmem:[#allocation2 + $0x25b0] sm:$0xff]  ;;  %v1343_v63 = vld [vmem:[#allocation2 + $0x2638] sm:$0xff] }
 0x3b9   :  { %8420 = vmatprep.subr.bf16.mxu1 %v8419_v6  ;;  %v1262_v6 = vld [vmem:[#allocation2 + $0x23b0] sm:$0xff]  ;;  %v1332_v57 = vld [vmem:[#allocation2 + $0x25e0] sm:$0xff]  ;;  %v1351_v0 = vld [vmem:[#allocation2 + $0x2678] sm:$0xff] }
 0x3ba   :  { %v1334_v60 = vld [vmem:[#allocation2 + $0x25f0] sm:$0xff] }
 0x3bb   :  { %7846 = vmatpush1.bf16.msra.mxu0 %v7845_v13  ;;  %v7865_v13 = vpack.c.bf16 %v1268_v5, %v1260_v4  ;;  %v1340_v4 = vld [vmem:[#allocation2 + $0x2620] sm:$0xff] }
 0x3bc   :  { %8422 = vmatpush1.bf16.msra.mxu1 %v8421_v14  ;;  %7848 = vmatprep.subr.bf16.mxu0 %v7847_v15  ;;  %v8441_v14 = vpack.c.bf16 %v1270_v8, %v1262_v6  ;;  %v7867_v15 = vpack.c.bf16 %v1285_v10, %v1277_v9  ;;  %v1348_v5 = vld [vmem:[#allocation2 + $0x2660] sm:$0xff]  ;;  %v1342_v6 = vld [vmem:[#allocation2 + $0x2630] sm:$0xff]  ;;  %v1357_v9 = vld [vmem:[#allocation2 + $0x26a8] sm:$0xff] }
 0x3bd   :  { %8424 = vmatprep.subr.bf16.mxu1 %v8423_v19  ;;  %v8443_v19 = vpack.c.bf16 %v1287_v12, %v1279_v11  ;;  %v1350_v8 = vld [vmem:[#allocation2 + $0x2670] sm:$0xff]  ;;  %v1365_v10 = vld [vmem:[#allocation2 + $0x26e8] sm:$0xff]  ;;  %v1359_v11 = vld [vmem:[#allocation2 + $0x26b8] sm:$0xff] }
 0x3be   :  { %v1367_v12 = vld [vmem:[#allocation2 + $0x26f8] sm:$0xff] }
 0x3bf   :  { %7850 = vmatpush1.bf16.msra.mxu0 %v7849_v25  ;;  %v7869_v25 = vpack.c.bf16 %v1284_v17, %v1276_v16  ;;  %v1356_v16 = vld [vmem:[#allocation2 + $0x26a0] sm:$0xff] }
 0x3c0   :  { %8426 = vmatpush1.bf16.msra.mxu1 %v8425_v26  ;;  %7852 = vmatprep.subr.bf16.mxu0 %v7851_v27  ;;  %v8445_v26 = vpack.c.bf16 %v1286_v20, %v1278_v18  ;;  %v7871_v27 = vpack.c.bf16 %v1301_v22, %v1293_v21  ;;  %v1364_v17 = vld [vmem:[#allocation2 + $0x26e0] sm:$0xff]  ;;  %v1358_v18 = vld [vmem:[#allocation2 + $0x26b0] sm:$0xff]  ;;  %v1373_v21 = vld [vmem:[#allocation2 + $0x2728] sm:$0xff] }
 0x3c1   :  { %8428 = vmatprep.subr.bf16.mxu1 %v8427_v31  ;;  %v8447_v31 = vpack.c.bf16 %v1303_v24, %v1295_v23  ;;  %v1366_v20 = vld [vmem:[#allocation2 + $0x26f0] sm:$0xff]  ;;  %v1381_v22 = vld [vmem:[#allocation2 + $0x2768] sm:$0xff]  ;;  %v1375_v23 = vld [vmem:[#allocation2 + $0x2738] sm:$0xff] }
 0x3c2   :  { %v1383_v24 = vld [vmem:[#allocation2 + $0x2778] sm:$0xff] }
 0x3c3   :  { %7854 = vmatpush1.bf16.msra.mxu0 %v7853_v37  ;;  %v7873_v37 = vpack.c.bf16 %v1300_v29, %v1292_v28  ;;  %v1372_v28 = vld [vmem:[#allocation2 + $0x2720] sm:$0xff] }
 0x3c4   :  { %8430 = vmatpush1.bf16.msra.mxu1 %v8429_v38  ;;  %7856 = vmatprep.subr.bf16.mxu0 %v7855_v39  ;;  %v8449_v38 = vpack.c.bf16 %v1302_v32, %v1294_v30  ;;  %v7875_v39 = vpack.c.bf16 %v1317_v34, %v1309_v33  ;;  %v1380_v29 = vld [vmem:[#allocation2 + $0x2760] sm:$0xff]  ;;  %v1374_v30 = vld [vmem:[#allocation2 + $0x2730] sm:$0xff]  ;;  %v1389_v33 = vld [vmem:[#allocation2 + $0x27a8] sm:$0xff] }
 0x3c5   :  { %8432 = vmatprep.subr.bf16.mxu1 %v8431_v44  ;;  %v8451_v44 = vpack.c.bf16 %v1319_v36, %v1311_v35  ;;  %v1382_v32 = vld [vmem:[#allocation2 + $0x2770] sm:$0xff]  ;;  %v1397_v34 = vld [vmem:[#allocation2 + $0x27e8] sm:$0xff]  ;;  %v1391_v35 = vld [vmem:[#allocation2 + $0x27b8] sm:$0xff] }
 0x3c6   :  { %v1399_v36 = vld [vmem:[#allocation2 + $0x27f8] sm:$0xff] }
 0x3c7   :  { %7858 = vmatpush1.bf16.msra.mxu0 %v7857_v53  ;;  %v7877_v53 = vpack.c.bf16 %v1316_v42, %v1308_v40  ;;  %v1388_v40 = vld [vmem:[#allocation2 + $0x27a0] sm:$0xff] }
 0x3c8   :  { %8434 = vmatpush1.bf16.msra.mxu1 %v8433_v54  ;;  %7860 = vmatprep.subr.bf16.mxu0 %v7859_v55  ;;  %v8453_v54 = vpack.c.bf16 %v1318_v45, %v1310_v43  ;;  %v7879_v55 = vpack.c.bf16 %v1333_v49, %v1325_v48  ;;  %v1396_v42 = vld [vmem:[#allocation2 + $0x27e0] sm:$0xff]  ;;  %v1390_v43 = vld [vmem:[#allocation2 + $0x27b0] sm:$0xff]  ;;  %v1405_v48 = vld [vmem:[#allocation2 + $0x2828] sm:$0xff] }
 0x3c9   :  { %8436 = vmatprep.subr.bf16.mxu1 %v8435_v59  ;;  %v8455_v59 = vpack.c.bf16 %v1335_v52, %v1327_v51  ;;  %v1398_v45 = vld [vmem:[#allocation2 + $0x27f0] sm:$0xff]  ;;  %v1413_v49 = vld [vmem:[#allocation2 + $0x2868] sm:$0xff]  ;;  %v1407_v51 = vld [vmem:[#allocation2 + $0x2838] sm:$0xff] }
 0x3ca   :  { %v1415_v52 = vld [vmem:[#allocation2 + $0x2878] sm:$0xff] }
 0x3cb   :  { %7862 = vmatpush1.bf16.msra.mxu0 %v7861_v1  ;;  %v7881_v1 = vpack.c.bf16 %v1332_v57, %v1324_v56  ;;  %v1404_v56 = vld [vmem:[#allocation2 + $0x2820] sm:$0xff] }
 0x3cc   :  { %8438 = vmatpush1.bf16.msra.mxu1 %v8437_v2  ;;  %7864 = vmatprep.subr.bf16.mxu0 %v7863_v3  ;;  %v8457_v2 = vpack.c.bf16 %v1334_v60, %v1326_v58  ;;  %v7883_v3 = vpack.c.bf16 %v1349_v62, %v1341_v61  ;;  %v1412_v57 = vld [vmem:[#allocation2 + $0x2860] sm:$0xff]  ;;  %v1406_v58 = vld [vmem:[#allocation2 + $0x2830] sm:$0xff]  ;;  %v1421_v61 = vld [vmem:[#allocation2 + $0x28a8] sm:$0xff] }
 0x3cd   :  { %8440 = vmatprep.subr.bf16.mxu1 %v8439_v7  ;;  %v8459_v7 = vpack.c.bf16 %v1351_v0, %v1343_v63  ;;  %v1414_v60 = vld [vmem:[#allocation2 + $0x2870] sm:$0xff]  ;;  %v1429_v62 = vld [vmem:[#allocation2 + $0x28e8] sm:$0xff]  ;;  %v1423_v63 = vld [vmem:[#allocation2 + $0x28b8] sm:$0xff] }
 0x3ce   :  { %v1431_v0 = vld [vmem:[#allocation2 + $0x28f8] sm:$0xff] }
 0x3cf   :  { %7866 = vmatpush1.bf16.msra.mxu0 %v7865_v13  ;;  %v7885_v13 = vpack.c.bf16 %v1348_v5, %v1340_v4  ;;  %v1420_v4 = vld [vmem:[#allocation2 + $0x28a0] sm:$0xff] }
 0x3d0   :  { %8442 = vmatpush1.bf16.msra.mxu1 %v8441_v14  ;;  %7868 = vmatprep.subr.bf16.mxu0 %v7867_v15  ;;  %v8461_v14 = vpack.c.bf16 %v1350_v8, %v1342_v6  ;;  %v7887_v15 = vpack.c.bf16 %v1365_v10, %v1357_v9  ;;  %v1428_v5 = vld [vmem:[#allocation2 + $0x28e0] sm:$0xff]  ;;  %v1422_v6 = vld [vmem:[#allocation2 + $0x28b0] sm:$0xff]  ;;  %v1437_v9 = vld [vmem:[#allocation2 + $0x2928] sm:$0xff] }
 0x3d1   :  { %8444 = vmatprep.subr.bf16.mxu1 %v8443_v19  ;;  %v8463_v19 = vpack.c.bf16 %v1367_v12, %v1359_v11  ;;  %v1430_v8 = vld [vmem:[#allocation2 + $0x28f0] sm:$0xff]  ;;  %v1445_v10 = vld [vmem:[#allocation2 + $0x2968] sm:$0xff]  ;;  %v9416_v11 = vld [vmem:[%s9854_s0 + $0x40] sm:$0xff] }
 0x3d2   :  { %v1439_v12 = vld [vmem:[#allocation2 + $0x2938] sm:$0xff] }
 0x3d3   :  { %7870 = vmatpush1.bf16.msra.mxu0 %v7869_v25  ;;  %v7889_v25 = vpack.c.bf16 %v1364_v17, %v1356_v16  ;;  %v7907_v16 = vpack.c.bf16 %v1445_v10, %v1437_v9  ;;  %v1436_v17 = vld [vmem:[#allocation2 + $0x2920] sm:$0xff]  ;;  %v1510_v10 = vld [vmem:[#allocation2 + $0x2b70] sm:$0xff] }
 0x3d4   :  { %8446 = vmatpush1.bf16.msra.mxu1 %v8445_v26  ;;  %7872 = vmatprep.subr.bf16.mxu0 %v7871_v27  ;;  %v8465_v26 = vpack.c.bf16 %v1366_v20, %v1358_v18  ;;  %v7891_v27 = vpack.c.bf16 %v1381_v22, %v1373_v21  ;;  %v1444_v18 = vld [vmem:[#allocation2 + $0x2960] sm:$0xff]  ;;  %v1446_v21 = vld [vmem:[#allocation2 + $0x2970] sm:$0xff]  ;;  %v1453_v22 = vld [vmem:[#allocation2 + $0x29a8] sm:$0xff] }
 0x3d5   :  { %8448 = vmatprep.subr.bf16.mxu1 %v8447_v31  ;;  %v8467_v31 = vpack.c.bf16 %v1383_v24, %v1375_v23  ;;  %v1461_v23 = vld [vmem:[#allocation2 + $0x29e8] sm:$0xff]  ;;  %v9417_v24 = vld [vmem:[%s9854_s0 + $0x58] sm:$0xff] }
 0x3d7   :  { %7874 = vmatpush1.bf16.msra.mxu0 %v7873_v37  ;;  %v7893_v37 = vpack.c.bf16 %v1380_v29, %v1372_v28  ;;  %v7911_v29 = vpack.c.bf16 %v1461_v23, %v1453_v22  ;;  %v1526_v22 = vld [vmem:[#allocation2 + $0x2bf0] sm:$0xff]  ;;  %v1533_v23 = vld [vmem:[#allocation2 + $0x2c28] sm:$0xff] }
 0x3d8   :  { %8450 = vmatpush1.bf16.msra.mxu1 %v8449_v38  ;;  %7876 = vmatprep.subr.bf16.mxu0 %v7875_v39  ;;  %v8469_v38 = vpack.c.bf16 %v1382_v32, %v1374_v30  ;;  %v7895_v39 = vpack.c.bf16 %v1397_v34, %v1389_v33  ;;  %v1452_v30 = vld [vmem:[#allocation2 + $0x29a0] sm:$0xff]  ;;  %v1454_v32 = vld [vmem:[#allocation2 + $0x29b0] sm:$0xff] }
 0x3d9   :  { %8452 = vmatprep.subr.bf16.mxu1 %v8451_v44  ;;  %v8471_v44 = vpack.c.bf16 %v1399_v36, %v1391_v35  ;;  %v1462_v34 = vld [vmem:[#allocation2 + $0x29f0] sm:$0xff]  ;;  %v1469_v35 = vld [vmem:[#allocation2 + $0x2a28] sm:$0xff] }
 0x3da   :  { %v1477_v36 = vld [vmem:[#allocation2 + $0x2a68] sm:$0xff] }
 0x3db   :  { %7878 = vmatpush1.bf16.msra.mxu0 %v7877_v53  ;;  %v7897_v53 = vpack.c.bf16 %v1396_v42, %v1388_v40  ;;  %v8489_v40 = vpack.c.bf16 %v1462_v34, %v1454_v32  ;;  %v7915_v42 = vpack.c.bf16 %v1477_v36, %v1469_v35  ;;  %v1534_v32 = vld [vmem:[#allocation2 + $0x2c30] sm:$0xff]  ;;  %v1549_v35 = vld [vmem:[#allocation2 + $0x2ca8] sm:$0xff] }
 0x3dc   :  { %8454 = vmatpush1.bf16.msra.mxu1 %v8453_v54  ;;  %7880 = vmatprep.subr.bf16.mxu0 %v7879_v55  ;;  %v8473_v54 = vpack.c.bf16 %v1398_v45, %v1390_v43  ;;  %v7899_v55 = vpack.c.bf16 %v1413_v49, %v1405_v48  ;;  %v1468_v43 = vld [vmem:[#allocation2 + $0x2a20] sm:$0xff]  ;;  %v1470_v45 = vld [vmem:[#allocation2 + $0x2a30] sm:$0xff]  ;;  %v1557_v36 = vld [vmem:[#allocation2 + $0x2ce8] sm:$0xff] }
 0x3dd   :  { %8456 = vmatprep.subr.bf16.mxu1 %v8455_v59  ;;  %v8475_v59 = vpack.c.bf16 %v1415_v52, %v1407_v51  ;;  %v1478_v49 = vld [vmem:[#allocation2 + $0x2a70] sm:$0xff]  ;;  %v1485_v51 = vld [vmem:[#allocation2 + $0x2aa8] sm:$0xff] }
 0x3de   :  { %v1493_v52 = vld [vmem:[#allocation2 + $0x2ae8] sm:$0xff]  ;;  %v1542_v34 = vld [vmem:[#allocation2 + $0x2c70] sm:$0xff] }
 0x3df   :  { %7882 = vmatpush1.bf16.msra.mxu0 %v7881_v1  ;;  %v7901_v1 = vpack.c.bf16 %v1412_v57, %v1404_v56  ;;  %v8493_v56 = vpack.c.bf16 %v1478_v49, %v1470_v45  ;;  %v7919_v57 = vpack.c.bf16 %v1493_v52, %v1485_v51  ;;  %v1550_v45 = vld [vmem:[#allocation2 + $0x2cb0] sm:$0xff]  ;;  %v1565_v51 = vld [vmem:[#allocation2 + $0x2d28] sm:$0xff] }
 0x3e0   :  { %8458 = vmatpush1.bf16.msra.mxu1 %v8457_v2  ;;  %7884 = vmatprep.subr.bf16.mxu0 %v7883_v3  ;;  %v8477_v2 = vpack.c.bf16 %v1414_v60, %v1406_v58  ;;  %v7903_v3 = vpack.c.bf16 %v1429_v62, %v1421_v61  ;;  %v1484_v58 = vld [vmem:[#allocation2 + $0x2aa0] sm:$0xff]  ;;  %v1486_v60 = vld [vmem:[#allocation2 + $0x2ab0] sm:$0xff]  ;;  %v1573_v52 = vld [vmem:[#allocation2 + $0x2d68] sm:$0xff] }
 0x3e1   :  { %8460 = vmatprep.subr.bf16.mxu1 %v8459_v7  ;;  %v8479_v7 = vpack.c.bf16 %v1431_v0, %v1423_v63  ;;  %v1494_v62 = vld [vmem:[#allocation2 + $0x2af0] sm:$0xff]  ;;  %v1501_v63 = vld [vmem:[#allocation2 + $0x2b28] sm:$0xff] }
 0x3e2   :  { %v1509_v0 = vld [vmem:[#allocation2 + $0x2b68] sm:$0xff]  ;;  %v1558_v49 = vld [vmem:[#allocation2 + $0x2cf0] sm:$0xff] }
 0x3e3   :  { %7886 = vmatpush1.bf16.msra.mxu0 %v7885_v13  ;;  %v1447_v13 = vld [vmem:[#allocation2 + $0x2978] sm:$0xff] }
 0x3e4   :  { %8462 = vmatpush1.bf16.msra.mxu1 %v8461_v14  ;;  %7888 = vmatprep.subr.bf16.mxu0 %v7887_v15  ;;  %v7905_v14 = vpack.c.bf16 %v1428_v5, %v1420_v4  ;;  %v8481_v15 = vpack.c.bf16 %v1430_v8, %v1422_v6  ;;  %v8483_v20 = vpack.c.bf16 %v1447_v13, %v1439_v12  ;;  %v1500_v6 = vld [vmem:[#allocation2 + $0x2b20] sm:$0xff]  ;;  %v1502_v8 = vld [vmem:[#allocation2 + $0x2b30] sm:$0xff]  ;;  %v1525_v12 = vld [vmem:[#allocation2 + $0x2be8] sm:$0xff] }
 0x3e5   :  { %8464 = vmatprep.subr.bf16.mxu1 %v8463_v19  ;;  %v1438_v19 = vld [vmem:[#allocation2 + $0x2930] sm:$0xff]  ;;  %v8497_v4 = vpack.c.bf16 %v1494_v62, %v1486_v60  ;;  %v7923_v5 = vpack.c.bf16 %v1509_v0, %v1501_v63  ;;  %v1519_v13 = vld [vmem:[#allocation2 + $0x2bb8] sm:$0xff]  ;;  %v1581_v63 = vld [vmem:[#allocation2 + $0x2da8] sm:$0xff] }
 0x3e6   :  { %v8485_v28 = vpack.c.bf16 %v1446_v21, %v1438_v19  ;;  %v1524_v19 = vld [vmem:[#allocation2 + $0x2be0] sm:$0xff]  ;;  %v1566_v60 = vld [vmem:[#allocation2 + $0x2d30] sm:$0xff]  ;;  %v1589_v0 = vld [vmem:[#allocation2 + $0x2de8] sm:$0xff] }
 0x3e7   :  { %7890 = vmatpush1.bf16.msra.mxu0 %v7889_v25  ;;  %v1455_v25 = vld [vmem:[#allocation2 + $0x29b8] sm:$0xff]  ;;  %v1574_v62 = vld [vmem:[#allocation2 + $0x2d70] sm:$0xff] }
 0x3e8   :  { %8466 = vmatpush1.bf16.msra.mxu1 %v8465_v26  ;;  %7892 = vmatprep.subr.bf16.mxu0 %v7891_v27  ;;  %v1463_v26 = vld [vmem:[#allocation2 + $0x29f8] sm:$0xff]  ;;  %v7909_v27 = vpack.c.bf16 %v1444_v18, %v1436_v17  ;;  %v1516_v18 = vld [vmem:[#allocation2 + $0x2ba0] sm:$0xff] }
 0x3e9   :  { %8468 = vmatprep.subr.bf16.mxu1 %v8467_v31  ;;  %v1460_v31 = vld [vmem:[#allocation2 + $0x29e0] sm:$0xff]  ;;  %v8487_v33 = vpack.c.bf16 %v1463_v26, %v1455_v25  ;;  %v1535_v25 = vld [vmem:[#allocation2 + $0x2c38] sm:$0xff] }
 0x3ea   :  { %v1543_v26 = vld [vmem:[#allocation2 + $0x2c78] sm:$0xff] }
 0x3eb   :  { %7894 = vmatpush1.bf16.msra.mxu0 %v7893_v37  ;;  %v1471_v37 = vld [vmem:[#allocation2 + $0x2a38] sm:$0xff] }
 0x3ec   :  { %8470 = vmatpush1.bf16.msra.mxu1 %v8469_v38  ;;  %7896 = vmatprep.subr.bf16.mxu0 %v7895_v39  ;;  %v1479_v38 = vld [vmem:[#allocation2 + $0x2a78] sm:$0xff]  ;;  %v7913_v39 = vpack.c.bf16 %v1460_v31, %v1452_v30  ;;  %v1532_v30 = vld [vmem:[#allocation2 + $0x2c20] sm:$0xff] }
 0x3ed   :  { %8472 = vmatprep.subr.bf16.mxu1 %v8471_v44  ;;  %v1476_v44 = vld [vmem:[#allocation2 + $0x2a60] sm:$0xff]  ;;  %v8491_v48 = vpack.c.bf16 %v1479_v38, %v1471_v37  ;;  %v1551_v37 = vld [vmem:[#allocation2 + $0x2cb8] sm:$0xff] }
 0x3ee   :  { %v1540_v31 = vld [vmem:[#allocation2 + $0x2c60] sm:$0xff]  ;;  %v1559_v38 = vld [vmem:[#allocation2 + $0x2cf8] sm:$0xff] }
 0x3ef   :  { %7898 = vmatpush1.bf16.msra.mxu0 %v7897_v53  ;;  %v1487_v53 = vld [vmem:[#allocation2 + $0x2ab8] sm:$0xff] }
 0x3f0   :  { %8474 = vmatpush1.bf16.msra.mxu1 %v8473_v54  ;;  %7900 = vmatprep.subr.bf16.mxu0 %v7899_v55  ;;  %v1495_v54 = vld [vmem:[#allocation2 + $0x2af8] sm:$0xff]  ;;  %v7917_v55 = vpack.c.bf16 %v1476_v44, %v1468_v43  ;;  %v1548_v43 = vld [vmem:[#allocation2 + $0x2ca0] sm:$0xff] }
 0x3f1   :  { %8476 = vmatprep.subr.bf16.mxu1 %v8475_v59  ;;  %v1492_v59 = vld [vmem:[#allocation2 + $0x2ae0] sm:$0xff]  ;;  %v8495_v61 = vpack.c.bf16 %v1495_v54, %v1487_v53  ;;  %v1567_v53 = vld [vmem:[#allocation2 + $0x2d38] sm:$0xff] }
 0x3f2   :  { %4093 = vmatmul.mubr.f32.vlgmr.msra.gmra.mrb[2].mxu0 %v9416_v11  ;;  %v1556_v44 = vld [vmem:[#allocation2 + $0x2ce0] sm:$0xff]  ;;  %v1575_v54 = vld [vmem:[#allocation2 + $0x2d78] sm:$0xff] }
 0x3f3   :  { %7902 = vmatpush1.bf16.msra.mxu0 %v7901_v1  ;;  %4732 = vmatmul.mubr.f32.vlgmr.msra.gmra.mrb[2].mxu1 %v9416_v11  ;;  %v1503_v1 = vld [vmem:[#allocation2 + $0x2b38] sm:$0xff]  ;;  %v1517_v11 = vld [vmem:[#allocation2 + $0x2ba8] sm:$0xff] }
 0x3f4   :  { %8478 = vmatpush1.bf16.msra.mxu1 %v8477_v2  ;;  %7904 = vmatprep.subr.bf16.mxu0 %v7903_v3  ;;  %v1511_v2 = vld [vmem:[#allocation2 + $0x2b78] sm:$0xff]  ;;  %v7921_v3 = vpack.c.bf16 %v1492_v59, %v1484_v58  ;;  %v7927_v17 = vpack.c.bf16 %v1525_v12, %v1517_v11  ;;  %v1564_v58 = vld [vmem:[#allocation2 + $0x2d20] sm:$0xff]  ;;  %v1597_v11 = vld [vmem:[#allocation2 + $0x2e28] sm:$0xff] }
 0x3f5   :  { %8480 = vmatprep.subr.bf16.mxu1 %v8479_v7  ;;  %4163 = vmatprep.mubr.f32.mxu0 %v9417_v24  ;;  %v1508_v7 = vld [vmem:[#allocation2 + $0x2b60] sm:$0xff]  ;;  %v8499_v9 = vpack.c.bf16 %v1511_v2, %v1503_v1  ;;  %v1583_v1 = vld [vmem:[#allocation2 + $0x2db8] sm:$0xff]  ;;  %v1605_v12 = vld [vmem:[#allocation2 + $0x2e68] sm:$0xff] }
 0x3f6   :  { %4802 = vmatprep.mubr.f32.mxu1 %v9417_v24  ;;  %v1541_v24 = vld [vmem:[#allocation2 + $0x2c68] sm:$0xff]  ;;  %v1572_v59 = vld [vmem:[#allocation2 + $0x2d60] sm:$0xff]  ;;  %v1591_v2 = vld [vmem:[#allocation2 + $0x2df8] sm:$0xff] }
 0x3f7   :  { %7906 = vmatpush1.bf16.msra.mxu0 %v7905_v14  ;;  %v1527_v14 = vld [vmem:[#allocation2 + $0x2bf8] sm:$0xff] }
 0x3f8   :  { %8482 = vmatpush1.bf16.msra.mxu1 %v8481_v15  ;;  %7908 = vmatprep.subr.bf16.mxu0 %v7907_v16  ;;  %v7925_v15 = vpack.c.bf16 %v1508_v7, %v1500_v6  ;;  %v8501_v16 = vpack.c.bf16 %v1510_v10, %v1502_v8  ;;  %v8503_v21 = vpack.c.bf16 %v1527_v14, %v1519_v13  ;;  %v1580_v6 = vld [vmem:[#allocation2 + $0x2da0] sm:$0xff]  ;;  %v1582_v8 = vld [vmem:[#allocation2 + $0x2db0] sm:$0xff]  ;;  %v1599_v13 = vld [vmem:[#allocation2 + $0x2e38] sm:$0xff] }
 0x3f9   :  { %8484 = vmatprep.subr.bf16.mxu1 %v8483_v20  ;;  %v1518_v20 = vld [vmem:[#allocation2 + $0x2bb0] sm:$0xff]  ;;  %v1588_v7 = vld [vmem:[#allocation2 + $0x2de0] sm:$0xff]  ;;  %v1607_v14 = vld [vmem:[#allocation2 + $0x2e78] sm:$0xff] }
 0x3fa   :  { %v1590_v10 = vld [vmem:[#allocation2 + $0x2df0] sm:$0xff] }
 0x3fb   :  { %7910 = vmatpush1.bf16.msra.mxu0 %v7909_v27  ;;  %v7929_v27 = vpack.c.bf16 %v1524_v19, %v1516_v18  ;;  %v1596_v18 = vld [vmem:[#allocation2 + $0x2e20] sm:$0xff] }
 0x3fc   :  { %8486 = vmatpush1.bf16.msra.mxu1 %v8485_v28  ;;  %7912 = vmatprep.subr.bf16.mxu0 %v7911_v29  ;;  %v8505_v28 = vpack.c.bf16 %v1526_v22, %v1518_v20  ;;  %v7931_v29 = vpack.c.bf16 %v1541_v24, %v1533_v23  ;;  %v1604_v19 = vld [vmem:[#allocation2 + $0x2e60] sm:$0xff]  ;;  %v1598_v20 = vld [vmem:[#allocation2 + $0x2e30] sm:$0xff]  ;;  %v1613_v23 = vld [vmem:[#allocation2 + $0x2ea8] sm:$0xff] }
 0x3fd   :  { %8488 = vmatprep.subr.bf16.mxu1 %v8487_v33  ;;  %v8507_v33 = vpack.c.bf16 %v1543_v26, %v1535_v25  ;;  %v1606_v22 = vld [vmem:[#allocation2 + $0x2e70] sm:$0xff]  ;;  %v1621_v24 = vld [vmem:[#allocation2 + $0x2ee8] sm:$0xff]  ;;  %v1615_v25 = vld [vmem:[#allocation2 + $0x2eb8] sm:$0xff] }
 0x3fe   :  { %v1623_v26 = vld [vmem:[#allocation2 + $0x2ef8] sm:$0xff] }
 0x3ff   :  { %7914 = vmatpush1.bf16.msra.mxu0 %v7913_v39  ;;  %v7933_v39 = vpack.c.bf16 %v1540_v31, %v1532_v30  ;;  %v1612_v30 = vld [vmem:[#allocation2 + $0x2ea0] sm:$0xff] }
 0x400   :  { %8490 = vmatpush1.bf16.msra.mxu1 %v8489_v40  ;;  %7916 = vmatprep.subr.bf16.mxu0 %v7915_v42  ;;  %v8509_v40 = vpack.c.bf16 %v1542_v34, %v1534_v32  ;;  %v7935_v42 = vpack.c.bf16 %v1557_v36, %v1549_v35  ;;  %v1620_v31 = vld [vmem:[#allocation2 + $0x2ee0] sm:$0xff]  ;;  %v1614_v32 = vld [vmem:[#allocation2 + $0x2eb0] sm:$0xff]  ;;  %v1629_v35 = vld [vmem:[#allocation2 + $0x2f28] sm:$0xff] }
 0x401   :  { %8492 = vmatprep.subr.bf16.mxu1 %v8491_v48  ;;  %v8511_v48 = vpack.c.bf16 %v1559_v38, %v1551_v37  ;;  %v1622_v34 = vld [vmem:[#allocation2 + $0x2ef0] sm:$0xff]  ;;  %v1637_v36 = vld [vmem:[#allocation2 + $0x2f68] sm:$0xff]  ;;  %v1631_v37 = vld [vmem:[#allocation2 + $0x2f38] sm:$0xff] }
 0x402   :  { %v1639_v38 = vld [vmem:[#allocation2 + $0x2f78] sm:$0xff] }
 0x403   :  { %7918 = vmatpush1.bf16.msra.mxu0 %v7917_v55  ;;  %v7937_v55 = vpack.c.bf16 %v1556_v44, %v1548_v43  ;;  %v1628_v43 = vld [vmem:[#allocation2 + $0x2f20] sm:$0xff] }
 0x404   :  { %8494 = vmatpush1.bf16.msra.mxu1 %v8493_v56  ;;  %7920 = vmatprep.subr.bf16.mxu0 %v7919_v57  ;;  %v8513_v56 = vpack.c.bf16 %v1558_v49, %v1550_v45  ;;  %v7939_v57 = vpack.c.bf16 %v1573_v52, %v1565_v51  ;;  %v1636_v44 = vld [vmem:[#allocation2 + $0x2f60] sm:$0xff]  ;;  %v1630_v45 = vld [vmem:[#allocation2 + $0x2f30] sm:$0xff]  ;;  %v1645_v51 = vld [vmem:[#allocation2 + $0x2fa8] sm:$0xff] }
 0x405   :  { %8496 = vmatprep.subr.bf16.mxu1 %v8495_v61  ;;  %v8515_v61 = vpack.c.bf16 %v1575_v54, %v1567_v53  ;;  %v1638_v49 = vld [vmem:[#allocation2 + $0x2f70] sm:$0xff]  ;;  %v1653_v52 = vld [vmem:[#allocation2 + $0x2fe8] sm:$0xff]  ;;  %v1647_v53 = vld [vmem:[#allocation2 + $0x2fb8] sm:$0xff] }
 0x406   :  { %v1655_v54 = vld [vmem:[#allocation2 + $0x2ff8] sm:$0xff] }
 0x407   :  { %7922 = vmatpush1.bf16.msra.mxu0 %v7921_v3  ;;  %v7941_v3 = vpack.c.bf16 %v1572_v59, %v1564_v58  ;;  %v1644_v58 = vld [vmem:[#allocation2 + $0x2fa0] sm:$0xff] }
 0x408   :  { %8498 = vmatpush1.bf16.msra.mxu1 %v8497_v4  ;;  %7924 = vmatprep.subr.bf16.mxu0 %v7923_v5  ;;  %v8517_v4 = vpack.c.bf16 %v1574_v62, %v1566_v60  ;;  %v7943_v5 = vpack.c.bf16 %v1589_v0, %v1581_v63  ;;  %v1652_v59 = vld [vmem:[#allocation2 + $0x2fe0] sm:$0xff]  ;;  %v1646_v60 = vld [vmem:[#allocation2 + $0x2fb0] sm:$0xff]  ;;  %v1661_v63 = vld [vmem:[#allocation2 + $0x3028] sm:$0xff] }
 0x409   :  { %8500 = vmatprep.subr.bf16.mxu1 %v8499_v9  ;;  %v8519_v9 = vpack.c.bf16 %v1591_v2, %v1583_v1  ;;  %v1654_v62 = vld [vmem:[#allocation2 + $0x2ff0] sm:$0xff]  ;;  %v1669_v0 = vld [vmem:[#allocation2 + $0x3068] sm:$0xff]  ;;  %v1663_v1 = vld [vmem:[#allocation2 + $0x3038] sm:$0xff] }
 0x40a   :  { %v1671_v2 = vld [vmem:[#allocation2 + $0x3078] sm:$0xff] }
 0x40b   :  { %7926 = vmatpush1.bf16.msra.mxu0 %v7925_v15  ;;  %v7945_v15 = vpack.c.bf16 %v1588_v7, %v1580_v6  ;;  %v1660_v6 = vld [vmem:[#allocation2 + $0x3020] sm:$0xff] }
 0x40c   :  { %8502 = vmatpush1.bf16.msra.mxu1 %v8501_v16  ;;  %7928 = vmatprep.subr.bf16.mxu0 %v7927_v17  ;;  %v8521_v16 = vpack.c.bf16 %v1590_v10, %v1582_v8  ;;  %v7947_v17 = vpack.c.bf16 %v1605_v12, %v1597_v11  ;;  %v1668_v7 = vld [vmem:[#allocation2 + $0x3060] sm:$0xff]  ;;  %v1662_v8 = vld [vmem:[#allocation2 + $0x3030] sm:$0xff]  ;;  %v1677_v11 = vld [vmem:[#allocation2 + $0x30a8] sm:$0xff] }
 0x40d   :  { %8504 = vmatprep.subr.bf16.mxu1 %v8503_v21  ;;  %v8523_v21 = vpack.c.bf16 %v1607_v14, %v1599_v13  ;;  %v1670_v10 = vld [vmem:[#allocation2 + $0x3070] sm:$0xff]  ;;  %v1685_v12 = vld [vmem:[#allocation2 + $0x30e8] sm:$0xff]  ;;  %v1679_v13 = vld [vmem:[#allocation2 + $0x30b8] sm:$0xff] }
 0x40e   :  { %v1687_v14 = vld [vmem:[#allocation2 + $0x30f8] sm:$0xff] }
 0x40f   :  { %7930 = vmatpush1.bf16.msra.mxu0 %v7929_v27  ;;  %v7949_v27 = vpack.c.bf16 %v1604_v19, %v1596_v18  ;;  %v1676_v18 = vld [vmem:[#allocation2 + $0x30a0] sm:$0xff] }
 0x410   :  { %8506 = vmatpush1.bf16.msra.mxu1 %v8505_v28  ;;  %7932 = vmatprep.subr.bf16.mxu0 %v7931_v29  ;;  %v8525_v28 = vpack.c.bf16 %v1606_v22, %v1598_v20  ;;  %v7951_v29 = vpack.c.bf16 %v1621_v24, %v1613_v23  ;;  %v1684_v19 = vld [vmem:[#allocation2 + $0x30e0] sm:$0xff]  ;;  %v1678_v20 = vld [vmem:[#allocation2 + $0x30b0] sm:$0xff]  ;;  %v1693_v23 = vld [vmem:[#allocation2 + $0x3128] sm:$0xff] }
 0x411   :  { %8508 = vmatprep.subr.bf16.mxu1 %v8507_v33  ;;  %v8527_v33 = vpack.c.bf16 %v1623_v26, %v1615_v25  ;;  %v1686_v22 = vld [vmem:[#allocation2 + $0x30f0] sm:$0xff]  ;;  %v1701_v24 = vld [vmem:[#allocation2 + $0x3168] sm:$0xff]  ;;  %v1695_v26 = vld [vmem:[#allocation2 + $0x3138] sm:$0xff] }
 0x412   :  { %v9418_v25 = vld [vmem:[%s9854_s0 + $0x50] sm:$0xff] }
 0x413   :  { %7934 = vmatpush1.bf16.msra.mxu0 %v7933_v39  ;;  %v7953_v39 = vpack.c.bf16 %v1620_v31, %v1612_v30  ;;  %v7971_v30 = vpack.c.bf16 %v1701_v24, %v1693_v23  ;;  %v1692_v31 = vld [vmem:[#allocation2 + $0x3120] sm:$0xff]  ;;  %v1766_v24 = vld [vmem:[#allocation2 + $0x3370] sm:$0xff] }
 0x414   :  { %8510 = vmatpush1.bf16.msra.mxu1 %v8509_v40  ;;  %7936 = vmatprep.subr.bf16.mxu0 %v7935_v42  ;;  %v8529_v40 = vpack.c.bf16 %v1622_v34, %v1614_v32  ;;  %v7955_v42 = vpack.c.bf16 %v1637_v36, %v1629_v35  ;;  %v1700_v32 = vld [vmem:[#allocation2 + $0x3160] sm:$0xff]  ;;  %v1702_v35 = vld [vmem:[#allocation2 + $0x3170] sm:$0xff]  ;;  %v1709_v36 = vld [vmem:[#allocation2 + $0x31a8] sm:$0xff] }
 0x415   :  { %8512 = vmatprep.subr.bf16.mxu1 %v8511_v48  ;;  %v8531_v48 = vpack.c.bf16 %v1639_v38, %v1631_v37  ;;  %v1717_v37 = vld [vmem:[#allocation2 + $0x31e8] sm:$0xff] }
 0x416   :  { %v9419_v38 = vld [vmem:[%s9854_s0 + $0x68] sm:$0xff] }
 0x417   :  { %7938 = vmatpush1.bf16.msra.mxu0 %v7937_v55  ;;  %v7957_v55 = vpack.c.bf16 %v1636_v44, %v1628_v43  ;;  %v7975_v44 = vpack.c.bf16 %v1717_v37, %v1709_v36  ;;  %v1782_v36 = vld [vmem:[#allocation2 + $0x33f0] sm:$0xff]  ;;  %v1789_v37 = vld [vmem:[#allocation2 + $0x3428] sm:$0xff] }
 0x418   :  { %8514 = vmatpush1.bf16.msra.mxu1 %v8513_v56  ;;  %7940 = vmatprep.subr.bf16.mxu0 %v7939_v57  ;;  %v8533_v56 = vpack.c.bf16 %v1638_v49, %v1630_v45  ;;  %v7959_v57 = vpack.c.bf16 %v1653_v52, %v1645_v51  ;;  %v1708_v45 = vld [vmem:[#allocation2 + $0x31a0] sm:$0xff]  ;;  %v1710_v49 = vld [vmem:[#allocation2 + $0x31b0] sm:$0xff] }
 0x419   :  { %8516 = vmatprep.subr.bf16.mxu1 %v8515_v61  ;;  %v8535_v61 = vpack.c.bf16 %v1655_v54, %v1647_v53  ;;  %v1718_v52 = vld [vmem:[#allocation2 + $0x31f0] sm:$0xff]  ;;  %v1725_v53 = vld [vmem:[#allocation2 + $0x3228] sm:$0xff] }
 0x41a   :  { %v1733_v54 = vld [vmem:[#allocation2 + $0x3268] sm:$0xff] }
 0x41b   :  { %7942 = vmatpush1.bf16.msra.mxu0 %v7941_v3  ;;  %v7961_v3 = vpack.c.bf16 %v1652_v59, %v1644_v58  ;;  %v8553_v58 = vpack.c.bf16 %v1718_v52, %v1710_v49  ;;  %v7979_v59 = vpack.c.bf16 %v1733_v54, %v1725_v53  ;;  %v1790_v49 = vld [vmem:[#allocation2 + $0x3430] sm:$0xff]  ;;  %v1805_v53 = vld [vmem:[#allocation2 + $0x34a8] sm:$0xff] }
 0x41c   :  { %8518 = vmatpush1.bf16.msra.mxu1 %v8517_v4  ;;  %7944 = vmatprep.subr.bf16.mxu0 %v7943_v5  ;;  %v8537_v4 = vpack.c.bf16 %v1654_v62, %v1646_v60  ;;  %v7963_v5 = vpack.c.bf16 %v1669_v0, %v1661_v63  ;;  %v1724_v60 = vld [vmem:[#allocation2 + $0x3220] sm:$0xff]  ;;  %v1726_v62 = vld [vmem:[#allocation2 + $0x3230] sm:$0xff]  ;;  %v1813_v54 = vld [vmem:[#allocation2 + $0x34e8] sm:$0xff] }
 0x41d   :  { %8520 = vmatprep.subr.bf16.mxu1 %v8519_v9  ;;  %v8539_v9 = vpack.c.bf16 %v1671_v2, %v1663_v1  ;;  %v1734_v0 = vld [vmem:[#allocation2 + $0x3270] sm:$0xff]  ;;  %v1741_v1 = vld [vmem:[#allocation2 + $0x32a8] sm:$0xff] }
 0x41e   :  { %v1749_v2 = vld [vmem:[#allocation2 + $0x32e8] sm:$0xff]  ;;  %v1798_v52 = vld [vmem:[#allocation2 + $0x3470] sm:$0xff] }
 0x41f   :  { %7946 = vmatpush1.bf16.msra.mxu0 %v7945_v15  ;;  %v7965_v15 = vpack.c.bf16 %v1668_v7, %v1660_v6  ;;  %v8557_v6 = vpack.c.bf16 %v1734_v0, %v1726_v62  ;;  %v7983_v7 = vpack.c.bf16 %v1749_v2, %v1741_v1  ;;  %v1806_v62 = vld [vmem:[#allocation2 + $0x34b0] sm:$0xff]  ;;  %v1821_v1 = vld [vmem:[#allocation2 + $0x3528] sm:$0xff] }
 0x420   :  { %8522 = vmatpush1.bf16.msra.mxu1 %v8521_v16  ;;  %7948 = vmatprep.subr.bf16.mxu0 %v7947_v17  ;;  %v8541_v16 = vpack.c.bf16 %v1670_v10, %v1662_v8  ;;  %v7967_v17 = vpack.c.bf16 %v1685_v12, %v1677_v11  ;;  %v1740_v8 = vld [vmem:[#allocation2 + $0x32a0] sm:$0xff]  ;;  %v1742_v10 = vld [vmem:[#allocation2 + $0x32b0] sm:$0xff]  ;;  %v1829_v2 = vld [vmem:[#allocation2 + $0x3568] sm:$0xff] }
 0x421   :  { %8524 = vmatprep.subr.bf16.mxu1 %v8523_v21  ;;  %v8543_v21 = vpack.c.bf16 %v1687_v14, %v1679_v13  ;;  %v1750_v12 = vld [vmem:[#allocation2 + $0x32f0] sm:$0xff]  ;;  %v1757_v13 = vld [vmem:[#allocation2 + $0x3328] sm:$0xff] }
 0x422   :  { %v1765_v14 = vld [vmem:[#allocation2 + $0x3368] sm:$0xff]  ;;  %v1814_v0 = vld [vmem:[#allocation2 + $0x34f0] sm:$0xff] }
 0x423   :  { %7950 = vmatpush1.bf16.msra.mxu0 %v7949_v27  ;;  %v1703_v27 = vld [vmem:[#allocation2 + $0x3178] sm:$0xff] }
 0x424   :  { %8526 = vmatpush1.bf16.msra.mxu1 %v8525_v28  ;;  %7952 = vmatprep.subr.bf16.mxu0 %v7951_v29  ;;  %v7969_v28 = vpack.c.bf16 %v1684_v19, %v1676_v18  ;;  %v8545_v29 = vpack.c.bf16 %v1686_v22, %v1678_v20  ;;  %v8547_v34 = vpack.c.bf16 %v1703_v27, %v1695_v26  ;;  %v1756_v20 = vld [vmem:[#allocation2 + $0x3320] sm:$0xff]  ;;  %v1758_v22 = vld [vmem:[#allocation2 + $0x3330] sm:$0xff]  ;;  %v1781_v26 = vld [vmem:[#allocation2 + $0x33e8] sm:$0xff] }
 0x425   :  { %8528 = vmatprep.subr.bf16.mxu1 %v8527_v33  ;;  %v1694_v33 = vld [vmem:[#allocation2 + $0x3130] sm:$0xff]  ;;  %v8561_v18 = vpack.c.bf16 %v1750_v12, %v1742_v10  ;;  %v7987_v19 = vpack.c.bf16 %v1765_v14, %v1757_v13  ;;  %v1775_v27 = vld [vmem:[#allocation2 + $0x33b8] sm:$0xff]  ;;  %v1837_v13 = vld [vmem:[#allocation2 + $0x35a8] sm:$0xff] }
 0x426   :  { %v8549_v43 = vpack.c.bf16 %v1702_v35, %v1694_v33  ;;  %v1780_v33 = vld [vmem:[#allocation2 + $0x33e0] sm:$0xff]  ;;  %v1822_v10 = vld [vmem:[#allocation2 + $0x3530] sm:$0xff]  ;;  %v1845_v14 = vld [vmem:[#allocation2 + $0x35e8] sm:$0xff] }
 0x427   :  { %7954 = vmatpush1.bf16.msra.mxu0 %v7953_v39  ;;  %v1711_v39 = vld [vmem:[#allocation2 + $0x31b8] sm:$0xff]  ;;  %v1830_v12 = vld [vmem:[#allocation2 + $0x3570] sm:$0xff] }
 0x428   :  { %8530 = vmatpush1.bf16.msra.mxu1 %v8529_v40  ;;  %7956 = vmatprep.subr.bf16.mxu0 %v7955_v42  ;;  %v1719_v40 = vld [vmem:[#allocation2 + $0x31f8] sm:$0xff]  ;;  %v7973_v42 = vpack.c.bf16 %v1700_v32, %v1692_v31  ;;  %v1772_v32 = vld [vmem:[#allocation2 + $0x33a0] sm:$0xff] }
 0x429   :  { %8532 = vmatprep.subr.bf16.mxu1 %v8531_v48  ;;  %v1716_v48 = vld [vmem:[#allocation2 + $0x31e0] sm:$0xff]  ;;  %v8551_v51 = vpack.c.bf16 %v1719_v40, %v1711_v39  ;;  %v1791_v39 = vld [vmem:[#allocation2 + $0x3438] sm:$0xff] }
 0x42a   :  { %v1799_v40 = vld [vmem:[#allocation2 + $0x3478] sm:$0xff] }
 0x42b   :  { %7958 = vmatpush1.bf16.msra.mxu0 %v7957_v55  ;;  %v1727_v55 = vld [vmem:[#allocation2 + $0x3238] sm:$0xff] }
 0x42c   :  { %8534 = vmatpush1.bf16.msra.mxu1 %v8533_v56  ;;  %7960 = vmatprep.subr.bf16.mxu0 %v7959_v57  ;;  %v1735_v56 = vld [vmem:[#allocation2 + $0x3278] sm:$0xff]  ;;  %v7977_v57 = vpack.c.bf16 %v1716_v48, %v1708_v45  ;;  %v1788_v45 = vld [vmem:[#allocation2 + $0x3420] sm:$0xff] }
 0x42d   :  { %8536 = vmatprep.subr.bf16.mxu1 %v8535_v61  ;;  %v1732_v61 = vld [vmem:[#allocation2 + $0x3260] sm:$0xff]  ;;  %v8555_v63 = vpack.c.bf16 %v1735_v56, %v1727_v55  ;;  %v1807_v55 = vld [vmem:[#allocation2 + $0x34b8] sm:$0xff] }
 0x42e   :  { %v1796_v48 = vld [vmem:[#allocation2 + $0x3460] sm:$0xff]  ;;  %v1815_v56 = vld [vmem:[#allocation2 + $0x34f8] sm:$0xff] }
 0x42f   :  { %7962 = vmatpush1.bf16.msra.mxu0 %v7961_v3  ;;  %v1743_v3 = vld [vmem:[#allocation2 + $0x32b8] sm:$0xff] }
 0x430   :  { %8538 = vmatpush1.bf16.msra.mxu1 %v8537_v4  ;;  %7964 = vmatprep.subr.bf16.mxu0 %v7963_v5  ;;  %v1751_v4 = vld [vmem:[#allocation2 + $0x32f8] sm:$0xff]  ;;  %v7981_v5 = vpack.c.bf16 %v1732_v61, %v1724_v60  ;;  %v1804_v60 = vld [vmem:[#allocation2 + $0x34a0] sm:$0xff] }
 0x431   :  { %8540 = vmatprep.subr.bf16.mxu1 %v8539_v9  ;;  %v1748_v9 = vld [vmem:[#allocation2 + $0x32e0] sm:$0xff]  ;;  %v8559_v11 = vpack.c.bf16 %v1751_v4, %v1743_v3  ;;  %v1823_v3 = vld [vmem:[#allocation2 + $0x3538] sm:$0xff] }
 0x432   :  { %4164 = vmatmul.mubr.f32.vlgmr.msra.gmra.mrb[2].mxu0 %v9418_v25  ;;  %v1812_v61 = vld [vmem:[#allocation2 + $0x34e0] sm:$0xff]  ;;  %v1831_v4 = vld [vmem:[#allocation2 + $0x3578] sm:$0xff] }
 0x433   :  { %7966 = vmatpush1.bf16.msra.mxu0 %v7965_v15  ;;  %4803 = vmatmul.mubr.f32.vlgmr.msra.gmra.mrb[2].mxu1 %v9418_v25  ;;  %v1759_v15 = vld [vmem:[#allocation2 + $0x3338] sm:$0xff]  ;;  %v1773_v25 = vld [vmem:[#allocation2 + $0x33a8] sm:$0xff] }
 0x434   :  { %8542 = vmatpush1.bf16.msra.mxu1 %v8541_v16  ;;  %7968 = vmatprep.subr.bf16.mxu0 %v7967_v17  ;;  %v1767_v16 = vld [vmem:[#allocation2 + $0x3378] sm:$0xff]  ;;  %v7985_v17 = vpack.c.bf16 %v1748_v9, %v1740_v8  ;;  %v7991_v31 = vpack.c.bf16 %v1781_v26, %v1773_v25  ;;  %v1820_v8 = vld [vmem:[#allocation2 + $0x3520] sm:$0xff]  ;;  %v1853_v25 = vld [vmem:[#allocation2 + $0x3628] sm:$0xff] }
 0x435   :  { %8544 = vmatprep.subr.bf16.mxu1 %v8543_v21  ;;  %4234 = vmatprep.mubr.f32.mxu0 %v9419_v38  ;;  %v1764_v21 = vld [vmem:[#allocation2 + $0x3360] sm:$0xff]  ;;  %v8563_v23 = vpack.c.bf16 %v1767_v16, %v1759_v15  ;;  %v1839_v15 = vld [vmem:[#allocation2 + $0x35b8] sm:$0xff]  ;;  %v1861_v26 = vld [vmem:[#allocation2 + $0x3668] sm:$0xff] }
 0x436   :  { %4873 = vmatprep.mubr.f32.mxu1 %v9419_v38  ;;  %v1797_v38 = vld [vmem:[#allocation2 + $0x3468] sm:$0xff]  ;;  %v1828_v9 = vld [vmem:[#allocation2 + $0x3560] sm:$0xff]  ;;  %v1847_v16 = vld [vmem:[#allocation2 + $0x35f8] sm:$0xff] }
 0x437   :  { %7970 = vmatpush1.bf16.msra.mxu0 %v7969_v28  ;;  %v1783_v28 = vld [vmem:[#allocation2 + $0x33f8] sm:$0xff] }
 0x438   :  { %8546 = vmatpush1.bf16.msra.mxu1 %v8545_v29  ;;  %7972 = vmatprep.subr.bf16.mxu0 %v7971_v30  ;;  %v7989_v29 = vpack.c.bf16 %v1764_v21, %v1756_v20  ;;  %v8565_v30 = vpack.c.bf16 %v1766_v24, %v1758_v22  ;;  %v8567_v35 = vpack.c.bf16 %v1783_v28, %v1775_v27  ;;  %v1836_v20 = vld [vmem:[#allocation2 + $0x35a0] sm:$0xff]  ;;  %v1838_v22 = vld [vmem:[#allocation2 + $0x35b0] sm:$0xff]  ;;  %v1855_v27 = vld [vmem:[#allocation2 + $0x3638] sm:$0xff] }
 0x439   :  { %8548 = vmatprep.subr.bf16.mxu1 %v8547_v34  ;;  %v1774_v34 = vld [vmem:[#allocation2 + $0x33b0] sm:$0xff]  ;;  %v1844_v21 = vld [vmem:[#allocation2 + $0x35e0] sm:$0xff]  ;;  %v1863_v28 = vld [vmem:[#allocation2 + $0x3678] sm:$0xff] }
 0x43a   :  { %v1846_v24 = vld [vmem:[#allocation2 + $0x35f0] sm:$0xff] }
 0x43b   :  { %7974 = vmatpush1.bf16.msra.mxu0 %v7973_v42  ;;  %v7993_v42 = vpack.c.bf16 %v1780_v33, %v1772_v32  ;;  %v1852_v32 = vld [vmem:[#allocation2 + $0x3620] sm:$0xff] }
 0x43c   :  { %8550 = vmatpush1.bf16.msra.mxu1 %v8549_v43  ;;  %7976 = vmatprep.subr.bf16.mxu0 %v7975_v44  ;;  %v8569_v43 = vpack.c.bf16 %v1782_v36, %v1774_v34  ;;  %v7995_v44 = vpack.c.bf16 %v1797_v38, %v1789_v37  ;;  %v1860_v33 = vld [vmem:[#allocation2 + $0x3660] sm:$0xff]  ;;  %v1854_v34 = vld [vmem:[#allocation2 + $0x3630] sm:$0xff]  ;;  %v1869_v37 = vld [vmem:[#allocation2 + $0x36a8] sm:$0xff] }
 0x43d   :  { %8552 = vmatprep.subr.bf16.mxu1 %v8551_v51  ;;  %v8571_v51 = vpack.c.bf16 %v1799_v40, %v1791_v39  ;;  %v1862_v36 = vld [vmem:[#allocation2 + $0x3670] sm:$0xff]  ;;  %v1877_v38 = vld [vmem:[#allocation2 + $0x36e8] sm:$0xff]  ;;  %v1871_v39 = vld [vmem:[#allocation2 + $0x36b8] sm:$0xff] }
 0x43e   :  { %v1879_v40 = vld [vmem:[#allocation2 + $0x36f8] sm:$0xff] }
 0x43f   :  { %7978 = vmatpush1.bf16.msra.mxu0 %v7977_v57  ;;  %v7997_v57 = vpack.c.bf16 %v1796_v48, %v1788_v45  ;;  %v1868_v45 = vld [vmem:[#allocation2 + $0x36a0] sm:$0xff] }
 0x440   :  { %8554 = vmatpush1.bf16.msra.mxu1 %v8553_v58  ;;  %7980 = vmatprep.subr.bf16.mxu0 %v7979_v59  ;;  %v8573_v58 = vpack.c.bf16 %v1798_v52, %v1790_v49  ;;  %v7999_v59 = vpack.c.bf16 %v1813_v54, %v1805_v53  ;;  %v1876_v48 = vld [vmem:[#allocation2 + $0x36e0] sm:$0xff]  ;;  %v1870_v49 = vld [vmem:[#allocation2 + $0x36b0] sm:$0xff]  ;;  %v1885_v53 = vld [vmem:[#allocation2 + $0x3728] sm:$0xff] }
 0x441   :  { %8556 = vmatprep.subr.bf16.mxu1 %v8555_v63  ;;  %v8575_v63 = vpack.c.bf16 %v1815_v56, %v1807_v55  ;;  %v1878_v52 = vld [vmem:[#allocation2 + $0x36f0] sm:$0xff]  ;;  %v1893_v54 = vld [vmem:[#allocation2 + $0x3768] sm:$0xff]  ;;  %v1887_v55 = vld [vmem:[#allocation2 + $0x3738] sm:$0xff] }
 0x442   :  { %v1895_v56 = vld [vmem:[#allocation2 + $0x3778] sm:$0xff] }
 0x443   :  { %7982 = vmatpush1.bf16.msra.mxu0 %v7981_v5  ;;  %v8001_v5 = vpack.c.bf16 %v1812_v61, %v1804_v60  ;;  %v1884_v60 = vld [vmem:[#allocation2 + $0x3720] sm:$0xff] }
 0x444   :  { %8558 = vmatpush1.bf16.msra.mxu1 %v8557_v6  ;;  %7984 = vmatprep.subr.bf16.mxu0 %v7983_v7  ;;  %v8577_v6 = vpack.c.bf16 %v1814_v0, %v1806_v62  ;;  %v8003_v7 = vpack.c.bf16 %v1829_v2, %v1821_v1  ;;  %v1892_v61 = vld [vmem:[#allocation2 + $0x3760] sm:$0xff]  ;;  %v1886_v62 = vld [vmem:[#allocation2 + $0x3730] sm:$0xff]  ;;  %v1901_v1 = vld [vmem:[#allocation2 + $0x37a8] sm:$0xff] }
 0x445   :  { %8560 = vmatprep.subr.bf16.mxu1 %v8559_v11  ;;  %v8579_v11 = vpack.c.bf16 %v1831_v4, %v1823_v3  ;;  %v1894_v0 = vld [vmem:[#allocation2 + $0x3770] sm:$0xff]  ;;  %v1909_v2 = vld [vmem:[#allocation2 + $0x37e8] sm:$0xff]  ;;  %v1903_v3 = vld [vmem:[#allocation2 + $0x37b8] sm:$0xff] }
 0x446   :  { %v1911_v4 = vld [vmem:[#allocation2 + $0x37f8] sm:$0xff] }
 0x447   :  { %7986 = vmatpush1.bf16.msra.mxu0 %v7985_v17  ;;  %v8005_v17 = vpack.c.bf16 %v1828_v9, %v1820_v8  ;;  %v1900_v8 = vld [vmem:[#allocation2 + $0x37a0] sm:$0xff] }
 0x448   :  { %8562 = vmatpush1.bf16.msra.mxu1 %v8561_v18  ;;  %7988 = vmatprep.subr.bf16.mxu0 %v7987_v19  ;;  %v8581_v18 = vpack.c.bf16 %v1830_v12, %v1822_v10  ;;  %v8007_v19 = vpack.c.bf16 %v1845_v14, %v1837_v13  ;;  %v1908_v9 = vld [vmem:[#allocation2 + $0x37e0] sm:$0xff]  ;;  %v1902_v10 = vld [vmem:[#allocation2 + $0x37b0] sm:$0xff]  ;;  %v1917_v13 = vld [vmem:[#allocation2 + $0x3828] sm:$0xff] }
 0x449   :  { %8564 = vmatprep.subr.bf16.mxu1 %v8563_v23  ;;  %v8583_v23 = vpack.c.bf16 %v1847_v16, %v1839_v15  ;;  %v1910_v12 = vld [vmem:[#allocation2 + $0x37f0] sm:$0xff]  ;;  %v1925_v14 = vld [vmem:[#allocation2 + $0x3868] sm:$0xff]  ;;  %v1919_v15 = vld [vmem:[#allocation2 + $0x3838] sm:$0xff] }
 0x44a   :  { %v1927_v16 = vld [vmem:[#allocation2 + $0x3878] sm:$0xff] }
 0x44b   :  { %7990 = vmatpush1.bf16.msra.mxu0 %v7989_v29  ;;  %v8009_v29 = vpack.c.bf16 %v1844_v21, %v1836_v20  ;;  %v1916_v20 = vld [vmem:[#allocation2 + $0x3820] sm:$0xff] }
 0x44c   :  { %8566 = vmatpush1.bf16.msra.mxu1 %v8565_v30  ;;  %7992 = vmatprep.subr.bf16.mxu0 %v7991_v31  ;;  %v8585_v30 = vpack.c.bf16 %v1846_v24, %v1838_v22  ;;  %v8011_v31 = vpack.c.bf16 %v1861_v26, %v1853_v25  ;;  %v1924_v21 = vld [vmem:[#allocation2 + $0x3860] sm:$0xff]  ;;  %v1918_v22 = vld [vmem:[#allocation2 + $0x3830] sm:$0xff]  ;;  %v1933_v25 = vld [vmem:[#allocation2 + $0x38a8] sm:$0xff] }
 0x44d   :  { %8568 = vmatprep.subr.bf16.mxu1 %v8567_v35  ;;  %v8587_v35 = vpack.c.bf16 %v1863_v28, %v1855_v27  ;;  %v1926_v24 = vld [vmem:[#allocation2 + $0x3870] sm:$0xff]  ;;  %v1941_v26 = vld [vmem:[#allocation2 + $0x38e8] sm:$0xff]  ;;  %v1935_v27 = vld [vmem:[#allocation2 + $0x38b8] sm:$0xff] }
 0x44e   :  { %v1943_v28 = vld [vmem:[#allocation2 + $0x38f8] sm:$0xff] }
 0x44f   :  { %7994 = vmatpush1.bf16.msra.mxu0 %v7993_v42  ;;  %v8013_v42 = vpack.c.bf16 %v1860_v33, %v1852_v32  ;;  %v1932_v32 = vld [vmem:[#allocation2 + $0x38a0] sm:$0xff] }
 0x450   :  { %8570 = vmatpush1.bf16.msra.mxu1 %v8569_v43  ;;  %7996 = vmatprep.subr.bf16.mxu0 %v7995_v44  ;;  %v8589_v43 = vpack.c.bf16 %v1862_v36, %v1854_v34  ;;  %v8015_v44 = vpack.c.bf16 %v1877_v38, %v1869_v37  ;;  %v1940_v33 = vld [vmem:[#allocation2 + $0x38e0] sm:$0xff]  ;;  %v1934_v34 = vld [vmem:[#allocation2 + $0x38b0] sm:$0xff]  ;;  %v1949_v37 = vld [vmem:[#allocation2 + $0x3928] sm:$0xff] }
 0x451   :  { %8572 = vmatprep.subr.bf16.mxu1 %v8571_v51  ;;  %v8591_v51 = vpack.c.bf16 %v1879_v40, %v1871_v39  ;;  %v1942_v36 = vld [vmem:[#allocation2 + $0x38f0] sm:$0xff]  ;;  %v1957_v38 = vld [vmem:[#allocation2 + $0x3968] sm:$0xff]  ;;  %v9420_v39 = vld [vmem:[%s9854_s0 + $0x60] sm:$0xff] }
 0x452   :  { %v1951_v40 = vld [vmem:[#allocation2 + $0x3938] sm:$0xff] }
 0x453   :  { %7998 = vmatpush1.bf16.msra.mxu0 %v7997_v57  ;;  %v8017_v57 = vpack.c.bf16 %v1876_v48, %v1868_v45  ;;  %v8035_v45 = vpack.c.bf16 %v1957_v38, %v1949_v37  ;;  %v1948_v48 = vld [vmem:[#allocation2 + $0x3920] sm:$0xff]  ;;  %v2022_v38 = vld [vmem:[#allocation2 + $0x3b70] sm:$0xff] }
 0x454   :  { %8574 = vmatpush1.bf16.msra.mxu1 %v8573_v58  ;;  %8000 = vmatprep.subr.bf16.mxu0 %v7999_v59  ;;  %v8593_v58 = vpack.c.bf16 %v1878_v52, %v1870_v49  ;;  %v8019_v59 = vpack.c.bf16 %v1893_v54, %v1885_v53  ;;  %v1956_v49 = vld [vmem:[#allocation2 + $0x3960] sm:$0xff]  ;;  %v1958_v53 = vld [vmem:[#allocation2 + $0x3970] sm:$0xff]  ;;  %v1965_v54 = vld [vmem:[#allocation2 + $0x39a8] sm:$0xff] }
 0x455   :  { %8576 = vmatprep.subr.bf16.mxu1 %v8575_v63  ;;  %v8595_v63 = vpack.c.bf16 %v1895_v56, %v1887_v55  ;;  %v1973_v55 = vld [vmem:[#allocation2 + $0x39e8] sm:$0xff]  ;;  %v9421_v56 = vld [vmem:[%s9854_s0 + $0x78] sm:$0xff] }
 0x457   :  { %8002 = vmatpush1.bf16.msra.mxu0 %v8001_v5  ;;  %v8021_v5 = vpack.c.bf16 %v1892_v61, %v1884_v60  ;;  %v8039_v61 = vpack.c.bf16 %v1973_v55, %v1965_v54  ;;  %v2038_v54 = vld [vmem:[#allocation2 + $0x3bf0] sm:$0xff]  ;;  %v2045_v55 = vld [vmem:[#allocation2 + $0x3c28] sm:$0xff] }
 0x458   :  { %8578 = vmatpush1.bf16.msra.mxu1 %v8577_v6  ;;  %8004 = vmatprep.subr.bf16.mxu0 %v8003_v7  ;;  %v8597_v6 = vpack.c.bf16 %v1894_v0, %v1886_v62  ;;  %v8023_v7 = vpack.c.bf16 %v1909_v2, %v1901_v1  ;;  %v1964_v62 = vld [vmem:[#allocation2 + $0x39a0] sm:$0xff]  ;;  %v1966_v0 = vld [vmem:[#allocation2 + $0x39b0] sm:$0xff] }
 0x459   :  { %8580 = vmatprep.subr.bf16.mxu1 %v8579_v11  ;;  %v8599_v11 = vpack.c.bf16 %v1911_v4, %v1903_v3  ;;  %v1974_v2 = vld [vmem:[#allocation2 + $0x39f0] sm:$0xff]  ;;  %v1981_v3 = vld [vmem:[#allocation2 + $0x3a28] sm:$0xff] }
 0x45a   :  { %v1989_v4 = vld [vmem:[#allocation2 + $0x3a68] sm:$0xff] }
 0x45b   :  { %8006 = vmatpush1.bf16.msra.mxu0 %v8005_v17  ;;  %v8025_v17 = vpack.c.bf16 %v1908_v9, %v1900_v8  ;;  %v8617_v8 = vpack.c.bf16 %v1974_v2, %v1966_v0  ;;  %v8043_v9 = vpack.c.bf16 %v1989_v4, %v1981_v3  ;;  %v2046_v0 = vld [vmem:[#allocation2 + $0x3c30] sm:$0xff]  ;;  %v2061_v3 = vld [vmem:[#allocation2 + $0x3ca8] sm:$0xff] }
 0x45c   :  { %8582 = vmatpush1.bf16.msra.mxu1 %v8581_v18  ;;  %8008 = vmatprep.subr.bf16.mxu0 %v8007_v19  ;;  %v8601_v18 = vpack.c.bf16 %v1910_v12, %v1902_v10  ;;  %v8027_v19 = vpack.c.bf16 %v1925_v14, %v1917_v13  ;;  %v1980_v10 = vld [vmem:[#allocation2 + $0x3a20] sm:$0xff]  ;;  %v1982_v12 = vld [vmem:[#allocation2 + $0x3a30] sm:$0xff]  ;;  %v2069_v4 = vld [vmem:[#allocation2 + $0x3ce8] sm:$0xff] }
 0x45d   :  { %8584 = vmatprep.subr.bf16.mxu1 %v8583_v23  ;;  %v8603_v23 = vpack.c.bf16 %v1927_v16, %v1919_v15  ;;  %v1990_v14 = vld [vmem:[#allocation2 + $0x3a70] sm:$0xff]  ;;  %v1997_v15 = vld [vmem:[#allocation2 + $0x3aa8] sm:$0xff] }
 0x45e   :  { %v2005_v16 = vld [vmem:[#allocation2 + $0x3ae8] sm:$0xff]  ;;  %v2054_v2 = vld [vmem:[#allocation2 + $0x3c70] sm:$0xff] }
 0x45f   :  { %8010 = vmatpush1.bf16.msra.mxu0 %v8009_v29  ;;  %v8029_v29 = vpack.c.bf16 %v1924_v21, %v1916_v20  ;;  %v8621_v20 = vpack.c.bf16 %v1990_v14, %v1982_v12  ;;  %v8047_v21 = vpack.c.bf16 %v2005_v16, %v1997_v15  ;;  %v2062_v12 = vld [vmem:[#allocation2 + $0x3cb0] sm:$0xff]  ;;  %v2077_v15 = vld [vmem:[#allocation2 + $0x3d28] sm:$0xff] }
 0x460   :  { %8586 = vmatpush1.bf16.msra.mxu1 %v8585_v30  ;;  %8012 = vmatprep.subr.bf16.mxu0 %v8011_v31  ;;  %v8605_v30 = vpack.c.bf16 %v1926_v24, %v1918_v22  ;;  %v8031_v31 = vpack.c.bf16 %v1941_v26, %v1933_v25  ;;  %v1996_v22 = vld [vmem:[#allocation2 + $0x3aa0] sm:$0xff]  ;;  %v1998_v24 = vld [vmem:[#allocation2 + $0x3ab0] sm:$0xff]  ;;  %v2085_v16 = vld [vmem:[#allocation2 + $0x3d68] sm:$0xff] }
 0x461   :  { %8588 = vmatprep.subr.bf16.mxu1 %v8587_v35  ;;  %v8607_v35 = vpack.c.bf16 %v1943_v28, %v1935_v27  ;;  %v2006_v26 = vld [vmem:[#allocation2 + $0x3af0] sm:$0xff]  ;;  %v2013_v27 = vld [vmem:[#allocation2 + $0x3b28] sm:$0xff] }
 0x462   :  { %v2021_v28 = vld [vmem:[#allocation2 + $0x3b68] sm:$0xff]  ;;  %v2070_v14 = vld [vmem:[#allocation2 + $0x3cf0] sm:$0xff] }
 0x463   :  { %8014 = vmatpush1.bf16.msra.mxu0 %v8013_v42  ;;  %v1959_v42 = vld [vmem:[#allocation2 + $0x3978] sm:$0xff] }
 0x464   :  { %8590 = vmatpush1.bf16.msra.mxu1 %v8589_v43  ;;  %8016 = vmatprep.subr.bf16.mxu0 %v8015_v44  ;;  %v8033_v43 = vpack.c.bf16 %v1940_v33, %v1932_v32  ;;  %v8609_v44 = vpack.c.bf16 %v1942_v36, %v1934_v34  ;;  %v8611_v52 = vpack.c.bf16 %v1959_v42, %v1951_v40  ;;  %v2012_v34 = vld [vmem:[#allocation2 + $0x3b20] sm:$0xff]  ;;  %v2014_v36 = vld [vmem:[#allocation2 + $0x3b30] sm:$0xff]  ;;  %v2037_v40 = vld [vmem:[#allocation2 + $0x3be8] sm:$0xff] }
 0x465   :  { %8592 = vmatprep.subr.bf16.mxu1 %v8591_v51  ;;  %v1950_v51 = vld [vmem:[#allocation2 + $0x3930] sm:$0xff]  ;;  %v8625_v32 = vpack.c.bf16 %v2006_v26, %v1998_v24  ;;  %v8051_v33 = vpack.c.bf16 %v2021_v28, %v2013_v27  ;;  %v2031_v42 = vld [vmem:[#allocation2 + $0x3bb8] sm:$0xff]  ;;  %v2093_v27 = vld [vmem:[#allocation2 + $0x3da8] sm:$0xff] }
 0x466   :  { %v8613_v60 = vpack.c.bf16 %v1958_v53, %v1950_v51  ;;  %v2036_v51 = vld [vmem:[#allocation2 + $0x3be0] sm:$0xff]  ;;  %v2078_v24 = vld [vmem:[#allocation2 + $0x3d30] sm:$0xff]  ;;  %v2101_v28 = vld [vmem:[#allocation2 + $0x3de8] sm:$0xff] }
 0x467   :  { %8018 = vmatpush1.bf16.msra.mxu0 %v8017_v57  ;;  %v1967_v57 = vld [vmem:[#allocation2 + $0x39b8] sm:$0xff]  ;;  %v2086_v26 = vld [vmem:[#allocation2 + $0x3d70] sm:$0xff] }
 0x468   :  { %8594 = vmatpush1.bf16.msra.mxu1 %v8593_v58  ;;  %8020 = vmatprep.subr.bf16.mxu0 %v8019_v59  ;;  %v1975_v58 = vld [vmem:[#allocation2 + $0x39f8] sm:$0xff]  ;;  %v8037_v59 = vpack.c.bf16 %v1956_v49, %v1948_v48  ;;  %v2028_v49 = vld [vmem:[#allocation2 + $0x3ba0] sm:$0xff] }
 0x469   :  { %8596 = vmatprep.subr.bf16.mxu1 %v8595_v63  ;;  %v1972_v63 = vld [vmem:[#allocation2 + $0x39e0] sm:$0xff]  ;;  %v8615_v1 = vpack.c.bf16 %v1975_v58, %v1967_v57  ;;  %v2047_v57 = vld [vmem:[#allocation2 + $0x3c38] sm:$0xff] }
 0x46a   :  { %v2055_v58 = vld [vmem:[#allocation2 + $0x3c78] sm:$0xff] }
 0x46b   :  { %8022 = vmatpush1.bf16.msra.mxu0 %v8021_v5  ;;  %v1983_v5 = vld [vmem:[#allocation2 + $0x3a38] sm:$0xff] }
 0x46c   :  { %8598 = vmatpush1.bf16.msra.mxu1 %v8597_v6  ;;  %8024 = vmatprep.subr.bf16.mxu0 %v8023_v7  ;;  %v1991_v6 = vld [vmem:[#allocation2 + $0x3a78] sm:$0xff]  ;;  %v8041_v7 = vpack.c.bf16 %v1972_v63, %v1964_v62  ;;  %v2044_v62 = vld [vmem:[#allocation2 + $0x3c20] sm:$0xff] }
 0x46d   :  { %8600 = vmatprep.subr.bf16.mxu1 %v8599_v11  ;;  %v1988_v11 = vld [vmem:[#allocation2 + $0x3a60] sm:$0xff]  ;;  %v8619_v13 = vpack.c.bf16 %v1991_v6, %v1983_v5  ;;  %v2063_v5 = vld [vmem:[#allocation2 + $0x3cb8] sm:$0xff] }
 0x46e   :  { %v2052_v63 = vld [vmem:[#allocation2 + $0x3c60] sm:$0xff]  ;;  %v2071_v6 = vld [vmem:[#allocation2 + $0x3cf8] sm:$0xff] }
 0x46f   :  { %8026 = vmatpush1.bf16.msra.mxu0 %v8025_v17  ;;  %v1999_v17 = vld [vmem:[#allocation2 + $0x3ab8] sm:$0xff] }
 0x470   :  { %8602 = vmatpush1.bf16.msra.mxu1 %v8601_v18  ;;  %8028 = vmatprep.subr.bf16.mxu0 %v8027_v19  ;;  %v2007_v18 = vld [vmem:[#allocation2 + $0x3af8] sm:$0xff]  ;;  %v8045_v19 = vpack.c.bf16 %v1988_v11, %v1980_v10  ;;  %v2060_v10 = vld [vmem:[#allocation2 + $0x3ca0] sm:$0xff] }
 0x471   :  { %8604 = vmatprep.subr.bf16.mxu1 %v8603_v23  ;;  %v2004_v23 = vld [vmem:[#allocation2 + $0x3ae0] sm:$0xff]  ;;  %v8623_v25 = vpack.c.bf16 %v2007_v18, %v1999_v17  ;;  %v2079_v17 = vld [vmem:[#allocation2 + $0x3d38] sm:$0xff] }
 0x472   :  { %4235 = vmatmul.mubr.f32.vlgmr.msra.gmra.mrb[2].mxu0 %v9420_v39  ;;  %v2068_v11 = vld [vmem:[#allocation2 + $0x3ce0] sm:$0xff]  ;;  %v2087_v18 = vld [vmem:[#allocation2 + $0x3d78] sm:$0xff] }
 0x473   :  { %8030 = vmatpush1.bf16.msra.mxu0 %v8029_v29  ;;  %4874 = vmatmul.mubr.f32.vlgmr.msra.gmra.mrb[2].mxu1 %v9420_v39  ;;  %v2015_v29 = vld [vmem:[#allocation2 + $0x3b38] sm:$0xff]  ;;  %v2029_v39 = vld [vmem:[#allocation2 + $0x3ba8] sm:$0xff] }
 0x474   :  { %8606 = vmatpush1.bf16.msra.mxu1 %v8605_v30  ;;  %8032 = vmatprep.subr.bf16.mxu0 %v8031_v31  ;;  %v2023_v30 = vld [vmem:[#allocation2 + $0x3b78] sm:$0xff]  ;;  %v8049_v31 = vpack.c.bf16 %v2004_v23, %v1996_v22  ;;  %v8055_v48 = vpack.c.bf16 %v2037_v40, %v2029_v39  ;;  %v2076_v22 = vld [vmem:[#allocation2 + $0x3d20] sm:$0xff]  ;;  %v2109_v39 = vld [vmem:[#allocation2 + $0x3e28] sm:$0xff] }
 0x475   :  { %8608 = vmatprep.subr.bf16.mxu1 %v8607_v35  ;;  %4305 = vmatprep.mubr.f32.mxu0 %v9421_v56  ;;  %v2020_v35 = vld [vmem:[#allocation2 + $0x3b60] sm:$0xff]  ;;  %v8627_v37 = vpack.c.bf16 %v2023_v30, %v2015_v29  ;;  %v2095_v29 = vld [vmem:[#allocation2 + $0x3db8] sm:$0xff]  ;;  %v2117_v40 = vld [vmem:[#allocation2 + $0x3e68] sm:$0xff] }
 0x476   :  { %4944 = vmatprep.mubr.f32.mxu1 %v9421_v56  ;;  %v2053_v56 = vld [vmem:[#allocation2 + $0x3c68] sm:$0xff]  ;;  %v2084_v23 = vld [vmem:[#allocation2 + $0x3d60] sm:$0xff]  ;;  %v2103_v30 = vld [vmem:[#allocation2 + $0x3df8] sm:$0xff] }
 0x477   :  { %8034 = vmatpush1.bf16.msra.mxu0 %v8033_v43  ;;  %v2039_v43 = vld [vmem:[#allocation2 + $0x3bf8] sm:$0xff] }
 0x478   :  { %8610 = vmatpush1.bf16.msra.mxu1 %v8609_v44  ;;  %8036 = vmatprep.subr.bf16.mxu0 %v8035_v45  ;;  %v8053_v44 = vpack.c.bf16 %v2020_v35, %v2012_v34  ;;  %v8629_v45 = vpack.c.bf16 %v2022_v38, %v2014_v36  ;;  %v8631_v53 = vpack.c.bf16 %v2039_v43, %v2031_v42  ;;  %v2092_v34 = vld [vmem:[#allocation2 + $0x3da0] sm:$0xff]  ;;  %v2094_v36 = vld [vmem:[#allocation2 + $0x3db0] sm:$0xff]  ;;  %v2111_v42 = vld [vmem:[#allocation2 + $0x3e38] sm:$0xff] }
 0x479   :  { %8612 = vmatprep.subr.bf16.mxu1 %v8611_v52  ;;  %v2030_v52 = vld [vmem:[#allocation2 + $0x3bb0] sm:$0xff]  ;;  %v2100_v35 = vld [vmem:[#allocation2 + $0x3de0] sm:$0xff]  ;;  %v2119_v43 = vld [vmem:[#allocation2 + $0x3e78] sm:$0xff] }
 0x47a   :  { %v2102_v38 = vld [vmem:[#allocation2 + $0x3df0] sm:$0xff] }
 0x47b   :  { %8038 = vmatpush1.bf16.msra.mxu0 %v8037_v59  ;;  %v8057_v59 = vpack.c.bf16 %v2036_v51, %v2028_v49  ;;  %v2108_v49 = vld [vmem:[#allocation2 + $0x3e20] sm:$0xff] }
 0x47c   :  { %8614 = vmatpush1.bf16.msra.mxu1 %v8613_v60  ;;  %8040 = vmatprep.subr.bf16.mxu0 %v8039_v61  ;;  %v8633_v60 = vpack.c.bf16 %v2038_v54, %v2030_v52  ;;  %v8059_v61 = vpack.c.bf16 %v2053_v56, %v2045_v55  ;;  %v2116_v51 = vld [vmem:[#allocation2 + $0x3e60] sm:$0xff]  ;;  %v2110_v52 = vld [vmem:[#allocation2 + $0x3e30] sm:$0xff]  ;;  %v2125_v55 = vld [vmem:[#allocation2 + $0x3ea8] sm:$0xff] }
 0x47d   :  { %8616 = vmatprep.subr.bf16.mxu1 %v8615_v1  ;;  %v8635_v1 = vpack.c.bf16 %v2055_v58, %v2047_v57  ;;  %v2118_v54 = vld [vmem:[#allocation2 + $0x3e70] sm:$0xff]  ;;  %v2133_v56 = vld [vmem:[#allocation2 + $0x3ee8] sm:$0xff]  ;;  %v2127_v57 = vld [vmem:[#allocation2 + $0x3eb8] sm:$0xff] }
 0x47e   :  { %v2135_v58 = vld [vmem:[#allocation2 + $0x3ef8] sm:$0xff] }
 0x47f   :  { %8042 = vmatpush1.bf16.msra.mxu0 %v8041_v7  ;;  %v8061_v7 = vpack.c.bf16 %v2052_v63, %v2044_v62  ;;  %v2124_v62 = vld [vmem:[#allocation2 + $0x3ea0] sm:$0xff] }
 0x480   :  { %8618 = vmatpush1.bf16.msra.mxu1 %v8617_v8  ;;  %8044 = vmatprep.subr.bf16.mxu0 %v8043_v9  ;;  %v8637_v8 = vpack.c.bf16 %v2054_v2, %v2046_v0  ;;  %v8063_v9 = vpack.c.bf16 %v2069_v4, %v2061_v3  ;;  %v2132_v63 = vld [vmem:[#allocation2 + $0x3ee0] sm:$0xff]  ;;  %v2126_v0 = vld [vmem:[#allocation2 + $0x3eb0] sm:$0xff]  ;;  %v2141_v3 = vld [vmem:[#allocation2 + $0x3f28] sm:$0xff] }
 0x481   :  { %8620 = vmatprep.subr.bf16.mxu1 %v8619_v13  ;;  %v8639_v13 = vpack.c.bf16 %v2071_v6, %v2063_v5  ;;  %v2134_v2 = vld [vmem:[#allocation2 + $0x3ef0] sm:$0xff]  ;;  %v2149_v4 = vld [vmem:[#allocation2 + $0x3f68] sm:$0xff]  ;;  %v2143_v5 = vld [vmem:[#allocation2 + $0x3f38] sm:$0xff] }
 0x482   :  { %v2151_v6 = vld [vmem:[#allocation2 + $0x3f78] sm:$0xff] }
 0x483   :  { %8046 = vmatpush1.bf16.msra.mxu0 %v8045_v19  ;;  %v8065_v19 = vpack.c.bf16 %v2068_v11, %v2060_v10  ;;  %v2140_v10 = vld [vmem:[#allocation2 + $0x3f20] sm:$0xff] }
 0x484   :  { %8622 = vmatpush1.bf16.msra.mxu1 %v8621_v20  ;;  %8048 = vmatprep.subr.bf16.mxu0 %v8047_v21  ;;  %v8641_v20 = vpack.c.bf16 %v2070_v14, %v2062_v12  ;;  %v8067_v21 = vpack.c.bf16 %v2085_v16, %v2077_v15  ;;  %v2148_v11 = vld [vmem:[#allocation2 + $0x3f60] sm:$0xff]  ;;  %v2142_v12 = vld [vmem:[#allocation2 + $0x3f30] sm:$0xff]  ;;  %v2157_v15 = vld [vmem:[#allocation2 + $0x3fa8] sm:$0xff] }
 0x485   :  { %8624 = vmatprep.subr.bf16.mxu1 %v8623_v25  ;;  %v8643_v25 = vpack.c.bf16 %v2087_v18, %v2079_v17  ;;  %v2150_v14 = vld [vmem:[#allocation2 + $0x3f70] sm:$0xff]  ;;  %v2165_v16 = vld [vmem:[#allocation2 + $0x3fe8] sm:$0xff]  ;;  %v2159_v17 = vld [vmem:[#allocation2 + $0x3fb8] sm:$0xff] }
 0x486   :  { %v2167_v18 = vld [vmem:[#allocation2 + $0x3ff8] sm:$0xff] }
 0x487   :  { %8050 = vmatpush1.bf16.msra.mxu0 %v8049_v31  ;;  %v8069_v31 = vpack.c.bf16 %v2084_v23, %v2076_v22  ;;  %v2156_v22 = vld [vmem:[#allocation2 + $0x3fa0] sm:$0xff] }
 0x488   :  { %8626 = vmatpush1.bf16.msra.mxu1 %v8625_v32  ;;  %8052 = vmatprep.subr.bf16.mxu0 %v8051_v33  ;;  %v8645_v32 = vpack.c.bf16 %v2086_v26, %v2078_v24  ;;  %v8071_v33 = vpack.c.bf16 %v2101_v28, %v2093_v27  ;;  %v2164_v23 = vld [vmem:[#allocation2 + $0x3fe0] sm:$0xff]  ;;  %v2158_v24 = vld [vmem:[#allocation2 + $0x3fb0] sm:$0xff]  ;;  %v2173_v27 = vld [vmem:[#allocation2 + $0x4028] sm:$0xff] }
 0x489   :  { %8628 = vmatprep.subr.bf16.mxu1 %v8627_v37  ;;  %v8647_v37 = vpack.c.bf16 %v2103_v30, %v2095_v29  ;;  %v2166_v26 = vld [vmem:[#allocation2 + $0x3ff0] sm:$0xff]  ;;  %v2181_v28 = vld [vmem:[#allocation2 + $0x4068] sm:$0xff]  ;;  %v2175_v29 = vld [vmem:[#allocation2 + $0x4038] sm:$0xff] }
 0x48a   :  { %v2183_v30 = vld [vmem:[#allocation2 + $0x4078] sm:$0xff] }
 0x48b   :  { %8054 = vmatpush1.bf16.msra.mxu0 %v8053_v44  ;;  %v8073_v44 = vpack.c.bf16 %v2100_v35, %v2092_v34  ;;  %v2172_v34 = vld [vmem:[#allocation2 + $0x4020] sm:$0xff] }
 0x48c   :  { %8630 = vmatpush1.bf16.msra.mxu1 %v8629_v45  ;;  %8056 = vmatprep.subr.bf16.mxu0 %v8055_v48  ;;  %v8649_v45 = vpack.c.bf16 %v2102_v38, %v2094_v36  ;;  %v8075_v48 = vpack.c.bf16 %v2117_v40, %v2109_v39  ;;  %v2180_v35 = vld [vmem:[#allocation2 + $0x4060] sm:$0xff]  ;;  %v2174_v36 = vld [vmem:[#allocation2 + $0x4030] sm:$0xff]  ;;  %v2189_v39 = vld [vmem:[#allocation2 + $0x40a8] sm:$0xff] }
 0x48d   :  { %8632 = vmatprep.subr.bf16.mxu1 %v8631_v53  ;;  %v8651_v53 = vpack.c.bf16 %v2119_v43, %v2111_v42  ;;  %v2182_v38 = vld [vmem:[#allocation2 + $0x4070] sm:$0xff]  ;;  %v2197_v40 = vld [vmem:[#allocation2 + $0x40e8] sm:$0xff]  ;;  %v2191_v42 = vld [vmem:[#allocation2 + $0x40b8] sm:$0xff] }
 0x48e   :  { %v2199_v43 = vld [vmem:[#allocation2 + $0x40f8] sm:$0xff] }
 0x48f   :  { %8058 = vmatpush1.bf16.msra.mxu0 %v8057_v59  ;;  %v8077_v59 = vpack.c.bf16 %v2116_v51, %v2108_v49  ;;  %v2188_v49 = vld [vmem:[#allocation2 + $0x40a0] sm:$0xff] }
 0x490   :  { %8634 = vmatpush1.bf16.msra.mxu1 %v8633_v60  ;;  %8060 = vmatprep.subr.bf16.mxu0 %v8059_v61  ;;  %v8653_v60 = vpack.c.bf16 %v2118_v54, %v2110_v52  ;;  %v8079_v61 = vpack.c.bf16 %v2133_v56, %v2125_v55  ;;  %v2196_v51 = vld [vmem:[#allocation2 + $0x40e0] sm:$0xff]  ;;  %v2190_v52 = vld [vmem:[#allocation2 + $0x40b0] sm:$0xff]  ;;  %v2205_v55 = vld [vmem:[#allocation2 + $0x4128] sm:$0xff] }
 0x491   :  { %8636 = vmatprep.subr.bf16.mxu1 %v8635_v1  ;;  %v8655_v1 = vpack.c.bf16 %v2135_v58, %v2127_v57  ;;  %v2198_v54 = vld [vmem:[#allocation2 + $0x40f0] sm:$0xff]  ;;  %v2213_v56 = vld [vmem:[#allocation2 + $0x4168] sm:$0xff]  ;;  %v2207_v58 = vld [vmem:[#allocation2 + $0x4138] sm:$0xff] }
 0x492   :  { %v9422_v57 = vld [vmem:[%s9854_s0 + $0x70] sm:$0xff] }
 0x493   :  { %8062 = vmatpush1.bf16.msra.mxu0 %v8061_v7  ;;  %v8081_v7 = vpack.c.bf16 %v2132_v63, %v2124_v62  ;;  %v8099_v62 = vpack.c.bf16 %v2213_v56, %v2205_v55  ;;  %v2204_v63 = vld [vmem:[#allocation2 + $0x4120] sm:$0xff]  ;;  %v2278_v56 = vld [vmem:[#allocation2 + $0x4370] sm:$0xff] }
 0x494   :  { %8638 = vmatpush1.bf16.msra.mxu1 %v8637_v8  ;;  %8064 = vmatprep.subr.bf16.mxu0 %v8063_v9  ;;  %v8657_v8 = vpack.c.bf16 %v2134_v2, %v2126_v0  ;;  %v8083_v9 = vpack.c.bf16 %v2149_v4, %v2141_v3  ;;  %v2212_v0 = vld [vmem:[#allocation2 + $0x4160] sm:$0xff]  ;;  %v2214_v3 = vld [vmem:[#allocation2 + $0x4170] sm:$0xff]  ;;  %v2221_v4 = vld [vmem:[#allocation2 + $0x41a8] sm:$0xff] }
 0x495   :  { %8640 = vmatprep.subr.bf16.mxu1 %v8639_v13  ;;  %v8659_v13 = vpack.c.bf16 %v2151_v6, %v2143_v5  ;;  %v2229_v5 = vld [vmem:[#allocation2 + $0x41e8] sm:$0xff] }
 0x496   :  { %v9423_v6 = vld [vmem:[%s9854_s0 + $0x88] sm:$0xff] }
 0x497   :  { %8066 = vmatpush1.bf16.msra.mxu0 %v8065_v19  ;;  %v8085_v19 = vpack.c.bf16 %v2148_v11, %v2140_v10  ;;  %v8103_v11 = vpack.c.bf16 %v2229_v5, %v2221_v4  ;;  %v2294_v4 = vld [vmem:[#allocation2 + $0x43f0] sm:$0xff]  ;;  %v2301_v5 = vld [vmem:[#allocation2 + $0x4428] sm:$0xff] }
 0x498   :  { %8642 = vmatpush1.bf16.msra.mxu1 %v8641_v20  ;;  %8068 = vmatprep.subr.bf16.mxu0 %v8067_v21  ;;  %v8661_v20 = vpack.c.bf16 %v2150_v14, %v2142_v12  ;;  %v8087_v21 = vpack.c.bf16 %v2165_v16, %v2157_v15  ;;  %v2220_v12 = vld [vmem:[#allocation2 + $0x41a0] sm:$0xff]  ;;  %v2222_v14 = vld [vmem:[#allocation2 + $0x41b0] sm:$0xff] }
 0x499   :  { %8644 = vmatprep.subr.bf16.mxu1 %v8643_v25  ;;  %v8663_v25 = vpack.c.bf16 %v2167_v18, %v2159_v17  ;;  %v2230_v16 = vld [vmem:[#allocation2 + $0x41f0] sm:$0xff]  ;;  %v2237_v17 = vld [vmem:[#allocation2 + $0x4228] sm:$0xff] }
 0x49a   :  { %v2245_v18 = vld [vmem:[#allocation2 + $0x4268] sm:$0xff] }
 0x49b   :  { %8070 = vmatpush1.bf16.msra.mxu0 %v8069_v31  ;;  %v8089_v31 = vpack.c.bf16 %v2164_v23, %v2156_v22  ;;  %v8681_v22 = vpack.c.bf16 %v2230_v16, %v2222_v14  ;;  %v8107_v23 = vpack.c.bf16 %v2245_v18, %v2237_v17  ;;  %v2302_v14 = vld [vmem:[#allocation2 + $0x4430] sm:$0xff]  ;;  %v2317_v17 = vld [vmem:[#allocation2 + $0x44a8] sm:$0xff] }
 0x49c   :  { %8646 = vmatpush1.bf16.msra.mxu1 %v8645_v32  ;;  %8072 = vmatprep.subr.bf16.mxu0 %v8071_v33  ;;  %v8665_v32 = vpack.c.bf16 %v2166_v26, %v2158_v24  ;;  %v8091_v33 = vpack.c.bf16 %v2181_v28, %v2173_v27  ;;  %v2236_v24 = vld [vmem:[#allocation2 + $0x4220] sm:$0xff]  ;;  %v2238_v26 = vld [vmem:[#allocation2 + $0x4230] sm:$0xff]  ;;  %v2325_v18 = vld [vmem:[#allocation2 + $0x44e8] sm:$0xff] }
 0x49d   :  { %8648 = vmatprep.subr.bf16.mxu1 %v8647_v37  ;;  %v8667_v37 = vpack.c.bf16 %v2183_v30, %v2175_v29  ;;  %v2246_v28 = vld [vmem:[#allocation2 + $0x4270] sm:$0xff]  ;;  %v2253_v29 = vld [vmem:[#allocation2 + $0x42a8] sm:$0xff] }
 0x49e   :  { %v2261_v30 = vld [vmem:[#allocation2 + $0x42e8] sm:$0xff]  ;;  %v2310_v16 = vld [vmem:[#allocation2 + $0x4470] sm:$0xff] }
 0x49f   :  { %8074 = vmatpush1.bf16.msra.mxu0 %v8073_v44  ;;  %v8093_v44 = vpack.c.bf16 %v2180_v35, %v2172_v34  ;;  %v8685_v34 = vpack.c.bf16 %v2246_v28, %v2238_v26  ;;  %v8111_v35 = vpack.c.bf16 %v2261_v30, %v2253_v29  ;;  %v2318_v26 = vld [vmem:[#allocation2 + $0x44b0] sm:$0xff]  ;;  %v2333_v29 = vld [vmem:[#allocation2 + $0x4528] sm:$0xff] }
 0x4a0   :  { %8650 = vmatpush1.bf16.msra.mxu1 %v8649_v45  ;;  %8076 = vmatprep.subr.bf16.mxu0 %v8075_v48  ;;  %v8669_v45 = vpack.c.bf16 %v2182_v38, %v2174_v36  ;;  %v8095_v48 = vpack.c.bf16 %v2197_v40, %v2189_v39  ;;  %v2252_v36 = vld [vmem:[#allocation2 + $0x42a0] sm:$0xff]  ;;  %v2254_v38 = vld [vmem:[#allocation2 + $0x42b0] sm:$0xff]  ;;  %v2341_v30 = vld [vmem:[#allocation2 + $0x4568] sm:$0xff] }
 0x4a1   :  { %8652 = vmatprep.subr.bf16.mxu1 %v8651_v53  ;;  %v8671_v53 = vpack.c.bf16 %v2199_v43, %v2191_v42  ;;  %v2262_v40 = vld [vmem:[#allocation2 + $0x42f0] sm:$0xff]  ;;  %v2269_v42 = vld [vmem:[#allocation2 + $0x4328] sm:$0xff] }
 0x4a2   :  { %v2277_v43 = vld [vmem:[#allocation2 + $0x4368] sm:$0xff]  ;;  %v2326_v28 = vld [vmem:[#allocation2 + $0x44f0] sm:$0xff] }
 0x4a3   :  { %8078 = vmatpush1.bf16.msra.mxu0 %v8077_v59  ;;  %v2215_v59 = vld [vmem:[#allocation2 + $0x4178] sm:$0xff] }
 0x4a4   :  { %8654 = vmatpush1.bf16.msra.mxu1 %v8653_v60  ;;  %8080 = vmatprep.subr.bf16.mxu0 %v8079_v61  ;;  %v8097_v60 = vpack.c.bf16 %v2196_v51, %v2188_v49  ;;  %v8673_v61 = vpack.c.bf16 %v2198_v54, %v2190_v52  ;;  %v8675_v2 = vpack.c.bf16 %v2215_v59, %v2207_v58  ;;  %v2268_v52 = vld [vmem:[#allocation2 + $0x4320] sm:$0xff]  ;;  %v2270_v54 = vld [vmem:[#allocation2 + $0x4330] sm:$0xff]  ;;  %v2293_v58 = vld [vmem:[#allocation2 + $0x43e8] sm:$0xff] }
 0x4a5   :  { %8656 = vmatprep.subr.bf16.mxu1 %v8655_v1  ;;  %v2206_v1 = vld [vmem:[#allocation2 + $0x4130] sm:$0xff]  ;;  %v8689_v49 = vpack.c.bf16 %v2262_v40, %v2254_v38  ;;  %v8115_v51 = vpack.c.bf16 %v2277_v43, %v2269_v42  ;;  %v2287_v59 = vld [vmem:[#allocation2 + $0x43b8] sm:$0xff]  ;;  %v2349_v42 = vld [vmem:[#allocation2 + $0x45a8] sm:$0xff] }
 0x4a6   :  { %v8677_v10 = vpack.c.bf16 %v2214_v3, %v2206_v1  ;;  %v2292_v1 = vld [vmem:[#allocation2 + $0x43e0] sm:$0xff]  ;;  %v2334_v38 = vld [vmem:[#allocation2 + $0x4530] sm:$0xff]  ;;  %v2357_v43 = vld [vmem:[#allocation2 + $0x45e8] sm:$0xff] }
 0x4a7   :  { %8082 = vmatpush1.bf16.msra.mxu0 %v8081_v7  ;;  %v2223_v7 = vld [vmem:[#allocation2 + $0x41b8] sm:$0xff]  ;;  %v2342_v40 = vld [vmem:[#allocation2 + $0x4570] sm:$0xff] }
 0x4a8   :  { %8658 = vmatpush1.bf16.msra.mxu1 %v8657_v8  ;;  %8084 = vmatprep.subr.bf16.mxu0 %v8083_v9  ;;  %v2231_v8 = vld [vmem:[#allocation2 + $0x41f8] sm:$0xff]  ;;  %v8101_v9 = vpack.c.bf16 %v2212_v0, %v2204_v63  ;;  %v2284_v0 = vld [vmem:[#allocation2 + $0x43a0] sm:$0xff] }
 0x4a9   :  { %8660 = vmatprep.subr.bf16.mxu1 %v8659_v13  ;;  %v2228_v13 = vld [vmem:[#allocation2 + $0x41e0] sm:$0xff]  ;;  %v8679_v15 = vpack.c.bf16 %v2231_v8, %v2223_v7  ;;  %v2303_v7 = vld [vmem:[#allocation2 + $0x4438] sm:$0xff] }
 0x4aa   :  { %v2311_v8 = vld [vmem:[#allocation2 + $0x4478] sm:$0xff] }
 0x4ab   :  { %8086 = vmatpush1.bf16.msra.mxu0 %v8085_v19  ;;  %v2239_v19 = vld [vmem:[#allocation2 + $0x4238] sm:$0xff] }
 0x4ac   :  { %8662 = vmatpush1.bf16.msra.mxu1 %v8661_v20  ;;  %8088 = vmatprep.subr.bf16.mxu0 %v8087_v21  ;;  %v2247_v20 = vld [vmem:[#allocation2 + $0x4278] sm:$0xff]  ;;  %v8105_v21 = vpack.c.bf16 %v2228_v13, %v2220_v12  ;;  %v2300_v12 = vld [vmem:[#allocation2 + $0x4420] sm:$0xff] }
 0x4ad   :  { %8664 = vmatprep.subr.bf16.mxu1 %v8663_v25  ;;  %v2244_v25 = vld [vmem:[#allocation2 + $0x4260] sm:$0xff]  ;;  %v8683_v27 = vpack.c.bf16 %v2247_v20, %v2239_v19  ;;  %v2319_v19 = vld [vmem:[#allocation2 + $0x44b8] sm:$0xff] }
 0x4ae   :  { %v2308_v13 = vld [vmem:[#allocation2 + $0x4460] sm:$0xff]  ;;  %v2327_v20 = vld [vmem:[#allocation2 + $0x44f8] sm:$0xff] }
 0x4af   :  { %8090 = vmatpush1.bf16.msra.mxu0 %v8089_v31  ;;  %v2255_v31 = vld [vmem:[#allocation2 + $0x42b8] sm:$0xff] }
 0x4b0   :  { %8666 = vmatpush1.bf16.msra.mxu1 %v8665_v32  ;;  %8092 = vmatprep.subr.bf16.mxu0 %v8091_v33  ;;  %v2263_v32 = vld [vmem:[#allocation2 + $0x42f8] sm:$0xff]  ;;  %v8109_v33 = vpack.c.bf16 %v2244_v25, %v2236_v24  ;;  %v2316_v24 = vld [vmem:[#allocation2 + $0x44a0] sm:$0xff] }
 0x4b1   :  { %8668 = vmatprep.subr.bf16.mxu1 %v8667_v37  ;;  %v2260_v37 = vld [vmem:[#allocation2 + $0x42e0] sm:$0xff]  ;;  %v8687_v39 = vpack.c.bf16 %v2263_v32, %v2255_v31  ;;  %v2335_v31 = vld [vmem:[#allocation2 + $0x4538] sm:$0xff] }
 0x4b2   :  { %4306 = vmatmul.mubr.f32.vlgmr.msra.gmra.mrb[2].mxu0 %v9422_v57  ;;  %v2324_v25 = vld [vmem:[#allocation2 + $0x44e0] sm:$0xff]  ;;  %v2343_v32 = vld [vmem:[#allocation2 + $0x4578] sm:$0xff] }
 0x4b3   :  { %8094 = vmatpush1.bf16.msra.mxu0 %v8093_v44  ;;  %4945 = vmatmul.mubr.f32.vlgmr.msra.gmra.mrb[2].mxu1 %v9422_v57  ;;  %v2271_v44 = vld [vmem:[#allocation2 + $0x4338] sm:$0xff]  ;;  %v2285_v57 = vld [vmem:[#allocation2 + $0x43a8] sm:$0xff] }
 0x4b4   :  { %8670 = vmatpush1.bf16.msra.mxu1 %v8669_v45  ;;  %8096 = vmatprep.subr.bf16.mxu0 %v8095_v48  ;;  %v2279_v45 = vld [vmem:[#allocation2 + $0x4378] sm:$0xff]  ;;  %v8113_v48 = vpack.c.bf16 %v2260_v37, %v2252_v36  ;;  %v8119_v63 = vpack.c.bf16 %v2293_v58, %v2285_v57  ;;  %v2332_v36 = vld [vmem:[#allocation2 + $0x4520] sm:$0xff]  ;;  %v2365_v57 = vld [vmem:[#allocation2 + $0x4628] sm:$0xff] }
 0x4b5   :  { %8672 = vmatprep.subr.bf16.mxu1 %v8671_v53  ;;  %4376 = vmatprep.mubr.f32.mxu0 %v9423_v6  ;;  %v2276_v53 = vld [vmem:[#allocation2 + $0x4360] sm:$0xff]  ;;  %v8691_v55 = vpack.c.bf16 %v2279_v45, %v2271_v44  ;;  %v2351_v44 = vld [vmem:[#allocation2 + $0x45b8] sm:$0xff]  ;;  %v2373_v58 = vld [vmem:[#allocation2 + $0x4668] sm:$0xff] }
 0x4b6   :  { %5015 = vmatprep.mubr.f32.mxu1 %v9423_v6  ;;  %v2309_v6 = vld [vmem:[#allocation2 + $0x4468] sm:$0xff]  ;;  %v2340_v37 = vld [vmem:[#allocation2 + $0x4560] sm:$0xff]  ;;  %v2359_v45 = vld [vmem:[#allocation2 + $0x45f8] sm:$0xff] }
 0x4b7   :  { %8098 = vmatpush1.bf16.msra.mxu0 %v8097_v60  ;;  %v2295_v60 = vld [vmem:[#allocation2 + $0x43f8] sm:$0xff] }
 0x4b8   :  { %8674 = vmatpush1.bf16.msra.mxu1 %v8673_v61  ;;  %8100 = vmatprep.subr.bf16.mxu0 %v8099_v62  ;;  %v8117_v61 = vpack.c.bf16 %v2276_v53, %v2268_v52  ;;  %v8693_v62 = vpack.c.bf16 %v2278_v56, %v2270_v54  ;;  %v8695_v3 = vpack.c.bf16 %v2295_v60, %v2287_v59  ;;  %v2348_v52 = vld [vmem:[#allocation2 + $0x45a0] sm:$0xff]  ;;  %v2350_v54 = vld [vmem:[#allocation2 + $0x45b0] sm:$0xff]  ;;  %v2367_v59 = vld [vmem:[#allocation2 + $0x4638] sm:$0xff] }
 0x4b9   :  { %8676 = vmatprep.subr.bf16.mxu1 %v8675_v2  ;;  %v2286_v2 = vld [vmem:[#allocation2 + $0x43b0] sm:$0xff]  ;;  %v2356_v53 = vld [vmem:[#allocation2 + $0x45e0] sm:$0xff]  ;;  %v2375_v60 = vld [vmem:[#allocation2 + $0x4678] sm:$0xff] }
 0x4ba   :  { %v2358_v56 = vld [vmem:[#allocation2 + $0x45f0] sm:$0xff] }
 0x4bb   :  { %8102 = vmatpush1.bf16.msra.mxu0 %v8101_v9  ;;  %v8121_v9 = vpack.c.bf16 %v2292_v1, %v2284_v0  ;;  %v2364_v0 = vld [vmem:[#allocation2 + $0x4620] sm:$0xff] }
 0x4bc   :  { %8678 = vmatpush1.bf16.msra.mxu1 %v8677_v10  ;;  %8104 = vmatprep.subr.bf16.mxu0 %v8103_v11  ;;  %v8697_v10 = vpack.c.bf16 %v2294_v4, %v2286_v2  ;;  %v8123_v11 = vpack.c.bf16 %v2309_v6, %v2301_v5  ;;  %v2372_v1 = vld [vmem:[#allocation2 + $0x4660] sm:$0xff]  ;;  %v2366_v2 = vld [vmem:[#allocation2 + $0x4630] sm:$0xff]  ;;  %v2381_v5 = vld [vmem:[#allocation2 + $0x46a8] sm:$0xff] }
 0x4bd   :  { %8680 = vmatprep.subr.bf16.mxu1 %v8679_v15  ;;  %v8699_v15 = vpack.c.bf16 %v2311_v8, %v2303_v7  ;;  %v2374_v4 = vld [vmem:[#allocation2 + $0x4670] sm:$0xff]  ;;  %v2389_v6 = vld [vmem:[#allocation2 + $0x46e8] sm:$0xff]  ;;  %v2426_v7 = vlaneseq  ;;  %v2383_v8 = vld [vmem:[#allocation2 + $0x46b8] sm:$0xff] }
 0x4bf   :  { %8106 = vmatpush1.bf16.msra.mxu0 %v8105_v21  ;;  %v8125_v21 = vpack.c.bf16 %v2308_v13, %v2300_v12  ;;  %v8143_v12 = vpack.c.bf16 %v2389_v6, %v2381_v5  ;;  %v2380_v13 = vld [vmem:[#allocation2 + $0x46a0] sm:$0xff]  ;;  %v5038_v5 = vld [vmem:[#allocation6 + $0x40] sm:$0xff] }
 0x4c0   :  { %8682 = vmatpush1.bf16.msra.mxu1 %v8681_v22  ;;  %8108 = vmatprep.subr.bf16.mxu0 %v8107_v23  ;;  %v8701_v22 = vpack.c.bf16 %v2310_v16, %v2302_v14  ;;  %v8127_v23 = vpack.c.bf16 %v2325_v18, %v2317_v17  ;;  %v2388_v14 = vld [vmem:[#allocation2 + $0x46e0] sm:$0xff]  ;;  %v2390_v17 = vld [vmem:[#allocation2 + $0x46f0] sm:$0xff]  ;;  %v2397_v18 = vld [vmem:[#allocation2 + $0x4728] sm:$0xff] }
 0x4c1   :  { %8684 = vmatprep.subr.bf16.mxu1 %v8683_v27  ;;  %v8703_v27 = vpack.c.bf16 %v2327_v20, %v2319_v19  ;;  %v2405_v19 = vld [vmem:[#allocation2 + $0x4768] sm:$0xff]  ;;  %v9804_v20 = vshrl.u32 %v2426_v7, 7  ;;  %v5040_v7 = vld [vmem:[#allocation6 + $0x50] sm:$0xff] }
 0x4c2   :  { %v5042_v6 = vld [vmem:[#allocation6 + $0x60] sm:$0xff] }
 0x4c3   :  { %8110 = vmatpush1.bf16.msra.mxu0 %v8109_v33  ;;  %v8129_v33 = vpack.c.bf16 %v2324_v25, %v2316_v24  ;;  %v8147_v25 = vpack.c.bf16 %v2405_v19, %v2397_v18  ;;  %v5046_v19 = vld [vmem:[#allocation6 + $0x80] sm:$0xff] }
 0x4c4   :  { %8686 = vmatpush1.bf16.msra.mxu1 %v8685_v34  ;;  %8112 = vmatprep.subr.bf16.mxu0 %v8111_v35  ;;  %v8705_v34 = vpack.c.bf16 %v2326_v28, %v2318_v26  ;;  %v8131_v35 = vpack.c.bf16 %v2341_v30, %v2333_v29  ;;  %v2396_v26 = vld [vmem:[#allocation2 + $0x4720] sm:$0xff]  ;;  %v2398_v28 = vld [vmem:[#allocation2 + $0x4730] sm:$0xff] }
 0x4c5   :  { %8688 = vmatprep.subr.bf16.mxu1 %v8687_v39  ;;  %v8707_v39 = vpack.c.bf16 %v2343_v32, %v2335_v31  ;;  %v2406_v30 = vld [vmem:[#allocation2 + $0x4770] sm:$0xff]  ;;  %v2413_v31 = vld [vmem:[#allocation2 + $0x47a8] sm:$0xff] }
 0x4c6   :  { %v2421_v32 = vld [vmem:[#allocation2 + $0x47e8] sm:$0xff] }
 0x4c7   :  { %8114 = vmatpush1.bf16.msra.mxu0 %v8113_v48  ;;  %v8133_v48 = vpack.c.bf16 %v2340_v37, %v2332_v36  ;;  %v9807_v36 = vld [vmem:[#allocation4] sm:$0xff] }
 0x4c8   :  { %8690 = vmatpush1.bf16.msra.mxu1 %v8689_v49  ;;  %8116 = vmatprep.subr.bf16.mxu0 %v8115_v51  ;;  %v8709_v49 = vpack.c.bf16 %v2342_v40, %v2334_v38  ;;  %v8135_v51 = vpack.c.bf16 %v2357_v43, %v2349_v42  ;;  %v8725_v38 = vpack.c.bf16 %v2406_v30, %v2398_v28  ;;  %v2412_v40 = vld [vmem:[#allocation2 + $0x47a0] sm:$0xff]  ;;  %v2414_v43 = vld [vmem:[#allocation2 + $0x47b0] sm:$0xff] }
 0x4c9   :  { %8692 = vmatprep.subr.bf16.mxu1 %v8691_v55  ;;  %v8711_v55 = vpack.c.bf16 %v2359_v45, %v2351_v44  ;;  %v2420_v42 = vld [vmem:[#allocation2 + $0x47e0] sm:$0xff]  ;;  %v2422_v45 = vld [vmem:[#allocation2 + $0x47f0] sm:$0xff] }
 0x4ca   :  { %v5061_v28 = vld [vmem:[#allocation6 + $0xf8] sm:$0xff] }
 0x4cb   :  { %8118 = vmatpush1.bf16.msra.mxu0 %v8117_v61  ;;  %v8137_v61 = vpack.c.bf16 %v2356_v53, %v2348_v52  ;;  %v5033_v52 = vld [vmem:[#allocation6 + $0x18] sm:$0xff] }
 0x4cc   :  { %8694 = vmatpush1.bf16.msra.mxu1 %v8693_v62  ;;  %8120 = vmatprep.subr.bf16.mxu0 %v8119_v63  ;;  %v8713_v62 = vpack.c.bf16 %v2358_v56, %v2350_v54  ;;  %v8139_v63 = vpack.c.bf16 %v2373_v58, %v2365_v57  ;;  %v5037_v53 = vld [vmem:[#allocation6 + $0x38] sm:$0xff]  ;;  %v8153_v54 = vpack.c.bf16 %v2420_v42, %v2412_v40  ;;  %v5030_v57 = vld [vmem:[#allocation6] sm:$0xff]  ;;  %v5067_v40 = vld [vmem:[#allocation6 + $0x128] sm:$0xff] }
 0x4cd   :  { %8696 = vmatprep.subr.bf16.mxu1 %v8695_v3  ;;  %v8715_v3 = vpack.c.bf16 %v2375_v60, %v2367_v59  ;;  %v5034_v58 = vld [vmem:[#allocation6 + $0x20] sm:$0xff]  ;;  %v8987_v59 = vpack.c.bf16 %v5037_v53, %v5033_v52  ;;  %v5032_v60 = vld [vmem:[#allocation6 + $0x10] sm:$0xff]  ;;  %v5065_v42 = vld [vmem:[#allocation6 + $0x118] sm:$0xff] }
 0x4ce   :  { %v5064_v52 = vld [vmem:[#allocation6 + $0x110] sm:$0xff] }
 0x4cf   :  { %8122 = vmatpush1.bf16.msra.mxu0 %v8121_v9  ;;  %v2391_v9 = vld [vmem:[#allocation2 + $0x46f8] sm:$0xff] }
 0x4d0   :  { %8698 = vmatpush1.bf16.msra.mxu1 %v8697_v10  ;;  %8124 = vmatprep.subr.bf16.mxu0 %v8123_v11  ;;  %v8141_v10 = vpack.c.bf16 %v2372_v1, %v2364_v0  ;;  %v8717_v11 = vpack.c.bf16 %v2374_v4, %v2366_v2  ;;  %v8719_v16 = vpack.c.bf16 %v2391_v9, %v2383_v8  ;;  %v5043_v0 = vld [vmem:[#allocation6 + $0x68] sm:$0xff]  ;;  %v5041_v2 = vld [vmem:[#allocation6 + $0x58] sm:$0xff]  ;;  %v5044_v9 = vld [vmem:[#allocation6 + $0x70] sm:$0xff] }
 0x4d1   :  { %8700 = vmatprep.subr.bf16.mxu1 %v8699_v15  ;;  %v2382_v15 = vld [vmem:[#allocation2 + $0x46b0] sm:$0xff]  ;;  %v8733_v1 = vpack.c.bf16 %v5034_v58, %v5030_v57  ;;  %v5073_v57 = vld [vmem:[#allocation6 + $0x158] sm:$0xff] }
 0x4d2   :  { %v8721_v24 = vpack.c.bf16 %v2390_v17, %v2382_v15  ;;  %v5053_v15 = vld [vmem:[#allocation6 + $0xb8] sm:$0xff]  ;;  %v8993_v17 = vpack.c.bf16 %v5044_v9, %v5040_v7 }
 0x4d3   :  { %8126 = vmatpush1.bf16.msra.mxu0 %v8125_v21  ;;  %v2399_v21 = vld [vmem:[#allocation2 + $0x4738] sm:$0xff]  ;;  %v5077_v58 = vld [vmem:[#allocation6 + $0x178] sm:$0xff] }
 0x4d4   :  { %8702 = vmatpush1.bf16.msra.mxu1 %v8701_v22  ;;  %8128 = vmatprep.subr.bf16.mxu0 %v8127_v23  ;;  %v2407_v22 = vld [vmem:[#allocation2 + $0x4778] sm:$0xff]  ;;  %v8145_v23 = vpack.c.bf16 %v2388_v14, %v2380_v13  ;;  %v5049_v14 = vld [vmem:[#allocation6 + $0x98] sm:$0xff] }
 0x4d5   :  { %8704 = vmatprep.subr.bf16.mxu1 %v8703_v27  ;;  %v2404_v27 = vld [vmem:[#allocation2 + $0x4760] sm:$0xff]  ;;  %v8723_v29 = vpack.c.bf16 %v2407_v22, %v2399_v21  ;;  %v5050_v21 = vld [vmem:[#allocation6 + $0xa0] sm:$0xff]  ;;  %v5048_v22 = vld [vmem:[#allocation6 + $0x90] sm:$0xff] }
 0x4d6   :  { %v8149_v37 = vpack.c.bf16 %v2404_v27, %v2396_v26  ;;  %v5059_v26 = vld [vmem:[#allocation6 + $0xe8] sm:$0xff]  ;;  %v5057_v27 = vld [vmem:[#allocation6 + $0xd8] sm:$0xff] }
 0x4d7   :  { %8130 = vmatpush1.bf16.msra.mxu0 %v8129_v33  ;;  %v2432_v33 = vsub.s32 1, %v9804_v20 }
 0x4d8   :  { %8706 = vmatpush1.bf16.msra.mxu1 %v8705_v34  ;;  %8132 = vmatprep.subr.bf16.mxu0 %v8131_v35  ;;  %v2415_v34 = vld [vmem:[#allocation2 + $0x47b8] sm:$0xff] }
 0x4d9   :  { %8708 = vmatprep.subr.bf16.mxu1 %v8707_v39  ;;  %v2423_v35 = vld [vmem:[#allocation2 + $0x47f8] sm:$0xff]  ;;  %v8151_v39 = vpack.c.bf16 %v2421_v32, %v2413_v31  ;;  %v5054_v32 = vld [vmem:[#allocation6 + $0xc0] sm:$0xff] }
 0x4da   :  { %v8727_v44 = vpack.c.bf16 %v2423_v35, %v2415_v34  ;;  %v5058_v34 = vld [vmem:[#allocation6 + $0xe0] sm:$0xff]  ;;  %v5056_v35 = vld [vmem:[#allocation6 + $0xd0] sm:$0xff] }
 0x4db   :  { %8134 = vmatpush1.bf16.msra.mxu0 %v8133_v48  ;;  %v5031_v48 = vld [vmem:[#allocation6 + $0x8] sm:$0xff] }
 0x4dc   :  { %8710 = vmatpush1.bf16.msra.mxu1 %v8709_v49  ;;  %8136 = vmatprep.subr.bf16.mxu0 %v8135_v51  ;;  %v5035_v49 = vld [vmem:[#allocation6 + $0x28] sm:$0xff]  ;;  %v2433_v51 = vrot.slane %v9807_v36, %v2432_v33 }
 0x4dd   :  { %8712 = vmatprep.subr.bf16.mxu1 %v8711_v55  ;;  %v8729_v55 = vpack.c.bf16 %v2422_v45, %v2414_v43  ;;  %v8731_v56 = vpack.c.bf16 %v5035_v49, %v5031_v48  ;;  %v5069_v43 = vld [vmem:[#allocation6 + $0x138] sm:$0xff]  ;;  %v5062_v49 = vld [vmem:[#allocation6 + $0x100] sm:$0xff] }
 0x4de   :  { %v9003_v53 = vpack.c.bf16 %v5069_v43, %v5065_v42  ;;  %v5103_v42 = vld [vmem:[#allocation6 + $0x248] sm:$0xff] }
 0x4df   :  { %8138 = vmatpush1.bf16.msra.mxu0 %v8137_v61  ;;  %v5036_v61 = vld [vmem:[#allocation6 + $0x30] sm:$0xff]  ;;  %v5107_v43 = vld [vmem:[#allocation6 + $0x268] sm:$0xff] }
 0x4e0   :  { %8714 = vmatpush1.bf16.msra.mxu1 %v8713_v62  ;;  %8140 = vmatprep.subr.bf16.mxu0 %v8139_v63  ;;  %v9308_v62 = vadd.f32 %v9770_v47, %v2433_v51  ;;  %v5039_v63 = vld [vmem:[#allocation6 + $0x48] sm:$0xff]  ;;  %v8989_v4 = vpack.c.bf16 %v5036_v61, %v5032_v60  ;;  %v9424_v47 = vld [vmem:[%s9854_s0 + $0x80] sm:$0xff]  ;;  %v5066_v51 = vld [vmem:[#allocation6 + $0x120] sm:$0xff] }
 0x4e1   :  { %8716 = vmatprep.subr.bf16.mxu1 %v8715_v3  ;;  %v5045_v3 = vld [vmem:[#allocation6 + $0x78] sm:$0xff]  ;;  %v8735_v8 = vpack.c.bf16 %v5043_v0, %v5039_v63  ;;  %v5074_v63 = vld [vmem:[#allocation6 + $0x160] sm:$0xff]  ;;  %v5072_v0 = vld [vmem:[#allocation6 + $0x150] sm:$0xff] }
 0x4e2   :  { %v8991_v13 = vpack.c.bf16 %v5045_v3, %v5041_v2  ;;  %v5076_v2 = vld [vmem:[#allocation6 + $0x170] sm:$0xff]  ;;  %v5079_v3 = vld [vmem:[#allocation6 + $0x188] sm:$0xff] }
 0x4e3   :  { %8142 = vmatpush1.bf16.msra.mxu0 %v8141_v10  ;;  %v5047_v10 = vld [vmem:[#allocation6 + $0x88] sm:$0xff] }
 0x4e4   :  { %8718 = vmatpush1.bf16.msra.mxu1 %v8717_v11  ;;  %8144 = vmatprep.subr.bf16.mxu0 %v8143_v12  ;;  %v5051_v11 = vld [vmem:[#allocation6 + $0xa8] sm:$0xff]  ;;  %v5023_v12 = vmax.f32 %v9308_v62, 0.0  ;;  %v5070_v62 = vld [vmem:[#allocation6 + $0x140] sm:$0xff] }
 0x4e5   :  { %8720 = vmatprep.subr.bf16.mxu1 %v8719_v16  ;;  %v8737_v16 = vpack.c.bf16 %v5042_v6, %v5038_v5  ;;  %v8739_v18 = vpack.c.bf16 %v5051_v11, %v5047_v10  ;;  %v5081_v5 = vld [vmem:[#allocation6 + $0x198] sm:$0xff]  ;;  %v8753_v7 = vpack.c.bf16 %v5074_v63, %v5070_v62  ;;  %v5078_v10 = vld [vmem:[#allocation6 + $0x180] sm:$0xff] }
 0x4e6   :  { %v5085_v6 = vld [vmem:[#allocation6 + $0x1b8] sm:$0xff]  ;;  %v5082_v11 = vld [vmem:[#allocation6 + $0x1a0] sm:$0xff] }
 0x4e7   :  { %8146 = vmatpush1.bf16.msra.mxu0 %v8145_v23  ;;  %v8995_v23 = vpack.c.bf16 %v5053_v15, %v5049_v14  ;;  %v5087_v14 = vld [vmem:[#allocation6 + $0x1c8] sm:$0xff] }
 0x4e8   :  { %8722 = vmatpush1.bf16.msra.mxu1 %v8721_v24  ;;  %8148 = vmatprep.subr.bf16.mxu0 %v8147_v25  ;;  %v5052_v24 = vld [vmem:[#allocation6 + $0xb0] sm:$0xff]  ;;  %v5055_v25 = vld [vmem:[#allocation6 + $0xc8] sm:$0xff] }
 0x4e9   :  { %8724 = vmatprep.subr.bf16.mxu1 %v8723_v29  ;;  %v8741_v29 = vpack.c.bf16 %v5050_v21, %v5046_v19  ;;  %v8997_v30 = vpack.c.bf16 %v5052_v24, %v5048_v22  ;;  %v8743_v31 = vpack.c.bf16 %v5059_v26, %v5055_v25  ;;  %v5091_v15 = vld [vmem:[#allocation6 + $0x1e8] sm:$0xff]  ;;  %v5086_v22 = vld [vmem:[#allocation6 + $0x1c0] sm:$0xff]  ;;  %v5088_v24 = vld [vmem:[#allocation6 + $0x1d0] sm:$0xff] }
 0x4ea   :  { %v8759_v21 = vpack.c.bf16 %v5091_v15, %v5087_v14  ;;  %v5092_v26 = vld [vmem:[#allocation6 + $0x1f0] sm:$0xff] }
 0x4eb   :  { %8150 = vmatpush1.bf16.msra.mxu0 %v8149_v37  ;;  %v8999_v37 = vpack.c.bf16 %v5061_v28, %v5057_v27  ;;  %v5095_v27 = vld [vmem:[#allocation6 + $0x208] sm:$0xff]  ;;  %v5124_v15 = vld [vmem:[#allocation6 + $0x2f0] sm:$0xff] }
 0x4ec   :  { %8726 = vmatpush1.bf16.msra.mxu1 %v8725_v38  ;;  %8152 = vmatprep.subr.bf16.mxu0 %v8151_v39  ;;  %v5060_v38 = vld [vmem:[#allocation6 + $0xf0] sm:$0xff]  ;;  %v5063_v39 = vld [vmem:[#allocation6 + $0x108] sm:$0xff] }
 0x4ed   :  { %8728 = vmatprep.subr.bf16.mxu1 %v8727_v44  ;;  %v8745_v44 = vpack.c.bf16 %v5058_v34, %v5054_v32  ;;  %v9001_v45 = vpack.c.bf16 %v5060_v38, %v5056_v35  ;;  %v8747_v48 = vpack.c.bf16 %v5067_v40, %v5063_v39  ;;  %v5099_v28 = vld [vmem:[#allocation6 + $0x228] sm:$0xff]  ;;  %v9017_v32 = vpack.c.bf16 %v5092_v26, %v5088_v24  ;;  %v5094_v35 = vld [vmem:[#allocation6 + $0x200] sm:$0xff]  ;;  %v5096_v38 = vld [vmem:[#allocation6 + $0x210] sm:$0xff] }
 0x4ee   :  { %v8763_v34 = vpack.c.bf16 %v5099_v28, %v5095_v27  ;;  %v5100_v40 = vld [vmem:[#allocation6 + $0x230] sm:$0xff]  ;;  %v5126_v24 = vld [vmem:[#allocation6 + $0x300] sm:$0xff] }
 0x4ef   :  { %8154 = vmatpush1.bf16.msra.mxu0 %v8153_v54  ;;  %v5068_v54 = vld [vmem:[#allocation6 + $0x130] sm:$0xff] }
 0x4f0   :  { %8730 = vmatpush1.bf16.msra.mxu1 %v8729_v55  ;;  %8732 = vmatprep.subr.bf16.mxu0 %v8731_v56  ;;  %v5071_v55 = vld [vmem:[#allocation6 + $0x148] sm:$0xff]  ;;  %v9005_v60 = vpack.c.bf16 %v5068_v54, %v5064_v52  ;;  %v5102_v52 = vld [vmem:[#allocation6 + $0x240] sm:$0xff]  ;;  %v5104_v54 = vld [vmem:[#allocation6 + $0x250] sm:$0xff] }
 0x4f1   :  { %8988 = vmatprep.subr.bf16.mxu1 %v8987_v59  ;;  %v5075_v56 = vld [vmem:[#allocation6 + $0x168] sm:$0xff]  ;;  %v8749_v59 = vpack.c.bf16 %v5066_v51, %v5062_v49  ;;  %v9021_v49 = vpack.c.bf16 %v5100_v40, %v5096_v38  ;;  %v8767_v51 = vpack.c.bf16 %v5107_v43, %v5103_v42  ;;  %v5128_v26 = vld [vmem:[#allocation6 + $0x310] sm:$0xff]  ;;  %v5134_v38 = vld [vmem:[#allocation6 + $0x340] sm:$0xff] }
 0x4f2   :  { %4377 = vmatmul.mubr.f32.vlgmr.msra.gmra.mrb[2].mxu0 %v9424_v47  ;;  %v8751_v61 = vpack.c.bf16 %v5075_v56, %v5071_v55  ;;  %v5108_v56 = vld [vmem:[#allocation6 + $0x270] sm:$0xff] }
 0x4f3   :  { %5016 = vmatmul.mubr.f32.vlgmr.msra.gmra.mrb[2].mxu1 %v9424_v47  ;;  %8734 = vmatpush1.bf16.msra.mxu0 %v8733_v1  ;;  %v9007_v1 = vpack.c.bf16 %v5077_v58, %v5073_v57  ;;  %v9011_v47 = vpack.c.bf16 %v5085_v6, %v5081_v5  ;;  %v5111_v57 = vld [vmem:[#allocation6 + $0x288] sm:$0xff]  ;;  %v9025_v62 = vpack.c.bf16 %v5108_v56, %v5104_v54  ;;  %v5132_v28 = vld [vmem:[#allocation6 + $0x330] sm:$0xff]  ;;  %v5146_v56 = vld [vmem:[#allocation6 + $0x3a0] sm:$0xff] }
 0x4f4   :  { %5628 = vmatprep.mubr.f32.mxu0 %v5023_v12  ;;  %8990 = vmatpush1.bf16.msra.mxu1 %v8989_v4  ;;  %v5083_v4 = vld [vmem:[#allocation6 + $0x1a8] sm:$0xff]  ;;  %v5136_v40 = vld [vmem:[#allocation6 + $0x350] sm:$0xff] }
 0x4f5   :  { %5912 = vmatprep.mubr.f32.mxu1 %v5023_v12  ;;  %8736 = vmatprep.subr.bf16.mxu0 %v8735_v8  ;;  %v9009_v8 = vpack.c.bf16 %v5076_v2, %v5072_v0  ;;  %v8755_v9 = vpack.c.bf16 %v5083_v4, %v5079_v3  ;;  %v5080_v12 = vld [vmem:[#allocation6 + $0x190] sm:$0xff]  ;;  %v5115_v58 = vld [vmem:[#allocation6 + $0x2a8] sm:$0xff]  ;;  %v5110_v0 = vld [vmem:[#allocation6 + $0x280] sm:$0xff] }
 0x4f6   :  { %8992 = vmatprep.subr.bf16.mxu1 %v8991_v13  ;;  %v5084_v13 = vld [vmem:[#allocation6 + $0x1b0] sm:$0xff]  ;;  %v8771_v63 = vpack.c.bf16 %v5115_v58, %v5111_v57  ;;  %v5119_v5 = vld [vmem:[#allocation6 + $0x2c8] sm:$0xff] }
 0x4f7   :  { %8738 = vmatpush1.bf16.msra.mxu0 %v8737_v16  ;;  %v5089_v16 = vld [vmem:[#allocation6 + $0x1d8] sm:$0xff]  ;;  %v9013_v19 = vpack.c.bf16 %v5084_v13, %v5080_v12  ;;  %v5112_v2 = vld [vmem:[#allocation6 + $0x290] sm:$0xff]  ;;  %v5123_v6 = vld [vmem:[#allocation6 + $0x2e8] sm:$0xff] }
 0x4f8   :  { %8994 = vmatpush1.bf16.msra.mxu1 %v8993_v17  ;;  %8740 = vmatprep.subr.bf16.mxu0 %v8739_v18  ;;  %v5093_v17 = vld [vmem:[#allocation6 + $0x1f8] sm:$0xff]  ;;  %v8757_v18 = vpack.c.bf16 %v5082_v11, %v5078_v10  ;;  %v5116_v4 = vld [vmem:[#allocation6 + $0x2b0] sm:$0xff]  ;;  %v8775_v11 = vpack.c.bf16 %v5123_v6, %v5119_v5  ;;  %v5118_v12 = vld [vmem:[#allocation6 + $0x2c0] sm:$0xff] }
 0x4f9   :  { %8996 = vmatprep.subr.bf16.mxu1 %v8995_v23  ;;  %v5090_v23 = vld [vmem:[#allocation6 + $0x1e0] sm:$0xff]  ;;  %v9015_v25 = vpack.c.bf16 %v5093_v17, %v5089_v16  ;;  %v9029_v10 = vpack.c.bf16 %v5116_v4, %v5112_v2  ;;  %v5120_v13 = vld [vmem:[#allocation6 + $0x2d0] sm:$0xff]  ;;  %v5127_v16 = vld [vmem:[#allocation6 + $0x308] sm:$0xff] }
 0x4fa   :  { %v5131_v17 = vld [vmem:[#allocation6 + $0x328] sm:$0xff]  ;;  %v5140_v43 = vld [vmem:[#allocation6 + $0x370] sm:$0xff]  ;;  %v5150_v5 = vld [vmem:[#allocation6 + $0x3c0] sm:$0xff] }
 0x4fb   :  { %8742 = vmatpush1.bf16.msra.mxu0 %v8741_v29  ;;  %v5097_v29 = vld [vmem:[#allocation6 + $0x218] sm:$0xff]  ;;  %v5144_v57 = vld [vmem:[#allocation6 + $0x390] sm:$0xff]  ;;  %v5154_v6 = vld [vmem:[#allocation6 + $0x3e0] sm:$0xff] }
 0x4fc   :  { %8998 = vmatpush1.bf16.msra.mxu1 %v8997_v30  ;;  %8744 = vmatprep.subr.bf16.mxu0 %v8743_v31  ;;  %v5101_v30 = vld [vmem:[#allocation6 + $0x238] sm:$0xff]  ;;  %v8761_v31 = vpack.c.bf16 %v5090_v23, %v5086_v22  ;;  %v9033_v22 = vpack.c.bf16 %v5124_v15, %v5120_v13  ;;  %v8779_v23 = vpack.c.bf16 %v5131_v17, %v5127_v16 }
 0x4fd   :  { %9000 = vmatprep.subr.bf16.mxu1 %v8999_v37  ;;  %v5098_v37 = vld [vmem:[#allocation6 + $0x220] sm:$0xff]  ;;  %v9019_v39 = vpack.c.bf16 %v5101_v30, %v5097_v29  ;;  %v5135_v29 = vld [vmem:[#allocation6 + $0x348] sm:$0xff]  ;;  %v5165_v13 = vld [vmem:[#allocation6 + $0x438] sm:$0xff] }
 0x4fe   :  { %v5139_v30 = vld [vmem:[#allocation6 + $0x368] sm:$0xff] }
 0x4ff   :  { %8746 = vmatpush1.bf16.msra.mxu0 %v8745_v44  ;;  %v5105_v44 = vld [vmem:[#allocation6 + $0x258] sm:$0xff] }
 0x500   :  { %9002 = vmatpush1.bf16.msra.mxu1 %v9001_v45  ;;  %8748 = vmatprep.subr.bf16.mxu0 %v8747_v48  ;;  %v5109_v45 = vld [vmem:[#allocation6 + $0x278] sm:$0xff]  ;;  %v8765_v48 = vpack.c.bf16 %v5098_v37, %v5094_v35  ;;  %v9037_v35 = vpack.c.bf16 %v5132_v28, %v5128_v26  ;;  %v8783_v37 = vpack.c.bf16 %v5139_v30, %v5135_v29  ;;  %v5166_v30 = vld [vmem:[#allocation6 + $0x440] sm:$0xff] }
 0x501   :  { %9004 = vmatprep.subr.bf16.mxu1 %v9003_v53  ;;  %v5106_v53 = vld [vmem:[#allocation6 + $0x260] sm:$0xff]  ;;  %v9023_v55 = vpack.c.bf16 %v5109_v45, %v5105_v44  ;;  %v5143_v44 = vld [vmem:[#allocation6 + $0x388] sm:$0xff]  ;;  %v5173_v28 = vld [vmem:[#allocation6 + $0x478] sm:$0xff] }
 0x502   :  { %v5147_v45 = vld [vmem:[#allocation6 + $0x3a8] sm:$0xff] }
 0x503   :  { %8750 = vmatpush1.bf16.msra.mxu0 %v8749_v59  ;;  %v5113_v59 = vld [vmem:[#allocation6 + $0x298] sm:$0xff]  ;;  %v8787_v54 = vpack.c.bf16 %v5147_v45, %v5143_v44 }
 0x504   :  { %9006 = vmatpush1.bf16.msra.mxu1 %v9005_v60  ;;  %8752 = vmatprep.subr.bf16.mxu0 %v8751_v61  ;;  %v5117_v60 = vld [vmem:[#allocation6 + $0x2b8] sm:$0xff]  ;;  %v8769_v61 = vpack.c.bf16 %v5106_v53, %v5102_v52  ;;  %v2428_v52 = vsub.s32 0, %v9804_v20  ;;  %v9041_v53 = vpack.c.bf16 %v5140_v43, %v5136_v40 }
 0x505   :  { %9008 = vmatprep.subr.bf16.mxu1 %v9007_v1  ;;  %v5114_v1 = vld [vmem:[#allocation6 + $0x2a0] sm:$0xff]  ;;  %v9027_v3 = vpack.c.bf16 %v5117_v60, %v5113_v59  ;;  %v5148_v59 = vld [vmem:[#allocation6 + $0x3b0] sm:$0xff]  ;;  %v5151_v60 = vld [vmem:[#allocation6 + $0x3c8] sm:$0xff] }
 0x506   :  { %v2429_v2 = vrot.slane %v9807_v36, %v2428_v52  ;;  %v5177_v40 = vld [vmem:[#allocation6 + $0x498] sm:$0xff] }
 0x507   :  { %8754 = vmatpush1.bf16.msra.mxu0 %v8753_v7  ;;  %v5121_v7 = vld [vmem:[#allocation6 + $0x2d8] sm:$0xff] }
 0x508   :  { %9010 = vmatpush1.bf16.msra.mxu1 %v9009_v8  ;;  %8756 = vmatprep.subr.bf16.mxu0 %v8755_v9  ;;  %v5125_v8 = vld [vmem:[#allocation6 + $0x2f8] sm:$0xff]  ;;  %v8773_v9 = vpack.c.bf16 %v5114_v1, %v5110_v0  ;;  %v9307_v15 = vadd.f32 %v9766_v41, %v2429_v2 }
 0x509   :  { %9012 = vmatprep.subr.bf16.mxu1 %v9011_v47  ;;  %v5122_v47 = vld [vmem:[#allocation6 + $0x2e0] sm:$0xff]  ;;  %v9031_v14 = vpack.c.bf16 %v5125_v8, %v5121_v7  ;;  %v5157_v0 = vld [vmem:[#allocation6 + $0x3f8] sm:$0xff]  ;;  %v5152_v7 = vld [vmem:[#allocation6 + $0x3d0] sm:$0xff] }
 0x50a   :  { %v5022_v29 = vmax.f32 %v9307_v15, 0.0  ;;  %v5199_v15 = vld [vmem:[#allocation6 + $0x548] sm:$0xff] }
 0x50b   :  { %8758 = vmatpush1.bf16.msra.mxu0 %v8757_v18  ;;  %v5129_v18 = vld [vmem:[#allocation6 + $0x318] sm:$0xff] }
 0x50c   :  { %9014 = vmatpush1.bf16.msra.mxu1 %v9013_v19  ;;  %8760 = vmatprep.subr.bf16.mxu0 %v8759_v21  ;;  %v5133_v19 = vld [vmem:[#allocation6 + $0x338] sm:$0xff]  ;;  %v8777_v21 = vpack.c.bf16 %v5122_v47, %v5118_v12 }
 0x50d   :  { %9016 = vmatprep.subr.bf16.mxu1 %v9015_v25  ;;  %v5130_v25 = vld [vmem:[#allocation6 + $0x320] sm:$0xff]  ;;  %v9035_v27 = vpack.c.bf16 %v5133_v19, %v5129_v18  ;;  %v5161_v47 = vld [vmem:[#allocation6 + $0x418] sm:$0xff] }
 0x50e   :  { %v5158_v18 = vld [vmem:[#allocation6 + $0x400] sm:$0xff] }
 0x50f   :  { %8762 = vmatpush1.bf16.msra.mxu0 %v8761_v31  ;;  %v5137_v31 = vld [vmem:[#allocation6 + $0x358] sm:$0xff]  ;;  %v5162_v19 = vld [vmem:[#allocation6 + $0x420] sm:$0xff] }
 0x510   :  { %9018 = vmatpush1.bf16.msra.mxu1 %v9017_v32  ;;  %8764 = vmatprep.subr.bf16.mxu0 %v8763_v34  ;;  %v5141_v32 = vld [vmem:[#allocation6 + $0x378] sm:$0xff]  ;;  %v8781_v34 = vpack.c.bf16 %v5130_v25, %v5126_v24  ;;  %v5167_v25 = vld [vmem:[#allocation6 + $0x448] sm:$0xff]  ;;  %v8797_v26 = vpack.c.bf16 %v5162_v19, %v5158_v18 }
 0x511   :  { %9020 = vmatprep.subr.bf16.mxu1 %v9019_v39  ;;  %v5138_v39 = vld [vmem:[#allocation6 + $0x360] sm:$0xff]  ;;  %v9039_v42 = vpack.c.bf16 %v5141_v32, %v5137_v31  ;;  %v5168_v32 = vld [vmem:[#allocation6 + $0x450] sm:$0xff]  ;;  %v5205_v18 = vld [vmem:[#allocation6 + $0x578] sm:$0xff] }
 0x512   :  { %v5170_v31 = vld [vmem:[#allocation6 + $0x460] sm:$0xff] }
 0x513   :  { %8766 = vmatpush1.bf16.msra.mxu0 %v8765_v48  ;;  %v5145_v48 = vld [vmem:[#allocation6 + $0x398] sm:$0xff]  ;;  %v8801_v43 = vpack.c.bf16 %v5170_v31, %v5166_v30 }
 0x514   :  { %9022 = vmatpush1.bf16.msra.mxu1 %v9021_v49  ;;  %8768 = vmatprep.subr.bf16.mxu0 %v8767_v51  ;;  %v5149_v49 = vld [vmem:[#allocation6 + $0x3b8] sm:$0xff]  ;;  %v8785_v51 = vpack.c.bf16 %v5138_v39, %v5134_v38  ;;  %v5179_v38 = vld [vmem:[#allocation6 + $0x4a8] sm:$0xff] }
 0x515   :  { %9024 = vmatprep.subr.bf16.mxu1 %v9023_v55  ;;  %v5142_v55 = vld [vmem:[#allocation6 + $0x380] sm:$0xff]  ;;  %v9043_v58 = vpack.c.bf16 %v5149_v49, %v5145_v48 }
 0x516   :  { %v8789_v1 = vpack.c.bf16 %v5146_v56, %v5142_v55  ;;  %v5174_v48 = vld [vmem:[#allocation6 + $0x480] sm:$0xff]  ;;  %v5183_v55 = vld [vmem:[#allocation6 + $0x4c8] sm:$0xff] }
 0x517   :  { %8770 = vmatpush1.bf16.msra.mxu0 %v8769_v61  ;;  %v5155_v61 = vld [vmem:[#allocation6 + $0x3e8] sm:$0xff]  ;;  %v5178_v49 = vld [vmem:[#allocation6 + $0x4a0] sm:$0xff] }
 0x518   :  { %9026 = vmatpush1.bf16.msra.mxu1 %v9025_v62  ;;  %8772 = vmatprep.subr.bf16.mxu0 %v8771_v63  ;;  %v2440_v62 = vsub.s32 3, %v9804_v20  ;;  %v5153_v63 = vld [vmem:[#allocation6 + $0x3d8] sm:$0xff]  ;;  %v8791_v4 = vpack.c.bf16 %v5155_v61, %v5151_v60  ;;  %v5187_v56 = vld [vmem:[#allocation6 + $0x4e8] sm:$0xff] }
 0x519   :  { %9028 = vmatprep.subr.bf16.mxu1 %v9027_v3  ;;  %v9045_v3 = vpack.c.bf16 %v5148_v59, %v5144_v57  ;;  %v9047_v8 = vpack.c.bf16 %v5157_v0, %v5153_v63  ;;  %v5185_v57 = vld [vmem:[#allocation6 + $0x4d8] sm:$0xff]  ;;  %v8805_v59 = vpack.c.bf16 %v5178_v49, %v5174_v48  ;;  %v8807_v61 = vpack.c.bf16 %v5187_v56, %v5183_v55  ;;  %v5182_v63 = vld [vmem:[#allocation6 + $0x4c0] sm:$0xff]  ;;  %v5220_v55 = vld [vmem:[#allocation6 + $0x5f0] sm:$0xff] }
 0x51a   :  { %v2441_v12 = vrot.slane %v9807_v36, %v2440_v62  ;;  %v5171_v36 = vld [vmem:[#allocation6 + $0x468] sm:$0xff]  ;;  %v5186_v0 = vld [vmem:[#allocation6 + $0x4e0] sm:$0xff] }
 0x51b   :  { %8774 = vmatpush1.bf16.msra.mxu0 %v8773_v9  ;;  %v5156_v9 = vld [vmem:[#allocation6 + $0x3f0] sm:$0xff]  ;;  %v5214_v49 = vld [vmem:[#allocation6 + $0x5c0] sm:$0xff]  ;;  %v5223_v56 = vld [vmem:[#allocation6 + $0x608] sm:$0xff] }
 0x51c   :  { %9030 = vmatpush1.bf16.msra.mxu1 %v9029_v10  ;;  %8776 = vmatprep.subr.bf16.mxu0 %v8775_v11  ;;  %v5159_v10 = vld [vmem:[#allocation6 + $0x408] sm:$0xff]  ;;  %v9049_v16 = vpack.c.bf16 %v5156_v9, %v5152_v7  ;;  %v9310_v24 = vadd.f32 %v9772_v50, %v2441_v12  ;;  %v5197_v7 = vld [vmem:[#allocation6 + $0x538] sm:$0xff]  ;;  %v5194_v12 = vld [vmem:[#allocation6 + $0x520] sm:$0xff] }
 0x51d   :  { %9032 = vmatprep.subr.bf16.mxu1 %v9031_v14  ;;  %v5163_v11 = vld [vmem:[#allocation6 + $0x428] sm:$0xff]  ;;  %v8793_v14 = vpack.c.bf16 %v5154_v6, %v5150_v5  ;;  %v5193_v6 = vld [vmem:[#allocation6 + $0x518] sm:$0xff] }
 0x51e   :  { %v8795_v17 = vpack.c.bf16 %v5163_v11, %v5159_v10  ;;  %v5025_v39 = vmax.f32 %v9310_v24, 0.0  ;;  %v5195_v5 = vld [vmem:[#allocation6 + $0x528] sm:$0xff]  ;;  %v5190_v11 = vld [vmem:[#allocation6 + $0x500] sm:$0xff] }
 0x51f   :  { %8778 = vmatpush1.bf16.msra.mxu0 %v8777_v21  ;;  %v9051_v21 = vpack.c.bf16 %v5165_v13, %v5161_v47  ;;  %v5192_v47 = vld [vmem:[#allocation6 + $0x510] sm:$0xff]  ;;  %v9067_v13 = vpack.c.bf16 %v5197_v7, %v5193_v6  ;;  %v8813_v19 = vpack.c.bf16 %v5194_v12, %v5190_v11  ;;  %v5202_v24 = vld [vmem:[#allocation6 + $0x560] sm:$0xff]  ;;  %v5235_v6 = vld [vmem:[#allocation6 + $0x668] sm:$0xff] }
 0x520   :  { %9034 = vmatpush1.bf16.msra.mxu1 %v9033_v22  ;;  %8780 = vmatprep.subr.bf16.mxu0 %v8779_v23  ;;  %v5160_v22 = vld [vmem:[#allocation6 + $0x410] sm:$0xff]  ;;  %v5233_v7 = vld [vmem:[#allocation6 + $0x658] sm:$0xff]  ;;  %v5230_v12 = vld [vmem:[#allocation6 + $0x640] sm:$0xff] }
 0x521   :  { %9036 = vmatprep.subr.bf16.mxu1 %v9035_v27  ;;  %v5164_v23 = vld [vmem:[#allocation6 + $0x430] sm:$0xff]  ;;  %v5169_v27 = vld [vmem:[#allocation6 + $0x458] sm:$0xff] }
 0x522   :  { %v9053_v41 = vpack.c.bf16 %v5164_v23, %v5160_v22  ;;  %v9055_v50 = vpack.c.bf16 %v5173_v28, %v5169_v27  ;;  %v5198_v23 = vld [vmem:[#allocation6 + $0x540] sm:$0xff]  ;;  %v5207_v27 = vld [vmem:[#allocation6 + $0x588] sm:$0xff] }
 0x523   :  { %8782 = vmatpush1.bf16.msra.mxu0 %v8781_v34  ;;  %v8799_v34 = vpack.c.bf16 %v5171_v36, %v5167_v25  ;;  %v5200_v25 = vld [vmem:[#allocation6 + $0x550] sm:$0xff]  ;;  %v5211_v28 = vld [vmem:[#allocation6 + $0x5a8] sm:$0xff]  ;;  %v8817_v30 = vpack.c.bf16 %v5202_v24, %v5198_v23  ;;  %v5238_v24 = vld [vmem:[#allocation6 + $0x680] sm:$0xff] }
 0x524   :  { %9038 = vmatpush1.bf16.msra.mxu1 %v9037_v35  ;;  %8784 = vmatprep.subr.bf16.mxu0 %v8783_v37  ;;  %v5172_v35 = vld [vmem:[#allocation6 + $0x470] sm:$0xff]  ;;  %v5175_v37 = vld [vmem:[#allocation6 + $0x488] sm:$0xff] }
 0x525   :  { %9040 = vmatprep.subr.bf16.mxu1 %v9039_v42  ;;  %v5181_v42 = vld [vmem:[#allocation6 + $0x4b8] sm:$0xff]  ;;  %v9057_v44 = vpack.c.bf16 %v5172_v35, %v5168_v32  ;;  %v8803_v45 = vpack.c.bf16 %v5179_v38, %v5175_v37  ;;  %v8819_v32 = vpack.c.bf16 %v5211_v28, %v5207_v27  ;;  %v5210_v35 = vld [vmem:[#allocation6 + $0x5a0] sm:$0xff]  ;;  %v5208_v37 = vld [vmem:[#allocation6 + $0x590] sm:$0xff] }
 0x526   :  { %v5244_v27 = vld [vmem:[#allocation6 + $0x6b0] sm:$0xff]  ;;  %v5247_v28 = vld [vmem:[#allocation6 + $0x6c8] sm:$0xff] }
 0x527   :  { %8786 = vmatpush1.bf16.msra.mxu0 %v8785_v51  ;;  %v5176_v51 = vld [vmem:[#allocation6 + $0x490] sm:$0xff] }
 0x528   :  { %9042 = vmatpush1.bf16.msra.mxu1 %v9041_v53  ;;  %8788 = vmatprep.subr.bf16.mxu0 %v8787_v54  ;;  %v9059_v53 = vpack.c.bf16 %v5181_v42, %v5177_v40  ;;  %v5180_v54 = vld [vmem:[#allocation6 + $0x4b0] sm:$0xff]  ;;  %v5219_v40 = vld [vmem:[#allocation6 + $0x5e8] sm:$0xff]  ;;  %v5217_v42 = vld [vmem:[#allocation6 + $0x5d8] sm:$0xff] }
 0x529   :  { %9044 = vmatprep.subr.bf16.mxu1 %v9043_v58  ;;  %v5189_v58 = vld [vmem:[#allocation6 + $0x4f8] sm:$0xff]  ;;  %v9061_v60 = vpack.c.bf16 %v5180_v54, %v5176_v51  ;;  %v5218_v51 = vld [vmem:[#allocation6 + $0x5e0] sm:$0xff] }
 0x52a   :  { %v9063_v2 = vpack.c.bf16 %v5189_v58, %v5185_v57  ;;  %v5227_v57 = vld [vmem:[#allocation6 + $0x628] sm:$0xff]  ;;  %v5225_v58 = vld [vmem:[#allocation6 + $0x618] sm:$0xff] }
 0x52b   :  { %8790 = vmatpush1.bf16.msra.mxu0 %v8789_v1  ;;  %v5184_v1 = vld [vmem:[#allocation6 + $0x4d0] sm:$0xff] }
 0x52c   :  { %9046 = vmatpush1.bf16.msra.mxu1 %v9045_v3  ;;  %8792 = vmatprep.subr.bf16.mxu0 %v8791_v4  ;;  %v5188_v3 = vld [vmem:[#allocation6 + $0x4f0] sm:$0xff]  ;;  %v5191_v4 = vld [vmem:[#allocation6 + $0x508] sm:$0xff] }
 0x52d   :  { %9048 = vmatprep.subr.bf16.mxu1 %v9047_v8  ;;  %v8809_v8 = vpack.c.bf16 %v5186_v0, %v5182_v63  ;;  %v9065_v9 = vpack.c.bf16 %v5188_v3, %v5184_v1  ;;  %v8811_v10 = vpack.c.bf16 %v5195_v5, %v5191_v4  ;;  %v8827_v63 = vpack.c.bf16 %v5227_v57, %v5223_v56  ;;  %v5222_v0 = vld [vmem:[#allocation6 + $0x600] sm:$0xff]  ;;  %v5228_v4 = vld [vmem:[#allocation6 + $0x630] sm:$0xff]  ;;  %v5231_v5 = vld [vmem:[#allocation6 + $0x648] sm:$0xff] }
 0x52e   :  { %v5226_v1 = vld [vmem:[#allocation6 + $0x620] sm:$0xff]  ;;  %v8831_v11 = vpack.c.bf16 %v5235_v6, %v5231_v5  ;;  %v5260_v56 = vld [vmem:[#allocation6 + $0x730] sm:$0xff]  ;;  %v5263_v57 = vld [vmem:[#allocation6 + $0x748] sm:$0xff] }
 0x52f   :  { %8794 = vmatpush1.bf16.msra.mxu0 %v8793_v14  ;;  %v5196_v14 = vld [vmem:[#allocation6 + $0x530] sm:$0xff]  ;;  %v5271_v6 = vld [vmem:[#allocation6 + $0x788] sm:$0xff] }
 0x530   :  { %9050 = vmatpush1.bf16.msra.mxu1 %v9049_v16  ;;  %8796 = vmatprep.subr.bf16.mxu0 %v8795_v17  ;;  %v5203_v16 = vld [vmem:[#allocation6 + $0x568] sm:$0xff]  ;;  %v5201_v17 = vld [vmem:[#allocation6 + $0x558] sm:$0xff]  ;;  %v5268_v5 = vld [vmem:[#allocation6 + $0x770] sm:$0xff] }
 0x531   :  { %9052 = vmatprep.subr.bf16.mxu1 %v9051_v21  ;;  %v9069_v21 = vpack.c.bf16 %v5196_v14, %v5192_v47  ;;  %v8815_v22 = vpack.c.bf16 %v5203_v16, %v5199_v15  ;;  %v9071_v36 = vpack.c.bf16 %v5205_v18, %v5201_v17  ;;  %v5234_v47 = vld [vmem:[#allocation6 + $0x660] sm:$0xff]  ;;  %v5236_v15 = vld [vmem:[#allocation6 + $0x670] sm:$0xff]  ;;  %v5239_v16 = vld [vmem:[#allocation6 + $0x688] sm:$0xff] }
 0x532   :  { %5629 = vmatmul.mubr.f32.vlgmr.msra.gmra.mrb[4].mxu0 %v5022_v29  ;;  %v5243_v17 = vld [vmem:[#allocation6 + $0x6a8] sm:$0xff]  ;;  %v5241_v18 = vld [vmem:[#allocation6 + $0x698] sm:$0xff] }
 0x533   :  { %5913 = vmatmul.mubr.f32.vlgmr.msra.gmra.mrb[4].mxu1 %v5022_v29  ;;  %8798 = vmatpush1.bf16.msra.mxu0 %v8797_v26  ;;  %v5204_v26 = vld [vmem:[#allocation6 + $0x570] sm:$0xff]  ;;  %v5209_v29 = vld [vmem:[#allocation6 + $0x598] sm:$0xff]  ;;  %v8835_v23 = vpack.c.bf16 %v5243_v17, %v5239_v16 }
 0x534   :  { %5699 = vmatprep.mubr.f32.mxu0 %v5025_v39  ;;  %9054 = vmatpush1.bf16.msra.mxu1 %v9053_v41  ;;  %v5213_v41 = vld [vmem:[#allocation6 + $0x5b8] sm:$0xff]  ;;  %v9073_v31 = vpack.c.bf16 %v5204_v26, %v5200_v25  ;;  %v5242_v25 = vld [vmem:[#allocation6 + $0x6a0] sm:$0xff]  ;;  %v5276_v17 = vld [vmem:[#allocation6 + $0x7b0] sm:$0xff] }
 0x535   :  { %5983 = vmatprep.mubr.f32.mxu1 %v5025_v39  ;;  %8800 = vmatprep.subr.bf16.mxu0 %v8799_v34  ;;  %v5206_v34 = vld [vmem:[#allocation6 + $0x580] sm:$0xff]  ;;  %v9075_v38 = vpack.c.bf16 %v5213_v41, %v5209_v29  ;;  %v5212_v39 = vld [vmem:[#allocation6 + $0x5b0] sm:$0xff]  ;;  %v5251_v29 = vld [vmem:[#allocation6 + $0x6e8] sm:$0xff] }
 0x536   :  { %9056 = vmatprep.subr.bf16.mxu1 %v9055_v50  ;;  %v5215_v50 = vld [vmem:[#allocation6 + $0x5c8] sm:$0xff]  ;;  %v5249_v41 = vld [vmem:[#allocation6 + $0x6d8] sm:$0xff] }
 0x537   :  { %8802 = vmatpush1.bf16.msra.mxu0 %v8801_v43  ;;  %v5221_v43 = vld [vmem:[#allocation6 + $0x5f8] sm:$0xff]  ;;  %v8823_v48 = vpack.c.bf16 %v5219_v40, %v5215_v50  ;;  %v5252_v50 = vld [vmem:[#allocation6 + $0x6f0] sm:$0xff]  ;;  %v5255_v40 = vld [vmem:[#allocation6 + $0x708] sm:$0xff] }
 0x538   :  { %9058 = vmatpush1.bf16.msra.mxu1 %v9057_v44  ;;  %8804 = vmatprep.subr.bf16.mxu0 %v8803_v45  ;;  %v8821_v44 = vpack.c.bf16 %v5210_v35, %v5206_v34  ;;  %v9077_v45 = vpack.c.bf16 %v5212_v39, %v5208_v37  ;;  %v9079_v54 = vpack.c.bf16 %v5221_v43, %v5217_v42  ;;  %v5246_v35 = vld [vmem:[#allocation6 + $0x6c0] sm:$0xff]  ;;  %v5259_v42 = vld [vmem:[#allocation6 + $0x728] sm:$0xff]  ;;  %v5257_v43 = vld [vmem:[#allocation6 + $0x718] sm:$0xff] }
 0x539   :  { %9060 = vmatprep.subr.bf16.mxu1 %v9059_v53  ;;  %v5216_v53 = vld [vmem:[#allocation6 + $0x5d0] sm:$0xff]  ;;  %v8839_v34 = vpack.c.bf16 %v5251_v29, %v5247_v28  ;;  %v5250_v37 = vld [vmem:[#allocation6 + $0x6e0] sm:$0xff] }
 0x53a   :  { %v5282_v28 = vld [vmem:[#allocation6 + $0x7e0] sm:$0xff]  ;;  %v5280_v29 = vld [vmem:[#allocation6 + $0x7d0] sm:$0xff] }
 0x53b   :  { %8806 = vmatpush1.bf16.msra.mxu0 %v8805_v59  ;;  %v5229_v59 = vld [vmem:[#allocation6 + $0x638] sm:$0xff] }
 0x53c   :  { %9062 = vmatpush1.bf16.msra.mxu1 %v9061_v60  ;;  %8808 = vmatprep.subr.bf16.mxu0 %v8807_v61  ;;  %v8825_v60 = vpack.c.bf16 %v5218_v51, %v5214_v49  ;;  %v9081_v61 = vpack.c.bf16 %v5220_v55, %v5216_v53  ;;  %v9083_v3 = vpack.c.bf16 %v5229_v59, %v5225_v58  ;;  %v5254_v51 = vld [vmem:[#allocation6 + $0x700] sm:$0xff]  ;;  %v5267_v58 = vld [vmem:[#allocation6 + $0x768] sm:$0xff]  ;;  %v5265_v59 = vld [vmem:[#allocation6 + $0x758] sm:$0xff] }
 0x53d   :  { %9064 = vmatprep.subr.bf16.mxu1 %v9063_v2  ;;  %v5224_v2 = vld [vmem:[#allocation6 + $0x610] sm:$0xff]  ;;  %v8843_v49 = vpack.c.bf16 %v5259_v42, %v5255_v40  ;;  %v5258_v53 = vld [vmem:[#allocation6 + $0x720] sm:$0xff] }
 0x53e   :  { %v5286_v40 = vld [vmem:[#allocation6 + $0x800] sm:$0xff] }
 0x53f   :  { %8810 = vmatpush1.bf16.msra.mxu0 %v8809_v8  ;;  %v5237_v8 = vld [vmem:[#allocation6 + $0x678] sm:$0xff]  ;;  %v5290_v42 = vld [vmem:[#allocation6 + $0x820] sm:$0xff] }
 0x540   :  { %9066 = vmatpush1.bf16.msra.mxu1 %v9065_v9  ;;  %8812 = vmatprep.subr.bf16.mxu0 %v8811_v10  ;;  %v8829_v9 = vpack.c.bf16 %v5226_v1, %v5222_v0  ;;  %v9085_v10 = vpack.c.bf16 %v5228_v4, %v5224_v2  ;;  %v9087_v14 = vpack.c.bf16 %v5237_v8, %v5233_v7  ;;  %v5262_v1 = vld [vmem:[#allocation6 + $0x740] sm:$0xff]  ;;  %v5275_v7 = vld [vmem:[#allocation6 + $0x7a8] sm:$0xff]  ;;  %v5273_v8 = vld [vmem:[#allocation6 + $0x798] sm:$0xff] }
 0x541   :  { %9068 = vmatprep.subr.bf16.mxu1 %v9067_v13  ;;  %v5232_v13 = vld [vmem:[#allocation6 + $0x650] sm:$0xff]  ;;  %v8847_v0 = vpack.c.bf16 %v5267_v58, %v5263_v57  ;;  %v5266_v2 = vld [vmem:[#allocation6 + $0x760] sm:$0xff] }
 0x542   :  { %v5294_v57 = vld [vmem:[#allocation6 + $0x840] sm:$0xff] }
 0x543   :  { %8814 = vmatpush1.bf16.msra.mxu0 %v8813_v19  ;;  %v5245_v19 = vld [vmem:[#allocation6 + $0x6b8] sm:$0xff]  ;;  %v5298_v58 = vld [vmem:[#allocation6 + $0x860] sm:$0xff] }
 0x544   :  { %9070 = vmatpush1.bf16.msra.mxu1 %v9069_v21  ;;  %8816 = vmatprep.subr.bf16.mxu0 %v8815_v22  ;;  %v8833_v21 = vpack.c.bf16 %v5234_v47, %v5230_v12  ;;  %v9089_v22 = vpack.c.bf16 %v5236_v15, %v5232_v13  ;;  %v9091_v26 = vpack.c.bf16 %v5245_v19, %v5241_v18  ;;  %v5270_v13 = vld [vmem:[#allocation6 + $0x780] sm:$0xff]  ;;  %v5272_v15 = vld [vmem:[#allocation6 + $0x790] sm:$0xff]  ;;  %v5279_v18 = vld [vmem:[#allocation6 + $0x7c8] sm:$0xff] }
 0x545   :  { %9072 = vmatprep.subr.bf16.mxu1 %v9071_v36  ;;  %v5240_v36 = vld [vmem:[#allocation6 + $0x690] sm:$0xff]  ;;  %v8851_v47 = vpack.c.bf16 %v5275_v7, %v5271_v6  ;;  %v5283_v19 = vld [vmem:[#allocation6 + $0x7e8] sm:$0xff]  ;;  %v5302_v6 = vld [vmem:[#allocation6 + $0x880] sm:$0xff] }
 0x546   :  { %v5306_v7 = vld [vmem:[#allocation6 + $0x8a0] sm:$0xff] }
 0x547   :  { %8818 = vmatpush1.bf16.msra.mxu0 %v8817_v30  ;;  %v5253_v30 = vld [vmem:[#allocation6 + $0x6f8] sm:$0xff] }
 0x548   :  { %9074 = vmatpush1.bf16.msra.mxu1 %v9073_v31  ;;  %8820 = vmatprep.subr.bf16.mxu0 %v8819_v32  ;;  %v8837_v31 = vpack.c.bf16 %v5242_v25, %v5238_v24  ;;  %v9093_v32 = vpack.c.bf16 %v5244_v27, %v5240_v36  ;;  %v9095_v39 = vpack.c.bf16 %v5253_v30, %v5249_v41  ;;  %v9827_v24 = vld [vmem:[#allocation4] sm:$0xff]  ;;  %v5278_v27 = vld [vmem:[#allocation6 + $0x7c0] sm:$0xff]  ;;  %v5284_v30 = vld [vmem:[#allocation6 + $0x7f0] sm:$0xff] }
 0x549   :  { %9076 = vmatprep.subr.bf16.mxu1 %v9075_v38  ;;  %v5248_v38 = vld [vmem:[#allocation6 + $0x6d0] sm:$0xff]  ;;  %v9109_v36 = vpack.c.bf16 %v5276_v17, %v5272_v15  ;;  %v8869_v15 = vpack.c.bf16 %v5306_v7, %v5302_v6 }
 0x54b   :  { %8822 = vmatpush1.bf16.msra.mxu0 %v8821_v44  ;;  %v5261_v44 = vld [vmem:[#allocation6 + $0x738] sm:$0xff] }
 0x54c   :  { %9078 = vmatpush1.bf16.msra.mxu1 %v9077_v45  ;;  %8824 = vmatprep.subr.bf16.mxu0 %v8823_v48  ;;  %v8841_v45 = vpack.c.bf16 %v5250_v37, %v5246_v35  ;;  %v9097_v48 = vpack.c.bf16 %v5252_v50, %v5248_v38  ;;  %v9099_v55 = vpack.c.bf16 %v5261_v44, %v5257_v43  ;;  %v5293_v35 = vld [vmem:[#allocation6 + $0x838] sm:$0xff]  ;;  %v5288_v43 = vld [vmem:[#allocation6 + $0x810] sm:$0xff] }
 0x54d   :  { %9080 = vmatprep.subr.bf16.mxu1 %v9079_v54  ;;  %v5256_v54 = vld [vmem:[#allocation6 + $0x710] sm:$0xff]  ;;  %v8857_v37 = vpack.c.bf16 %v5282_v28, %v5278_v27  ;;  %v5325_v27 = vld [vmem:[#allocation6 + $0x938] sm:$0xff] }
 0x54f   :  { %8826 = vmatpush1.bf16.msra.mxu0 %v8825_v60  ;;  %v5269_v60 = vld [vmem:[#allocation6 + $0x778] sm:$0xff] }
 0x550   :  { %9082 = vmatpush1.bf16.msra.mxu1 %v9081_v61  ;;  %8828 = vmatprep.subr.bf16.mxu0 %v8827_v63  ;;  %v8845_v61 = vpack.c.bf16 %v5258_v53, %v5254_v51  ;;  %v9101_v63 = vpack.c.bf16 %v5260_v56, %v5256_v54  ;;  %v9103_v4 = vpack.c.bf16 %v5269_v60, %v5265_v59  ;;  %v5297_v51 = vld [vmem:[#allocation6 + $0x858] sm:$0xff]  ;;  %v5296_v59 = vld [vmem:[#allocation6 + $0x850] sm:$0xff] }
 0x551   :  { %9084 = vmatprep.subr.bf16.mxu1 %v9083_v3  ;;  %v5264_v3 = vld [vmem:[#allocation6 + $0x750] sm:$0xff]  ;;  %v5301_v53 = vld [vmem:[#allocation6 + $0x878] sm:$0xff]  ;;  %v8861_v54 = vpack.c.bf16 %v5290_v42, %v5286_v40 }
 0x552   :  { %v9105_v12 = vpack.c.bf16 %v5268_v5, %v5264_v3  ;;  %v9119_v60 = vpack.c.bf16 %v5301_v53, %v5297_v51  ;;  %v8865_v3 = vpack.c.bf16 %v5298_v58, %v5294_v57  ;;  %v5332_v51 = vld [vmem:[#allocation6 + $0x970] sm:$0xff]  ;;  %v5335_v53 = vld [vmem:[#allocation6 + $0x988] sm:$0xff] }
 0x553   :  { %8830 = vmatpush1.bf16.msra.mxu0 %v8829_v9  ;;  %v5277_v9 = vld [vmem:[#allocation6 + $0x7b8] sm:$0xff] }
 0x554   :  { %9086 = vmatpush1.bf16.msra.mxu1 %v9085_v10  ;;  %8832 = vmatprep.subr.bf16.mxu0 %v8831_v11  ;;  %v8849_v10 = vpack.c.bf16 %v5266_v2, %v5262_v1  ;;  %v2436_v11 = vsub.s32 2, %v9804_v20  ;;  %v9107_v16 = vpack.c.bf16 %v5277_v9, %v5273_v8  ;;  %v5305_v1 = vld [vmem:[#allocation6 + $0x898] sm:$0xff]  ;;  %v5304_v8 = vld [vmem:[#allocation6 + $0x890] sm:$0xff] }
 0x555   :  { %9088 = vmatprep.subr.bf16.mxu1 %v9087_v14  ;;  %v5274_v14 = vld [vmem:[#allocation6 + $0x7a0] sm:$0xff]  ;;  %v5309_v2 = vld [vmem:[#allocation6 + $0x8b8] sm:$0xff] }
 0x556   :  { %v2437_v25 = vrot.slane %v9827_v24, %v2436_v11  ;;  %v9123_v9 = vpack.c.bf16 %v5309_v2, %v5305_v1  ;;  %v5343_v1 = vld [vmem:[#allocation6 + $0x9c8] sm:$0xff] }
 0x557   :  { %8834 = vmatpush1.bf16.msra.mxu0 %v8833_v21  ;;  %v5281_v21 = vld [vmem:[#allocation6 + $0x7d8] sm:$0xff]  ;;  %v5347_v2 = vld [vmem:[#allocation6 + $0x9e8] sm:$0xff] }
 0x558   :  { %9090 = vmatpush1.bf16.msra.mxu1 %v9089_v22  ;;  %8836 = vmatprep.subr.bf16.mxu0 %v8835_v23  ;;  %v5285_v22 = vld [vmem:[#allocation6 + $0x7f8] sm:$0xff]  ;;  %v8853_v23 = vpack.c.bf16 %v5274_v14, %v5270_v13  ;;  %v9309_v38 = vadd.f32 %v9768_v46, %v2437_v25  ;;  %v5319_v25 = vld [vmem:[#allocation6 + $0x908] sm:$0xff]  ;;  %v8887_v7 = vpack.c.bf16 %v5347_v2, %v5343_v1  ;;  %v5380_v2 = vld [vmem:[#allocation6 + $0xaf0] sm:$0xff] }
 0x559   :  { %9092 = vmatprep.subr.bf16.mxu1 %v9091_v26  ;;  %v8855_v26 = vpack.c.bf16 %v5283_v19, %v5279_v18  ;;  %v9111_v41 = vpack.c.bf16 %v5285_v22, %v5281_v21  ;;  %v5313_v13 = vld [vmem:[#allocation6 + $0x8d8] sm:$0xff]  ;;  %v5310_v18 = vld [vmem:[#allocation6 + $0x8c0] sm:$0xff]  ;;  %v5312_v21 = vld [vmem:[#allocation6 + $0x8d0] sm:$0xff] }
 0x55a   :  { %v5317_v14 = vld [vmem:[#allocation6 + $0x8f8] sm:$0xff]  ;;  %v5314_v19 = vld [vmem:[#allocation6 + $0x8e0] sm:$0xff] }
 0x55b   :  { %8838 = vmatpush1.bf16.msra.mxu0 %v8837_v31  ;;  %v5287_v31 = vld [vmem:[#allocation6 + $0x808] sm:$0xff]  ;;  %v9127_v22 = vpack.c.bf16 %v5317_v14, %v5313_v13  ;;  %v8873_v28 = vpack.c.bf16 %v5314_v19, %v5310_v18 }
 0x55c   :  { %9094 = vmatpush1.bf16.msra.mxu1 %v9093_v32  ;;  %8840 = vmatprep.subr.bf16.mxu0 %v8839_v34  ;;  %v5291_v32 = vld [vmem:[#allocation6 + $0x828] sm:$0xff]  ;;  %v5289_v34 = vld [vmem:[#allocation6 + $0x818] sm:$0xff] }
 0x55d   :  { %9096 = vmatprep.subr.bf16.mxu1 %v9095_v39  ;;  %v9113_v39 = vpack.c.bf16 %v5284_v30, %v5280_v29  ;;  %v8859_v50 = vpack.c.bf16 %v5291_v32, %v5287_v31  ;;  %v9115_v44 = vpack.c.bf16 %v5293_v35, %v5289_v34  ;;  %v5318_v30 = vld [vmem:[#allocation6 + $0x900] sm:$0xff]  ;;  %v5320_v32 = vld [vmem:[#allocation6 + $0x910] sm:$0xff]  ;;  %v5351_v13 = vld [vmem:[#allocation6 + $0xa08] sm:$0xff] }
 0x55e   :  { %v5322_v31 = vld [vmem:[#allocation6 + $0x920] sm:$0xff]  ;;  %v5324_v35 = vld [vmem:[#allocation6 + $0x930] sm:$0xff]  ;;  %v5355_v14 = vld [vmem:[#allocation6 + $0xa28] sm:$0xff] }
 0x55f   :  { %8842 = vmatpush1.bf16.msra.mxu0 %v8841_v45  ;;  %v5292_v45 = vld [vmem:[#allocation6 + $0x830] sm:$0xff]  ;;  %v8877_v40 = vpack.c.bf16 %v5322_v31, %v5318_v30  ;;  %v9133_v42 = vpack.c.bf16 %v5324_v35, %v5320_v32  ;;  %v8891_v19 = vpack.c.bf16 %v5355_v14, %v5351_v13  ;;  %v5358_v32 = vld [vmem:[#allocation6 + $0xa40] sm:$0xff] }
 0x560   :  { %9098 = vmatpush1.bf16.msra.mxu1 %v9097_v48  ;;  %8844 = vmatprep.subr.bf16.mxu0 %v8843_v49  ;;  %v5295_v48 = vld [vmem:[#allocation6 + $0x848] sm:$0xff]  ;;  %v9117_v46 = vpack.c.bf16 %v5292_v45, %v5288_v43  ;;  %v5330_v45 = vld [vmem:[#allocation6 + $0x960] sm:$0xff]  ;;  %v5360_v35 = vld [vmem:[#allocation6 + $0xa50] sm:$0xff] }
 0x561   :  { %9100 = vmatprep.subr.bf16.mxu1 %v9099_v55  ;;  %v5299_v49 = vld [vmem:[#allocation6 + $0x868] sm:$0xff]  ;;  %v5024_v55 = vmax.f32 %v9309_v38, 0.0  ;;  %v5388_v14 = vld [vmem:[#allocation6 + $0xb30] sm:$0xff] }
 0x562   :  { %v8863_v56 = vpack.c.bf16 %v5299_v49, %v5295_v48  ;;  %v5331_v38 = vld [vmem:[#allocation6 + $0x968] sm:$0xff]  ;;  %v5328_v48 = vld [vmem:[#allocation6 + $0x950] sm:$0xff] }
 0x563   :  { %8846 = vmatpush1.bf16.msra.mxu0 %v8845_v61  ;;  %v5300_v61 = vld [vmem:[#allocation6 + $0x870] sm:$0xff]  ;;  %v9137_v57 = vpack.c.bf16 %v5332_v51, %v5328_v48  ;;  %v5366_v48 = vld [vmem:[#allocation6 + $0xa80] sm:$0xff] }
 0x564   :  { %9102 = vmatpush1.bf16.msra.mxu1 %v9101_v63  ;;  %8848 = vmatprep.subr.bf16.mxu0 %v8847_v0  ;;  %v5303_v63 = vld [vmem:[#allocation6 + $0x888] sm:$0xff]  ;;  %v5368_v51 = vld [vmem:[#allocation6 + $0xa90] sm:$0xff] }
 0x565   :  { %9104 = vmatprep.subr.bf16.mxu1 %v9103_v4  ;;  %v5307_v0 = vld [vmem:[#allocation6 + $0x8a8] sm:$0xff]  ;;  %v9121_v4 = vpack.c.bf16 %v5300_v61, %v5296_v59  ;;  %v5334_v59 = vld [vmem:[#allocation6 + $0x980] sm:$0xff]  ;;  %v5336_v61 = vld [vmem:[#allocation6 + $0x990] sm:$0xff] }
 0x566   :  { %v8867_v5 = vpack.c.bf16 %v5307_v0, %v5303_v63  ;;  %v5340_v0 = vld [vmem:[#allocation6 + $0x9b0] sm:$0xff] }
 0x567   :  { %8850 = vmatpush1.bf16.msra.mxu0 %v8849_v10  ;;  %v5308_v10 = vld [vmem:[#allocation6 + $0x8b0] sm:$0xff]  ;;  %v9141_v6 = vpack.c.bf16 %v5340_v0, %v5336_v61  ;;  %v5374_v61 = vld [vmem:[#allocation6 + $0xac0] sm:$0xff] }
 0x568   :  { %9106 = vmatpush1.bf16.msra.mxu1 %v9105_v12  ;;  %8852 = vmatprep.subr.bf16.mxu0 %v8851_v47  ;;  %v5311_v12 = vld [vmem:[#allocation6 + $0x8c8] sm:$0xff]  ;;  %v5376_v0 = vld [vmem:[#allocation6 + $0xad0] sm:$0xff] }
 0x569   :  { %9108 = vmatprep.subr.bf16.mxu1 %v9107_v16  ;;  %v5315_v47 = vld [vmem:[#allocation6 + $0x8e8] sm:$0xff]  ;;  %v9125_v16 = vpack.c.bf16 %v5308_v10, %v5304_v8  ;;  %v5342_v8 = vld [vmem:[#allocation6 + $0x9c0] sm:$0xff]  ;;  %v5344_v10 = vld [vmem:[#allocation6 + $0x9d0] sm:$0xff] }
 0x56a   :  { %v8871_v17 = vpack.c.bf16 %v5315_v47, %v5311_v12  ;;  %v5348_v47 = vld [vmem:[#allocation6 + $0x9f0] sm:$0xff] }
 0x56b   :  { %8854 = vmatpush1.bf16.msra.mxu0 %v8853_v23  ;;  %v5316_v23 = vld [vmem:[#allocation6 + $0x8f0] sm:$0xff]  ;;  %v9145_v18 = vpack.c.bf16 %v5348_v47, %v5344_v10  ;;  %v5382_v10 = vld [vmem:[#allocation6 + $0xb00] sm:$0xff] }
 0x56c   :  { %9110 = vmatpush1.bf16.msra.mxu1 %v9109_v36  ;;  %8856 = vmatprep.subr.bf16.mxu0 %v8855_v26  ;;  %v5323_v36 = vld [vmem:[#allocation6 + $0x928] sm:$0xff]  ;;  %v5321_v26 = vld [vmem:[#allocation6 + $0x918] sm:$0xff]  ;;  %v9129_v29 = vpack.c.bf16 %v5316_v23, %v5312_v21  ;;  %v5350_v21 = vld [vmem:[#allocation6 + $0xa00] sm:$0xff] }
 0x56d   :  { %9112 = vmatprep.subr.bf16.mxu1 %v9111_v41  ;;  %v8875_v41 = vpack.c.bf16 %v5323_v36, %v5319_v25  ;;  %v9131_v34 = vpack.c.bf16 %v5325_v27, %v5321_v26  ;;  %v5352_v23 = vld [vmem:[#allocation6 + $0xa10] sm:$0xff]  ;;  %v5359_v26 = vld [vmem:[#allocation6 + $0xa48] sm:$0xff] }
 0x56e   :  { %v5356_v36 = vld [vmem:[#allocation6 + $0xa30] sm:$0xff]  ;;  %v5363_v27 = vld [vmem:[#allocation6 + $0xa68] sm:$0xff] }
 0x56f   :  { %8858 = vmatpush1.bf16.msra.mxu0 %v8857_v37  ;;  %v5327_v37 = vld [vmem:[#allocation6 + $0x948] sm:$0xff]  ;;  %v9149_v30 = vpack.c.bf16 %v5356_v36, %v5352_v23  ;;  %v8895_v31 = vpack.c.bf16 %v5363_v27, %v5359_v26  ;;  %v5384_v47 = vld [vmem:[#allocation6 + $0xb10] sm:$0xff]  ;;  %v5390_v23 = vld [vmem:[#allocation6 + $0xb40] sm:$0xff] }
 0x570   :  { %9114 = vmatpush1.bf16.msra.mxu1 %v9113_v39  ;;  %8860 = vmatprep.subr.bf16.mxu0 %v8859_v50  ;;  %v5329_v39 = vld [vmem:[#allocation6 + $0x958] sm:$0xff]  ;;  %v8879_v43 = vpack.c.bf16 %v5331_v38, %v5327_v37  ;;  %v5364_v38 = vld [vmem:[#allocation6 + $0xa70] sm:$0xff] }
 0x571   :  { %9116 = vmatprep.subr.bf16.mxu1 %v9115_v44  ;;  %v5333_v50 = vld [vmem:[#allocation6 + $0x978] sm:$0xff]  ;;  %v5326_v44 = vld [vmem:[#allocation6 + $0x940] sm:$0xff]  ;;  %v5392_v36 = vld [vmem:[#allocation6 + $0xb50] sm:$0xff] }
 0x572   :  { %5700 = vmatmul.mubr.f32.vlgmr.msra.gmra.mrb[4].mxu0 %v5024_v55  ;;  %v9135_v49 = vpack.c.bf16 %v5333_v50, %v5329_v39  ;;  %v5367_v39 = vld [vmem:[#allocation6 + $0xa88] sm:$0xff]  ;;  %v5396_v27 = vld [vmem:[#allocation6 + $0xb70] sm:$0xff] }
 0x573   :  { %5984 = vmatmul.mubr.f32.vlgmr.msra.gmra.mrb[4].mxu1 %v5024_v55  ;;  %8862 = vmatpush1.bf16.msra.mxu0 %v8861_v54  ;;  %v5339_v54 = vld [vmem:[#allocation6 + $0x9a8] sm:$0xff]  ;;  %v5337_v55 = vld [vmem:[#allocation6 + $0x998] sm:$0xff] }
 0x574   :  { %9118 = vmatpush1.bf16.msra.mxu1 %v9117_v46  ;;  %8864 = vmatprep.subr.bf16.mxu0 %v8863_v56  ;;  %v5341_v46 = vld [vmem:[#allocation6 + $0x9b8] sm:$0xff]  ;;  %v8881_v56 = vpack.c.bf16 %v5330_v45, %v5326_v44  ;;  %v8883_v58 = vpack.c.bf16 %v5339_v54, %v5335_v53  ;;  %v5371_v50 = vld [vmem:[#allocation6 + $0xaa8] sm:$0xff]  ;;  %v9153_v44 = vpack.c.bf16 %v5364_v38, %v5360_v35  ;;  %v5372_v54 = vld [vmem:[#allocation6 + $0xab0] sm:$0xff] }
 0x575   :  { %9120 = vmatprep.subr.bf16.mxu1 %v9119_v60  ;;  %v5338_v60 = vld [vmem:[#allocation6 + $0x9a0] sm:$0xff]  ;;  %v9139_v63 = vpack.c.bf16 %v5341_v46, %v5337_v55  ;;  %v8899_v45 = vpack.c.bf16 %v5371_v50, %v5367_v39  ;;  %v5375_v55 = vld [vmem:[#allocation6 + $0xac8] sm:$0xff]  ;;  %v5400_v38 = vld [vmem:[#allocation6 + $0xb90] sm:$0xff] }
 0x576   :  { %v5379_v46 = vld [vmem:[#allocation6 + $0xae8] sm:$0xff]  ;;  %v5398_v35 = vld [vmem:[#allocation6 + $0xb80] sm:$0xff]  ;;  %v5404_v50 = vld [vmem:[#allocation6 + $0xbb0] sm:$0xff] }
 0x577   :  { %8866 = vmatpush1.bf16.msra.mxu0 %v8865_v3  ;;  %v5345_v3 = vld [vmem:[#allocation6 + $0x9d8] sm:$0xff] }
 0x578   :  { %9122 = vmatpush1.bf16.msra.mxu1 %v9121_v4  ;;  %8868 = vmatprep.subr.bf16.mxu0 %v8867_v5  ;;  %v5349_v4 = vld [vmem:[#allocation6 + $0x9f8] sm:$0xff]  ;;  %v8885_v5 = vpack.c.bf16 %v5338_v60, %v5334_v59  ;;  %v9157_v59 = vpack.c.bf16 %v5372_v54, %v5368_v51  ;;  %v8903_v60 = vpack.c.bf16 %v5379_v46, %v5375_v55  ;;  %v5406_v51 = vld [vmem:[#allocation6 + $0xbc0] sm:$0xff]  ;;  %v5408_v54 = vld [vmem:[#allocation6 + $0xbd0] sm:$0xff] }
 0x579   :  { %9124 = vmatprep.subr.bf16.mxu1 %v9123_v9  ;;  %v5346_v9 = vld [vmem:[#allocation6 + $0x9e0] sm:$0xff]  ;;  %v9143_v12 = vpack.c.bf16 %v5349_v4, %v5345_v3  ;;  %v5383_v3 = vld [vmem:[#allocation6 + $0xb08] sm:$0xff]  ;;  %v5412_v46 = vld [vmem:[#allocation6 + $0xbf0] sm:$0xff] }
 0x57a   :  { %v5387_v4 = vld [vmem:[#allocation6 + $0xb28] sm:$0xff] }
 0x57b   :  { %8870 = vmatpush1.bf16.msra.mxu0 %v8869_v15  ;;  %v5353_v15 = vld [vmem:[#allocation6 + $0xa18] sm:$0xff] }
 0x57c   :  { %9126 = vmatpush1.bf16.msra.mxu1 %v9125_v16  ;;  %8872 = vmatprep.subr.bf16.mxu0 %v8871_v17  ;;  %v5357_v16 = vld [vmem:[#allocation6 + $0xa38] sm:$0xff]  ;;  %v8889_v17 = vpack.c.bf16 %v5346_v9, %v5342_v8  ;;  %v9161_v8 = vpack.c.bf16 %v5380_v2, %v5376_v0  ;;  %v8907_v9 = vpack.c.bf16 %v5387_v4, %v5383_v3  ;;  %v2448_v2 = vsub.s32 5, %v9804_v20 }
 0x57d   :  { %9128 = vmatprep.subr.bf16.mxu1 %v9127_v22  ;;  %v5354_v22 = vld [vmem:[#allocation6 + $0xa20] sm:$0xff]  ;;  %v9147_v25 = vpack.c.bf16 %v5357_v16, %v5353_v15  ;;  %v5391_v15 = vld [vmem:[#allocation6 + $0xb48] sm:$0xff]  ;;  %v2456_v3 = vsub.s32 7, %v9804_v20 }
 0x57e   :  { %v5395_v16 = vld [vmem:[#allocation6 + $0xb68] sm:$0xff] }
 0x57f   :  { %8874 = vmatpush1.bf16.msra.mxu0 %v8873_v28  ;;  %v5361_v28 = vld [vmem:[#allocation6 + $0xa58] sm:$0xff] }
 0x580   :  { %9130 = vmatpush1.bf16.msra.mxu1 %v9129_v29  ;;  %8876 = vmatprep.subr.bf16.mxu0 %v8875_v41  ;;  %v5365_v29 = vld [vmem:[#allocation6 + $0xa78] sm:$0xff]  ;;  %v8893_v41 = vpack.c.bf16 %v5354_v22, %v5350_v21  ;;  %v9165_v21 = vpack.c.bf16 %v5388_v14, %v5384_v47  ;;  %v8911_v22 = vpack.c.bf16 %v5395_v16, %v5391_v15  ;;  %v5418_v47 = vld [vmem:[#allocation6 + $0xc20] sm:$0xff]  ;;  %v5420_v14 = vld [vmem:[#allocation6 + $0xc30] sm:$0xff] }
 0x581   :  { %9132 = vmatprep.subr.bf16.mxu1 %v9131_v34  ;;  %v5362_v34 = vld [vmem:[#allocation6 + $0xa60] sm:$0xff]  ;;  %v9151_v37 = vpack.c.bf16 %v5365_v29, %v5361_v28  ;;  %v5399_v28 = vld [vmem:[#allocation6 + $0xb88] sm:$0xff] }
 0x582   :  { %v5403_v29 = vld [vmem:[#allocation6 + $0xba8] sm:$0xff] }
 0x583   :  { %8878 = vmatpush1.bf16.msra.mxu0 %v8877_v40  ;;  %v5369_v40 = vld [vmem:[#allocation6 + $0xa98] sm:$0xff] }
 0x584   :  { %9134 = vmatpush1.bf16.msra.mxu1 %v9133_v42  ;;  %8880 = vmatprep.subr.bf16.mxu0 %v8879_v43  ;;  %v5373_v42 = vld [vmem:[#allocation6 + $0xab8] sm:$0xff]  ;;  %v8897_v43 = vpack.c.bf16 %v5362_v34, %v5358_v32  ;;  %v9169_v32 = vpack.c.bf16 %v5396_v27, %v5392_v36  ;;  %v8915_v34 = vpack.c.bf16 %v5403_v29, %v5399_v28  ;;  %v5424_v28 = vld [vmem:[#allocation6 + $0xc50] sm:$0xff] }
 0x585   :  { %9136 = vmatprep.subr.bf16.mxu1 %v9135_v49  ;;  %v5370_v49 = vld [vmem:[#allocation6 + $0xaa0] sm:$0xff]  ;;  %v9155_v53 = vpack.c.bf16 %v5373_v42, %v5369_v40  ;;  %v5407_v40 = vld [vmem:[#allocation6 + $0xbc8] sm:$0xff]  ;;  %v5428_v29 = vld [vmem:[#allocation6 + $0xc70] sm:$0xff] }
 0x586   :  { %v5411_v42 = vld [vmem:[#allocation6 + $0xbe8] sm:$0xff] }
 0x587   :  { %8882 = vmatpush1.bf16.msra.mxu0 %v8881_v56  ;;  %v5377_v56 = vld [vmem:[#allocation6 + $0xad8] sm:$0xff] }
 0x588   :  { %9138 = vmatpush1.bf16.msra.mxu1 %v9137_v57  ;;  %8884 = vmatprep.subr.bf16.mxu0 %v8883_v58  ;;  %v5381_v57 = vld [vmem:[#allocation6 + $0xaf8] sm:$0xff]  ;;  %v8901_v58 = vpack.c.bf16 %v5370_v49, %v5366_v48  ;;  %v9173_v48 = vpack.c.bf16 %v5404_v50, %v5400_v38  ;;  %v8919_v49 = vpack.c.bf16 %v5411_v42, %v5407_v40  ;;  %v5430_v50 = vld [vmem:[#allocation6 + $0xc80] sm:$0xff] }
 0x589   :  { %9140 = vmatprep.subr.bf16.mxu1 %v9139_v63  ;;  %v5378_v63 = vld [vmem:[#allocation6 + $0xae0] sm:$0xff]  ;;  %v9159_v1 = vpack.c.bf16 %v5381_v57, %v5377_v56  ;;  %v5415_v56 = vld [vmem:[#allocation6 + $0xc08] sm:$0xff] }
 0x58a   :  { %v5419_v57 = vld [vmem:[#allocation6 + $0xc28] sm:$0xff]  ;;  %v5434_v40 = vld [vmem:[#allocation6 + $0xca0] sm:$0xff] }
 0x58b   :  { %8886 = vmatpush1.bf16.msra.mxu0 %v8885_v5  ;;  %v5385_v5 = vld [vmem:[#allocation6 + $0xb18] sm:$0xff] }
 0x58c   :  { %9142 = vmatpush1.bf16.msra.mxu1 %v9141_v6  ;;  %8888 = vmatprep.subr.bf16.mxu0 %v8887_v7  ;;  %v5389_v6 = vld [vmem:[#allocation6 + $0xb38] sm:$0xff]  ;;  %v8905_v7 = vpack.c.bf16 %v5378_v63, %v5374_v61  ;;  %v9177_v61 = vpack.c.bf16 %v5412_v46, %v5408_v54  ;;  %v8923_v63 = vpack.c.bf16 %v5419_v57, %v5415_v56  ;;  %v5438_v46 = vld [vmem:[#allocation6 + $0xcc0] sm:$0xff] }
 0x58d   :  { %9144 = vmatprep.subr.bf16.mxu1 %v9143_v12  ;;  %v5386_v12 = vld [vmem:[#allocation6 + $0xb20] sm:$0xff]  ;;  %v9163_v13 = vpack.c.bf16 %v5389_v6, %v5385_v5  ;;  %v2449_v5 = vrot.slane %v9827_v24, %v2448_v2  ;;  %v2457_v6 = vrot.slane %v9827_v24, %v2456_v3  ;;  %v8933_v54 = vpack.c.bf16 %v5434_v40, %v5430_v50 }
 0x58e   :  { %v5442_v56 = vld [vmem:[#allocation6 + $0xce0] sm:$0xff] }
 0x58f   :  { %8890 = vmatpush1.bf16.msra.mxu0 %v8889_v17  ;;  %v5393_v17 = vld [vmem:[#allocation6 + $0xb58] sm:$0xff]  ;;  %v8937_v2 = vpack.c.bf16 %v5442_v56, %v5438_v46 }
 0x590   :  { %9146 = vmatpush1.bf16.msra.mxu1 %v9145_v18  ;;  %8892 = vmatprep.subr.bf16.mxu0 %v8891_v19  ;;  %v5397_v18 = vld [vmem:[#allocation6 + $0xb78] sm:$0xff]  ;;  %v8909_v19 = vpack.c.bf16 %v5386_v12, %v5382_v10 }
 0x591   :  { %9148 = vmatprep.subr.bf16.mxu1 %v9147_v25  ;;  %v5394_v25 = vld [vmem:[#allocation6 + $0xb60] sm:$0xff]  ;;  %v9167_v26 = vpack.c.bf16 %v5397_v18, %v5393_v17  ;;  %v5423_v17 = vld [vmem:[#allocation6 + $0xc48] sm:$0xff] }
 0x593   :  { %8894 = vmatpush1.bf16.msra.mxu0 %v8893_v41  ;;  %v5401_v41 = vld [vmem:[#allocation6 + $0xb98] sm:$0xff] }
 0x594   :  { %9150 = vmatpush1.bf16.msra.mxu1 %v9149_v30  ;;  %8896 = vmatprep.subr.bf16.mxu0 %v8895_v31  ;;  %v5405_v30 = vld [vmem:[#allocation6 + $0xbb8] sm:$0xff]  ;;  %v8913_v31 = vpack.c.bf16 %v5394_v25, %v5390_v23 }
 0x595   :  { %9152 = vmatprep.subr.bf16.mxu1 %v9151_v37  ;;  %v5402_v37 = vld [vmem:[#allocation6 + $0xba0] sm:$0xff]  ;;  %v9171_v39 = vpack.c.bf16 %v5405_v30, %v5401_v41  ;;  %v5431_v41 = vld [vmem:[#allocation6 + $0xc88] sm:$0xff] }
 0x597   :  { %8898 = vmatpush1.bf16.msra.mxu0 %v8897_v43  ;;  %v5409_v43 = vld [vmem:[#allocation6 + $0xbd8] sm:$0xff] }
 0x598   :  { %9154 = vmatpush1.bf16.msra.mxu1 %v9153_v44  ;;  %8900 = vmatprep.subr.bf16.mxu0 %v8899_v45  ;;  %v5413_v44 = vld [vmem:[#allocation6 + $0xbf8] sm:$0xff]  ;;  %v8917_v45 = vpack.c.bf16 %v5402_v37, %v5398_v35 }
 0x599   :  { %9156 = vmatprep.subr.bf16.mxu1 %v9155_v53  ;;  %v5410_v53 = vld [vmem:[#allocation6 + $0xbe0] sm:$0xff]  ;;  %v9175_v55 = vpack.c.bf16 %v5413_v44, %v5409_v43  ;;  %v5437_v35 = vld [vmem:[#allocation6 + $0xcb8] sm:$0xff]  ;;  %v5432_v44 = vld [vmem:[#allocation6 + $0xc90] sm:$0xff] }
 0x59b   :  { %8902 = vmatpush1.bf16.msra.mxu0 %v8901_v58  ;;  %v5417_v58 = vld [vmem:[#allocation6 + $0xc18] sm:$0xff] }
 0x59c   :  { %9158 = vmatpush1.bf16.msra.mxu1 %v9157_v59  ;;  %8904 = vmatprep.subr.bf16.mxu0 %v8903_v60  ;;  %v5421_v59 = vld [vmem:[#allocation6 + $0xc38] sm:$0xff]  ;;  %v8921_v60 = vpack.c.bf16 %v5410_v53, %v5406_v51 }
 0x59d   :  { %9160 = vmatprep.subr.bf16.mxu1 %v9159_v1  ;;  %v9179_v0 = vpack.c.bf16 %v5421_v59, %v5417_v58  ;;  %v2444_v1 = vsub.s32 4, %v9804_v20  ;;  %v5441_v51 = vld [vmem:[#allocation6 + $0xcd8] sm:$0xff]  ;;  %v5440_v59 = vld [vmem:[#allocation6 + $0xcd0] sm:$0xff] }
 0x59e   :  { %v5445_v53 = vld [vmem:[#allocation6 + $0xcf8] sm:$0xff] }
 0x59f   :  { %8906 = vmatpush1.bf16.msra.mxu0 %v8905_v7  ;;  %v2445_v4 = vrot.slane %v9827_v24, %v2444_v1  ;;  %v5422_v24 = vld [vmem:[#allocation6 + $0xc40] sm:$0xff]  ;;  %v9191_v58 = vpack.c.bf16 %v5445_v53, %v5441_v51  ;;  %v5453_v1 = vld [vmem:[#allocation6 + $0xd38] sm:$0xff]  ;;  %v5479_v51 = vld [vmem:[#allocation6 + $0xe08] sm:$0xff] }
 0x5a0   :  { %9162 = vmatpush1.bf16.msra.mxu1 %v9161_v8  ;;  %8908 = vmatprep.subr.bf16.mxu0 %v8907_v9  ;;  %v5414_v8 = vld [vmem:[#allocation6 + $0xc00] sm:$0xff]  ;;  %v5483_v53 = vld [vmem:[#allocation6 + $0xe28] sm:$0xff] }
 0x5a1   :  { %9164 = vmatprep.subr.bf16.mxu1 %v9163_v13  ;;  %v5416_v13 = vld [vmem:[#allocation6 + $0xc10] sm:$0xff]  ;;  %v8925_v25 = vpack.c.bf16 %v5418_v47, %v5414_v8  ;;  %v5459_v47 = vld [vmem:[#allocation6 + $0xd68] sm:$0xff] }
 0x5a2   :  { %v9181_v36 = vpack.c.bf16 %v5420_v14, %v5416_v13  ;;  %v5448_v8 = vld [vmem:[#allocation6 + $0xd10] sm:$0xff]  ;;  %v5457_v13 = vld [vmem:[#allocation6 + $0xd58] sm:$0xff] }
 0x5a3   :  { %8910 = vmatpush1.bf16.msra.mxu0 %v8909_v19  ;;  %v5427_v19 = vld [vmem:[#allocation6 + $0xc68] sm:$0xff]  ;;  %v5461_v14 = vld [vmem:[#allocation6 + $0xd78] sm:$0xff] }
 0x5a4   :  { %9166 = vmatpush1.bf16.msra.mxu1 %v9165_v21  ;;  %8912 = vmatprep.subr.bf16.mxu0 %v8911_v22  ;;  %v5425_v21 = vld [vmem:[#allocation6 + $0xc58] sm:$0xff]  ;;  %v8927_v30 = vpack.c.bf16 %v5427_v19, %v5423_v17  ;;  %v5454_v17 = vld [vmem:[#allocation6 + $0xd40] sm:$0xff] }
 0x5a5   :  { %9168 = vmatprep.subr.bf16.mxu1 %v9167_v26  ;;  %v5429_v22 = vld [vmem:[#allocation6 + $0xc78] sm:$0xff]  ;;  %v5426_v26 = vld [vmem:[#allocation6 + $0xc60] sm:$0xff] }
 0x5a6   :  { %v8929_v38 = vpack.c.bf16 %v5426_v26, %v5422_v24  ;;  %v5465_v24 = vld [vmem:[#allocation6 + $0xd98] sm:$0xff] }
 0x5a7   :  { %8914 = vmatpush1.bf16.msra.mxu0 %v8913_v31  ;;  %v9183_v31 = vpack.c.bf16 %v5429_v22, %v5425_v21  ;;  %v9199_v21 = vpack.c.bf16 %v5461_v14, %v5457_v13  ;;  %v5456_v22 = vld [vmem:[#allocation6 + $0xd50] sm:$0xff]  ;;  %v5469_v26 = vld [vmem:[#allocation6 + $0xdb8] sm:$0xff]  ;;  %v5495_v13 = vld [vmem:[#allocation6 + $0xe88] sm:$0xff] }
 0x5a8   :  { %9170 = vmatpush1.bf16.msra.mxu1 %v9169_v32  ;;  %8916 = vmatprep.subr.bf16.mxu0 %v8915_v34  ;;  %v5435_v32 = vld [vmem:[#allocation6 + $0xca8] sm:$0xff]  ;;  %v5433_v34 = vld [vmem:[#allocation6 + $0xc98] sm:$0xff] }
 0x5a9   :  { %9172 = vmatprep.subr.bf16.mxu1 %v9171_v39  ;;  %v9185_v39 = vpack.c.bf16 %v5428_v29, %v5424_v28  ;;  %v8931_v42 = vpack.c.bf16 %v5435_v32, %v5431_v41  ;;  %v9187_v43 = vpack.c.bf16 %v5437_v35, %v5433_v34  ;;  %v5462_v29 = vld [vmem:[#allocation6 + $0xd80] sm:$0xff]  ;;  %v5464_v32 = vld [vmem:[#allocation6 + $0xd90] sm:$0xff]  ;;  %v5471_v35 = vld [vmem:[#allocation6 + $0xdc8] sm:$0xff] }
 0x5aa   :  { %v5466_v41 = vld [vmem:[#allocation6 + $0xda0] sm:$0xff]  ;;  %v5468_v34 = vld [vmem:[#allocation6 + $0xdb0] sm:$0xff]  ;;  %v5499_v14 = vld [vmem:[#allocation6 + $0xea8] sm:$0xff] }
 0x5ab   :  { %8918 = vmatpush1.bf16.msra.mxu0 %v8917_v45  ;;  %v5436_v45 = vld [vmem:[#allocation6 + $0xcb0] sm:$0xff]  ;;  %v8949_v50 = vpack.c.bf16 %v5466_v41, %v5462_v29  ;;  %v9205_v40 = vpack.c.bf16 %v5468_v34, %v5464_v32 }
 0x5ac   :  { %9174 = vmatpush1.bf16.msra.mxu1 %v9173_v48  ;;  %8920 = vmatprep.subr.bf16.mxu0 %v8919_v49  ;;  %v5439_v48 = vld [vmem:[#allocation6 + $0xcc8] sm:$0xff] }
 0x5ad   :  { %9176 = vmatprep.subr.bf16.mxu1 %v9175_v55  ;;  %v5443_v49 = vld [vmem:[#allocation6 + $0xce8] sm:$0xff]  ;;  %v9189_v55 = vpack.c.bf16 %v5436_v45, %v5432_v44 }
 0x5ae   :  { %v8935_v57 = vpack.c.bf16 %v5443_v49, %v5439_v48  ;;  %v5472_v48 = vld [vmem:[#allocation6 + $0xdd0] sm:$0xff] }
 0x5af   :  { %8922 = vmatpush1.bf16.msra.mxu0 %v8921_v60  ;;  %v5444_v60 = vld [vmem:[#allocation6 + $0xcf0] sm:$0xff] }
 0x5b0   :  { %9178 = vmatpush1.bf16.msra.mxu1 %v9177_v61  ;;  %8924 = vmatprep.subr.bf16.mxu0 %v8923_v63  ;;  %v5447_v61 = vld [vmem:[#allocation6 + $0xd08] sm:$0xff]  ;;  %v9193_v3 = vpack.c.bf16 %v5444_v60, %v5440_v59  ;;  %v5476_v49 = vld [vmem:[#allocation6 + $0xdf0] sm:$0xff]  ;;  %v8955_v59 = vpack.c.bf16 %v5483_v53, %v5479_v51 }
 0x5b1   :  { %9180 = vmatprep.subr.bf16.mxu1 %v9179_v0  ;;  %v5451_v63 = vld [vmem:[#allocation6 + $0xd28] sm:$0xff]  ;;  %v5449_v0 = vld [vmem:[#allocation6 + $0xd18] sm:$0xff]  ;;  %v9209_v56 = vpack.c.bf16 %v5476_v49, %v5472_v48  ;;  %v5512_v51 = vld [vmem:[#allocation6 + $0xf10] sm:$0xff] }
 0x5b2   :  { %v5516_v53 = vld [vmem:[#allocation6 + $0xf30] sm:$0xff] }
 0x5c5   :  { %v4378_v7 = vpop.f32.mrb[2].mxu0 }
 0x5c6   :  { %v9311_v9 = vadd.f32 %v4378_v7, %v2445_v4  ;;  %v9839_v10 = vpop.f32.mrb[2].mxu1  ;;  %v4380_v12 = vpop.f32.mrb[3].mxu0  ;;  %v5446_v4 = vld [vmem:[#allocation6 + $0xd00] sm:$0xff]  ;;  %v9195_v7 = vpack.c.bf16 %v5453_v1, %v5449_v0  ;;  %v5487_v0 = vld [vmem:[#allocation6 + $0xe48] sm:$0xff] }
 0x5c7   :  { %v9312_v15 = vadd.f32 %v4380_v12, %v2449_v5  ;;  %v5019_v16 = vpop.f32.mrb[3].mxu1  ;;  %v5450_v5 = vld [vmem:[#allocation6 + $0xd20] sm:$0xff]  ;;  %v5455_v12 = vld [vmem:[#allocation6 + $0xd48] sm:$0xff] }
 0x5c8   :  { %v9314_v18 = vadd.f32 %v5019_v16, %v2457_v6  ;;  %v5026_v27 = vmax.f32 %v9311_v9, 0.0  ;;  %v8939_v6 = vpack.c.bf16 %v5451_v63, %v5447_v61  ;;  %v5452_v9 = vld [vmem:[#allocation6 + $0xd30] sm:$0xff]  ;;  %v8943_v19 = vpack.c.bf16 %v5459_v47, %v5455_v12  ;;  %v5491_v1 = vld [vmem:[#allocation6 + $0xe68] sm:$0xff] }
 0x5c9   :  { %v5027_v23 = vmax.f32 %v9312_v15, 0.0  ;;  %v8941_v15 = vpack.c.bf16 %v5450_v5, %v5446_v4  ;;  %v9197_v16 = vpack.c.bf16 %v5452_v9, %v5448_v8  ;;  %v5480_v61 = vld [vmem:[#allocation6 + $0xe10] sm:$0xff]  ;;  %v8959_v8 = vpack.c.bf16 %v5491_v1, %v5487_v0 }
 0x5ca   :  { %v5029_v37 = vmax.f32 %v9314_v18, 0.0  ;;  %v5458_v18 = vld [vmem:[#allocation6 + $0xd60] sm:$0xff]  ;;  %v5484_v63 = vld [vmem:[#allocation6 + $0xe30] sm:$0xff] }
 0x5cb   :  { %5770 = vmatprep.mubr.f32.mxu0 %v5027_v23  ;;  %6054 = vmatprep.mubr.f32.mxu1 %v5027_v23  ;;  %v5460_v23 = vld [vmem:[#allocation6 + $0xd70] sm:$0xff]  ;;  %v9213_v5 = vpack.c.bf16 %v5484_v63, %v5480_v61 }
 0x5cc   :  { %5771 = vmatmul.mubr.f32.vlgmr.msra.gmra.mrb[4].mxu0 %v5026_v27  ;;  %6055 = vmatmul.mubr.f32.vlgmr.msra.gmra.mrb[4].mxu1 %v5026_v27  ;;  %v8945_v27 = vpack.c.bf16 %v5458_v18, %v5454_v17  ;;  %v9201_v28 = vpack.c.bf16 %v5460_v23, %v5456_v22  ;;  %v5488_v12 = vld [vmem:[#allocation6 + $0xe50] sm:$0xff]  ;;  %v8963_v22 = vpack.c.bf16 %v5499_v14, %v5495_v13 }
 0x5cd   :  { %8926 = vmatpush1.bf16.msra.mxu0 %v8925_v25  ;;  %9182 = vmatpush1.bf16.msra.mxu1 %v9181_v36  ;;  %v5463_v25 = vld [vmem:[#allocation6 + $0xd88] sm:$0xff]  ;;  %v5492_v47 = vld [vmem:[#allocation6 + $0xe70] sm:$0xff] }
 0x5ce   :  { %5841 = vmatprep.mubr.f32.mxu0 %v5029_v37  ;;  %6125 = vmatprep.mubr.f32.mxu1 %v5029_v37  ;;  %v5467_v36 = vld [vmem:[#allocation6 + $0xda8] sm:$0xff]  ;;  %v9217_v18 = vpack.c.bf16 %v5492_v47, %v5488_v12  ;;  %v5520_v0 = vld [vmem:[#allocation6 + $0xf50] sm:$0xff]  ;;  %v2452_v12 = vsub.s32 6, %v9804_v20  ;;  %v6356_v20 = vld [vmem:[#allocation10] ss:$0 sm:$0xff] }
 0x5cf   :  { %8928 = vmatprep.subr.bf16.mxu0 %v8927_v30  ;;  %9184 = vmatprep.subr.bf16.mxu1 %v9183_v31  ;;  %v8947_v30 = vpack.c.bf16 %v5467_v36, %v5463_v25  ;;  %v9203_v31 = vpack.c.bf16 %v5469_v26, %v5465_v24  ;;  %v5475_v37 = vld [vmem:[#allocation6 + $0xde8] sm:$0xff]  ;;  %v5496_v25 = vld [vmem:[#allocation6 + $0xe90] sm:$0xff] }
 0x5d0   :  { %v8951_v44 = vpack.c.bf16 %v5475_v37, %v5471_v35  ;;  %v5500_v36 = vld [vmem:[#allocation6 + $0xeb0] sm:$0xff]  ;;  %v5503_v24 = vld [vmem:[#allocation6 + $0xec8] sm:$0xff] }
 0x5d1   :  { %8930 = vmatpush1.bf16.msra.mxu0 %v8929_v38  ;;  %9186 = vmatpush1.bf16.msra.mxu1 %v9185_v39  ;;  %v5473_v38 = vld [vmem:[#allocation6 + $0xdd8] sm:$0xff]  ;;  %v5507_v26 = vld [vmem:[#allocation6 + $0xee8] sm:$0xff]  ;;  %v9221_v41 = vpack.c.bf16 %v5500_v36, %v5496_v25  ;;  %v5504_v35 = vld [vmem:[#allocation6 + $0xed0] sm:$0xff] }
 0x5d2   :  { %8932 = vmatprep.subr.bf16.mxu0 %v8931_v42  ;;  %9188 = vmatprep.subr.bf16.mxu1 %v9187_v43  ;;  %v5477_v39 = vld [vmem:[#allocation6 + $0xdf8] sm:$0xff]  ;;  %v5470_v42 = vld [vmem:[#allocation6 + $0xdc0] sm:$0xff]  ;;  %v8967_v32 = vpack.c.bf16 %v5507_v26, %v5503_v24  ;;  %v5508_v37 = vld [vmem:[#allocation6 + $0xef0] sm:$0xff] }
 0x5d3   :  { %v5474_v43 = vld [vmem:[#allocation6 + $0xde0] sm:$0xff]  ;;  %v9207_v45 = vpack.c.bf16 %v5477_v39, %v5473_v38  ;;  %v5511_v38 = vld [vmem:[#allocation6 + $0xf08] sm:$0xff]  ;;  %v5524_v1 = vld [vmem:[#allocation6 + $0xf70] sm:$0xff] }
 0x5d4   :  { %v8953_v46 = vpack.c.bf16 %v5474_v43, %v5470_v42  ;;  %v5515_v39 = vld [vmem:[#allocation6 + $0xf28] sm:$0xff]  ;;  %v9225_v43 = vpack.c.bf16 %v5508_v37, %v5504_v35  ;;  %v5528_v14 = vld [vmem:[#allocation6 + $0xf90] sm:$0xff]  ;;  %v5538_v25 = vld [vmem:[#allocation6 + $0xfe0] sm:$0xff] }
 0x5d5   :  { %8934 = vmatpush1.bf16.msra.mxu0 %v8933_v54  ;;  %9190 = vmatpush1.bf16.msra.mxu1 %v9189_v55  ;;  %v5481_v54 = vld [vmem:[#allocation6 + $0xe18] sm:$0xff]  ;;  %v8971_v48 = vpack.c.bf16 %v5515_v39, %v5511_v38  ;;  %v6136_v37 = vld [vmem:[#allocation9] sm:$0xff]  ;;  %v6137_v38 = vld [vmem:[#allocation9 + $0x8] sm:$0xff] }
 0x5d6   :  { %8936 = vmatprep.subr.bf16.mxu0 %v8935_v57  ;;  %9192 = vmatprep.subr.bf16.mxu1 %v9191_v58  ;;  %v5485_v55 = vld [vmem:[#allocation6 + $0xe38] sm:$0xff]  ;;  %v5478_v57 = vld [vmem:[#allocation6 + $0xe00] sm:$0xff] }
 0x5d7   :  { %v5482_v58 = vld [vmem:[#allocation6 + $0xe20] sm:$0xff]  ;;  %v9211_v60 = vpack.c.bf16 %v5485_v55, %v5481_v54  ;;  %v5519_v54 = vld [vmem:[#allocation6 + $0xf48] sm:$0xff]  ;;  %v9426_v36 = vld [vmem:[#allocation4] sm:$0xff] }
 0x5d8   :  { %v8957_v4 = vpack.c.bf16 %v5482_v58, %v5478_v57  ;;  %v5523_v55 = vld [vmem:[#allocation6 + $0xf68] sm:$0xff]  ;;  %v9229_v58 = vpack.c.bf16 %v5516_v53, %v5512_v51  ;;  %v2453_v24 = vrot.slane %v9426_v36, %v2452_v12  ;;  %v9245_v51 = vpack.c.bf16 %v6137_v38, %v6136_v37  ;;  %v6190_v12 = vld [vmem:[#allocation9 + $0x1b0] sm:$0xff]  ;;  %v6195_v37 = vld [vmem:[#allocation9 + $0x1d8] sm:$0xff] }
 0x5d9   :  { %8938 = vmatpush1.bf16.msra.mxu0 %v8937_v2  ;;  %9194 = vmatpush1.bf16.msra.mxu1 %v9193_v3  ;;  %v5489_v2 = vld [vmem:[#allocation6 + $0xe58] sm:$0xff]  ;;  %v8975_v61 = vpack.c.bf16 %v5523_v55, %v5519_v54  ;;  %v6193_v36 = vld [vmem:[#allocation9 + $0x1c8] sm:$0xff] }
 0x5da   :  { %8940 = vmatprep.subr.bf16.mxu0 %v8939_v6  ;;  %9196 = vmatprep.subr.bf16.mxu1 %v9195_v7  ;;  %v5493_v3 = vld [vmem:[#allocation6 + $0xe78] sm:$0xff]  ;;  %v5486_v6 = vld [vmem:[#allocation6 + $0xe40] sm:$0xff]  ;;  %v9313_v39 = vadd.f32 %v9839_v10, %v2453_v24 }
 0x5db   :  { %v5490_v7 = vld [vmem:[#allocation6 + $0xe60] sm:$0xff]  ;;  %v9215_v9 = vpack.c.bf16 %v5493_v3, %v5489_v2  ;;  %v5527_v2 = vld [vmem:[#allocation6 + $0xf88] sm:$0xff]  ;;  %v6138_v54 = vld [vmem:[#allocation9 + $0x10] sm:$0xff] }
 0x5dc   :  { %v8961_v17 = vpack.c.bf16 %v5490_v7, %v5486_v6  ;;  %v5531_v3 = vld [vmem:[#allocation6 + $0xfa8] sm:$0xff]  ;;  %v9233_v7 = vpack.c.bf16 %v5524_v1, %v5520_v0  ;;  %v6139_v55 = vld [vmem:[#allocation9 + $0x18] sm:$0xff] }
 0x5dd   :  { %8942 = vmatpush1.bf16.msra.mxu0 %v8941_v15  ;;  %9198 = vmatpush1.bf16.msra.mxu1 %v9197_v16  ;;  %v5497_v15 = vld [vmem:[#allocation6 + $0xe98] sm:$0xff]  ;;  %v8979_v47 = vpack.c.bf16 %v5531_v3, %v5527_v2  ;;  %v9249_v0 = vpack.c.bf16 %v6139_v55, %v6138_v54  ;;  %v6140_v2 = vld [vmem:[#allocation9 + $0x20] sm:$0xff]  ;;  %v6141_v3 = vld [vmem:[#allocation9 + $0x28] sm:$0xff] }
 0x5de   :  { %8944 = vmatprep.subr.bf16.mxu0 %v8943_v19  ;;  %9200 = vmatprep.subr.bf16.mxu1 %v9199_v21  ;;  %v5501_v16 = vld [vmem:[#allocation6 + $0xeb8] sm:$0xff]  ;;  %v5494_v19 = vld [vmem:[#allocation6 + $0xe80] sm:$0xff] }
 0x5df   :  { %v5498_v21 = vld [vmem:[#allocation6 + $0xea0] sm:$0xff]  ;;  %v9219_v23 = vpack.c.bf16 %v5501_v16, %v5497_v15  ;;  %v5532_v15 = vld [vmem:[#allocation6 + $0xfb0] sm:$0xff]  ;;  %v5535_v16 = vld [vmem:[#allocation6 + $0xfc8] sm:$0xff] }
 0x5e0   :  { %v8965_v29 = vpack.c.bf16 %v5498_v21, %v5494_v19  ;;  %v5541_v19 = vld [vmem:[#allocation6 + $0xff8] sm:$0xff] }
 0x5e1   :  { %8946 = vmatpush1.bf16.msra.mxu0 %v8945_v27  ;;  %9202 = vmatpush1.bf16.msra.mxu1 %v9201_v28  ;;  %v5505_v27 = vld [vmem:[#allocation6 + $0xed8] sm:$0xff] }
 0x5e2   :  { %8948 = vmatprep.subr.bf16.mxu0 %v8947_v30  ;;  %9204 = vmatprep.subr.bf16.mxu1 %v9203_v31  ;;  %v5509_v28 = vld [vmem:[#allocation6 + $0xef8] sm:$0xff]  ;;  %v5502_v30 = vld [vmem:[#allocation6 + $0xec0] sm:$0xff] }
 0x5e3   :  { %v5506_v31 = vld [vmem:[#allocation6 + $0xee0] sm:$0xff]  ;;  %v9223_v34 = vpack.c.bf16 %v5509_v28, %v5505_v27  ;;  %v5536_v28 = vld [vmem:[#allocation6 + $0xfd0] sm:$0xff] }
 0x5e4   :  { %v8969_v42 = vpack.c.bf16 %v5506_v31, %v5502_v30  ;;  %v6153_v30 = vld [vmem:[#allocation9 + $0x88] sm:$0xff]  ;;  %v6184_v31 = vld [vmem:[#allocation9 + $0x180] sm:$0xff] }
 0x5e5   :  { %8950 = vmatpush1.bf16.msra.mxu0 %v8949_v50  ;;  %9206 = vmatpush1.bf16.msra.mxu1 %v9205_v40  ;;  %v5513_v50 = vld [vmem:[#allocation6 + $0xf18] sm:$0xff] }
 0x5e6   :  { %8952 = vmatprep.subr.bf16.mxu0 %v8951_v44  ;;  %9208 = vmatprep.subr.bf16.mxu1 %v9207_v45  ;;  %v5517_v40 = vld [vmem:[#allocation6 + $0xf38] sm:$0xff]  ;;  %v5510_v44 = vld [vmem:[#allocation6 + $0xf00] sm:$0xff] }
 0x5e7   :  { %v5514_v45 = vld [vmem:[#allocation6 + $0xf20] sm:$0xff]  ;;  %v9227_v49 = vpack.c.bf16 %v5517_v40, %v5513_v50 }
 0x5e8   :  { %v8973_v57 = vpack.c.bf16 %v5514_v45, %v5510_v44  ;;  %v6154_v44 = vld [vmem:[#allocation9 + $0x90] sm:$0xff]  ;;  %v6155_v45 = vld [vmem:[#allocation9 + $0x98] sm:$0xff] }
 0x5e9   :  { %8954 = vmatpush1.bf16.msra.mxu0 %v8953_v46  ;;  %9210 = vmatpush1.bf16.msra.mxu1 %v9209_v56  ;;  %v5521_v46 = vld [vmem:[#allocation6 + $0xf58] sm:$0xff]  ;;  %v9247_v10 = vpack.c.bf16 %v6155_v45, %v6154_v44 }
 0x5ea   :  { %8956 = vmatprep.subr.bf16.mxu0 %v8955_v59  ;;  %9212 = vmatprep.subr.bf16.mxu1 %v9211_v60  ;;  %v5525_v56 = vld [vmem:[#allocation6 + $0xf78] sm:$0xff]  ;;  %v5518_v59 = vld [vmem:[#allocation6 + $0xf40] sm:$0xff] }
 0x5eb   :  { %v5522_v60 = vld [vmem:[#allocation6 + $0xf60] sm:$0xff]  ;;  %v9231_v63 = vpack.c.bf16 %v5525_v56, %v5521_v46  ;;  %v5028_v46 = vmax.f32 %v9313_v39, 0.0  ;;  %v6178_v44 = vld [vmem:[#allocation9 + $0x150] sm:$0xff] }
 0x5ec   :  { %v8977_v6 = vpack.c.bf16 %v5522_v60, %v5518_v59  ;;  %v6156_v59 = vld [vmem:[#allocation9 + $0xa0] sm:$0xff]  ;;  %v6157_v60 = vld [vmem:[#allocation9 + $0xa8] sm:$0xff]  ;;  %v6179_v45 = vld [vmem:[#allocation9 + $0x158] sm:$0xff] }
 0x5ed   :  { %8958 = vmatpush1.bf16.msra.mxu0 %v8957_v4  ;;  %9214 = vmatpush1.bf16.msra.mxu1 %v9213_v5  ;;  %v5529_v4 = vld [vmem:[#allocation6 + $0xf98] sm:$0xff]  ;;  %v9297_v55 = vpack.c.bf16 %v6179_v45, %v6178_v44 }
 0x5ee   :  { %8960 = vmatprep.subr.bf16.mxu0 %v8959_v8  ;;  %9216 = vmatprep.subr.bf16.mxu1 %v9215_v9  ;;  %v5533_v5 = vld [vmem:[#allocation6 + $0xfb8] sm:$0xff]  ;;  %v5526_v8 = vld [vmem:[#allocation6 + $0xf80] sm:$0xff] }
 0x5ef   :  { %v5530_v9 = vld [vmem:[#allocation6 + $0xfa0] sm:$0xff]  ;;  %v9235_v13 = vpack.c.bf16 %v5533_v5, %v5529_v4  ;;  %v9251_v4 = vpack.c.bf16 %v6157_v60, %v6156_v59  ;;  %v6181_v60 = vld [vmem:[#allocation9 + $0x168] sm:$0xff] }
 0x5f0   :  { %v8981_v21 = vpack.c.bf16 %v5530_v9, %v5526_v8  ;;  %v6158_v8 = vld [vmem:[#allocation9 + $0xb0] sm:$0xff]  ;;  %v6159_v9 = vld [vmem:[#allocation9 + $0xb8] sm:$0xff] }
 0x5f1   :  { %8962 = vmatpush1.bf16.msra.mxu0 %v8961_v17  ;;  %9218 = vmatpush1.bf16.msra.mxu1 %v9217_v18  ;;  %v5539_v17 = vld [vmem:[#allocation6 + $0xfe8] sm:$0xff]  ;;  %v5537_v18 = vld [vmem:[#allocation6 + $0xfd8] sm:$0xff] }
 0x5f2   :  { %8964 = vmatprep.subr.bf16.mxu0 %v8963_v22  ;;  %9220 = vmatprep.subr.bf16.mxu1 %v9219_v23  ;;  %v9237_v22 = vpack.c.bf16 %v5532_v15, %v5528_v14  ;;  %v5534_v23 = vld [vmem:[#allocation6 + $0xfc0] sm:$0xff]  ;;  %v8983_v26 = vpack.c.bf16 %v5539_v17, %v5535_v16  ;;  %v9239_v27 = vpack.c.bf16 %v5541_v19, %v5537_v18  ;;  %v6142_v15 = vld [vmem:[#allocation9 + $0x30] sm:$0xff] }
 0x5f3   :  { %v6143_v16 = vld [vmem:[#allocation9 + $0x38] sm:$0xff]  ;;  %v9255_v17 = vpack.c.bf16 %v6159_v9, %v6158_v8  ;;  %v6174_v19 = vld [vmem:[#allocation9 + $0x130] sm:$0xff] }
 0x5f4   :  { %v9257_v24 = vpack.c.bf16 %v6143_v16, %v6142_v15  ;;  %v6182_v8 = vld [vmem:[#allocation9 + $0x170] sm:$0xff]  ;;  %v6183_v9 = vld [vmem:[#allocation9 + $0x178] sm:$0xff] }
 0x5f5   :  { %8966 = vmatpush1.bf16.msra.mxu0 %v8965_v29  ;;  %9222 = vmatpush1.bf16.msra.mxu1 %v9221_v41  ;;  %v5540_v29 = vld [vmem:[#allocation6 + $0xff0] sm:$0xff]  ;;  %v6152_v41 = vld [vmem:[#allocation9 + $0x80] sm:$0xff] }
 0x5f6   :  { %8968 = vmatprep.subr.bf16.mxu0 %v8967_v32  ;;  %9224 = vmatprep.subr.bf16.mxu1 %v9223_v34  ;;  %v6185_v32 = vld [vmem:[#allocation9 + $0x188] sm:$0xff]  ;;  %v8985_v34 = vpack.c.bf16 %v5538_v25, %v5534_v23  ;;  %v9241_v35 = vpack.c.bf16 %v5540_v29, %v5536_v28  ;;  %v9243_v50 = vpack.c.bf16 %v6153_v30, %v6152_v41  ;;  %v6192_v25 = vld [vmem:[#allocation9 + $0x1c0] sm:$0xff] }
 0x5f7   :  { %v9275_v40 = vpack.c.bf16 %v6185_v32, %v6184_v31  ;;  %v6161_v23 = vld [vmem:[#allocation9 + $0xc8] sm:$0xff]  ;;  %v9291_v41 = vpack.c.bf16 %v6193_v36, %v6192_v25  ;;  %v6176_v30 = vld [vmem:[#allocation9 + $0x140] sm:$0xff]  ;;  %v6162_v32 = vld [vmem:[#allocation9 + $0xd0] sm:$0xff] }
 0x5f8   :  { %v6145_v28 = vld [vmem:[#allocation9 + $0x48] sm:$0xff] }
 0x5f9   :  { %8970 = vmatpush1.bf16.msra.mxu0 %v8969_v42  ;;  %9226 = vmatpush1.bf16.msra.mxu1 %v9225_v43  ;;  %v6168_v42 = vld [vmem:[#allocation9 + $0x100] sm:$0xff]  ;;  %v6169_v43 = vld [vmem:[#allocation9 + $0x108] sm:$0xff] }
 0x5fa   :  { %8972 = vmatprep.subr.bf16.mxu0 %v8971_v48  ;;  %9228 = vmatprep.subr.bf16.mxu1 %v9227_v49  ;;  %v6186_v48 = vld [vmem:[#allocation9 + $0x190] sm:$0xff]  ;;  %v6187_v49 = vld [vmem:[#allocation9 + $0x198] sm:$0xff]  ;;  %v9277_v53 = vpack.c.bf16 %v6169_v43, %v6168_v42  ;;  %v6177_v31 = vld [vmem:[#allocation9 + $0x148] sm:$0xff] }
 0x5fb   :  { %v9279_v56 = vpack.c.bf16 %v6187_v49, %v6186_v48  ;;  %v9293_v39 = vpack.c.bf16 %v6177_v31, %v6176_v30  ;;  %v6164_v48 = vld [vmem:[#allocation9 + $0xe0] sm:$0xff]  ;;  %v6165_v49 = vld [vmem:[#allocation9 + $0xe8] sm:$0xff] }
 0x5fd   :  { %8974 = vmatpush1.bf16.msra.mxu0 %v8973_v57  ;;  %9230 = vmatpush1.bf16.msra.mxu1 %v9229_v58  ;;  %v6170_v57 = vld [vmem:[#allocation9 + $0x110] sm:$0xff]  ;;  %v6171_v58 = vld [vmem:[#allocation9 + $0x118] sm:$0xff] }
 0x5fe   :  { %8976 = vmatprep.subr.bf16.mxu0 %v8975_v61  ;;  %9232 = vmatprep.subr.bf16.mxu1 %v9231_v63  ;;  %v6188_v61 = vld [vmem:[#allocation9 + $0x1a0] sm:$0xff]  ;;  %v6189_v63 = vld [vmem:[#allocation9 + $0x1a8] sm:$0xff]  ;;  %v9281_v1 = vpack.c.bf16 %v6171_v58, %v6170_v57 }
 0x5ff   :  { %v9283_v5 = vpack.c.bf16 %v6189_v63, %v6188_v61  ;;  %v6149_v57 = vld [vmem:[#allocation9 + $0x68] sm:$0xff]  ;;  %v6180_v58 = vld [vmem:[#allocation9 + $0x160] sm:$0xff]  ;;  %v6166_v63 = vld [vmem:[#allocation9 + $0xf0] sm:$0xff] }
 0x600   :  { %v9301_v61 = vpack.c.bf16 %v6181_v60, %v6180_v58 }
 0x601   :  { %8978 = vmatpush1.bf16.msra.mxu0 %v8977_v6  ;;  %9234 = vmatpush1.bf16.msra.mxu1 %v9233_v7  ;;  %v6172_v6 = vld [vmem:[#allocation9 + $0x120] sm:$0xff]  ;;  %v6173_v7 = vld [vmem:[#allocation9 + $0x128] sm:$0xff] }
 0x602   :  { %8980 = vmatprep.subr.bf16.mxu0 %v8979_v47  ;;  %9236 = vmatprep.subr.bf16.mxu1 %v9235_v13  ;;  %v6191_v47 = vld [vmem:[#allocation9 + $0x1b8] sm:$0xff]  ;;  %v9253_v13 = vpack.c.bf16 %v6141_v3, %v6140_v2  ;;  %v9285_v14 = vpack.c.bf16 %v6173_v7, %v6172_v6 }
 0x603   :  { %v9287_v18 = vpack.c.bf16 %v6191_v47, %v6190_v12  ;;  %v6199_v3 = vld [vmem:[#allocation9 + $0x1f8] sm:$0xff]  ;;  %v9305_v12 = vpack.c.bf16 %v6183_v9, %v6182_v8 }
 0x604   :  { %v5542_v47 = vld [vmem:[#allocation7] sm:$0xf] }
 0x605   :  { %8982 = vmatpush1.bf16.msra.mxu0 %v8981_v21  ;;  %9238 = vmatpush1.bf16.msra.mxu1 %v9237_v22  ;;  %v6175_v21 = vld [vmem:[#allocation9 + $0x138] sm:$0xff]  ;;  %v6160_v22 = vld [vmem:[#allocation9 + $0xc0] sm:$0xff]  ;;  %v5551_v15 = vrot.slane %v5542_v47, %v2432_v33  ;;  %v5559_v16 = vrot.slane %v5542_v47, %v2440_v62 }
 0x606   :  { %8984 = vmatprep.subr.bf16.mxu0 %v8983_v26  ;;  %9240 = vmatprep.subr.bf16.mxu1 %v9239_v27  ;;  %v9289_v26 = vpack.c.bf16 %v6175_v21, %v6174_v19  ;;  %v6144_v27 = vld [vmem:[#allocation9 + $0x40] sm:$0xff]  ;;  %v9259_v29 = vpack.c.bf16 %v6161_v23, %v6160_v22 }
 0x607   :  { %v9261_v38 = vpack.c.bf16 %v6145_v28, %v6144_v27 }
 0x609   :  { %8986 = vmatpush1.bf16.msra.mxu0 %v8985_v34  ;;  %9242 = vmatpush1.bf16.msra.mxu1 %v9241_v35  ;;  %v6163_v34 = vld [vmem:[#allocation9 + $0xd8] sm:$0xff]  ;;  %v6194_v35 = vld [vmem:[#allocation9 + $0x1d0] sm:$0xff] }
 0x60a   :  { %9244 = vmatprep.subr.bf16.mxu0 %v9243_v50  ;;  %9276 = vmatprep.subr.bf16.mxu1 %v9275_v40  ;;  %v6146_v50 = vld [vmem:[#allocation9 + $0x50] sm:$0xff]  ;;  %v6147_v40 = vld [vmem:[#allocation9 + $0x58] sm:$0xff]  ;;  %v9263_v42 = vpack.c.bf16 %v6163_v34, %v6162_v32  ;;  %v9295_v43 = vpack.c.bf16 %v6195_v37, %v6194_v35 }
 0x60b   :  { %v9265_v54 = vpack.c.bf16 %v6147_v40, %v6146_v50 }
 0x60c   :  { %5842 = vmatmul.mubr.f32.vlgmr.msra.gmra.mrb[4].mxu0 %v5028_v46  ;;  %6126 = vmatmul.mubr.f32.vlgmr.msra.gmra.mrb[4].mxu1 %v5028_v46  ;;  %v9267_v46 = vpack.c.bf16 %v6165_v49, %v6164_v48 }
 0x60d   :  { %9246 = vmatpush3.bf16.msra.mxu0 %v9245_v51  ;;  %9278 = vmatpush3.bf16.msra.mxu1 %v9277_v53  ;;  %v6196_v51 = vld [vmem:[#allocation9 + $0x1e0] sm:$0xff]  ;;  %v6197_v53 = vld [vmem:[#allocation9 + $0x1e8] sm:$0xff] }
 0x60e   :  { %9248 = vmatprep.subr.bf16.mxu0 %v9247_v10  ;;  %9280 = vmatprep.subr.bf16.mxu1 %v9279_v56  ;;  %v9299_v10 = vpack.c.bf16 %v6197_v53, %v6196_v51  ;;  %v6148_v56 = vld [vmem:[#allocation9 + $0x60] sm:$0xff] }
 0x60f   :  { %v9269_v59 = vpack.c.bf16 %v6149_v57, %v6148_v56 }
 0x611   :  { %9250 = vmatpush3.bf16.msra.mxu0 %v9249_v0  ;;  %9282 = vmatpush3.bf16.msra.mxu1 %v9281_v1  ;;  %v6167_v0 = vld [vmem:[#allocation9 + $0xf8] sm:$0xff]  ;;  %v6198_v1 = vld [vmem:[#allocation9 + $0x1f0] sm:$0xff] }
 0x612   :  { %9252 = vmatprep.subr.bf16.mxu0 %v9251_v4  ;;  %9284 = vmatprep.subr.bf16.mxu1 %v9283_v5  ;;  %v9271_v2 = vpack.c.bf16 %v6167_v0, %v6166_v63  ;;  %v6150_v4 = vld [vmem:[#allocation9 + $0x70] sm:$0xff]  ;;  %v6151_v5 = vld [vmem:[#allocation9 + $0x78] sm:$0xff]  ;;  %v9303_v6 = vpack.c.bf16 %v6199_v3, %v6198_v1 }
 0x613   :  { %v9273_v7 = vpack.c.bf16 %v6151_v5, %v6150_v4 }
 0x615   :  { %9254 = vmatpush3.bf16.msra.mxu0 %v9253_v13  ;;  %9286 = vmatpush3.bf16.msra.mxu1 %v9285_v14  ;;  %v5547_v13 = vrot.slane %v5542_v47, %v2428_v52  ;;  %v5555_v14 = vrot.slane %v5542_v47, %v2436_v11 }
 0x616   :  { %9256 = vmatprep.subr.bf16.mxu0 %v9255_v17  ;;  %9288 = vmatprep.subr.bf16.mxu1 %v9287_v18 }
 0x619   :  { %9258 = vmatpush3.bf16.msra.mxu0 %v9257_v24  ;;  %9290 = vmatpush3.bf16.msra.mxu1 %v9289_v26 }
 0x61a   :  { %9260 = vmatprep.subr.bf16.mxu0 %v9259_v29  ;;  %9292 = vmatprep.subr.bf16.mxu1 %v9291_v41 }
 0x61d   :  { %9262 = vmatpush3.bf16.msra.mxu0 %v9261_v38  ;;  %9294 = vmatpush3.bf16.msra.mxu1 %v9293_v39 }
 0x61e   :  { %9264 = vmatprep.subr.bf16.mxu0 %v9263_v42  ;;  %9296 = vmatprep.subr.bf16.mxu1 %v9295_v43 }
 0x621   :  { %9266 = vmatpush3.bf16.msra.mxu0 %v9265_v54  ;;  %9298 = vmatpush3.bf16.msra.mxu1 %v9297_v55 }
 0x622   :  { %9268 = vmatprep.subr.bf16.mxu0 %v9267_v46  ;;  %9300 = vmatprep.subr.bf16.mxu1 %v9299_v10 }
 0x625   :  { %9270 = vmatpush3.bf16.msra.mxu0 %v9269_v59  ;;  %9302 = vmatpush3.bf16.msra.mxu1 %v9301_v61 }
 0x626   :  { %9272 = vmatprep.subr.bf16.mxu0 %v9271_v2  ;;  %9304 = vmatprep.subr.bf16.mxu1 %v9303_v6 }
 0x629   :  { %9274 = vmatpush3.bf16.msra.mxu0 %v9273_v7  ;;  %9306 = vmatpush3.bf16.msra.mxu1 %v9305_v12 }
 0x6df   :  { %v5843_v17 = vpop.f32.mrb[4].mxu0  ;;  %v6127_v18 = vpop.f32.mrb[4].mxu1 }
 0x6e0   :  { %v9315_v19 = vadd.f32 %v5843_v17, %v5547_v13  ;;  %v9317_v21 = vadd.f32 %v6127_v18, %v5555_v14  ;;  %v5845_v22 = vpop.f32.mrb[5].mxu0  ;;  %v6129_v23 = vpop.f32.mrb[5].mxu1 }
 0x6e1   :  { %v9316_v25 = vadd.f32 %v5845_v22, %v5551_v15  ;;  %v9318_v36 = vadd.f32 %v6129_v23, %v5559_v16 }
 0x6e2   :  { %v6132_v52 = vmax.f32 %v9315_v19, 0.0  ;;  %v6134_v27 = vmax.f32 %v9317_v21, 0.0 }
 0x6e3   :  { %v6133_v24 = vmax.f32 %v9316_v25, 0.0  ;;  %v6135_v26 = vmax.f32 %v9318_v36, 0.0 }
 0x6e5   :  { %6271 = vmatprep.mubr.f32.mxu0 %v6133_v24  ;;  %6341 = vmatprep.mubr.f32.mxu1 %v6135_v26 }
 0x6e6   :  { %6272 = vmatmul.mubr.f32.vlgmr.msra.gmra.mrb[6].mxu0 %v6132_v52  ;;  %6342 = vmatmul.mubr.f32.vlgmr.msra.gmra.mrb[6].mxu1 %v6134_v27 }
 0x7b9   :  { %v6389_v33 = vpop.f32.mrb[6].mxu0  ;;  %v6424_v11 = vpop.f32.mrb[6].mxu1 }
 0x7ba   :  { %v6390_v62 = vpop.f32.mrb[7].mxu0  ;;  %v6425_v28 = vpop.f32.mrb[7].mxu1 }
 0x7bb   :  { %v6391_v29 = vadd.f32 %v6390_v62, %v6389_v33  ;;  %v6426_v41 = vadd.f32 %v6425_v28, %v6424_v11 }
 0x7bd   :  { %v6274_v30 = vadd.f32 %v6391_v29, %v6356_v20 }
 0x7bf   :  { %v6344_v31 = vadd.f32 %v6426_v41, %v6274_v30 }
 0x7c1   :  { %6347 = vst [vmem:[%s9861_s7] sm:$0xff] %v6344_v31 }
 0x7c2   :  { %6352 = vsyncpa [#allocation3], 1 }
 0x7c3   :  { %6353 = vsyncpa [#allocation5], 1 }
 0x7c4   :  { %6354 = vsyncpa [#allocation8], 1 }
 0x7c5   :  { %6355 = vsyncpa [#allocation11], 1 }

</bundles_post_ra>
